<compile_context>
chip_gen: v5e
topology: v5e:2x2
jax: 0.10.0
libtpu: 0.0.40
codegen_flags: <defaults>
</compile_context>

<pallas_src>
import functools

import jax
import jax.numpy as jnp
from jax import lax
from jax.experimental import pallas as pl
from jax.experimental.pallas import tpu as pltpu

H, W = 20, 87
HW = H * W                      # 1740
C1, C2 = 16, 32
K_PROJ = C2 * HW                # 55680
N_PROJ = 256


# ----------------------------------------------------------------------------
# Pallas kernel 1: channel-major conv matmul (per batch element)
#   out[b] = w (Cout, K) @ patches[b] (K, HW) + bias   [+ ReLU]
# ----------------------------------------------------------------------------
def _conv_cm_kernel(p_ref, w_ref, b_ref, o_ref, *, relu):
    out = jnp.dot(w_ref[...], p_ref[0],
                  preferred_element_type=jnp.float32) + b_ref[...]
    if relu:
        out = jnp.maximum(out, 0.0)
    o_ref[0] = out


def conv_cm(patches, w_cm, bias_col, *, relu):
    """patches: (B, K, HW), w_cm: (Cout, K), bias_col: (Cout, 1) -> (B, Cout, HW)."""
    B, K, hw = patches.shape
    Cout = w_cm.shape[0]
    return pl.pallas_call(
        functools.partial(_conv_cm_kernel, relu=relu),
        out_shape=jax.ShapeDtypeStruct((B, Cout, hw), jnp.float32),
        grid_spec=pltpu.PrefetchScalarGridSpec(
            num_scalar_prefetch=0,
            grid=(B,),
            in_specs=[
                pl.BlockSpec((1, K, hw), lambda b: (b, 0, 0)),
                pl.BlockSpec((Cout, K), lambda b: (0, 0)),
                pl.BlockSpec((Cout, 1), lambda b: (0, 0)),
            ],
            out_specs=pl.BlockSpec((1, Cout, hw), lambda b: (b, 0, 0)),
        ),
        compiler_params=pltpu.CompilerParams(
            dimension_semantics=("parallel",)),
    )(patches, w_cm, bias_col)


# ----------------------------------------------------------------------------
# Pallas kernel 2: projection  (B, K) @ (K, N) + bias
#   grid = (N/tn "parallel", K/tk "arbitrary"); accumulate into resident o_ref
# ----------------------------------------------------------------------------
def _proj_kernel(x_ref, w_ref, b_ref, o_ref):
    k = pl.program_id(1)

    @pl.when(k == 0)
    def _():
        o_ref[...] = jnp.zeros_like(o_ref)

    o_ref[...] += jnp.dot(x_ref[...], w_ref[...],
                          preferred_element_type=jnp.float32)

    @pl.when(k == pl.num_programs(1) - 1)
    def _():
        o_ref[...] += b_ref[...]


def projection(x_flat, w_kn, bias_row, *, tk=11136, n_split=2):
    """x_flat: (B, K), w_kn: (K, N) already transposed, bias_row: (1, N) -> (B, N)."""
    B, K = x_flat.shape
    N = w_kn.shape[1]
    assert K % tk == 0 and tk % 128 == 0
    assert N % n_split == 0
    tn = N // n_split
    assert tn % 128 == 0
    return pl.pallas_call(
        _proj_kernel,
        out_shape=jax.ShapeDtypeStruct((B, N), jnp.float32),
        grid_spec=pltpu.PrefetchScalarGridSpec(
            num_scalar_prefetch=0,
            grid=(n_split, K // tk),                 # reduction axis last
            in_specs=[
                pl.BlockSpec((B, tk), lambda j, k: (0, k)),
                pl.BlockSpec((tk, tn), lambda j, k: (k, j)),
                pl.BlockSpec((1, tn), lambda j, k: (0, j)),
            ],
            out_specs=pl.BlockSpec((B, tn), lambda j, k: (0, j)),
        ),
        compiler_params=pltpu.CompilerParams(
            dimension_semantics=("parallel", "arbitrary"),
            # double-buffered (tk, tn) f32 weight tiles ~= 11 MB; raise the
            # scoped limit so v5e's 16 MiB default is not a constraint.
            vmem_limit_bytes=48 * 1024 * 1024),
    )(x_flat, w_kn, bias_row)


# ----------------------------------------------------------------------------
# Plain-JAX glue: channel-major im2col (3x3, pad=1, stride=1), parameter setup
# ----------------------------------------------------------------------------
def im2col_3x3_cm(x_nchw):
    """(B, C, H, W) -> (B, C*9, H*W); patch index = c*9 + kh*3 + kw
    (matches the torch OIHW weight reshape (Cout, Cin*9))."""
    B, c, h, w = x_nchw.shape
    xp = jnp.pad(x_nchw, ((0, 0), (0, 0), (1, 1), (1, 1)))
    patches = jnp.stack(
        [xp[:, :, kh:kh + h, kw:kw + w] for kh in range(3) for kw in range(3)],
        axis=2)                                     # (B, C, 9, H, W)
    return patches.reshape(B, c * 9, h * w)


def init_params(key):
    ks = jax.random.split(key, 6)

    def uni(k, shape, fan_in):
        bound = 1.0 / jnp.sqrt(fan_in)
        return jax.random.uniform(k, shape, jnp.float32, -bound, bound)

    w1 = uni(ks[0], (C1, 1, 3, 3), 1 * 9)            # torch OIHW
    b1 = uni(ks[1], (C1,), 1 * 9)
    w2 = uni(ks[2], (C2, C1, 3, 3), C1 * 9)
    b2 = uni(ks[3], (C2,), C1 * 9)
    wp = uni(ks[4], (N_PROJ, K_PROJ), K_PROJ)        # torch Linear (out, in)
    bp = uni(ks[5], (N_PROJ,), K_PROJ)
    return dict(w1=w1, b1=b1, w2=w2, b2=b2, wp=wp, bp=bp)


def prepare_params(params):
    """One-time (outside jit) layout prep: reshape conv weights to (Cout, Cin*9)
    and pre-transpose the big Linear weight to (K, N) so no per-call transpose
    of the 57 MB weight materializes inside the forward."""
    return dict(
        w1_cm=jnp.reshape(params["w1"], (C1, 9)),
        b1_col=params["b1"][:, None],
        w2_cm=jnp.reshape(params["w2"], (C2, C1 * 9)),
        b2_col=params["b2"][:, None],
        wp_kn=jnp.asarray(params["wp"].T),           # (K_PROJ, N_PROJ)
        bp_row=params["bp"][None, :],
    )


def audio_encoder_forward(x, kp):
    B = x.shape[0]
    xi = x.reshape(B, 1, H, W)

    # conv1 + ReLU  (channel-major activations, lane axis = H*W)
    p1 = im2col_3x3_cm(xi)                                     # (B, 9, 1740)
    h1 = conv_cm(p1, kp["w1_cm"], kp["b1_col"], relu=True)     # (B, 16, 1740)

    # conv2
    p2 = im2col_3x3_cm(h1.reshape(B, C1, H, W))                # (B, 144, 1740)
    h2 = conv_cm(p2, kp["w2_cm"], kp["b2_col"], relu=False)    # (B, 32, 1740)

    # channel-major layout already matches torch's x.view(B, 32*20*87)
    flat = h2.reshape(B, K_PROJ)

    return projection(flat, kp["wp_kn"], kp["bp_row"])


def reference_forward(x, params):
    """Pure-JAX reference reproducing the torch forward."""
    B = x.shape[0]
    xi = x.reshape(B, 1, H, W)
    dn = ("NCHW", "OIHW", "NCHW")
    h1 = lax.conv_general_dilated(xi, params["w1"], (1, 1), "SAME",
                                  dimension_numbers=dn)
    h1 = jnp.maximum(h1 + params["b1"][None, :, None, None], 0.0)
    h2 = lax.conv_general_dilated(h1, params["w2"], (1, 1), "SAME",
                                  dimension_numbers=dn)
    h2 = h2 + params["b2"][None, :, None, None]
    return h2.reshape(B, K_PROJ) @ params["wp"].T + params["bp"]


if __name__ == "__main__":
    key = jax.random.PRNGKey(0)
    k_x, k_p = jax.random.split(key)

    # batch=2; spatial 20x87 is fixed by the module's hard-coded view/Linear.
    x = jax.random.normal(k_x, (2, 1, H, W), jnp.float32)
    params = init_params(k_p)
    kparams = jax.block_until_ready(prepare_params(params))   # layout prep, once

    feat = jax.jit(audio_encoder_forward)(x, kparams)
    feat = jax.block_until_ready(feat)
    assert feat.shape == (2, N_PROJ)

    ref = reference_forward(x, params)
    assert jnp.allclose(feat, ref, rtol=1e-3, atol=1e-2), (
        float(jnp.max(jnp.abs(feat - ref))))

    print("KERNEL_OK")
</pallas_src>

<mosaic_0001>
module attributes {stable_mosaic.version = 11 : i64} {
  func.func @_conv_cm_kernel(%arg0: i32, %arg1: memref<1x9x1740xf32, #tpu.memory_space<vmem>>, %arg2: memref<16x9xf32, #tpu.memory_space<vmem>>, %arg3: memref<16x1xf32, #tpu.memory_space<vmem>>, %arg4: memref<1x16x1740xf32, #tpu.memory_space<vmem>>) attributes {dimension_semantics = [#tpu.dimension_semantics<parallel>], iteration_bounds = array<i64: 2>, scalar_prefetch = 0 : i64, scratch_operands = 0 : i64, tpu.core_type = #tpu.core_type<tc>, window_params = [{transform_indices = @transform_0, window_bounds = array<i64: 1, 9, 1740>}, {pipeline_mode = #tpu.pipeline_mode<synchronous>, transform_indices = @transform_1, window_bounds = array<i64: 16, 9>}, {pipeline_mode = #tpu.pipeline_mode<synchronous>, transform_indices = @transform_2, window_bounds = array<i64: 16, 1>}, {transform_indices = @transform_3, window_bounds = array<i64: 1, 16, 1740>}]} {
    %c0 = arith.constant 0 : index
    %c0_0 = arith.constant 0 : index
    %0 = vector.load %arg2[%c0, %c0_0] : memref<16x9xf32, #tpu.memory_space<vmem>>, vector<16x9xf32>
    %c0_1 = arith.constant 0 : index
    %c0_2 = arith.constant 0 : index
    %c0_3 = arith.constant 0 : index
    %1 = vector.load %arg1[%c0_1, %c0_2, %c0_3] : memref<1x9x1740xf32, #tpu.memory_space<vmem>>, vector<1x9x1740xf32>
    %2 = vector.shape_cast %1 : vector<1x9x1740xf32> to vector<9x1740xf32>
    %cst = arith.constant dense<0.000000e+00> : vector<16x1740xf32>
    %3 = tpu.matmul %0, %2, %cst {dimension_numbers = #tpu.dot_dimension_numbers<[1], [0], [0], [1], [0, 0, 1, 1], [], []>} : vector<16x9xf32>, vector<9x1740xf32>, vector<16x1740xf32> -> vector<16x1740xf32>
    %c0_4 = arith.constant 0 : index
    %c0_5 = arith.constant 0 : index
    %4 = vector.load %arg3[%c0_4, %c0_5] : memref<16x1xf32, #tpu.memory_space<vmem>>, vector<16x1xf32>
    %5 = vector.broadcast %4 : vector<16x1xf32> to vector<16x1740xf32>
    %6 = arith.addf %3, %5 : vector<16x1740xf32>
    %cst_6 = arith.constant 0.000000e+00 : f32
    %7 = vector.broadcast %cst_6 : f32 to vector<16x1740xf32>
    %8 = arith.maximumf %6, %7 : vector<16x1740xf32>
    %c0_7 = arith.constant 0 : index
    %c0_8 = arith.constant 0 : index
    %c0_9 = arith.constant 0 : index
    %9 = vector.load %arg4[%c0_7, %c0_8, %c0_9] : memref<1x16x1740xf32, #tpu.memory_space<vmem>>, vector<1x16x1740xf32>
    %10 = vector.shape_cast %9 : vector<1x16x1740xf32> to vector<16x1740xf32>
    %11 = vector.shape_cast %8 : vector<16x1740xf32> to vector<1x16x1740xf32>
    tpu.vector_store %arg4[%c0_7, %c0_8, %c0_9], %11 {strides = array<i32>} : memref<1x16x1740xf32, #tpu.memory_space<vmem>>, vector<1x16x1740xf32>,
    return
  }
  func.func @transform_0(%arg0: i32) -> (i32, i32, i32) {
    %c0_i32 = arith.constant 0 : i32
    %c0_i32_0 = arith.constant 0 : i32
    %c0_i32_1 = arith.constant 0 : i32
    return %arg0, %c0_i32, %c0_i32_0 : i32, i32, i32
  }
  func.func @transform_1(%arg0: i32) -> (i32, i32) {
    %c0_i32 = arith.constant 0 : i32
    %c0_i32_0 = arith.constant 0 : i32
    %c0_i32_1 = arith.constant 0 : i32
    return %c0_i32, %c0_i32_0 : i32, i32
  }
  func.func @transform_2(%arg0: i32) -> (i32, i32) {
    %c0_i32 = arith.constant 0 : i32
    %c0_i32_0 = arith.constant 0 : i32
    %c0_i32_1 = arith.constant 0 : i32
    return %c0_i32, %c0_i32_0 : i32, i32
  }
  func.func @transform_3(%arg0: i32) -> (i32, i32, i32) {
    %c0_i32 = arith.constant 0 : i32
    %c0_i32_0 = arith.constant 0 : i32
    %c0_i32_1 = arith.constant 0 : i32
    return %arg0, %c0_i32, %c0_i32_0 : i32, i32, i32
  }
}

module attributes {stable_mosaic.version = 11 : i64} {
  func.func @_conv_cm_kernel(%arg0: i32, %arg1: memref<1x144x1740xf32, #tpu.memory_space<vmem>>, %arg2: memref<32x144xf32, #tpu.memory_space<vmem>>, %arg3: memref<32x1xf32, #tpu.memory_space<vmem>>, %arg4: memref<1x32x1740xf32, #tpu.memory_space<vmem>>) attributes {dimension_semantics = [#tpu.dimension_semantics<parallel>], iteration_bounds = array<i64: 2>, scalar_prefetch = 0 : i64, scratch_operands = 0 : i64, tpu.core_type = #tpu.core_type<tc>, window_params = [{transform_indices = @transform_0, window_bounds = array<i64: 1, 144, 1740>}, {pipeline_mode = #tpu.pipeline_mode<synchronous>, transform_indices = @transform_1, window_bounds = array<i64: 32, 144>}, {pipeline_mode = #tpu.pipeline_mode<synchronous>, transform_indices = @transform_2, window_bounds = array<i64: 32, 1>}, {transform_indices = @transform_3, window_bounds = array<i64: 1, 32, 1740>}]} {
    %c0 = arith.constant 0 : index
    %c0_0 = arith.constant 0 : index
    %0 = vector.load %arg2[%c0, %c0_0] : memref<32x144xf32, #tpu.memory_space<vmem>>, vector<32x144xf32>
    %c0_1 = arith.constant 0 : index
    %c0_2 = arith.constant 0 : index
    %c0_3 = arith.constant 0 : index
    %1 = vector.load %arg1[%c0_1, %c0_2, %c0_3] : memref<1x144x1740xf32, #tpu.memory_space<vmem>>, vector<1x144x1740xf32>
    %2 = vector.shape_cast %1 : vector<1x144x1740xf32> to vector<144x1740xf32>
    %cst = arith.constant dense<0.000000e+00> : vector<32x1740xf32>
    %3 = tpu.matmul %0, %2, %cst {dimension_numbers = #tpu.dot_dimension_numbers<[1], [0], [0], [1], [0, 0, 1, 1], [], []>} : vector<32x144xf32>, vector<144x1740xf32>, vector<32x1740xf32> -> vector<32x1740xf32>
    %c0_4 = arith.constant 0 : index
    %c0_5 = arith.constant 0 : index
    %4 = vector.load %arg3[%c0_4, %c0_5] : memref<32x1xf32, #tpu.memory_space<vmem>>, vector<32x1xf32>
    %5 = vector.broadcast %4 : vector<32x1xf32> to vector<32x1740xf32>
    %6 = arith.addf %3, %5 : vector<32x1740xf32>
    %c0_6 = arith.constant 0 : index
    %c0_7 = arith.constant 0 : index
    %c0_8 = arith.constant 0 : index
    %7 = vector.load %arg4[%c0_6, %c0_7, %c0_8] : memref<1x32x1740xf32, #tpu.memory_space<vmem>>, vector<1x32x1740xf32>
    %8 = vector.shape_cast %7 : vector<1x32x1740xf32> to vector<32x1740xf32>
    %9 = vector.shape_cast %6 : vector<32x1740xf32> to vector<1x32x1740xf32>
    tpu.vector_store %arg4[%c0_6, %c0_7, %c0_8], %9 {strides = array<i32>} : memref<1x32x1740xf32, #tpu.memory_space<vmem>>, vector<1x32x1740xf32>,
    return
  }
  func.func @transform_0(%arg0: i32) -> (i32, i32, i32) {
    %c0_i32 = arith.constant 0 : i32
    %c0_i32_0 = arith.constant 0 : i32
    %c0_i32_1 = arith.constant 0 : i32
    return %arg0, %c0_i32, %c0_i32_0 : i32, i32, i32
  }
  func.func @transform_1(%arg0: i32) -> (i32, i32) {
    %c0_i32 = arith.constant 0 : i32
    %c0_i32_0 = arith.constant 0 : i32
    %c0_i32_1 = arith.constant 0 : i32
    return %c0_i32, %c0_i32_0 : i32, i32
  }
  func.func @transform_2(%arg0: i32) -> (i32, i32) {
    %c0_i32 = arith.constant 0 : i32
    %c0_i32_0 = arith.constant 0 : i32
    %c0_i32_1 = arith.constant 0 : i32
    return %c0_i32, %c0_i32_0 : i32, i32
  }
  func.func @transform_3(%arg0: i32) -> (i32, i32, i32) {
    %c0_i32 = arith.constant 0 : i32
    %c0_i32_0 = arith.constant 0 : i32
    %c0_i32_1 = arith.constant 0 : i32
    return %arg0, %c0_i32, %c0_i32_0 : i32, i32, i32
  }
}

module attributes {stable_mosaic.version = 11 : i64} {
  func.func @_proj_kernel(%arg0: i32, %arg1: i32, %arg2: memref<2x11136xf32, #tpu.memory_space<vmem>>, %arg3: memref<11136x128xf32, #tpu.memory_space<vmem>>, %arg4: memref<1x128xf32, #tpu.memory_space<vmem>>, %arg5: memref<2x128xf32, #tpu.memory_space<vmem>>) attributes {dimension_semantics = [#tpu.dimension_semantics<parallel>, #tpu.dimension_semantics<arbitrary>], iteration_bounds = array<i64: 2, 5>, scalar_prefetch = 0 : i64, scratch_operands = 0 : i64, tpu.core_type = #tpu.core_type<tc>, window_params = [{transform_indices = @transform_0, window_bounds = array<i64: 2, 11136>}, {transform_indices = @transform_1, window_bounds = array<i64: 11136, 128>}, {transform_indices = @transform_2, window_bounds = array<i64: 1, 128>}, {transform_indices = @transform_3, window_bounds = array<i64: 2, 128>}]} {
    %c0_i32 = arith.constant 0 : i32
    %0 = arith.cmpi eq, %arg1, %c0_i32 : i32
    %1 = arith.extui %0 : i1 to i32
    %c0_i32_0 = arith.constant 0 : i32
    %2 = arith.cmpi ne, %1, %c0_i32_0 : i32
    scf.if %2 {
      %cst_9 = arith.constant 0.000000e+00 : f32
      %12 = vector.broadcast %cst_9 : f32 to vector<2x128xf32>
      %c0_10 = arith.constant 0 : index
      %c0_11 = arith.constant 0 : index
      %13 = vector.load %arg5[%c0_10, %c0_11] : memref<2x128xf32, #tpu.memory_space<vmem>>, vector<2x128xf32>
      tpu.vector_store %arg5[%c0_10, %c0_11], %12 {strides = array<i32>} : memref<2x128xf32, #tpu.memory_space<vmem>>, vector<2x128xf32>,
    } else {
    }
    %c0 = arith.constant 0 : index
    %c0_1 = arith.constant 0 : index
    %3 = vector.load %arg5[%c0, %c0_1] : memref<2x128xf32, #tpu.memory_space<vmem>>, vector<2x128xf32>
    %c0_2 = arith.constant 0 : index
    %c0_3 = arith.constant 0 : index
    %4 = vector.load %arg2[%c0_2, %c0_3] : memref<2x11136xf32, #tpu.memory_space<vmem>>, vector<2x11136xf32>
    %c0_4 = arith.constant 0 : index
    %c0_5 = arith.constant 0 : index
    %5 = vector.load %arg3[%c0_4, %c0_5] : memref<11136x128xf32, #tpu.memory_space<vmem>>, vector<11136x128xf32>
    %cst = arith.constant dense<0.000000e+00> : vector<2x128xf32>
    %6 = tpu.matmul %4, %5, %cst {dimension_numbers = #tpu.dot_dimension_numbers<[1], [0], [0], [1], [0, 0, 1, 1], [], []>} : vector<2x11136xf32>, vector<11136x128xf32>, vector<2x128xf32> -> vector<2x128xf32>
    %7 = arith.addf %3, %6 : vector<2x128xf32>
    %c0_6 = arith.constant 0 : index
    %c0_7 = arith.constant 0 : index
    %8 = vector.load %arg5[%c0_6, %c0_7] : memref<2x128xf32, #tpu.memory_space<vmem>>, vector<2x128xf32>
    tpu.vector_store %arg5[%c0_6, %c0_7], %7 {strides = array<i32>} : memref<2x128xf32, #tpu.memory_space<vmem>>, vector<2x128xf32>,
    %c4_i32 = arith.constant 4 : i32
    %9 = arith.cmpi eq, %arg1, %c4_i32 : i32
    %10 = arith.extui %9 : i1 to i32
    %c0_i32_8 = arith.constant 0 : i32
    %11 = arith.cmpi ne, %10, %c0_i32_8 : i32
    scf.if %11 {
      %c0_9 = arith.constant 0 : index
      %c0_10 = arith.constant 0 : index
      %12 = vector.load %arg5[%c0_9, %c0_10] : memref<2x128xf32, #tpu.memory_space<vmem>>, vector<2x128xf32>
      %c0_11 = arith.constant 0 : index
      %c0_12 = arith.constant 0 : index
      %13 = vector.load %arg4[%c0_11, %c0_12] : memref<1x128xf32, #tpu.memory_space<vmem>>, vector<1x128xf32>
      %14 = vector.broadcast %13 : vector<1x128xf32> to vector<2x128xf32>
      %15 = arith.addf %12, %14 : vector<2x128xf32>
      %c0_13 = arith.constant 0 : index
      %c0_14 = arith.constant 0 : index
      %16 = vector.load %arg5[%c0_13, %c0_14] : memref<2x128xf32, #tpu.memory_space<vmem>>, vector<2x128xf32>
      tpu.vector_store %arg5[%c0_13, %c0_14], %15 {strides = array<i32>} : memref<2x128xf32, #tpu.memory_space<vmem>>, vector<2x128xf32>,
    } else {
    }
    return
  }
  func.func @transform_0(%arg0: i32, %arg1: i32) -> (i32, i32) {
    %c0_i32 = arith.constant 0 : i32
    %c0_i32_0 = arith.constant 0 : i32
    return %c0_i32, %arg1 : i32, i32
  }
  func.func @transform_1(%arg0: i32, %arg1: i32) -> (i32, i32) {
    %c0_i32 = arith.constant 0 : i32
    return %arg1, %arg0 : i32, i32
  }
  func.func @transform_2(%arg0: i32, %arg1: i32) -> (i32, i32) {
    %c0_i32 = arith.constant 0 : i32
    %c0_i32_0 = arith.constant 0 : i32
    return %c0_i32, %arg0 : i32, i32
  }
  func.func @transform_3(%arg0: i32, %arg1: i32) -> (i32, i32) {
    %c0_i32 = arith.constant 0 : i32
    %c0_i32_0 = arith.constant 0 : i32
    return %c0_i32, %arg0 : i32, i32
  }
}

</mosaic_0001>

<bundles_post_ra>
// kernel: audio_encoder_forward.3
= control target key start
LH: loop header
LB: loop body
LE: loop exit
PB: predicated region body
PF: predicated region fallthrough
CT: control target
= control target key end

     0   :  { %8 = vsyncpa [#allocation3], 0  ;;  %s873_s12 = smov 0   ;;  %s1076_s0 = inlined_call_operand.vmem [shape: f32[2,9,1740], index: 0, kind: input, shape index: {}]   ;;  %s1077_s1 = inlined_call_operand.hbm [shape: f32[16,9], index: 1, kind: input, shape index: {}]   ;;  %s1078_s2 = inlined_call_operand.vmem [shape: f32[16,1], index: 2, kind: input, shape index: {}]   ;;  %s1079_s3 = inlined_call_operand.vmem [shape: f32[2,16,1740], index: 3, kind: output, shape index: {}]  }
   0x1 LB: > { %s124_s15 = sshll.u32 %s1077_s1, 4  ;;  %s726_s16 = sadd.s32 4294967295, %s847_s12   ;;  %s847_s12 = sphi %s873_s12, %s14_s12   ;;  %s125_s15 = int_to_ptr.hbm [resolvable:$true] %s124_s15 }
   0x2   : > { %p728_p0 = scmp.ge.s32.totalorder %s847_s12, 1  ;;  %p113_p1 = scmp.lt.s32.totalorder %s847_s12, 3 }
   0x3   : > { %p792_p2 = scmp.eq.s32.totalorder %s726_s16, 0  ;;  %s849_s17 = smov [#allocation2]  }
   0x4   : > { %p114_p3 = pnand %p728_p0, %p113_p1  ;;  %s126_s18 = sshll.u32 %s849_s17, 4  ;;  %s127_s18 = int_to_ptr.vmem [resolvable:$true] %s126_s18 }
   0x5   : > { %s850_s19 = smov 128   ;;  %s851_s20 = smov 8  }
   0x6   : > { %p788_p4 = pneg %p114_p3  ;;  %153 = sbr.rel (%p114_p3) target bundleno = 209 (0xd1), region = 32 }
   0x8   : > { %p789_p5 = pnand %p792_p2, %p788_p4 }
   0xa   : > { %791 = dma.hbm_to_vmem [thread:$0]  (!%p789_p5), %s125_s15, 256, %s127_s18, [#allocation3], %s850_s19, %s850_s19, %s851_s20  }
   0xb   : > { %842 = dma.done.wait (%p792_p2), [#allocation3], 256  }
   0xc   : > { %844 = vsyncadd (%p792_p2), [#allocation3], 4294967040  ;;  %p178_p6 = scmp.lt.s32.totalorder %s726_s16, 1  ;;  %v852_v0 = vmov 0   ;;  %vm237_vm0 = vcmask 1040384   ;;  %v902_v5 = vld [vmem:[#allocation2] sm:$0xff] }
   0xd   : > { %806 = vset.pattern.permute.xlu0 %v852_v0  ;;  %vm230_vm1 = vcmask 72704   ;;  %v904_v6 = vld [vmem:[#allocation2 + $0x8] sm:$0xff]  ;;  %v218_v17 = vld [vmem:[%s1078_s2] sm:$0xff]  ;;  %vm643_vm2 = vcmask 621568  }
   0xe   : > { %s1081_s16 = smov (!%p178_p6, %s726_s16), 1  ;;  %222 = vperm.xlu0 %806, %v218_v17   ;;  %v219_v29 = vld [vmem:[%s1078_s2 + $0x8] sm:$0xff] }
   0xf   : > { %s783_s21 = smul.u32 224, %s1081_s16 }
  0x11   : > { %s892_s24 = scalar_lea.vmem %s1076_s0, %s783_s21  ;;  %s1012_s4 = scalar_lea.vmem %s1079_s3, %s783_s21 }
  0x12   : > { %v204_v1 = vld [vmem:[%s892_s24 + $0x70] sm:$0x1]  ;;  %v205_v2 = vld [vmem:[%s892_s24 + $0x78] sm:$0x1]  ;;  %v190_v3 = vld [vmem:[%s892_s24] sm:$0xff] }
  0x13   : > { %735 = vmatpush.msk.msra.mxu0 %vm237_vm0, %v204_v1  ;;  %779 = vmatpush.msk.msra.mxu2 %vm237_vm0, %v204_v1  ;;  %v191_v4 = vld [vmem:[%s892_s24 + $0x8] sm:$0xff]  ;;  %v206_v7 = vld [vmem:[%s892_s24 + $0x80] sm:$0x1]  ;;  %v208_v9 = vld [vmem:[%s892_s24 + $0x90] sm:$0x1] }
  0x14   : > { %738 = vmatpush.msk.msra.mxu1 %vm237_vm0, %v205_v2  ;;  %781 = vmatpush.msk.msra.mxu3 %vm237_vm0, %v205_v2  ;;  %v207_v8 = vld [vmem:[%s892_s24 + $0x88] sm:$0x1]  ;;  %v209_v10 = vld [vmem:[%s892_s24 + $0x98] sm:$0x1]  ;;  %v192_v11 = vld [vmem:[%s892_s24 + $0x10] sm:$0xff] }
  0x15   : > { %295 = vmatpush.msra.mxu0 %v190_v3  ;;  %780 = vmatpush.msra.mxu2 %v190_v3  ;;  %v193_v12 = vld [vmem:[%s892_s24 + $0x18] sm:$0xff]  ;;  %v194_v13 = vld [vmem:[%s892_s24 + $0x20] sm:$0xff]  ;;  %v195_v14 = vld [vmem:[%s892_s24 + $0x28] sm:$0xff] }
  0x16   : > { %318 = vmatpush.msra.mxu1 %v191_v4  ;;  %782 = vmatpush.msra.mxu3 %v191_v4  ;;  %v210_v15 = vld [vmem:[%s892_s24 + $0xa0] sm:$0x1]  ;;  %v211_v16 = vld [vmem:[%s892_s24 + $0xa8] sm:$0x1]  ;;  %v212_v18 = vld [vmem:[%s892_s24 + $0xb0] sm:$0x1] }
  0x17   : > { %736 = vmatmul.msk.f32.vlgmr.msra.gmra.mxu0 %vm230_vm1, %v902_v5  ;;  %737 = vmatmul.msk.f32.vlgmr.msra.gmra.mxu2 %vm230_vm1, %v904_v6  ;;  %v213_v19 = vld [vmem:[%s892_s24 + $0xb8] sm:$0x1]  ;;  %v196_v20 = vld [vmem:[%s892_s24 + $0x30] sm:$0xff]  ;;  %v198_v22 = vld [vmem:[%s892_s24 + $0x40] sm:$0xff] }
  0x18   : > { %739 = vmatmul.msk.f32.vlgmr.msra.gmra.mxu1 %vm230_vm1, %v902_v5  ;;  %740 = vmatmul.msk.f32.vlgmr.msra.gmra.mxu3 %vm230_vm1, %v904_v6  ;;  %v197_v21 = vld [vmem:[%s892_s24 + $0x38] sm:$0xff]  ;;  %v199_v23 = vld [vmem:[%s892_s24 + $0x48] sm:$0xff]  ;;  %v214_v24 = vld [vmem:[%s892_s24 + $0xc0] sm:$0x1] }
  0x19   : > { %741 = vmatpush.msk.msrb.mxu2 %vm237_vm0, %v206_v7  ;;  %744 = vmatpush.msk.msrb.mxu3 %vm237_vm0, %v207_v8  ;;  %v215_v25 = vld [vmem:[%s892_s24 + $0xc8] sm:$0x1]  ;;  %v216_v26 = vld [vmem:[%s892_s24 + $0xd0] sm:$0x1]  ;;  %v217_v27 = vld [vmem:[%s892_s24 + $0xd8] sm:$0x1] }
  0x1a   : > { %747 = vmatpush.msk.msrb.mxu0 %vm237_vm0, %v208_v9  ;;  %750 = vmatpush.msk.msrb.mxu1 %vm237_vm0, %v209_v10  ;;  %v200_v28 = vld [vmem:[%s892_s24 + $0x50] sm:$0xff]  ;;  %v201_v30 = vld [vmem:[%s892_s24 + $0x58] sm:$0xff]  ;;  %v202_v31 = vld [vmem:[%s892_s24 + $0x60] sm:$0xff] }
  0x1b   : > { %341 = vmatpush.msrb.mxu2 %v192_v11  ;;  %364 = vmatpush.msrb.mxu3 %v193_v12  ;;  %v203_v32 = vld [vmem:[%s892_s24 + $0x68] sm:$0xff] }
  0x1c   : > { %387 = vmatpush.msrb.mxu0 %v194_v13  ;;  %410 = vmatpush.msrb.mxu1 %v195_v14 }
  0x1d   : > { %753 = vmatpush.msk.msra.mxu2 %vm237_vm0, %v210_v15  ;;  %756 = vmatpush.msk.msra.mxu3 %vm237_vm0, %v211_v16 }
  0x1e   : > { %759 = vmatpush.msk.msra.mxu0 %vm237_vm0, %v212_v18  ;;  %762 = vmatpush.msk.msra.mxu1 %vm237_vm0, %v213_v19 }
  0x1f   : > { %742 = vmatmul.msk.f32.vlgmr.msrb.gmra.mxu2 %vm230_vm1, %v902_v5  ;;  %748 = vmatmul.msk.f32.vlgmr.msrb.gmra.mxu0 %vm230_vm1, %v902_v5 }
  0x20   : > { %745 = vmatmul.msk.f32.vlgmr.msrb.gmra.mxu3 %vm230_vm1, %v902_v5  ;;  %751 = vmatmul.msk.f32.vlgmr.msrb.gmra.mxu1 %vm230_vm1, %v902_v5 }
  0x21   : > { %433 = vmatpush.msra.mxu2 %v196_v20  ;;  %456 = vmatpush.msra.mxu3 %v197_v21 }
  0x22   : > { %479 = vmatpush.msra.mxu0 %v198_v22  ;;  %502 = vmatpush.msra.mxu1 %v199_v23 }
  0x23   : > { %765 = vmatpush.msk.msrb.mxu2 %vm237_vm0, %v214_v24  ;;  %768 = vmatpush.msk.msrb.mxu3 %vm237_vm0, %v215_v25 }
  0x24   : > { %771 = vmatpush.msk.msrb.mxu0 %vm237_vm0, %v216_v26  ;;  %774 = vmatpush.msk.msrb.mxu1 %vm237_vm0, %v217_v27 }
  0x25   : > { %525 = vmatpush.msrb.mxu2 %v200_v28  ;;  %227 = vperm.xlu0 %806, %v219_v29  }
  0x26   : > { %548 = vmatpush.msrb.mxu3 %v201_v30  ;;  %571 = vmatpush.msrb.mxu0 %v202_v31 }
  0x27   : > { %743 = vmatmul.msk.f32.gmra.mxu2 %vm230_vm1, %v904_v6  ;;  %749 = vmatmul.msk.f32.gmra.mxu0 %vm230_vm1, %v904_v6 }
  0x28   : > { %746 = vmatmul.msk.f32.gmra.mxu3 %vm230_vm1, %v904_v6  ;;  %752 = vmatmul.msk.f32.gmra.mxu1 %vm230_vm1, %v904_v6 }
  0x29   : > { %594 = vmatpush.msrb.mxu1 %v203_v32 }
  0x2f   : > { %754 = vmatmul.msk.f32.vlgmr.msra.gmra.mxu2 %vm230_vm1, %v902_v5  ;;  %760 = vmatmul.msk.f32.vlgmr.msra.gmra.mxu0 %vm230_vm1, %v902_v5 }
  0x30   : > { %757 = vmatmul.msk.f32.vlgmr.msra.gmra.mxu3 %vm230_vm1, %v902_v5  ;;  %763 = vmatmul.msk.f32.vlgmr.msra.gmra.mxu1 %vm230_vm1, %v902_v5 }
  0x37   : > { %755 = vmatmul.msk.f32.gmra.mxu2 %vm230_vm1, %v904_v6  ;;  %761 = vmatmul.msk.f32.gmra.mxu0 %vm230_vm1, %v904_v6 }
  0x38   : > { %758 = vmatmul.msk.f32.gmra.mxu3 %vm230_vm1, %v904_v6  ;;  %764 = vmatmul.msk.f32.gmra.mxu1 %vm230_vm1, %v904_v6 }
  0x3f   : > { %766 = vmatmul.msk.f32.vlgmr.msrb.gmra.mxu2 %vm230_vm1, %v902_v5  ;;  %772 = vmatmul.msk.f32.vlgmr.msrb.gmra.mxu0 %vm230_vm1, %v902_v5 }
  0x40   : > { %769 = vmatmul.msk.f32.vlgmr.msrb.gmra.mxu3 %vm230_vm1, %v902_v5  ;;  %775 = vmatmul.msk.f32.vlgmr.msrb.gmra.mxu1 %vm230_vm1, %v902_v5 }
  0x47   : > { %767 = vmatmul.msk.f32.gmra.mxu2 %vm230_vm1, %v904_v6  ;;  %773 = vmatmul.msk.f32.gmra.mxu0 %vm230_vm1, %v904_v6 }
  0x48   : > { %770 = vmatmul.msk.f32.gmra.mxu3 %vm230_vm1, %v904_v6  ;;  %776 = vmatmul.msk.f32.gmra.mxu1 %vm230_vm1, %v904_v6 }
  0x80   : > { %v1004_v33 = vpop.permute.xlu0 %222 }
  0x94   : > { %v297_v34 = vpop.f32.mrf.mxu0 }
  0x95   : > { %v298_v35 = vadd.f32 %v297_v34, %v1004_v33  ;;  %v320_v36 = vpop.f32.mrf.mxu1 }
  0x96   : > { %v321_v37 = vadd.f32 %v320_v36, %v1004_v33 }
  0x97   : > { %v602_v38 = vmax.f32 %v298_v35, 0.0  ;;  %v1015_v40 = vpop.permute.xlu0 %227 }
  0x98   : > { %v603_v39 = vmax.f32 %v321_v37, 0.0 }
  0x99   : > { %630 = vst [vmem:[%s1012_s4] sm:$0xff] %v602_v38 }
  0x9a   : > { %631 = vst [vmem:[%s1012_s4 + $0x8] sm:$0xff] %v603_v39  ;;  %v300_v41 = vpop.f32.mrf.mxu2 }
  0x9b   : > { %v301_v42 = vadd.f32 %v300_v41, %v1015_v40  ;;  %v323_v43 = vpop.f32.mrf.mxu3 }
  0x9c   : > { %v324_v44 = vadd.f32 %v323_v43, %v1015_v40  ;;  %v389_v45 = vpop.f32.mrf.mxu0 }
  0x9d   : > { %v616_v46 = vmax.f32 %v301_v42, 0.0  ;;  %v390_v47 = vadd.f32 %v389_v45, %v1004_v33  ;;  %v412_v48 = vpop.f32.mrf.mxu1 }
  0x9e   : > { %v617_v49 = vmax.f32 %v324_v44, 0.0  ;;  %v413_v50 = vadd.f32 %v412_v48, %v1004_v33 }
  0x9f   : > { %645 = vst [vmem:[%s1012_s4 + $0x70] sm:$0xff] %v616_v46  ;;  %v606_v51 = vmax.f32 %v390_v47, 0.0 }
  0xa0   : > { %646 = vst [vmem:[%s1012_s4 + $0x78] sm:$0xff] %v617_v49  ;;  %v607_v52 = vmax.f32 %v413_v50, 0.0 }
  0xa1   : > { %634 = vst [vmem:[%s1012_s4 + $0x20] sm:$0xff] %v606_v51 }
  0xa2   : > { %635 = vst [vmem:[%s1012_s4 + $0x28] sm:$0xff] %v607_v52  ;;  %v343_v53 = vpop.f32.mrf.mxu2 }
  0xa3   : > { %v344_v54 = vadd.f32 %v343_v53, %v1004_v33  ;;  %v366_v55 = vpop.f32.mrf.mxu3 }
  0xa4   : > { %v367_v56 = vadd.f32 %v366_v55, %v1004_v33  ;;  %v392_v57 = vpop.f32.mrf.mxu0 }
  0xa5   : > { %v604_v58 = vmax.f32 %v344_v54, 0.0  ;;  %v393_v59 = vadd.f32 %v392_v57, %v1015_v40  ;;  %v415_v60 = vpop.f32.mrf.mxu1 }
  0xa6   : > { %v605_v61 = vmax.f32 %v367_v56, 0.0  ;;  %v416_v62 = vadd.f32 %v415_v60, %v1015_v40 }
  0xa7   : > { %632 = vst [vmem:[%s1012_s4 + $0x10] sm:$0xff] %v604_v58  ;;  %v620_v63 = vmax.f32 %v393_v59, 0.0 }
  0xa8   : > { %633 = vst [vmem:[%s1012_s4 + $0x18] sm:$0xff] %v605_v61  ;;  %v621_v0 = vmax.f32 %v416_v62, 0.0 }
  0xa9   : > { %649 = vst [vmem:[%s1012_s4 + $0x90] sm:$0xff] %v620_v63 }
  0xaa   : > { %650 = vst [vmem:[%s1012_s4 + $0x98] sm:$0xff] %v621_v0  ;;  %v346_v1 = vpop.f32.mrf.mxu2 }
  0xab   : > { %v347_v2 = vadd.f32 %v346_v1, %v1015_v40  ;;  %v369_v3 = vpop.f32.mrf.mxu3 }
  0xac   : > { %v370_v4 = vadd.f32 %v369_v3, %v1015_v40  ;;  %v481_v5 = vpop.f32.mrf.mxu0 }
  0xad   : > { %v618_v6 = vmax.f32 %v347_v2, 0.0  ;;  %v482_v7 = vadd.f32 %v481_v5, %v1004_v33  ;;  %v504_v8 = vpop.f32.mrf.mxu1 }
  0xae   : > { %v619_v9 = vmax.f32 %v370_v4, 0.0  ;;  %v505_v10 = vadd.f32 %v504_v8, %v1004_v33 }
  0xaf   : > { %647 = vst [vmem:[%s1012_s4 + $0x80] sm:$0xff] %v618_v6  ;;  %v610_v11 = vmax.f32 %v482_v7, 0.0 }
  0xb0   : > { %648 = vst [vmem:[%s1012_s4 + $0x88] sm:$0xff] %v619_v9  ;;  %v611_v12 = vmax.f32 %v505_v10, 0.0 }
  0xb1   : > { %638 = vst [vmem:[%s1012_s4 + $0x40] sm:$0xff] %v610_v11 }
  0xb2   : > { %639 = vst [vmem:[%s1012_s4 + $0x48] sm:$0xff] %v611_v12  ;;  %v435_v13 = vpop.f32.mrf.mxu2 }
  0xb3   : > { %v436_v14 = vadd.f32 %v435_v13, %v1004_v33  ;;  %v458_v15 = vpop.f32.mrf.mxu3 }
  0xb4   : > { %v459_v16 = vadd.f32 %v458_v15, %v1004_v33  ;;  %v484_v17 = vpop.f32.mrf.mxu0 }
  0xb5   : > { %v608_v18 = vmax.f32 %v436_v14, 0.0  ;;  %v485_v19 = vadd.f32 %v484_v17, %v1015_v40  ;;  %v507_v20 = vpop.f32.mrf.mxu1 }
  0xb6   : > { %v609_v21 = vmax.f32 %v459_v16, 0.0  ;;  %v508_v22 = vadd.f32 %v507_v20, %v1015_v40 }
  0xb7   : > { %636 = vst [vmem:[%s1012_s4 + $0x30] sm:$0xff] %v608_v18  ;;  %v624_v23 = vmax.f32 %v485_v19, 0.0 }
  0xb8   : > { %637 = vst [vmem:[%s1012_s4 + $0x38] sm:$0xff] %v609_v21  ;;  %v625_v24 = vmax.f32 %v508_v22, 0.0 }
  0xb9   : > { %653 = vst [vmem:[%s1012_s4 + $0xb0] sm:$0xff] %v624_v23 }
  0xba   : > { %654 = vst [vmem:[%s1012_s4 + $0xb8] sm:$0xff] %v625_v24  ;;  %v438_v25 = vpop.f32.mrf.mxu2 }
  0xbb   : > { %v439_v26 = vadd.f32 %v438_v25, %v1015_v40  ;;  %v461_v27 = vpop.f32.mrf.mxu3 }
  0xbc   : > { %v462_v28 = vadd.f32 %v461_v27, %v1015_v40  ;;  %v573_v29 = vpop.f32.mrf.mxu0 }
  0xbd   : > { %v622_v30 = vmax.f32 %v439_v26, 0.0  ;;  %v574_v31 = vadd.f32 %v573_v29, %v1004_v33  ;;  %v596_v32 = vpop.f32.mrf.mxu1 }
  0xbe   : > { %v623_v34 = vmax.f32 %v462_v28, 0.0  ;;  %v597_v35 = vadd.f32 %v596_v32, %v1004_v33 }
  0xbf   : > { %651 = vst [vmem:[%s1012_s4 + $0xa0] sm:$0xff] %v622_v30  ;;  %v614_v36 = vmax.f32 %v574_v31, 0.0 }
  0xc0   : > { %652 = vst [vmem:[%s1012_s4 + $0xa8] sm:$0xff] %v623_v34  ;;  %v615_v37 = vmax.f32 %v597_v35, 0.0 }
  0xc1   : > { %642 = vst [vmem:[%s1012_s4 + $0x60] sm:$0xff] %v614_v36 }
  0xc2   : > { %644 = vst.msk [vmem:[%s1012_s4 + $0x68] sm:$0xff] %vm643_vm2, %v615_v37  ;;  %v527_v38 = vpop.f32.mrf.mxu2 }
  0xc3   : > { %v528_v39 = vadd.f32 %v527_v38, %v1004_v33  ;;  %v550_v41 = vpop.f32.mrf.mxu3 }
  0xc4   : > { %v551_v42 = vadd.f32 %v550_v41, %v1004_v33  ;;  %v576_v43 = vpop.f32.mrf.mxu0 }
  0xc5   : > { %v612_v44 = vmax.f32 %v528_v39, 0.0  ;;  %v577_v45 = vadd.f32 %v576_v43, %v1015_v40  ;;  %v599_v46 = vpop.f32.mrf.mxu1 }
  0xc6   : > { %v613_v47 = vmax.f32 %v551_v42, 0.0  ;;  %v600_v48 = vadd.f32 %v599_v46, %v1015_v40 }
  0xc7   : > { %640 = vst [vmem:[%s1012_s4 + $0x50] sm:$0xff] %v612_v44  ;;  %v628_v49 = vmax.f32 %v577_v45, 0.0 }
  0xc8   : > { %641 = vst [vmem:[%s1012_s4 + $0x58] sm:$0xff] %v613_v47  ;;  %v629_v50 = vmax.f32 %v600_v48, 0.0 }
  0xc9   : > { %657 = vst [vmem:[%s1012_s4 + $0xd0] sm:$0xff] %v628_v49 }
  0xca   : > { %658 = vst.msk [vmem:[%s1012_s4 + $0xd8] sm:$0xff] %vm643_vm2, %v629_v50  ;;  %v530_v51 = vpop.f32.mrf.mxu2 }
  0xcb   : > { %v531_v33 = vadd.f32 %v530_v51, %v1015_v40  ;;  %v553_v52 = vpop.f32.mrf.mxu3 }
  0xcc   : > { %v554_v53 = vadd.f32 %v553_v52, %v1015_v40 }
  0xcd   : > { %v626_v54 = vmax.f32 %v531_v33, 0.0 }
  0xce   : > { %v627_v55 = vmax.f32 %v554_v53, 0.0 }
  0xcf   : > { %655 = vst [vmem:[%s1012_s4 + $0xc0] sm:$0xff] %v626_v54 }
  0xd0   : > { %656 = vst [vmem:[%s1012_s4 + $0xc8] sm:$0xff] %v627_v55 }
  0xd1 PF: > { %s14_s12 = sadd.s32 1, %s847_s12  }
  0xd2   : > { %p11_p7 = scmp.ge.s32.totalorder %s14_s12, 4  }
  0xd4   :  { %13 = sbr.rel (!%p11_p7) target bundleno = 1 (0x1), region = 67 }
  0xd9   :  { %680 = vsyncpa [#allocation3], 1 }
  0xda   :  { %682 = vsyncpa [#allocation3 + $0x1], 1 }

// kernel: audio_encoder_forward.4
= control target key start
LH: loop header
LB: loop body
LE: loop exit
PB: predicated region body
PF: predicated region fallthrough
CT: control target
= control target key end

     0   :  { %s1525_s12 = smov 0   ;;  %s2205_s0 = inlined_call_operand.vmem [shape: f32[2,144,1740], index: 0, kind: input, shape index: {}]   ;;  %s2206_s1 = inlined_call_operand.vmem [shape: f32[32,144], index: 1, kind: input, shape index: {}]   ;;  %s2207_s2 = inlined_call_operand.vmem [shape: f32[32,1], index: 2, kind: input, shape index: {}]   ;;  %s2208_s3 = inlined_call_operand.vmem [shape: f32[2,32,1740], index: 3, kind: output, shape index: {}]  }
   0x1 LB: > { %s1392_s13 = sadd.s32 4294967295, %s1502_s12   ;;  %p1396_p0 = scmp.ge.s32.totalorder %s1502_s12, 1  ;;  %s1502_s12 = sphi %s1525_s12, %s13_s12  }
   0x2   : > { %p137_p1 = scmp.lt.s32.totalorder %s1502_s12, 3 }
   0x4   : > { %p138_p2 = pnand %p1396_p0, %p137_p1 }
   0x5   : > { %p161_p3 = scmp.lt.s32.totalorder (!%p138_p2), %s1392_s13, 1 }
   0x6   : > { %141 = sbr.rel (%p138_p2) target bundleno = 402 (0x192), region = 32 }
   0xb   : > { %s2210_s13 = smov (!%p161_p3, %s1392_s13), 1  ;;  %v1556_v12 = vld [vmem:[%s2206_s1 + $0x8] sm:$0xff]  ;;  %vm455_vm0 = vcmask 130048   ;;  %v1504_v25 = vmov 0   ;;  %v1577_v26 = vld [vmem:[%s2206_s1 + $0x18] sm:$0xff]  ;;  %v431_v40 = vld [vmem:[%s2207_s2] sm:$0xff] }
   0xc   : > { %s1475_s14 = smul.u32 2016, %s2210_s13  ;;  %1486 = vset.pattern.permute.xlu0 %v1504_v25  ;;  %1487 = vset.pattern.permute.xlu1 %v1504_v25  ;;  %v1602_v41 = vld [vmem:[%s2206_s1 + $0x28] sm:$0xff]  ;;  %v433_v53 = vld [vmem:[%s2207_s2 + $0x10] sm:$0xff]  ;;  %v1630_v57 = vld [vmem:[%s2206_s1] sm:$0xff]  ;;  %vm1293_vm1 = vcmask 621568  }
   0xd   : > { %437 = vperm.xlu0 %1486, %v431_v40   ;;  %v432_v52 = vld [vmem:[%s2207_s2 + $0x8] sm:$0xff]  ;;  %447 = vperm.xlu1 %1487, %v433_v53   ;;  %v1635_v58 = vld [vmem:[%s2206_s1 + $0x38] sm:$0xff]  ;;  %s1476_s18 = smul.u32 448, %s2210_s13 }
   0xe   : > { %s1539_s17 = scalar_lea.vmem %s2205_s0, %s1475_s14 }
   0xf   : > { %v389_v0 = vld [vmem:[%s1539_s17 + $0x690] sm:$0xff]  ;;  %v390_v1 = vld [vmem:[%s1539_s17 + $0x698] sm:$0xff]  ;;  %v375_v2 = vld [vmem:[%s1539_s17 + $0x620] sm:$0xff]  ;;  %s1903_s20 = scalar_lea.vmem %s2208_s3, %s1476_s18 }
  0x10   : > { %468 = vmatpush.msra.mxu0 %v389_v0  ;;  %526 = vmatpush.msra.mxu2 %v390_v1  ;;  %v376_v3 = vld [vmem:[%s1539_s17 + $0x628] sm:$0xff]  ;;  %v361_v4 = vld [vmem:[%s1539_s17 + $0x5b0] sm:$0xff]  ;;  %v362_v5 = vld [vmem:[%s1539_s17 + $0x5b8] sm:$0xff] }
  0x11   : > { %v418_v6 = vld [vmem:[%s1539_s17 + $0x778] sm:$0xff]  ;;  %v404_v7 = vld [vmem:[%s1539_s17 + $0x708] sm:$0xff]  ;;  %v417_v8 = vld [vmem:[%s1539_s17 + $0x770] sm:$0xff] }
  0x12   : > { %469 = vmatpush.msra.mxu0 %v375_v2  ;;  %527 = vmatpush.msra.mxu2 %v376_v3  ;;  %v347_v9 = vld [vmem:[%s1539_s17 + $0x540] sm:$0xff]  ;;  %v348_v10 = vld [vmem:[%s1539_s17 + $0x548] sm:$0xff]  ;;  %v333_v13 = vld [vmem:[%s1539_s17 + $0x4d0] sm:$0xff] }
  0x13   : > { %569 = vmatpush.msra.mxu3 %v418_v6  ;;  %511 = vmatpush.msra.mxu1 %v417_v8  ;;  %v403_v11 = vld [vmem:[%s1539_s17 + $0x700] sm:$0xff]  ;;  %v334_v14 = vld [vmem:[%s1539_s17 + $0x4d8] sm:$0xff]  ;;  %v320_v18 = vld [vmem:[%s1539_s17 + $0x468] sm:$0xff] }
  0x14   : > { %470 = vmatpush.msra.mxu0 %v361_v4  ;;  %528 = vmatpush.msra.mxu2 %v362_v5  ;;  %v391_v15 = vld [vmem:[%s1539_s17 + $0x6a0] sm:$0xff]  ;;  %v377_v19 = vld [vmem:[%s1539_s17 + $0x630] sm:$0xff]  ;;  %v306_v21 = vld [vmem:[%s1539_s17 + $0x3f8] sm:$0xff] }
  0x15   : > { %570 = vmatpush.msra.mxu3 %v404_v7  ;;  %512 = vmatpush.msra.mxu1 %v403_v11  ;;  %v419_v16 = vld [vmem:[%s1539_s17 + $0x780] sm:$0xff]  ;;  %v305_v20 = vld [vmem:[%s1539_s17 + $0x3f0] sm:$0xff]  ;;  %v292_v24 = vld [vmem:[%s1539_s17 + $0x388] sm:$0xff] }
  0x16   : > { %471 = vmatpush.msra.mxu0 %v347_v9  ;;  %529 = vmatpush.msra.mxu2 %v348_v10  ;;  %v319_v17 = vld [vmem:[%s1539_s17 + $0x460] sm:$0xff]  ;;  %v349_v27 = vld [vmem:[%s1539_s17 + $0x550] sm:$0xff]  ;;  %v278_v29 = vld [vmem:[%s1539_s17 + $0x318] sm:$0xff] }
  0x17   : > { %1403 = vmatmul.msk.f32.vlgmr.msra.gmra.mxu3 %vm455_vm0, %v1556_v12  ;;  %1399 = vmatmul.msk.f32.vlgmr.msra.gmra.mxu1 %vm455_vm0, %v1556_v12  ;;  %v363_v22 = vld [vmem:[%s1539_s17 + $0x5c0] sm:$0xff]  ;;  %v277_v28 = vld [vmem:[%s1539_s17 + $0x310] sm:$0xff]  ;;  %v264_v31 = vld [vmem:[%s1539_s17 + $0x2a8] sm:$0xff] }
  0x18   : > { %472 = vmatpush.msra.mxu0 %v333_v13  ;;  %530 = vmatpush.msra.mxu2 %v334_v14  ;;  %v291_v23 = vld [vmem:[%s1539_s17 + $0x380] sm:$0xff]  ;;  %v405_v32 = vld [vmem:[%s1539_s17 + $0x710] sm:$0xff]  ;;  %v250_v35 = vld [vmem:[%s1539_s17 + $0x238] sm:$0xff] }
  0x19   : > { %584 = vmatpush.msrb.mxu1 %v391_v15  ;;  %627 = vmatpush.msrb.mxu3 %v419_v16  ;;  %v263_v30 = vld [vmem:[%s1539_s17 + $0x2a0] sm:$0xff]  ;;  %v249_v34 = vld [vmem:[%s1539_s17 + $0x230] sm:$0xff]  ;;  %v420_v37 = vld [vmem:[%s1539_s17 + $0x788] sm:$0xff] }
  0x1a   : > { %473 = vmatpush.msra.mxu0 %v319_v17  ;;  %531 = vmatpush.msra.mxu2 %v320_v18  ;;  %v335_v33 = vld [vmem:[%s1539_s17 + $0x4e0] sm:$0xff]  ;;  %v321_v36 = vld [vmem:[%s1539_s17 + $0x470] sm:$0xff]  ;;  %v236_v39 = vld [vmem:[%s1539_s17 + $0x1c8] sm:$0xff] }
  0x1b   : > { %585 = vmatpush.msrb.mxu1 %v377_v19  ;;  %628 = vmatpush.msrb.mxu3 %v405_v32  ;;  %v235_v38 = vld [vmem:[%s1539_s17 + $0x1c0] sm:$0xff]  ;;  %v221_v43 = vld [vmem:[%s1539_s17 + $0x150] sm:$0xff]  ;;  %v222_v44 = vld [vmem:[%s1539_s17 + $0x158] sm:$0xff] }
  0x1c   : > { %474 = vmatpush.msra.mxu0 %v305_v20  ;;  %532 = vmatpush.msra.mxu2 %v306_v21  ;;  %v307_v42 = vld [vmem:[%s1539_s17 + $0x400] sm:$0xff]  ;;  %v293_v45 = vld [vmem:[%s1539_s17 + $0x390] sm:$0xff]  ;;  %v208_v47 = vld [vmem:[%s1539_s17 + $0xe8] sm:$0xff] }
  0x1d   : > { %586 = vmatpush.msrb.mxu1 %v363_v22  ;;  %1457 = vmatpush.msra.mxu3 %v420_v37  ;;  %v207_v46 = vld [vmem:[%s1539_s17 + $0xe0] sm:$0xff]  ;;  %v406_v48 = vld [vmem:[%s1539_s17 + $0x718] sm:$0xff]  ;;  %v193_v49 = vld [vmem:[%s1539_s17 + $0x70] sm:$0xff] }
  0x1e   : > { %475 = vmatpush.msra.mxu0 %v291_v23  ;;  %533 = vmatpush.msra.mxu2 %v292_v24  ;;  %v194_v50 = vld [vmem:[%s1539_s17 + $0x78] sm:$0xff]  ;;  %v279_v51 = vld [vmem:[%s1539_s17 + $0x320] sm:$0xff]  ;;  %v180_v55 = vld [vmem:[%s1539_s17 + $0x8] sm:$0xff] }
  0x1f   : > { %1404 = vmatmul.msk.f32.gmra.mxu3 %vm455_vm0, %v1577_v26  ;;  %587 = vmatpush.msrb.mxu1 %v349_v27  ;;  %v179_v54 = vld [vmem:[%s1539_s17] sm:$0xff]  ;;  %v265_v56 = vld [vmem:[%s1539_s17 + $0x2b0] sm:$0xff]  ;;  %v392_v60 = vld [vmem:[%s1539_s17 + $0x6a8] sm:$0xff] }
  0x20   : > { %476 = vmatpush.msra.mxu0 %v277_v28  ;;  %534 = vmatpush.msra.mxu2 %v278_v29  ;;  %v251_v59 = vld [vmem:[%s1539_s17 + $0x240] sm:$0xff]  ;;  %v237_v61 = vld [vmem:[%s1539_s17 + $0x1d0] sm:$0xff]  ;;  %v378_v62 = vld [vmem:[%s1539_s17 + $0x638] sm:$0xff] }
  0x21   : > { %1400 = vmatmul.msk.f32.gmra.mxu1 %vm455_vm0, %v1577_v26  ;;  %1458 = vmatpush.msra.mxu3 %v406_v48  ;;  %v223_v63 = vld [vmem:[%s1539_s17 + $0x160] sm:$0xff]  ;;  %v422_v0 = vld [vmem:[%s1539_s17 + $0x798] sm:$0xff]  ;;  %v364_v1 = vld [vmem:[%s1539_s17 + $0x5c8] sm:$0xff] }
  0x22   : > { %477 = vmatpush.msra.mxu0 %v263_v30  ;;  %535 = vmatpush.msra.mxu2 %v264_v31  ;;  %v434_v2 = vld [vmem:[%s2207_s2 + $0x18] sm:$0xff]  ;;  %v209_v3 = vld [vmem:[%s1539_s17 + $0xf0] sm:$0xff]  ;;  %v195_v6 = vld [vmem:[%s1539_s17 + $0x80] sm:$0xff] }
  0x23   : > { %588 = vmatpush.msrb.mxu1 %v335_v33  ;;  %442 = vperm.xlu0 %1486, %v432_v52   ;;  %v1657_v4 = vld [vmem:[%s2206_s1 + $0x10] sm:$0xff]  ;;  %v350_v5 = vld [vmem:[%s1539_s17 + $0x558] sm:$0xff]  ;;  %v336_v7 = vld [vmem:[%s1539_s17 + $0x4e8] sm:$0xff] }
  0x24   : > { %478 = vmatpush.msra.mxu0 %v249_v34  ;;  %536 = vmatpush.msra.mxu2 %v250_v35  ;;  %v181_v8 = vld [vmem:[%s1539_s17 + $0x10] sm:$0xff]  ;;  %v322_v9 = vld [vmem:[%s1539_s17 + $0x478] sm:$0xff]  ;;  %v308_v11 = vld [vmem:[%s1539_s17 + $0x408] sm:$0xff] }
  0x25   : > { %589 = vmatpush.msrb.mxu1 %v321_v36  ;;  %452 = vperm.xlu1 %1487, %v434_v2   ;;  %v393_v10 = vld [vmem:[%s1539_s17 + $0x6b0] sm:$0xff]  ;;  %v379_v13 = vld [vmem:[%s1539_s17 + $0x640] sm:$0xff]  ;;  %v294_v15 = vld [vmem:[%s1539_s17 + $0x398] sm:$0xff] }
  0x26   : > { %479 = vmatpush.msra.mxu0 %v235_v38  ;;  %537 = vmatpush.msra.mxu2 %v236_v39  ;;  %v1675_v14 = vld [vmem:[%s2206_s1 + $0x20] sm:$0xff]  ;;  %v408_v16 = vld [vmem:[%s1539_s17 + $0x728] sm:$0xff]  ;;  %v365_v17 = vld [vmem:[%s1539_s17 + $0x5d0] sm:$0xff] }
  0x27   : > { %1405 = vmatmul.msk.f32.gmra.mxu3 %vm455_vm0, %v1602_v41  ;;  %590 = vmatpush.msrb.mxu1 %v307_v42  ;;  %v280_v18 = vld [vmem:[%s1539_s17 + $0x328] sm:$0xff]  ;;  %v421_v19 = vld [vmem:[%s1539_s17 + $0x790] sm:$0xff]  ;;  %v351_v20 = vld [vmem:[%s1539_s17 + $0x560] sm:$0xff] }
  0x28   : > { %480 = vmatpush.msra.mxu0 %v221_v43  ;;  %538 = vmatpush.msra.mxu2 %v222_v44  ;;  %v266_v21 = vld [vmem:[%s1539_s17 + $0x2b8] sm:$0xff]  ;;  %v337_v22 = vld [vmem:[%s1539_s17 + $0x4f0] sm:$0xff]  ;;  %v407_v23 = vld [vmem:[%s1539_s17 + $0x720] sm:$0xff] }
  0x29   : > { %591 = vmatpush.msrb.mxu1 %v293_v45  ;;  %v252_v24 = vld [vmem:[%s1539_s17 + $0x248] sm:$0xff]  ;;  %v323_v25 = vld [vmem:[%s1539_s17 + $0x480] sm:$0xff]  ;;  %v1696_v27 = vld [vmem:[%s2206_s1 + $0x30] sm:$0xff] }
  0x2a   : > { %481 = vmatpush.msra.mxu0 %v207_v46  ;;  %539 = vmatpush.msra.mxu2 %v208_v47  ;;  %v238_v28 = vld [vmem:[%s1539_s17 + $0x1d8] sm:$0xff]  ;;  %v309_v29 = vld [vmem:[%s1539_s17 + $0x410] sm:$0xff]  ;;  %v224_v30 = vld [vmem:[%s1539_s17 + $0x168] sm:$0xff] }
  0x2b   : > { %1401 = vmatmul.msk.f32.gmra.mxu1 %vm455_vm0, %v1602_v41  ;;  %v295_v31 = vld [vmem:[%s1539_s17 + $0x3a0] sm:$0xff]  ;;  %v210_v32 = vld [vmem:[%s1539_s17 + $0xf8] sm:$0xff]  ;;  %v281_v33 = vld [vmem:[%s1539_s17 + $0x330] sm:$0xff] }
  0x2c   : > { %482 = vmatpush.msra.mxu0 %v193_v49  ;;  %540 = vmatpush.msra.mxu2 %v194_v50  ;;  %v196_v34 = vld [vmem:[%s1539_s17 + $0x88] sm:$0xff]  ;;  %v267_v35 = vld [vmem:[%s1539_s17 + $0x2c0] sm:$0xff]  ;;  %v182_v36 = vld [vmem:[%s1539_s17 + $0x18] sm:$0xff] }
  0x2d   : > { %592 = vmatpush.msrb.mxu1 %v279_v51  ;;  %v394_v38 = vld [vmem:[%s1539_s17 + $0x6b8] sm:$0xff]  ;;  %v424_v39 = vld [vmem:[%s1539_s17 + $0x7a8] sm:$0xff]  ;;  %v239_v40 = vld [vmem:[%s1539_s17 + $0x1e0] sm:$0xff] }
  0x2e   : > { %483 = vmatpush.msra.mxu0 %v179_v54  ;;  %541 = vmatpush.msra.mxu2 %v180_v55  ;;  %v380_v42 = vld [vmem:[%s1539_s17 + $0x648] sm:$0xff]  ;;  %v225_v43 = vld [vmem:[%s1539_s17 + $0x170] sm:$0xff]  ;;  %v366_v44 = vld [vmem:[%s1539_s17 + $0x5d8] sm:$0xff] }
  0x2f   : > { %593 = vmatpush.msrb.mxu1 %v265_v56  ;;  %484 = vmatmul.f32.vlgmr.msra.gmra.mxu0 %v1630_v57  ;;  %v211_v45 = vld [vmem:[%s1539_s17 + $0x100] sm:$0xff]  ;;  %v352_v46 = vld [vmem:[%s1539_s17 + $0x568] sm:$0xff]  ;;  %v197_v47 = vld [vmem:[%s1539_s17 + $0x90] sm:$0xff] }
  0x30   : > { %542 = vmatmul.f32.vlgmr.msra.gmra.mxu2 %v1630_v57  ;;  %1406 = vmatmul.msk.f32.gmra.mxu3 %vm455_vm0, %v1635_v58  ;;  %v423_v49 = vld [vmem:[%s1539_s17 + $0x7a0] sm:$0xff]  ;;  %v324_v51 = vld [vmem:[%s1539_s17 + $0x488] sm:$0xff]  ;;  %v310_v53 = vld [vmem:[%s1539_s17 + $0x418] sm:$0xff] }
  0x31   : > { %685 = vmatpush.msrb.mxu2 %v420_v37  ;;  %594 = vmatpush.msrb.mxu1 %v251_v59  ;;  %v253_v37 = vld [vmem:[%s1539_s17 + $0x250] sm:$0xff]  ;;  %v183_v50 = vld [vmem:[%s1539_s17 + $0x20] sm:$0xff]  ;;  %v410_v55 = vld [vmem:[%s1539_s17 + $0x738] sm:$0xff] }
  0x32   : > { %642 = vmatpush.msrb.mxu0 %v392_v60  ;;  %v395_v52 = vld [vmem:[%s1539_s17 + $0x6c0] sm:$0xff]  ;;  %v409_v54 = vld [vmem:[%s1539_s17 + $0x730] sm:$0xff]  ;;  %v296_v59 = vld [vmem:[%s1539_s17 + $0x3a8] sm:$0xff] }
  0x33   : > { %595 = vmatpush.msrb.mxu1 %v237_v61  ;;  %686 = vmatpush.msrb.mxu2 %v406_v48  ;;  %v338_v48 = vld [vmem:[%s1539_s17 + $0x4f8] sm:$0xff]  ;;  %v381_v56 = vld [vmem:[%s1539_s17 + $0x650] sm:$0xff]  ;;  %v367_v61 = vld [vmem:[%s1539_s17 + $0x5e0] sm:$0xff] }
  0x34   : > { %643 = vmatpush.msrb.mxu0 %v378_v62  ;;  %1402 = vmatmul.msk.f32.gmra.mxu1 %vm455_vm0, %v1635_v58  ;;  %v282_v60 = vld [vmem:[%s1539_s17 + $0x338] sm:$0xff]  ;;  %v268_v62 = vld [vmem:[%s1539_s17 + $0x2c8] sm:$0xff] }
  0x35   : > { %596 = vmatpush.msrb.mxu1 %v223_v63  ;;  %801 = vmatpush.msra.mxu2 %v422_v0  ;;  %v353_v63 = vld [vmem:[%s1539_s17 + $0x570] sm:$0xff]  ;;  %v254_v0 = vld [vmem:[%s1539_s17 + $0x258] sm:$0xff]  ;;  %v240_v2 = vld [vmem:[%s1539_s17 + $0x1e8] sm:$0xff] }
  0x36   : > { %644 = vmatpush.msrb.mxu0 %v364_v1  ;;  %v339_v1 = vld [vmem:[%s1539_s17 + $0x500] sm:$0xff] }
  0x37   : > { %597 = vmatpush.msrb.mxu1 %v209_v3  ;;  %487 = vmatmul.f32.gmra.mxu0 %v1657_v4  ;;  %v325_v3 = vld [vmem:[%s1539_s17 + $0x490] sm:$0xff] }
  0x38   : > { %645 = vmatpush.msrb.mxu0 %v350_v5  ;;  %545 = vmatmul.f32.gmra.mxu2 %v1657_v4  ;;  %v226_v5 = vld [vmem:[%s1539_s17 + $0x178] sm:$0xff] }
  0x39   : > { %1407 = vmatmul.msk.f32.vlgmr.msrb.gmra.mxu3 %vm455_vm0, %v1556_v12  ;;  %598 = vmatpush.msrb.mxu1 %v195_v6  ;;  %v311_v6 = vld [vmem:[%s1539_s17 + $0x420] sm:$0xff] }
  0x3a   : > { %646 = vmatpush.msrb.mxu0 %v336_v7  ;;  %802 = vmatpush.msra.mxu2 %v408_v16  ;;  %v212_v7 = vld [vmem:[%s1539_s17 + $0x108] sm:$0xff]  ;;  %v269_v16 = vld [vmem:[%s1539_s17 + $0x2d0] sm:$0xff] }
  0x3b   : > { %599 = vmatpush.msrb.mxu1 %v181_v8  ;;  %743 = vmatpush.msrb.mxu3 %v421_v19  ;;  %v297_v8 = vld [vmem:[%s1539_s17 + $0x3b0] sm:$0xff] }
  0x3c   : > { %647 = vmatpush.msrb.mxu0 %v322_v9  ;;  %600 = vmatmul.f32.vlgmr.msrb.gmra.mxu1 %v1630_v57  ;;  %v198_v9 = vld [vmem:[%s1539_s17 + $0x98] sm:$0xff]  ;;  %v241_v19 = vld [vmem:[%s1539_s17 + $0x1f0] sm:$0xff] }
  0x3d   : > { %700 = vmatpush.msra.mxu1 %v393_v10  ;;  %744 = vmatpush.msrb.mxu3 %v407_v23  ;;  %v283_v10 = vld [vmem:[%s1539_s17 + $0x340] sm:$0xff]  ;;  %v213_v23 = vld [vmem:[%s1539_s17 + $0x110] sm:$0xff] }
  0x3e   : > { %648 = vmatpush.msrb.mxu0 %v308_v11  ;;  %v425_v11 = vld [vmem:[%s1539_s17 + $0x7b0] sm:$0xff] }
  0x3f   : > { %701 = vmatpush.msra.mxu1 %v379_v13  ;;  %490 = vmatmul.f32.gmra.mxu0 %v1675_v14  ;;  %v426_v13 = vld [vmem:[%s1539_s17 + $0x7b8] sm:$0xff] }
  0x40   : > { %649 = vmatpush.msrb.mxu0 %v294_v15  ;;  %548 = vmatmul.f32.gmra.mxu2 %v1675_v14  ;;  %v184_v15 = vld [vmem:[%s1539_s17 + $0x28] sm:$0xff] }
  0x41   : > { %1408 = vmatmul.msk.f32.gmra.mxu3 %vm455_vm0, %v1577_v26  ;;  %702 = vmatpush.msra.mxu1 %v365_v17  ;;  %v255_v17 = vld [vmem:[%s1539_s17 + $0x260] sm:$0xff] }
  0x42   : > { %650 = vmatpush.msrb.mxu0 %v280_v18  ;;  %v396_v18 = vld [vmem:[%s1539_s17 + $0x6c8] sm:$0xff] }
  0x43   : > { %703 = vmatpush.msra.mxu1 %v351_v20  ;;  %v382_v20 = vld [vmem:[%s1539_s17 + $0x658] sm:$0xff] }
  0x44   : > { %651 = vmatpush.msrb.mxu0 %v266_v21  ;;  %603 = vmatmul.f32.gmra.mxu1 %v1657_v4  ;;  %v227_v21 = vld [vmem:[%s1539_s17 + $0x180] sm:$0xff] }
  0x45   : > { %704 = vmatpush.msra.mxu1 %v337_v22  ;;  %v368_v22 = vld [vmem:[%s1539_s17 + $0x5e8] sm:$0xff] }
  0x46   : > { %652 = vmatpush.msrb.mxu0 %v252_v24  ;;  %v354_v24 = vld [vmem:[%s1539_s17 + $0x578] sm:$0xff] }
  0x47   : > { %705 = vmatpush.msra.mxu1 %v323_v25  ;;  %493 = vmatmul.f32.gmra.mxu0 %v1696_v27  ;;  %v199_v25 = vld [vmem:[%s1539_s17 + $0xa0] sm:$0xff] }
  0x48   : > { %653 = vmatpush.msrb.mxu0 %v238_v28  ;;  %551 = vmatmul.f32.gmra.mxu2 %v1696_v27  ;;  %v340_v28 = vld [vmem:[%s1539_s17 + $0x508] sm:$0xff] }
  0x49   : > { %1409 = vmatmul.msk.f32.gmra.mxu3 %vm455_vm0, %v1602_v41  ;;  %706 = vmatpush.msra.mxu1 %v309_v29  ;;  %v185_v29 = vld [vmem:[%s1539_s17 + $0x30] sm:$0xff] }
  0x4a   : > { %654 = vmatpush.msrb.mxu0 %v224_v30  ;;  %v326_v30 = vld [vmem:[%s1539_s17 + $0x498] sm:$0xff] }
  0x4b   : > { %707 = vmatpush.msra.mxu1 %v295_v31  ;;  %v397_v31 = vld [vmem:[%s1539_s17 + $0x6d0] sm:$0xff] }
  0x4c   : > { %655 = vmatpush.msrb.mxu0 %v210_v32  ;;  %606 = vmatmul.f32.gmra.mxu1 %v1675_v14  ;;  %v312_v32 = vld [vmem:[%s1539_s17 + $0x428] sm:$0xff] }
  0x4d   : > { %708 = vmatpush.msra.mxu1 %v281_v33  ;;  %v411_v33 = vld [vmem:[%s1539_s17 + $0x740] sm:$0xff] }
  0x4e   : > { %656 = vmatpush.msrb.mxu0 %v196_v34  ;;  %v412_v34 = vld [vmem:[%s1539_s17 + $0x748] sm:$0xff] }
  0x4f   : > { %709 = vmatpush.msra.mxu1 %v267_v35  ;;  %v383_v35 = vld [vmem:[%s1539_s17 + $0x660] sm:$0xff] }
  0x50   : > { %657 = vmatpush.msrb.mxu0 %v182_v36  ;;  %1411 = vmatmul.msk.f32.vlgmr.msrb.gmra.mxu2 %vm455_vm0, %v1556_v12  ;;  %v298_v36 = vld [vmem:[%s1539_s17 + $0x3b8] sm:$0xff] }
  0x51   : > { %1410 = vmatmul.msk.f32.gmra.mxu3 %vm455_vm0, %v1635_v58  ;;  %658 = vmatmul.f32.vlgmr.msrb.gmra.mxu0 %v1630_v57 }
  0x52   : > { %710 = vmatpush.msra.mxu1 %v253_v37  ;;  %758 = vmatpush.msra.mxu0 %v394_v38  ;;  %v284_v37 = vld [vmem:[%s1539_s17 + $0x348] sm:$0xff]  ;;  %v369_v38 = vld [vmem:[%s1539_s17 + $0x5f0] sm:$0xff] }
  0x53   : > { %917 = vmatpush.msrb.mxu2 %v424_v39  ;;  %v270_v39 = vld [vmem:[%s1539_s17 + $0x2d8] sm:$0xff] }
  0x54   : > { %711 = vmatpush.msra.mxu1 %v239_v40  ;;  %759 = vmatpush.msra.mxu0 %v380_v42  ;;  %v355_v40 = vld [vmem:[%s1539_s17 + $0x580] sm:$0xff]  ;;  %v256_v42 = vld [vmem:[%s1539_s17 + $0x268] sm:$0xff] }
  0x55   : > { %609 = vmatmul.f32.gmra.mxu1 %v1696_v27  ;;  %918 = vmatpush.msrb.mxu2 %v410_v55  ;;  %v271_v55 = vld [vmem:[%s1539_s17 + $0x2e0] sm:$0xff] }
  0x56   : > { %712 = vmatpush.msra.mxu1 %v225_v43  ;;  %760 = vmatpush.msra.mxu0 %v366_v44  ;;  %v341_v43 = vld [vmem:[%s1539_s17 + $0x510] sm:$0xff]  ;;  %v242_v44 = vld [vmem:[%s1539_s17 + $0x1f8] sm:$0xff] }
  0x58   : > { %713 = vmatpush.msra.mxu1 %v211_v45  ;;  %761 = vmatpush.msra.mxu0 %v352_v46  ;;  %v327_v45 = vld [vmem:[%s1539_s17 + $0x4a0] sm:$0xff]  ;;  %v228_v46 = vld [vmem:[%s1539_s17 + $0x188] sm:$0xff] }
  0x59   : > { %661 = vmatmul.f32.gmra.mxu0 %v1657_v4  ;;  %1412 = vmatmul.msk.f32.gmra.mxu2 %vm455_vm0, %v1577_v26 }
  0x5a   : > { %1414 = vmatmul.msk.f32.vlgmr.msra.gmra.mxu3 %vm455_vm0, %v1635_v58  ;;  %714 = vmatpush.msra.mxu1 %v197_v47  ;;  %v313_v47 = vld [vmem:[%s1539_s17 + $0x430] sm:$0xff] }
  0x5b   : > { %762 = vmatpush.msra.mxu0 %v338_v48  ;;  %859 = vmatpush.msra.mxu3 %v423_v49  ;;  %v214_v48 = vld [vmem:[%s1539_s17 + $0x118] sm:$0xff]  ;;  %v299_v49 = vld [vmem:[%s1539_s17 + $0x3c0] sm:$0xff] }
  0x5c   : > { %715 = vmatpush.msra.mxu1 %v183_v50  ;;  %v200_v50 = vld [vmem:[%s1539_s17 + $0xa8] sm:$0xff] }
  0x5d   : > { %763 = vmatpush.msra.mxu0 %v324_v51  ;;  %716 = vmatmul.f32.vlgmr.msra.gmra.mxu1 %v1630_v57  ;;  %v285_v51 = vld [vmem:[%s1539_s17 + $0x350] sm:$0xff] }
  0x5e   : > { %816 = vmatpush.msrb.mxu1 %v395_v52  ;;  %860 = vmatpush.msra.mxu3 %v409_v54  ;;  %v427_v52 = vld [vmem:[%s1539_s17 + $0x7c0] sm:$0xff]  ;;  %v186_v54 = vld [vmem:[%s1539_s17 + $0x38] sm:$0xff] }
  0x5f   : > { %764 = vmatpush.msra.mxu0 %v310_v53  ;;  %v428_v53 = vld [vmem:[%s1539_s17 + $0x7c8] sm:$0xff] }
  0x60   : > { %817 = vmatpush.msrb.mxu1 %v381_v56  ;;  %v257_v56 = vld [vmem:[%s1539_s17 + $0x270] sm:$0xff] }
  0x61   : > { %765 = vmatpush.msra.mxu0 %v296_v59  ;;  %1413 = vmatmul.msk.f32.gmra.mxu2 %vm455_vm0, %v1602_v41  ;;  %v398_v59 = vld [vmem:[%s1539_s17 + $0x6d8] sm:$0xff] }
  0x62   : > { %664 = vmatmul.f32.gmra.mxu0 %v1675_v14  ;;  %1415 = vmatmul.msk.f32.vlgmr.msrb.gmra.mxu3 %vm455_vm0, %v1556_v12 }
  0x63   : > { %766 = vmatpush.msra.mxu0 %v282_v60  ;;  %818 = vmatpush.msrb.mxu1 %v367_v61  ;;  %v243_v61 = vld [vmem:[%s1539_s17 + $0x200] sm:$0xff] }
  0x64   : > { %975 = vmatpush.msrb.mxu3 %v425_v11  ;;  %v314_v11 = vld [vmem:[%s1539_s17 + $0x438] sm:$0xff] }
  0x65   : > { %767 = vmatpush.msra.mxu0 %v268_v62  ;;  %819 = vmatpush.msrb.mxu1 %v353_v63  ;;  %v384_v62 = vld [vmem:[%s1539_s17 + $0x668] sm:$0xff]  ;;  %v229_v63 = vld [vmem:[%s1539_s17 + $0x190] sm:$0xff] }
  0x66   : > { %719 = vmatmul.f32.gmra.mxu1 %v1657_v4  ;;  %976 = vmatpush.msrb.mxu3 %v411_v33 }
  0x67   : > { %768 = vmatpush.msra.mxu0 %v254_v0  ;;  %820 = vmatpush.msrb.mxu1 %v339_v1  ;;  %v370_v0 = vld [vmem:[%s1539_s17 + $0x5f8] sm:$0xff]  ;;  %v215_v1 = vld [vmem:[%s1539_s17 + $0x120] sm:$0xff] }
  0x69   : > { %769 = vmatpush.msra.mxu0 %v240_v2  ;;  %821 = vmatpush.msrb.mxu1 %v325_v3  ;;  %v356_v2 = vld [vmem:[%s1539_s17 + $0x588] sm:$0xff] }
  0x6a   : > { %667 = vmatmul.f32.gmra.mxu0 %v1696_v27  ;;  %1416 = vmatmul.msk.f32.gmra.mxu3 %vm455_vm0, %v1577_v26 }
  0x6b   : > { %1419 = vmatmul.msk.f32.vlgmr.msra.gmra.mxu2 %vm455_vm0, %v1556_v12  ;;  %770 = vmatpush.msra.mxu0 %v226_v5  ;;  %v201_v5 = vld [vmem:[%s1539_s17 + $0xb0] sm:$0xff] }
  0x6c   : > { %822 = vmatpush.msrb.mxu1 %v311_v6  ;;  %1033 = vmatpush.msra.mxu2 %v426_v13  ;;  %v342_v6 = vld [vmem:[%s1539_s17 + $0x518] sm:$0xff]  ;;  %v413_v13 = vld [vmem:[%s1539_s17 + $0x750] sm:$0xff] }
  0x6d   : > { %771 = vmatpush.msra.mxu0 %v212_v7  ;;  %v187_v7 = vld [vmem:[%s1539_s17 + $0x40] sm:$0xff] }
  0x6e   : > { %823 = vmatpush.msrb.mxu1 %v297_v8  ;;  %1034 = vmatpush.msra.mxu2 %v412_v34  ;;  %v328_v8 = vld [vmem:[%s1539_s17 + $0x4a8] sm:$0xff]  ;;  %v315_v34 = vld [vmem:[%s1539_s17 + $0x440] sm:$0xff] }
  0x6f   : > { %722 = vmatmul.f32.gmra.mxu1 %v1675_v14  ;;  %772 = vmatpush.msra.mxu0 %v198_v9 }
  0x70   : > { %824 = vmatpush.msrb.mxu1 %v283_v10  ;;  %v399_v10 = vld [vmem:[%s1539_s17 + $0x6e0] sm:$0xff] }
  0x71   : > { %773 = vmatpush.msra.mxu0 %v184_v15  ;;  %v414_v15 = vld [vmem:[%s1539_s17 + $0x758] sm:$0xff] }
  0x72   : > { %825 = vmatpush.msrb.mxu1 %v269_v16  ;;  %1417 = vmatmul.msk.f32.gmra.mxu3 %vm455_vm0, %v1602_v41  ;;  %v385_v16 = vld [vmem:[%s1539_s17 + $0x670] sm:$0xff] }
  0x73   : > { %774 = vmatmul.f32.vlgmr.msra.gmra.mxu0 %v1630_v57  ;;  %1420 = vmatmul.msk.f32.gmra.mxu2 %vm455_vm0, %v1577_v26 }
  0x74   : > { %826 = vmatpush.msrb.mxu1 %v255_v17  ;;  %874 = vmatpush.msrb.mxu0 %v396_v18  ;;  %v300_v17 = vld [vmem:[%s1539_s17 + $0x3c8] sm:$0xff] }
  0x76   : > { %827 = vmatpush.msrb.mxu1 %v241_v19  ;;  %875 = vmatpush.msrb.mxu0 %v382_v20  ;;  %v286_v19 = vld [vmem:[%s1539_s17 + $0x358] sm:$0xff]  ;;  %v371_v20 = vld [vmem:[%s1539_s17 + $0x600] sm:$0xff] }
  0x77   : > { %725 = vmatmul.f32.gmra.mxu1 %v1696_v27 }
  0x78   : > { %828 = vmatpush.msrb.mxu1 %v227_v21  ;;  %876 = vmatpush.msrb.mxu0 %v368_v22  ;;  %v272_v21 = vld [vmem:[%s1539_s17 + $0x2e8] sm:$0xff]  ;;  %v357_v22 = vld [vmem:[%s1539_s17 + $0x590] sm:$0xff] }
  0x7a   : > { %829 = vmatpush.msrb.mxu1 %v213_v23  ;;  %877 = vmatpush.msrb.mxu0 %v354_v24  ;;  %v258_v23 = vld [vmem:[%s1539_s17 + $0x278] sm:$0xff]  ;;  %v343_v24 = vld [vmem:[%s1539_s17 + $0x520] sm:$0xff] }
  0x7b   : > { %1418 = vmatmul.msk.f32.gmra.mxu3 %vm455_vm0, %v1635_v58  ;;  %777 = vmatmul.f32.gmra.mxu0 %v1657_v4 }
  0x7c   : > { %1421 = vmatmul.msk.f32.gmra.mxu2 %vm455_vm0, %v1602_v41  ;;  %830 = vmatpush.msrb.mxu1 %v199_v25 }
  0x7d   : > { %878 = vmatpush.msrb.mxu0 %v340_v28 }
  0x7e   : > { %831 = vmatpush.msrb.mxu1 %v185_v29  ;;  %v244_v29 = vld [vmem:[%s1539_s17 + $0x208] sm:$0xff] }
  0x7f   : > { %879 = vmatpush.msrb.mxu0 %v326_v30  ;;  %832 = vmatmul.f32.vlgmr.msrb.gmra.mxu1 %v1630_v57  ;;  %v1885_v28 = vpop.permute.xlu0 %437  ;;  %v329_v30 = vld [vmem:[%s1539_s17 + $0x4b0] sm:$0xff] }
  0x80   : > { %932 = vmatpush.msra.mxu1 %v397_v31 }
  0x81   : > { %880 = vmatpush.msrb.mxu0 %v312_v32  ;;  %v230_v32 = vld [vmem:[%s1539_s17 + $0x198] sm:$0xff] }
  0x82   : > { %933 = vmatpush.msra.mxu1 %v383_v35 }
  0x83   : > { %881 = vmatpush.msrb.mxu0 %v298_v36  ;;  %1423 = vmatmul.msk.f32.vlgmr.msra.gmra.mxu3 %vm455_vm0, %v1556_v12  ;;  %v216_v36 = vld [vmem:[%s1539_s17 + $0x128] sm:$0xff] }
  0x84   : > { %780 = vmatmul.f32.gmra.mxu0 %v1675_v14  ;;  %1422 = vmatmul.msk.f32.gmra.mxu2 %vm455_vm0, %v1635_v58 }
  0x85   : > { %882 = vmatpush.msrb.mxu0 %v284_v37  ;;  %934 = vmatpush.msra.mxu1 %v369_v38  ;;  %v301_v37 = vld [vmem:[%s1539_s17 + $0x3d0] sm:$0xff] }
  0x86   : > { %1091 = vmatpush.msra.mxu3 %v427_v52  ;;  %v400_v52 = vld [vmem:[%s1539_s17 + $0x6e8] sm:$0xff] }
  0x87   : > { %883 = vmatpush.msrb.mxu0 %v270_v39  ;;  %935 = vmatpush.msra.mxu1 %v355_v40  ;;  %v202_v39 = vld [vmem:[%s1539_s17 + $0xb8] sm:$0xff]  ;;  %v287_v40 = vld [vmem:[%s1539_s17 + $0x360] sm:$0xff] }
  0x88   : > { %835 = vmatmul.f32.gmra.mxu1 %v1657_v4  ;;  %1092 = vmatpush.msra.mxu3 %v413_v13  ;;  %v189_v13 = vld [vmem:[%s1539_s17 + $0x50] sm:$0xff] }
  0x89   : > { %884 = vmatpush.msrb.mxu0 %v256_v42  ;;  %936 = vmatpush.msra.mxu1 %v341_v43  ;;  %v429_v43 = vld [vmem:[%s1539_s17 + $0x7d0] sm:$0xff] }
  0x8b   : > { %885 = vmatpush.msrb.mxu0 %v242_v44  ;;  %937 = vmatpush.msra.mxu1 %v327_v45  ;;  %v430_v44 = vld [vmem:[%s1539_s17 + $0x7d8] sm:$0xff]  ;;  %v188_v45 = vld [vmem:[%s1539_s17 + $0x48] sm:$0xff] }
  0x8c   : > { %783 = vmatmul.f32.gmra.mxu0 %v1696_v27  ;;  %1424 = vmatmul.msk.f32.gmra.mxu3 %vm455_vm0, %v1577_v26 }
  0x8d   : > { %1427 = vmatmul.msk.f32.vlgmr.msrb.gmra.mxu2 %vm455_vm0, %v1556_v12  ;;  %886 = vmatpush.msrb.mxu0 %v228_v46 }
  0x8e   : > { %938 = vmatpush.msra.mxu1 %v313_v47  ;;  %1149 = vmatpush.msrb.mxu2 %v428_v53 }
  0x8f   : > { %887 = vmatpush.msrb.mxu0 %v214_v48 }
  0x90   : > { %939 = vmatpush.msra.mxu1 %v299_v49  ;;  %1150 = vmatpush.msrb.mxu2 %v414_v15 }
  0x91   : > { %838 = vmatmul.f32.gmra.mxu1 %v1675_v14  ;;  %888 = vmatpush.msrb.mxu0 %v200_v50 }
  0x92   : > { %940 = vmatpush.msra.mxu1 %v285_v51  ;;  %v259_v51 = vld [vmem:[%s1539_s17 + $0x280] sm:$0xff] }
  0x93   : > { %889 = vmatpush.msrb.mxu0 %v186_v54 }
  0x94   : > { %941 = vmatpush.msra.mxu1 %v271_v55  ;;  %1425 = vmatmul.msk.f32.gmra.mxu3 %vm455_vm0, %v1602_v41  ;;  %v1838_v60 = vpop.f32.mrf.mxu1  ;;  %v245_v55 = vld [vmem:[%s1539_s17 + $0x210] sm:$0xff] }
  0x95   : > { %890 = vmatmul.f32.vlgmr.msrb.gmra.mxu0 %v1630_v57  ;;  %1428 = vmatmul.msk.f32.gmra.mxu2 %vm455_vm0, %v1577_v26  ;;  %v1917_v46 = vpop.permute.xlu0 %442 }
  0x96   : > { %942 = vmatpush.msra.mxu1 %v257_v56  ;;  %990 = vmatpush.msra.mxu0 %v398_v59  ;;  %v386_v56 = vld [vmem:[%s1539_s17 + $0x678] sm:$0xff] }
  0x98   : > { %943 = vmatpush.msra.mxu1 %v243_v61  ;;  %991 = vmatpush.msra.mxu0 %v384_v62  ;;  %v231_v61 = vld [vmem:[%s1539_s17 + $0x1a0] sm:$0xff]  ;;  %v372_v62 = vld [vmem:[%s1539_s17 + $0x608] sm:$0xff] }
  0x99   : > { %841 = vmatmul.f32.gmra.mxu1 %v1696_v27 }
  0x9a   : > { %944 = vmatpush.msra.mxu1 %v229_v63  ;;  %992 = vmatpush.msra.mxu0 %v370_v0  ;;  %v1850_v3 = vpop.f32.mrf.mxu3  ;;  %v217_v0 = vld [vmem:[%s1539_s17 + $0x130] sm:$0xff] }
  0x9c   : > { %945 = vmatpush.msra.mxu1 %v215_v1  ;;  %993 = vmatpush.msra.mxu0 %v356_v2  ;;  %v358_v1 = vld [vmem:[%s1539_s17 + $0x598] sm:$0xff] }
  0x9d   : > { %1426 = vmatmul.msk.f32.gmra.mxu3 %vm455_vm0, %v1635_v58  ;;  %893 = vmatmul.f32.gmra.mxu0 %v1657_v4 }
  0x9e   : > { %1429 = vmatmul.msk.f32.gmra.mxu2 %vm455_vm0, %v1602_v41  ;;  %946 = vmatpush.msra.mxu1 %v201_v5  ;;  %v1861_v9 = vpop.f32.mrf.mxu1 }
  0x9f   : > { %994 = vmatpush.msra.mxu0 %v342_v6 }
  0xa0   : > { %947 = vmatpush.msra.mxu1 %v187_v7  ;;  %v203_v7 = vld [vmem:[%s1539_s17 + $0xc0] sm:$0xff] }
  0xa1   : > { %995 = vmatpush.msra.mxu0 %v328_v8  ;;  %948 = vmatmul.f32.vlgmr.msra.gmra.mxu1 %v1630_v57 }
  0xa2   : > { %1048 = vmatpush.msrb.mxu1 %v399_v10  ;;  %v1870_v18 = vpop.f32.mrf.mxu3  ;;  %v344_v10 = vld [vmem:[%s1539_s17 + $0x528] sm:$0xff] }
  0xa3   : > { %996 = vmatpush.msra.mxu0 %v314_v11 }
  0xa4   : > { %1049 = vmatpush.msrb.mxu1 %v385_v16  ;;  %v330_v16 = vld [vmem:[%s1539_s17 + $0x4b8] sm:$0xff] }
  0xa5   : > { %997 = vmatpush.msra.mxu0 %v300_v17  ;;  %1431 = vmatmul.msk.f32.vlgmr.msrb.gmra.mxu3 %vm455_vm0, %v1556_v12  ;;  %v401_v17 = vld [vmem:[%s1539_s17 + $0x6f0] sm:$0xff] }
  0xa6   : > { %896 = vmatmul.f32.gmra.mxu0 %v1675_v14  ;;  %1430 = vmatmul.msk.f32.gmra.mxu2 %vm455_vm0, %v1635_v58 }
  0xa7   : > { %998 = vmatpush.msra.mxu0 %v286_v19  ;;  %1050 = vmatpush.msrb.mxu1 %v371_v20  ;;  %v316_v19 = vld [vmem:[%s1539_s17 + $0x448] sm:$0xff] }
  0xa8   : > { %v1883_v25 = vpop.f32.mrf.mxu1  ;;  %1207 = vmatpush.msrb.mxu3 %v429_v43  ;;  %v260_v43 = vld [vmem:[%s1539_s17 + $0x288] sm:$0xff] }
  0xa9   : > { %999 = vmatpush.msra.mxu0 %v272_v21  ;;  %1051 = vmatpush.msrb.mxu1 %v357_v22  ;;  %v415_v22 = vld [vmem:[%s1539_s17 + $0x760] sm:$0xff] }
  0xaa   : > { %951 = vmatmul.f32.gmra.mxu1 %v1657_v4  ;;  %v1890_v31 = vpop.f32.mrf.mxu3  ;;  %1208 = vmatpush.msrb.mxu3 %v415_v22 }
  0xab   : > { %1000 = vmatpush.msra.mxu0 %v258_v23  ;;  %1052 = vmatpush.msrb.mxu1 %v343_v24  ;;  %v416_v23 = vld [vmem:[%s1539_s17 + $0x768] sm:$0xff] }
  0xac   : > { %v485_v33 = vpop.f32.mrf.mxu0 }
  0xad   : > { %1001 = vmatpush.msra.mxu0 %v244_v29  ;;  %1053 = vmatpush.msrb.mxu1 %v329_v30  ;;  %v486_v35 = vadd.f32 %v485_v33, %v1885_v28 }
  0xae   : > { %899 = vmatmul.f32.gmra.mxu0 %v1696_v27  ;;  %1432 = vmatmul.msk.f32.gmra.mxu3 %vm455_vm0, %v1577_v26 }
  0xaf   : > { %1435 = vmatmul.msk.f32.vlgmr.msra.gmra.mxu2 %vm455_vm0, %v1556_v12  ;;  %1002 = vmatpush.msra.mxu0 %v230_v32  ;;  %v515_v38 = vadd.f32 %v1838_v60, %v486_v35  ;;  %v273_v12 = vld [vmem:[%s1539_s17 + $0x2f0] sm:$0xff]  ;;  %v1937_v60 = vpop.permute.xlu1 %447 }
  0xb0   : > { %1054 = vmatpush.msrb.mxu1 %v315_v34  ;;  %1265 = vmatpush.msra.mxu2 %v430_v44  ;;  %v373_v35 = vld [vmem:[%s1539_s17 + $0x610] sm:$0xff] }
  0xb1   : > { %1003 = vmatpush.msra.mxu0 %v216_v36  ;;  %1280 = vst [vmem:[%s1903_s20] sm:$0xff] %v515_v38  ;;  %v1912_v42 = vpop.f32.mrf.mxu1  ;;  %v345_v44 = vld [vmem:[%s1539_s17 + $0x530] sm:$0xff] }
  0xb2   : > { %1055 = vmatpush.msrb.mxu1 %v301_v37  ;;  %1266 = vmatpush.msra.mxu2 %v416_v23  ;;  %v1980_v37 = vld [vmem:[%s2206_s1 + $0x8] sm:$0xff] }
  0xb3   : > { %954 = vmatmul.f32.gmra.mxu1 %v1675_v14  ;;  %1004 = vmatpush.msra.mxu0 %v202_v39  ;;  %v543_v47 = vpop.f32.mrf.mxu2  ;;  %v1921_v48 = vpop.f32.mrf.mxu3  ;;  %v359_v39 = vld [vmem:[%s1539_s17 + $0x5a0] sm:$0xff] }
  0xb4   : > { %1056 = vmatpush.msrb.mxu1 %v287_v40  ;;  %v544_v49 = vadd.f32 %v543_v47, %v1885_v28  ;;  %v488_v50 = vpop.f32.mrf.mxu0 }
  0xb5   : > { %1005 = vmatpush.msra.mxu0 %v188_v45  ;;  %v489_v53 = vadd.f32 %v488_v50, %v1917_v46 }
  0xb6   : > { %1057 = vmatpush.msrb.mxu1 %v273_v12  ;;  %1433 = vmatmul.msk.f32.gmra.mxu3 %vm455_vm0, %v1602_v41  ;;  %v573_v54 = vadd.f32 %v1850_v3, %v544_v49  ;;  %v331_v12 = vld [vmem:[%s1539_s17 + $0x4c0] sm:$0xff] }
  0xb7   : > { %1006 = vmatmul.f32.vlgmr.msra.gmra.mxu0 %v1630_v57  ;;  %1436 = vmatmul.msk.f32.gmra.mxu2 %vm455_vm0, %v1577_v26  ;;  %v518_v59 = vadd.f32 %v1861_v9, %v489_v53  ;;  %v1965_v21 = vpop.permute.xlu1 %452 }
  0xb8   : > { %1058 = vmatpush.msrb.mxu1 %v259_v51  ;;  %1106 = vmatpush.msrb.mxu0 %v400_v52  ;;  %1281 = vst [vmem:[%s1903_s20 + $0x8] sm:$0xff] %v573_v54  ;;  %v232_v51 = vld [vmem:[%s1539_s17 + $0x1a8] sm:$0xff]  ;;  %v2008_v54 = vld [vmem:[%s2206_s1 + $0x18] sm:$0xff] }
  0xb9   : > { %1295 = vst [vmem:[%s1903_s20 + $0x70] sm:$0xff] %v518_v59  ;;  %v601_v63 = vpop.f32.mrf.mxu1  ;;  %v204_v59 = vld [vmem:[%s1539_s17 + $0xc8] sm:$0xff] }
  0xba   : > { %1059 = vmatpush.msrb.mxu1 %v245_v55  ;;  %1107 = vmatpush.msrb.mxu0 %v386_v56  ;;  %v602_v26 = vadd.f32 %v601_v63, %v1885_v28  ;;  %v303_v56 = vld [vmem:[%s1539_s17 + $0x3e0] sm:$0xff] }
  0xbb   : > { %957 = vmatmul.f32.gmra.mxu1 %v1696_v27  ;;  %v546_v2 = vpop.f32.mrf.mxu2 }
  0xbc   : > { %1060 = vmatpush.msrb.mxu1 %v231_v61  ;;  %1108 = vmatpush.msrb.mxu0 %v372_v62  ;;  %v547_v3 = vadd.f32 %v546_v2, %v1917_v46  ;;  %v630_v5 = vpop.f32.mrf.mxu3  ;;  %v491_v6 = vpop.f32.mrf.mxu0  ;;  %v289_v62 = vld [vmem:[%s1539_s17 + $0x370] sm:$0xff] }
  0xbd   : > { %v631_v8 = vadd.f32 %v630_v5, %v602_v26  ;;  %v492_v9 = vadd.f32 %v491_v6, %v1937_v60 }
  0xbe   : > { %1061 = vmatpush.msrb.mxu1 %v217_v0  ;;  %1109 = vmatpush.msrb.mxu0 %v358_v1  ;;  %v576_v11 = vadd.f32 %v1870_v18, %v547_v3  ;;  %v190_v0 = vld [vmem:[%s1539_s17 + $0x58] sm:$0xff]  ;;  %v275_v3 = vld [vmem:[%s1539_s17 + $0x300] sm:$0xff] }
  0xbf   : > { %1434 = vmatmul.msk.f32.gmra.mxu3 %vm455_vm0, %v1635_v58  ;;  %1009 = vmatmul.f32.gmra.mxu0 %v1657_v4  ;;  %1282 = vst [vmem:[%s1903_s20 + $0x10] sm:$0xff] %v631_v8  ;;  %v521_v15 = vadd.f32 %v1883_v25, %v492_v9  ;;  %v302_v25 = vld [vmem:[%s1539_s17 + $0x3d8] sm:$0xff]  ;;  %v2031_v9 = vld [vmem:[%s2206_s1 + $0x28] sm:$0xff] }
  0xc0   : > { %1437 = vmatmul.msk.f32.gmra.mxu2 %vm455_vm0, %v1602_v41  ;;  %1062 = vmatpush.msrb.mxu1 %v203_v7  ;;  %1296 = vst [vmem:[%s1903_s20 + $0x78] sm:$0xff] %v576_v11  ;;  %v387_v41 = vld [vmem:[%s1539_s17 + $0x680] sm:$0xff]  ;;  %v261_v7 = vld [vmem:[%s1539_s17 + $0x290] sm:$0xff]  ;;  %v402_v8 = vld [vmem:[%s1539_s17 + $0x6f8] sm:$0xff] }
  0xc1   : > { %1110 = vmatpush.msrb.mxu0 %v344_v10  ;;  %1309 = vst [vmem:[%s1903_s20 + $0xe0] sm:$0xff] %v521_v15  ;;  %v604_v18 = vpop.f32.mrf.mxu1  ;;  %v247_v10 = vld [vmem:[%s1539_s17 + $0x220] sm:$0xff]  ;;  %v388_v11 = vld [vmem:[%s1539_s17 + $0x688] sm:$0xff] }
  0xc2   : > { %1063 = vmatpush.msrb.mxu1 %v189_v13  ;;  %v605_v20 = vadd.f32 %v604_v18, %v1917_v46 }
  0xc3   : > { %1111 = vmatpush.msrb.mxu0 %v330_v16  ;;  %1064 = vmatmul.f32.vlgmr.msrb.gmra.mxu1 %v1630_v57  ;;  %v549_v24 = vpop.f32.mrf.mxu2  ;;  %v288_v57 = vld [vmem:[%s1539_s17 + $0x368] sm:$0xff]  ;;  %v233_v16 = vld [vmem:[%s1539_s17 + $0x1b0] sm:$0xff] }
  0xc4   : > { %1164 = vmatpush.msra.mxu1 %v401_v17  ;;  %v550_v29 = vadd.f32 %v549_v24, %v1937_v60  ;;  %v633_v30 = vpop.f32.mrf.mxu3  ;;  %v494_v32 = vpop.f32.mrf.mxu0  ;;  %v374_v17 = vld [vmem:[%s1539_s17 + $0x618] sm:$0xff] }
  0xc5   : > { %1112 = vmatpush.msrb.mxu0 %v316_v19  ;;  %v634_v33 = vadd.f32 %v633_v30, %v605_v20  ;;  %v495_v34 = vadd.f32 %v494_v32, %v1965_v21  ;;  %v219_v19 = vld [vmem:[%s1539_s17 + $0x140] sm:$0xff]  ;;  %v360_v20 = vld [vmem:[%s1539_s17 + $0x5a8] sm:$0xff] }
  0xc6   : > { %1165 = vmatpush.msra.mxu1 %v387_v41  ;;  %v579_v36 = vadd.f32 %v1890_v31, %v550_v29  ;;  %v274_v31 = vld [vmem:[%s1539_s17 + $0x2f8] sm:$0xff]  ;;  %v205_v41 = vld [vmem:[%s1539_s17 + $0xd0] sm:$0xff]  ;;  %v191_v30 = vld [vmem:[%s1539_s17 + $0x60] sm:$0xff] }
  0xc7   : > { %1113 = vmatpush.msrb.mxu0 %v302_v25  ;;  %1439 = vmatmul.msk.f32.vlgmr.msra.gmra.mxu3 %vm455_vm0, %v1980_v37  ;;  %1297 = vst [vmem:[%s1903_s20 + $0x80] sm:$0xff] %v634_v33  ;;  %v524_v38 = vadd.f32 %v1912_v42, %v495_v34  ;;  %v346_v25 = vld [vmem:[%s1539_s17 + $0x538] sm:$0xff]  ;;  %v332_v34 = vld [vmem:[%s1539_s17 + $0x4c8] sm:$0xff] }
  0xc8   : > { %1012 = vmatmul.f32.gmra.mxu0 %v1675_v14  ;;  %1438 = vmatmul.msk.f32.gmra.mxu2 %vm455_vm0, %v1635_v58  ;;  %1310 = vst [vmem:[%s1903_s20 + $0xe8] sm:$0xff] %v579_v36  ;;  %v246_v58 = vld [vmem:[%s1539_s17 + $0x218] sm:$0xff] }
  0xc9   : > { %1114 = vmatpush.msrb.mxu0 %v288_v57  ;;  %1166 = vmatpush.msra.mxu1 %v373_v35  ;;  %1323 = vst [vmem:[%s1903_s20 + $0x150] sm:$0xff] %v524_v38  ;;  %v607_v40 = vpop.f32.mrf.mxu1  ;;  %v2057_v29 = vld [vmem:[%s2206_s1 + $0x38] sm:$0xff] }
  0xca   : > { %v608_v45 = vadd.f32 %v607_v40, %v1937_v60  ;;  %v318_v35 = vld [vmem:[%s1539_s17 + $0x458] sm:$0xff] }
  0xcb   : > { %1115 = vmatpush.msrb.mxu0 %v274_v31  ;;  %1167 = vmatpush.msra.mxu1 %v359_v39  ;;  %v552_v42 = vpop.f32.mrf.mxu2  ;;  %v304_v39 = vld [vmem:[%s1539_s17 + $0x3e8] sm:$0xff] }
  0xcc   : > { %1067 = vmatmul.f32.gmra.mxu1 %v1657_v4  ;;  %v553_v47 = vadd.f32 %v552_v42, %v1965_v21  ;;  %v636_v49 = vpop.f32.mrf.mxu3  ;;  %v317_v4 = vld [vmem:[%s1539_s17 + $0x450] sm:$0xff]  ;;  %v2085_v42 = vld [vmem:[%s2206_s1 + $0x20] sm:$0xff] }
  0xcd   : > { %1116 = vmatpush.msrb.mxu0 %v260_v43  ;;  %1168 = vmatpush.msra.mxu1 %v345_v44  ;;  %v637_v50 = vadd.f32 %v636_v49, %v608_v45  ;;  %v290_v44 = vld [vmem:[%s1539_s17 + $0x378] sm:$0xff] }
  0xce   : > { %v582_v52 = vadd.f32 %v1921_v48, %v553_v47  ;;  %v659_v53 = vpop.f32.mrf.mxu0  ;;  %v218_v48 = vld [vmem:[%s1539_s17 + $0x138] sm:$0xff] }
  0xcf   : > { %1117 = vmatpush.msrb.mxu0 %v246_v58  ;;  %1169 = vmatpush.msra.mxu1 %v331_v12  ;;  %1311 = vst [vmem:[%s1903_s20 + $0xf0] sm:$0xff] %v637_v50  ;;  %v660_v55 = vadd.f32 %v659_v53, %v1885_v28  ;;  %v276_v12 = vld [vmem:[%s1539_s17 + $0x308] sm:$0xff]  ;;  %v262_v49 = vld [vmem:[%s1539_s17 + $0x298] sm:$0xff] }
  0xd0   : > { %1015 = vmatmul.f32.gmra.mxu0 %v1696_v27  ;;  %1440 = vmatmul.msk.f32.gmra.mxu3 %vm455_vm0, %v2008_v54  ;;  %1324 = vst [vmem:[%s1903_s20 + $0x158] sm:$0xff] %v582_v52  ;;  %v248_v52 = vld [vmem:[%s1539_s17 + $0x228] sm:$0xff] }
  0xd1   : > { %1443 = vmatmul.msk.f32.vlgmr.msrb.gmra.mxu2 %vm455_vm0, %v1980_v37  ;;  %1118 = vmatpush.msrb.mxu0 %v232_v51 }
  0xd2   : > { %1170 = vmatpush.msra.mxu1 %v317_v4  ;;  %v610_v61 = vpop.f32.mrf.mxu1 }
  0xd3   : > { %1119 = vmatpush.msrb.mxu0 %v218_v48  ;;  %v611_v63 = vadd.f32 %v610_v61, %v1965_v21  ;;  %v688_v26 = vpop.f32.mrf.mxu2 }
  0xd4   : > { %1171 = vmatpush.msra.mxu1 %v303_v56  ;;  %v639_v1 = vpop.f32.mrf.mxu3  ;;  %v689_v2 = vadd.f32 %v688_v26, %v660_v55  ;;  %v234_v55 = vld [vmem:[%s1539_s17 + $0x1b8] sm:$0xff] }
  0xd5   : > { %1070 = vmatmul.f32.gmra.mxu1 %v1675_v14  ;;  %1120 = vmatpush.msrb.mxu0 %v204_v59  ;;  %v640_v5 = vadd.f32 %v639_v1, %v611_v63  ;;  %v2038_v14 = vld [vmem:[%s2206_s1] sm:$0xff]  ;;  %v1495_v59 = vld [vmem:[%s2206_s1 + $0x30] sm:$0xff] }
  0xd6   : > { %1172 = vmatpush.msra.mxu1 %v289_v62  ;;  %1283 = vst [vmem:[%s1903_s20 + $0x18] sm:$0xff] %v689_v2  ;;  %v662_v6 = vpop.f32.mrf.mxu0  ;;  %v220_v62 = vld [vmem:[%s1539_s17 + $0x148] sm:$0xff] }
  0xd7   : > { %1121 = vmatpush.msrb.mxu0 %v190_v0  ;;  %1325 = vst [vmem:[%s1903_s20 + $0x160] sm:$0xff] %v640_v5  ;;  %v663_v13 = vadd.f32 %v662_v6, %v1917_v46  ;;  %v206_v0 = vld [vmem:[%s1539_s17 + $0xd8] sm:$0xff]  ;;  %v192_v5 = vld [vmem:[%s1539_s17 + $0x68] sm:$0xff] }
  0xd8   : > { %1173 = vmatpush.msra.mxu1 %v275_v3  ;;  %1441 = vmatmul.msk.f32.gmra.mxu3 %vm455_vm0, %v2031_v9 }
  0xd9   : > { %1122 = vmatmul.f32.vlgmr.msrb.gmra.mxu0 %v2038_v14  ;;  %1444 = vmatmul.msk.f32.gmra.mxu2 %vm455_vm0, %v2008_v54 }
  0xda   : > { %1174 = vmatpush.msra.mxu1 %v261_v7  ;;  %1222 = vmatpush.msra.mxu0 %v402_v8  ;;  %v717_v15 = vpop.f32.mrf.mxu1 }
  0xdb   : > { %v718_v33 = vadd.f32 %v717_v15, %v1885_v28 }
  0xdc   : > { %1175 = vmatpush.msra.mxu1 %v247_v10  ;;  %1223 = vmatpush.msra.mxu0 %v388_v11  ;;  %v691_v18 = vpop.f32.mrf.mxu2 }
  0xdd   : > { %1073 = vmatmul.f32.gmra.mxu1 %v1696_v27  ;;  %v692_v22 = vadd.f32 %v691_v18, %v663_v13  ;;  %v697_v23 = vpop.f32.mrf.mxu3  ;;  %v2064_v27 = vld [vmem:[%s2206_s1 + $0x10] sm:$0xff] }
  0xde   : > { %1176 = vmatpush.msra.mxu1 %v233_v16  ;;  %1224 = vmatpush.msra.mxu0 %v374_v17 }
  0xdf   : > { %1298 = vst [vmem:[%s1903_s20 + $0x88] sm:$0xff] %v692_v22  ;;  %v665_v24 = vpop.f32.mrf.mxu0 }
  0xe0   : > { %1177 = vmatpush.msra.mxu1 %v219_v19  ;;  %1225 = vmatpush.msra.mxu0 %v360_v20  ;;  %v666_v32 = vadd.f32 %v665_v24, %v1937_v60 }
  0xe1   : > { %1442 = vmatmul.msk.f32.gmra.mxu3 %vm455_vm0, %v2057_v29  ;;  %1125 = vmatmul.f32.gmra.mxu0 %v2064_v27 }
  0xe2   : > { %1445 = vmatmul.msk.f32.gmra.mxu2 %vm455_vm0, %v2031_v9  ;;  %1178 = vmatpush.msra.mxu1 %v205_v41 }
  0xe3   : > { %1226 = vmatpush.msra.mxu0 %v346_v25  ;;  %v720_v57 = vpop.f32.mrf.mxu1 }
  0xe4   : > { %1179 = vmatpush.msra.mxu1 %v191_v30  ;;  %v694_v36 = vpop.f32.mrf.mxu2  ;;  %v721_v58 = vadd.f32 %v720_v57, %v1917_v46 }
  0xe5   : > { %1227 = vmatpush.msra.mxu0 %v332_v34  ;;  %1180 = vmatmul.f32.vlgmr.msra.gmra.mxu1 %v2038_v14  ;;  %v695_v38 = vadd.f32 %v694_v36, %v666_v32  ;;  %v746_v31 = vpop.f32.mrf.mxu3 }
  0xe6   : > { %1459 = vmatpush.msrb.mxu1 %v402_v8  ;;  %v747_v40 = vadd.f32 %v746_v31, %v718_v33 }
  0xe7   : > { %1228 = vmatpush.msra.mxu0 %v318_v35  ;;  %1312 = vst [vmem:[%s1903_s20 + $0xf8] sm:$0xff] %v695_v38  ;;  %v668_v43 = vpop.f32.mrf.mxu0 }
  0xe8   : > { %1460 = vmatpush.msrb.mxu1 %v388_v11  ;;  %1284 = vst [vmem:[%s1903_s20 + $0x20] sm:$0xff] %v747_v40  ;;  %v669_v45 = vadd.f32 %v668_v43, %v1965_v21 }
  0xe9   : > { %1229 = vmatpush.msra.mxu0 %v304_v39  ;;  %1447 = vmatmul.msk.f32.vlgmr.msrb.gmra.mxu3 %vm455_vm0, %v1980_v37 }
  0xea   : > { %1128 = vmatmul.f32.gmra.mxu0 %v2085_v42  ;;  %1446 = vmatmul.msk.f32.gmra.mxu2 %vm455_vm0, %v2057_v29  ;;  %v698_v47 = vadd.f32 %v697_v23, %v669_v45 }
  0xeb   : > { %1461 = vmatpush.msrb.mxu1 %v374_v17  ;;  %1230 = vmatpush.msra.mxu0 %v290_v44 }
  0xec   : > { %1326 = vst [vmem:[%s1903_s20 + $0x168] sm:$0xff] %v698_v47  ;;  %v723_v50 = vpop.f32.mrf.mxu1 }
  0xed   : > { %1462 = vmatpush.msrb.mxu1 %v360_v20  ;;  %1231 = vmatpush.msra.mxu0 %v276_v12  ;;  %v749_v51 = vpop.f32.mrf.mxu3  ;;  %v724_v61 = vadd.f32 %v723_v50, %v1937_v60 }
  0xee   : > { %1183 = vmatmul.f32.gmra.mxu1 %v2064_v27  ;;  %v750_v53 = vadd.f32 %v749_v51, %v721_v58  ;;  %v804_v4 = vpop.f32.mrf.mxu2 }
  0xef   : > { %1463 = vmatpush.msrb.mxu1 %v346_v25  ;;  %1232 = vmatpush.msra.mxu0 %v262_v49 }
  0xf0   : > { %1299 = vst [vmem:[%s1903_s20 + $0x90] sm:$0xff] %v750_v53  ;;  %v775_v48 = vpop.f32.mrf.mxu0 }
  0xf1   : > { %1464 = vmatpush.msrb.mxu1 %v332_v34  ;;  %1233 = vmatpush.msra.mxu0 %v248_v52  ;;  %v776_v56 = vadd.f32 %v775_v48, %v1885_v28 }
  0xf2   : > { %1131 = vmatmul.f32.gmra.mxu0 %v1495_v59  ;;  %1448 = vmatmul.msk.f32.gmra.mxu3 %vm455_vm0, %v2008_v54 }
  0xf3   : > { %1451 = vmatmul.msk.f32.vlgmr.msra.gmra.mxu2 %vm455_vm0, %v1980_v37  ;;  %1465 = vmatpush.msrb.mxu1 %v318_v35  ;;  %v805_v63 = vadd.f32 %v804_v4, %v776_v56 }
  0xf4   : > { %1234 = vmatpush.msra.mxu0 %v234_v55  ;;  %v726_v26 = vpop.f32.mrf.mxu1 }
  0xf5   : > { %1466 = vmatpush.msrb.mxu1 %v304_v39  ;;  %1285 = vst [vmem:[%s1903_s20 + $0x28] sm:$0xff] %v805_v63  ;;  %v752_v1 = vpop.f32.mrf.mxu3  ;;  %v727_v7 = vadd.f32 %v726_v26, %v1965_v21 }
  0xf6   : > { %1235 = vmatpush.msra.mxu0 %v220_v62  ;;  %1186 = vmatmul.f32.gmra.mxu1 %v2085_v42  ;;  %v753_v2 = vadd.f32 %v752_v1, %v724_v61  ;;  %v807_v3 = vpop.f32.mrf.mxu2 }
  0xf7   : > { %1467 = vmatpush.msrb.mxu1 %v290_v44 }
  0xf8   : > { %1236 = vmatpush.msra.mxu0 %v206_v0  ;;  %1313 = vst [vmem:[%s1903_s20 + $0x100] sm:$0xff] %v753_v2  ;;  %v778_v37 = vpop.f32.mrf.mxu0 }
  0xf9   : > { %1468 = vmatpush.msrb.mxu1 %v276_v12  ;;  %v779_v6 = vadd.f32 %v778_v37, %v1917_v46 }
  0xfa   : > { %1237 = vmatpush.msra.mxu0 %v192_v5  ;;  %1449 = vmatmul.msk.f32.gmra.mxu3 %vm455_vm0, %v2031_v9 }
  0xfb   : > { %1238 = vmatmul.f32.vlgmr.msra.gmra.mxu0 %v2038_v14  ;;  %1452 = vmatmul.msk.f32.gmra.mxu2 %vm455_vm0, %v2008_v54  ;;  %v808_v8 = vadd.f32 %v807_v3, %v779_v6 }
  0xfc   : > { %1469 = vmatpush.msrb.mxu1 %v262_v49  ;;  %v833_v10 = vpop.f32.mrf.mxu1 }
  0xfd   : > { %1300 = vst [vmem:[%s1903_s20 + $0x98] sm:$0xff] %v808_v8  ;;  %v834_v14 = vadd.f32 %v833_v10, %v1885_v28 }
  0xfe   : > { %1470 = vmatpush.msrb.mxu1 %v248_v52  ;;  %v755_v11 = vpop.f32.mrf.mxu3 }
  0xff   : > { %1189 = vmatmul.f32.gmra.mxu1 %v1495_v59  ;;  %v756_v13 = vadd.f32 %v755_v11, %v727_v7  ;;  %v810_v15 = vpop.f32.mrf.mxu2 }
 0x100   : > { %1471 = vmatpush.msrb.mxu1 %v234_v55 }
 0x101   : > { %1327 = vst [vmem:[%s1903_s20 + $0x170] sm:$0xff] %v756_v13  ;;  %v781_v16 = vpop.f32.mrf.mxu0 }
 0x102   : > { %1472 = vmatpush.msrb.mxu1 %v220_v62  ;;  %1450 = vmatmul.msk.f32.gmra.mxu3 %vm455_vm0, %v2057_v29  ;;  %v782_v54 = vadd.f32 %v781_v16, %v1937_v60 }
 0x103   : > { %1241 = vmatmul.f32.gmra.mxu0 %v2064_v27  ;;  %1453 = vmatmul.msk.f32.gmra.mxu2 %vm455_vm0, %v2031_v9 }
 0x104   : > { %1473 = vmatpush.msrb.mxu1 %v206_v0  ;;  %v811_v17 = vadd.f32 %v810_v15, %v782_v54 }
 0x105   : > { %v836_v18 = vpop.f32.mrf.mxu1 }
 0x106   : > { %1474 = vmatpush.msrb.mxu1 %v192_v5  ;;  %1314 = vst [vmem:[%s1903_s20 + $0x108] sm:$0xff] %v811_v17  ;;  %v862_v19 = vpop.f32.mrf.mxu3  ;;  %v837_v9 = vadd.f32 %v836_v18, %v1917_v46 }
 0x107   : > { %1247 = vmatmul.f32.vlgmr.msrb.gmra.mxu1 %v1495_v59  ;;  %v813_v20 = vpop.f32.mrf.mxu2  ;;  %v863_v22 = vadd.f32 %v862_v19, %v834_v14 }
 0x109   : > { %1286 = vst [vmem:[%s1903_s20 + $0x30] sm:$0xff] %v863_v22  ;;  %v784_v23 = vpop.f32.mrf.mxu0 }
 0x10a   : > { %v785_v41 = vadd.f32 %v784_v23, %v1965_v21 }
 0x10b   : > { %1244 = vmatmul.f32.gmra.mxu0 %v2085_v42  ;;  %1454 = vmatmul.msk.f32.gmra.mxu2 %vm455_vm0, %v2057_v29 }
 0x10c   : > { %v814_v24 = vadd.f32 %v813_v20, %v785_v41 }
 0x10e   : > { %1328 = vst [vmem:[%s1903_s20 + $0x178] sm:$0xff] %v814_v24  ;;  %v839_v25 = vpop.f32.mrf.mxu1 }
 0x10f   : > { %v865_v27 = vpop.f32.mrf.mxu3  ;;  %v840_v57 = vadd.f32 %v839_v25, %v1937_v60 }
 0x110   : > { %v866_v30 = vadd.f32 %v865_v27, %v837_v9  ;;  %v920_v32 = vpop.f32.mrf.mxu2 }
 0x112   : > { %1301 = vst [vmem:[%s1903_s20 + $0xa0] sm:$0xff] %v866_v30  ;;  %v891_v33 = vpop.f32.mrf.mxu0 }
 0x113   : > { %v892_v34 = vadd.f32 %v891_v33, %v1885_v28 }
 0x115   : > { %v921_v35 = vadd.f32 %v920_v32, %v892_v34 }
 0x116   : > { %v842_v36 = vpop.f32.mrf.mxu1 }
 0x117   : > { %1287 = vst [vmem:[%s1903_s20 + $0x38] sm:$0xff] %v921_v35  ;;  %v868_v29 = vpop.f32.mrf.mxu3  ;;  %v843_v43 = vadd.f32 %v842_v36, %v1965_v21 }
 0x118   : > { %v869_v38 = vadd.f32 %v868_v29, %v840_v57  ;;  %v923_v31 = vpop.f32.mrf.mxu2 }
 0x11a   : > { %1315 = vst [vmem:[%s1903_s20 + $0x110] sm:$0xff] %v869_v38  ;;  %v894_v39 = vpop.f32.mrf.mxu0 }
 0x11b   : > { %v895_v40 = vadd.f32 %v894_v39, %v1917_v46 }
 0x11d   : > { %v924_v44 = vadd.f32 %v923_v31, %v895_v40 }
 0x11e   : > { %v949_v45 = vpop.f32.mrf.mxu1 }
 0x11f   : > { %1302 = vst [vmem:[%s1903_s20 + $0xa8] sm:$0xff] %v924_v44  ;;  %v950_v50 = vadd.f32 %v949_v45, %v1885_v28 }
 0x120   : > { %v871_v42 = vpop.f32.mrf.mxu3 }
 0x121   : > { %v872_v58 = vadd.f32 %v871_v42, %v843_v43  ;;  %v926_v12 = vpop.f32.mrf.mxu2 }
 0x123   : > { %1329 = vst [vmem:[%s1903_s20 + $0x180] sm:$0xff] %v872_v58  ;;  %v897_v47 = vpop.f32.mrf.mxu0 }
 0x124   : > { %v898_v49 = vadd.f32 %v897_v47, %v1937_v60 }
 0x126   : > { %v927_v51 = vadd.f32 %v926_v12, %v898_v49 }
 0x127   : > { %v952_v52 = vpop.f32.mrf.mxu1 }
 0x128   : > { %1316 = vst [vmem:[%s1903_s20 + $0x118] sm:$0xff] %v927_v51  ;;  %v978_v53 = vpop.f32.mrf.mxu3  ;;  %v953_v59 = vadd.f32 %v952_v52, %v1917_v46 }
 0x129   : > { %v929_v4 = vpop.f32.mrf.mxu2  ;;  %v979_v48 = vadd.f32 %v978_v53, %v950_v50 }
 0x12b   : > { %1288 = vst [vmem:[%s1903_s20 + $0x40] sm:$0xff] %v979_v48  ;;  %v900_v55 = vpop.f32.mrf.mxu0 }
 0x12c   : > { %v901_v56 = vadd.f32 %v900_v55, %v1965_v21 }
 0x12e   : > { %v930_v61 = vadd.f32 %v929_v4, %v901_v56 }
 0x130   : > { %1330 = vst [vmem:[%s1903_s20 + $0x188] sm:$0xff] %v930_v61  ;;  %v955_v62 = vpop.f32.mrf.mxu1 }
 0x131   : > { %v981_v63 = vpop.f32.mrf.mxu3  ;;  %v956_v3 = vadd.f32 %v955_v62, %v1937_v60 }
 0x132   : > { %v982_v26 = vadd.f32 %v981_v63, %v953_v59  ;;  %v1036_v0 = vpop.f32.mrf.mxu2 }
 0x134   : > { %1303 = vst [vmem:[%s1903_s20 + $0xb0] sm:$0xff] %v982_v26  ;;  %v1007_v1 = vpop.f32.mrf.mxu0 }
 0x135   : > { %v1008_v2 = vadd.f32 %v1007_v1, %v1885_v28 }
 0x137   : > { %v1037_v5 = vadd.f32 %v1036_v0, %v1008_v2 }
 0x138   : > { %v958_v37 = vpop.f32.mrf.mxu1 }
 0x139   : > { %1289 = vst [vmem:[%s1903_s20 + $0x48] sm:$0xff] %v1037_v5  ;;  %v984_v6 = vpop.f32.mrf.mxu3  ;;  %v959_v13 = vadd.f32 %v958_v37, %v1965_v21 }
 0x13a   : > { %v985_v7 = vadd.f32 %v984_v6, %v956_v3  ;;  %v1039_v8 = vpop.f32.mrf.mxu2 }
 0x13c   : > { %1317 = vst [vmem:[%s1903_s20 + $0x120] sm:$0xff] %v985_v7  ;;  %v1010_v10 = vpop.f32.mrf.mxu0 }
 0x13d   : > { %v1011_v11 = vadd.f32 %v1010_v10, %v1917_v46 }
 0x13f   : > { %v1040_v15 = vadd.f32 %v1039_v8, %v1011_v11 }
 0x140   : > { %v1065_v16 = vpop.f32.mrf.mxu1 }
 0x141   : > { %1304 = vst [vmem:[%s1903_s20 + $0xb8] sm:$0xff] %v1040_v15  ;;  %v1066_v20 = vadd.f32 %v1065_v16, %v1885_v28 }
 0x142   : > { %v987_v54 = vpop.f32.mrf.mxu3 }
 0x143   : > { %v988_v14 = vadd.f32 %v987_v54, %v959_v13  ;;  %v1042_v17 = vpop.f32.mrf.mxu2 }
 0x145   : > { %1331 = vst [vmem:[%s1903_s20 + $0x190] sm:$0xff] %v988_v14  ;;  %v1013_v18 = vpop.f32.mrf.mxu0 }
 0x146   : > { %v1014_v19 = vadd.f32 %v1013_v18, %v1937_v60 }
 0x148   : > { %v1043_v22 = vadd.f32 %v1042_v17, %v1014_v19 }
 0x149   : > { %v1068_v23 = vpop.f32.mrf.mxu1 }
 0x14a   : > { %1318 = vst [vmem:[%s1903_s20 + $0x128] sm:$0xff] %v1043_v22  ;;  %v1094_v41 = vpop.f32.mrf.mxu3  ;;  %v1069_v30 = vadd.f32 %v1068_v23, %v1917_v46 }
 0x14b   : > { %v1045_v9 = vpop.f32.mrf.mxu2  ;;  %v1095_v24 = vadd.f32 %v1094_v41, %v1066_v20 }
 0x14d   : > { %1290 = vst [vmem:[%s1903_s20 + $0x50] sm:$0xff] %v1095_v24  ;;  %v1016_v25 = vpop.f32.mrf.mxu0 }
 0x14e   : > { %v1017_v27 = vadd.f32 %v1016_v25, %v1965_v21 }
 0x150   : > { %v1046_v32 = vadd.f32 %v1045_v9, %v1017_v27 }
 0x152   : > { %1332 = vst [vmem:[%s1903_s20 + $0x198] sm:$0xff] %v1046_v32  ;;  %v1071_v33 = vpop.f32.mrf.mxu1 }
 0x153   : > { %v1097_v34 = vpop.f32.mrf.mxu3  ;;  %v1072_v38 = vadd.f32 %v1071_v33, %v1937_v60 }
 0x154   : > { %v1098_v57 = vadd.f32 %v1097_v34, %v1069_v30  ;;  %v1152_v35 = vpop.f32.mrf.mxu2 }
 0x156   : > { %1305 = vst [vmem:[%s1903_s20 + $0xc0] sm:$0xff] %v1098_v57  ;;  %v1123_v36 = vpop.f32.mrf.mxu0 }
 0x157   : > { %v1124_v29 = vadd.f32 %v1123_v36, %v1885_v28 }
 0x159   : > { %v1153_v31 = vadd.f32 %v1152_v35, %v1124_v29 }
 0x15a   : > { %v1074_v39 = vpop.f32.mrf.mxu1 }
 0x15b   : > { %1291 = vst [vmem:[%s1903_s20 + $0x58] sm:$0xff] %v1153_v31  ;;  %v1100_v40 = vpop.f32.mrf.mxu3  ;;  %v1075_v58 = vadd.f32 %v1074_v39, %v1965_v21 }
 0x15c   : > { %v1101_v43 = vadd.f32 %v1100_v40, %v1072_v38  ;;  %v1155_v44 = vpop.f32.mrf.mxu2 }
 0x15e   : > { %1319 = vst [vmem:[%s1903_s20 + $0x130] sm:$0xff] %v1101_v43  ;;  %v1126_v45 = vpop.f32.mrf.mxu0 }
 0x15f   : > { %v1127_v42 = vadd.f32 %v1126_v45, %v1917_v46 }
 0x161   : > { %v1156_v12 = vadd.f32 %v1155_v44, %v1127_v42 }
 0x162   : > { %v1181_v47 = vpop.f32.mrf.mxu1 }
 0x163   : > { %1306 = vst [vmem:[%s1903_s20 + $0xc8] sm:$0xff] %v1156_v12  ;;  %v1182_v4 = vadd.f32 %v1181_v47, %v1885_v28 }
 0x164   : > { %v1103_v49 = vpop.f32.mrf.mxu3 }
 0x165   : > { %v1104_v50 = vadd.f32 %v1103_v49, %v1075_v58  ;;  %v1158_v51 = vpop.f32.mrf.mxu2 }
 0x167   : > { %1333 = vst [vmem:[%s1903_s20 + $0x1a0] sm:$0xff] %v1104_v50  ;;  %v1129_v52 = vpop.f32.mrf.mxu0 }
 0x168   : > { %v1130_v53 = vadd.f32 %v1129_v52, %v1937_v60 }
 0x16a   : > { %v1159_v48 = vadd.f32 %v1158_v51, %v1130_v53 }
 0x16b   : > { %v1184_v55 = vpop.f32.mrf.mxu1 }
 0x16c   : > { %1320 = vst [vmem:[%s1903_s20 + $0x138] sm:$0xff] %v1159_v48  ;;  %v1210_v56 = vpop.f32.mrf.mxu3  ;;  %v1185_v26 = vadd.f32 %v1184_v55, %v1917_v46 }
 0x16d   : > { %v1161_v59 = vpop.f32.mrf.mxu2  ;;  %v1211_v61 = vadd.f32 %v1210_v56, %v1182_v4 }
 0x16f   : > { %1292 = vst [vmem:[%s1903_s20 + $0x60] sm:$0xff] %v1211_v61  ;;  %v1132_v62 = vpop.f32.mrf.mxu0 }
 0x170   : > { %v1133_v63 = vadd.f32 %v1132_v62, %v1965_v21 }
 0x172   : > { %v1162_v0 = vadd.f32 %v1161_v59, %v1133_v63 }
 0x173   : > { %v1187_v2 = vpop.f32.mrf.mxu1 }
 0x174   : > { %1334 = vst [vmem:[%s1903_s20 + $0x1a8] sm:$0xff] %v1162_v0  ;;  %v1188_v7 = vadd.f32 %v1187_v2, %v1937_v60 }
 0x175   : > { %v1213_v1 = vpop.f32.mrf.mxu3 }
 0x176   : > { %v1214_v3 = vadd.f32 %v1213_v1, %v1185_v26  ;;  %v1268_v5 = vpop.f32.mrf.mxu2 }
 0x178   : > { %1307 = vst [vmem:[%s1903_s20 + $0xd0] sm:$0xff] %v1214_v3  ;;  %v1239_v37 = vpop.f32.mrf.mxu0 }
 0x179   : > { %v1240_v6 = vadd.f32 %v1239_v37, %v1885_v28 }
 0x17b   : > { %v1269_v8 = vadd.f32 %v1268_v5, %v1240_v6 }
 0x17c   : > { %v1190_v15 = vpop.f32.mrf.mxu1 }
 0x17d   : > { %1294 = vst.msk [vmem:[%s1903_s20 + $0x68] sm:$0xff] %vm1293_vm1, %v1269_v8  ;;  %v1216_v10 = vpop.f32.mrf.mxu3  ;;  %v1191_v14 = vadd.f32 %v1190_v15, %v1965_v21 }
 0x17e   : > { %v1217_v11 = vadd.f32 %v1216_v10, %v1188_v7  ;;  %v1271_v13 = vpop.f32.mrf.mxu2 }
 0x180   : > { %1321 = vst [vmem:[%s1903_s20 + $0x140] sm:$0xff] %v1217_v11  ;;  %v1242_v16 = vpop.f32.mrf.mxu0 }
 0x181   : > { %v1243_v54 = vadd.f32 %v1242_v16, %v1917_v46 }
 0x183   : > { %v1272_v28 = vadd.f32 %v1271_v13, %v1243_v54 }
 0x184   : > { %v1248_v23 = vpop.f32.mrf.mxu1 }
 0x185   : > { %1308 = vst.msk [vmem:[%s1903_s20 + $0xd8] sm:$0xff] %vm1293_vm1, %v1272_v28  ;;  %v1219_v17 = vpop.f32.mrf.mxu3  ;;  %v1249_v9 = vadd.f32 %v1248_v23, %v1965_v21 }
 0x186   : > { %v1220_v18 = vadd.f32 %v1219_v17, %v1191_v14  ;;  %v1274_v19 = vpop.f32.mrf.mxu2 }
 0x188   : > { %1335 = vst [vmem:[%s1903_s20 + $0x1b0] sm:$0xff] %v1220_v18  ;;  %v1245_v20 = vpop.f32.mrf.mxu0 }
 0x189   : > { %v1246_v22 = vadd.f32 %v1245_v20, %v1937_v60 }
 0x18b   : > { %v1275_v41 = vadd.f32 %v1274_v19, %v1246_v22 }
 0x18d   : > { %1322 = vst.msk [vmem:[%s1903_s20 + $0x148] sm:$0xff] %vm1293_vm1, %v1275_v41 }
 0x18e   : > { %v1277_v46 = vpop.f32.mrf.mxu2 }
 0x18f   : > { %v1278_v24 = vadd.f32 %v1277_v46, %v1249_v9 }
 0x191   : > { %1336 = vst.msk [vmem:[%s1903_s20 + $0x1b8] sm:$0xff] %vm1293_vm1, %v1278_v24 }
 0x192 PF: > { %s13_s12 = sadd.s32 1, %s1502_s12  }
 0x193   : > { %p10_p4 = scmp.ge.s32.totalorder %s13_s12, 4  }
 0x195   :  { %12 = sbr.rel (!%p10_p4) target bundleno = 1 (0x1), region = 62 }

// kernel: audio_encoder_forward.5
= control target key start
LH: loop header
LB: loop body
LE: loop exit
PB: predicated region body
PF: predicated region fallthrough
CT: control target
= control target key end

     0   :  { %8 = vsyncpa [#allocation3], 0  ;;  %s5698_s0 = inlined_call_operand.vmem [shape: f32[2,55680], index: 0, kind: input, shape index: {}]   ;;  %s5699_s1 = inlined_call_operand.hbm [shape: f32[55680,256], index: 1, kind: input, shape index: {}]   ;;  %s5700_s2 = inlined_call_operand.vmem [shape: f32[1,256], index: 2, kind: input, shape index: {}]   ;;  %s5701_s3 = inlined_call_operand.hbm [shape: f32[2,256], index: 3, kind: output, shape index: {}]  }
   0x1   :  { %10 = vsyncpa [#allocation3 + $0x1], 0 }
   0x2   :  { %11 = vsyncpa [#allocation4], 0 }
   0x3   :  { %13 = vsyncpa [#allocation4 + $0x1], 0  ;;  %s4059_s12 = smov 0   ;;  %s4061_s13 = smov 0  }
   0x4   :  { %s4063_s14 = smov 0   ;;  %s4065_s15 = smov 0  }
   0x5   :  { %s4067_s16 = smov 0   ;;  %s4069_s17 = smov 0  }
   0x6   :  { %s4071_s18 = smov 0   ;;  %s4073_s19 = smov 0  }
   0x7   :  { %s4075_s20 = smov 0   ;;  %s4077_s21 = smov 0  }
   0x8   :  { %s4079_s22 = smov 0  }
   0x9 LB: > { %5706 = sst [smem:[#allocation8_spill]] %s4001_s14  ;;  %s3756_s23 = sadd.s32 4294967295, %s4033_s22   ;;  %s4033_s22 = sphi %s4079_s22, %s19_s22   ;;  %s4029_s21 = sphi %s4077_s21, %s5729_s21   ;;  %s4025_s20 = sphi %s4075_s20, %s5728_s20   ;;  %s4021_s19 = sphi %s4073_s19, %s5727_s19   ;;  %s4017_s18 = sphi %s4071_s18, %s5726_s18   ;;  %s4013_s17 = sphi %s4069_s17, %s5719_s17   ;;  %s4009_s16 = sphi %s4067_s16, %s5725_s16   ;;  %s4005_s15 = sphi %s4065_s15, %s5724_s15   ;;  %s4001_s14 = sphi %s4063_s14, %s5717_s14   ;;  %s3997_s13 = sphi %s4061_s13, %s5723_s13   ;;  %s3993_s12 = sphi %s4059_s12, %s5722_s12  }
   0xa   : > { %5707 = sst [smem:[#allocation9_spill]] %s4013_s17  ;;  %s3757_s24 = sadd.s32 4294967294, %s4033_s22  }
   0xb   : > { %s28_s25 = sadd.s32 1, %s4025_s20  ;;  %s31_s26 = sadd.s32 1, %s4029_s21 }
   0xc   : > { %p29_p0 = scmp.ge.s32.totalorder %s28_s25, 5  ;;  %s66_s27 = sadd.s32 1, %s4013_s17 }
   0xd   : > { %p73_p1 = scmp.ne.s32.totalorder %s4013_s17, %s4009_s16  ;;  %p74_p2 = scmp.eq.s32.totalorder %s4033_s22, 0 }
   0xe   : > { %s5731_s25 = smov (%p29_p0, %s28_s25), 0  ;;  %s5733_s26 = smov (!%p29_p0, %s31_s26), %s4029_s21 }
   0xf   : > { %5708 = sst [smem:[#allocation10_spill]] %s5731_s25  ;;  %s61_s28 = ssub.s32 %s4025_s20, %s5731_s25 }
  0x10   : > { %p4125_p3 = por %p74_p2, %p73_p1  ;;  %p33_p4 = scmp.ge.s32.totalorder %s5733_s26, 2 }
  0x11   : > { %p79_p5 = scmp.ne.s32.totalorder %s4009_s16, %s4005_s15  ;;  %p80_p6 = scmp.eq.s32.totalorder %s3756_s23, 0 }
  0x12   : > { %s118_s30 = sadd.s32 1, %s4001_s14  ;;  %s5735_s26 = smov (%p33_p4, %s5733_s26), 0 }
  0x13   : > { %5710 = sst [smem:[#allocation11_spill]] %s5735_s26  ;;  %p4133_p7 = por %p80_p6, %p79_p5 }
  0x14   : > { %p128_p8 = scmp.ne.s32.totalorder %s4001_s14, %s3997_s13  ;;  %s62_s5 = ssub.s32 %s4029_s21, %s5735_s26 }
  0x15   : > { %p129_p9 = scmp.eq.s32.totalorder %s3756_s23, 9  ;;  %s63_s6 = sor.u32 %s62_s5, %s61_s28 }
  0x16   : > { %p116_p10 = scmp.eq.s32.totalorder %s62_s5, 0  ;;  %p64_p11 = scmp.eq.s32.totalorder %s63_s6, 0 }
  0x17   : > { %p4141_p12 = por %p129_p9, %p128_p8  ;;  %p134_p13 = scmp.ne.s32.totalorder %s3997_s13, %s3993_s12 }
  0x18   : > { %s4146_s8 = scalar_select %p116_p10, %s4001_s14, %s118_s30  }
  0x19   : > { %s4149_s9 = scalar_select %p64_p11, %s4013_s17, %s66_s27  }
  0x1a   : > { %5713 = sst [smem:[#allocation12_spill]] %s4146_s8  ;;  %p135_p0 = scmp.eq.s32.totalorder %s3757_s24, 9 }
  0x1b   : > { %5714 = sst [smem:[#allocation13_spill]] %s4149_s9  ;;  %p3786_p1 = scmp.lt.s32.totalorder %s4033_s22, 10 }
  0x1c   : > { %p4154_p2 = por %p135_p0, %p134_p13  ;;  %s164_s11 = sand.u32 1, %s4013_s17  }
  0x1d   : > { %s3772_s15 = smul.u32 11136, %s164_s11  ;;  %p3779_p4 = pnand %p3786_p1, %p4125_p3 }
  0x1e   : > { %s3771_s23 = smul.u32 2784, %s4025_s20  ;;  %s165_s9 = scalar_lea.sflag [#allocation3], %s164_s11 }
  0x1f   : > { %s168_s5 = scalar_lea.vmem [#allocation2], %s3772_s15  ;;  %s4035_s8 = smov 256  }
  0x20   : > { %s173_s28 = sadd.s32 %s4029_s21, %s3771_s23  ;;  %s178_s30 = sshll.u32 %s168_s5, 4  ;;  %s179_s30 = int_to_ptr.vmem [resolvable:$true] %s178_s30 }
  0x21   : > { %s3761_s6 = sshll.u32 %s173_s28, 3  ;;  %s4036_s17 = smov 128  }
  0x22   : > { %s175_s24 = scalar_lea.hbm %s5699_s1, %s3761_s6  ;;  %s4037_s14 = smov 8  }
  0x23   : > { %s176_s25 = sshll.u32 %s175_s24, 4  ;;  %p3762_p5 = scmp.ge.s32.totalorder %s4033_s22, 1  ;;  %s177_s25 = int_to_ptr.hbm [resolvable:$true] %s176_s25 }
  0x24   : > { %3781 = dma.hbm_to_vmem [thread:$0]  (!%p3779_p4), %s177_s25, 178176, %s179_s30, %s165_s9, %s4035_s8, %s4036_s17, %s4037_s14  }
  0x25   : > { %p192_p6 = scmp.lt.s32.totalorder %s4033_s22, 11 }
  0x27   : > { %p193_p8 = pnand %p3762_p5, %p192_p6 }
  0x28   : > { %s198_s29 = sand.u32 (!%p193_p8), 1, %s4009_s16  }
  0x29   : > { %196 = sbr.rel (%p193_p8) target bundleno = 969 (0x3c9), region = 32  ;;  %s199_s23 = scalar_lea.sflag (!%p193_p8), [#allocation3], %s198_s29 }
  0x2a   : > { %s3773_s15 = smul.u32 (!%p193_p8), 11136, %s198_s29 }
  0x2c   : > { %s4169_s28 = scalar_lea.vmem (!%p193_p8), [#allocation2], %s3773_s15 }
  0x2e   : > { %3984 = dma.done.wait (%p4133_p7), %s199_s23, 178176  }
  0x2f   : > { %3986 = vsyncadd (%p4133_p7), %s199_s23, 4294789120  ;;  %s231_s14 = sand.u32 1, %s3997_s13   ;;  %s234_s17 = smul.u32 87, %s4017_s18 }
  0x30   : > { %s3763_s25 = sshll.u32 %s231_s14, 1  ;;  %p241_p3 = scmp.lt.s32.totalorder %s4021_s19, 1 }
  0x31   : > { %p235_p9 = scmp.lt.s32.totalorder %s234_s17, 434  ;;  %s4192_s27 = scalar_lea.vmem [#allocation5], %s3763_s25 }
  0x32   : > { %s4181_s26 = scalar_select %p241_p3, %s4021_s19, 1 }
  0x33   : > { %s5737_s17 = smov (!%p235_p9, %s234_s17), 434  ;;  %p3765_p7 = scmp.ne.s32.totalorder %s4017_s18, 0 }
  0x34   : > { %s243_s4 = scalar_lea.vmem %s5700_s2, %s4181_s26  ;;  %s3764_s11 = sshll.u32 %s5737_s17, 1 }
  0x35   : > { %s4190_s6 = scalar_lea.vmem %s5698_s0, %s3764_s11  ;;  %247 = sbr.rel (%p3765_p7) target bundleno = 60 (0x3c), region = 40 }
  0x3a   : > { %v4038_v0 = vmov 0.0  }
  0x3b   : > { %248 = vst [vmem:[%s4192_s27] sm:$0x3] %v4038_v0 }
  0x3c PF: > { %v287_v1 = vld [vmem:[%s4169_s28 + $0x78] sm:$0xff]  ;;  %v286_v3 = vld [vmem:[%s4169_s28 + $0x70] sm:$0xff]  ;;  %v285_v7 = vld [vmem:[%s4169_s28 + $0x68] sm:$0xff]  ;;  %p3766_p10 = scmp.ne.s32.totalorder %s4017_s18, 4 }
  0x3d   : > { %v319_v2 = vld [vmem:[%s4169_s28 + $0x178] sm:$0xff]  ;;  %1883 = vmatpush.msra.mxu0 %v287_v1  ;;  %v318_v5 = vld [vmem:[%s4169_s28 + $0x170] sm:$0xff]  ;;  %v317_v9 = vld [vmem:[%s4169_s28 + $0x168] sm:$0xff] }
  0x3e   : > { %1923 = vmatpush.msra.mxu2 %v319_v2  ;;  %v303_v4 = vld [vmem:[%s4169_s28 + $0xf8] sm:$0xff]  ;;  %v302_v8 = vld [vmem:[%s4169_s28 + $0xf0] sm:$0xff]  ;;  %v301_v11 = vld [vmem:[%s4169_s28 + $0xe8] sm:$0xff] }
  0x3f   : > { %v335_v6 = vld [vmem:[%s4169_s28 + $0x1f8] sm:$0xff]  ;;  %1903 = vmatpush.msra.mxu1 %v303_v4  ;;  %1884 = vmatpush.msra.mxu0 %v286_v3  ;;  %v334_v10 = vld [vmem:[%s4169_s28 + $0x1f0] sm:$0xff]  ;;  %v284_v12 = vld [vmem:[%s4169_s28 + $0x60] sm:$0xff] }
  0x40   : > { %1943 = vmatpush.msra.mxu3 %v335_v6  ;;  %1924 = vmatpush.msra.mxu2 %v318_v5  ;;  %v316_v13 = vld [vmem:[%s4169_s28 + $0x160] sm:$0xff]  ;;  %v333_v14 = vld [vmem:[%s4169_s28 + $0x1e8] sm:$0xff]  ;;  %v283_v17 = vld [vmem:[%s4169_s28 + $0x58] sm:$0xff] }
  0x41   : > { %1904 = vmatpush.msra.mxu1 %v302_v8  ;;  %1885 = vmatpush.msra.mxu0 %v285_v7  ;;  %v300_v15 = vld [vmem:[%s4169_s28 + $0xe0] sm:$0xff]  ;;  %v315_v18 = vld [vmem:[%s4169_s28 + $0x158] sm:$0xff]  ;;  %v282_v21 = vld [vmem:[%s4169_s28 + $0x50] sm:$0xff] }
  0x42   : > { %1944 = vmatpush.msra.mxu3 %v334_v10  ;;  %1925 = vmatpush.msra.mxu2 %v317_v9  ;;  %v332_v16 = vld [vmem:[%s4169_s28 + $0x1e0] sm:$0xff]  ;;  %v299_v19 = vld [vmem:[%s4169_s28 + $0xd8] sm:$0xff]  ;;  %v314_v22 = vld [vmem:[%s4169_s28 + $0x150] sm:$0xff] }
  0x43   : > { %1905 = vmatpush.msra.mxu1 %v301_v11  ;;  %1886 = vmatpush.msra.mxu0 %v284_v12  ;;  %v331_v20 = vld [vmem:[%s4169_s28 + $0x1d8] sm:$0xff]  ;;  %v298_v23 = vld [vmem:[%s4169_s28 + $0xd0] sm:$0xff]  ;;  %v281_v25 = vld [vmem:[%s4169_s28 + $0x48] sm:$0xff] }
  0x44   : > { %1945 = vmatpush.msra.mxu3 %v333_v14  ;;  %1926 = vmatpush.msra.mxu2 %v316_v13  ;;  %v330_v24 = vld [vmem:[%s4169_s28 + $0x1d0] sm:$0xff]  ;;  %v313_v26 = vld [vmem:[%s4169_s28 + $0x148] sm:$0xff]  ;;  %v280_v29 = vld [vmem:[%s4169_s28 + $0x40] sm:$0xff] }
  0x45   : > { %1906 = vmatpush.msra.mxu1 %v300_v15  ;;  %1887 = vmatpush.msra.mxu0 %v283_v17  ;;  %v297_v27 = vld [vmem:[%s4169_s28 + $0xc8] sm:$0xff]  ;;  %v312_v30 = vld [vmem:[%s4169_s28 + $0x140] sm:$0xff]  ;;  %v279_v33 = vld [vmem:[%s4169_s28 + $0x38] sm:$0xff] }
  0x46   : > { %1946 = vmatpush.msra.mxu3 %v332_v16  ;;  %1927 = vmatpush.msra.mxu2 %v315_v18  ;;  %v329_v28 = vld [vmem:[%s4169_s28 + $0x1c8] sm:$0xff]  ;;  %v296_v31 = vld [vmem:[%s4169_s28 + $0xc0] sm:$0xff]  ;;  %v311_v34 = vld [vmem:[%s4169_s28 + $0x138] sm:$0xff] }
  0x47   : > { %1907 = vmatpush.msra.mxu1 %v299_v19  ;;  %1888 = vmatpush.msra.mxu0 %v282_v21  ;;  %v328_v32 = vld [vmem:[%s4169_s28 + $0x1c0] sm:$0xff]  ;;  %v295_v35 = vld [vmem:[%s4169_s28 + $0xb8] sm:$0xff]  ;;  %v278_v37 = vld [vmem:[%s4169_s28 + $0x30] sm:$0xff] }
  0x48   : > { %1947 = vmatpush.msra.mxu3 %v331_v20  ;;  %1928 = vmatpush.msra.mxu2 %v314_v22  ;;  %v327_v36 = vld [vmem:[%s4169_s28 + $0x1b8] sm:$0xff]  ;;  %v310_v38 = vld [vmem:[%s4169_s28 + $0x130] sm:$0xff]  ;;  %v277_v41 = vld [vmem:[%s4169_s28 + $0x28] sm:$0xff] }
  0x49   : > { %1908 = vmatpush.msra.mxu1 %v298_v23  ;;  %1889 = vmatpush.msra.mxu0 %v281_v25  ;;  %v294_v39 = vld [vmem:[%s4169_s28 + $0xb0] sm:$0xff]  ;;  %v309_v42 = vld [vmem:[%s4169_s28 + $0x128] sm:$0xff]  ;;  %v276_v45 = vld [vmem:[%s4169_s28 + $0x20] sm:$0xff] }
  0x4a   : > { %1948 = vmatpush.msra.mxu3 %v330_v24  ;;  %1929 = vmatpush.msra.mxu2 %v313_v26  ;;  %v326_v40 = vld [vmem:[%s4169_s28 + $0x1b0] sm:$0xff]  ;;  %v293_v43 = vld [vmem:[%s4169_s28 + $0xa8] sm:$0xff]  ;;  %v308_v46 = vld [vmem:[%s4169_s28 + $0x120] sm:$0xff] }
  0x4b   : > { %1909 = vmatpush.msra.mxu1 %v297_v27  ;;  %1890 = vmatpush.msra.mxu0 %v280_v29  ;;  %v325_v44 = vld [vmem:[%s4169_s28 + $0x1a8] sm:$0xff]  ;;  %v292_v47 = vld [vmem:[%s4169_s28 + $0xa0] sm:$0xff]  ;;  %v275_v49 = vld [vmem:[%s4169_s28 + $0x18] sm:$0xff] }
  0x4c   : > { %1949 = vmatpush.msra.mxu3 %v329_v28  ;;  %1930 = vmatpush.msra.mxu2 %v312_v30  ;;  %v324_v48 = vld [vmem:[%s4169_s28 + $0x1a0] sm:$0xff]  ;;  %v307_v50 = vld [vmem:[%s4169_s28 + $0x118] sm:$0xff]  ;;  %v274_v53 = vld [vmem:[%s4169_s28 + $0x10] sm:$0xff] }
  0x4d   : > { %1910 = vmatpush.msra.mxu1 %v296_v31  ;;  %1891 = vmatpush.msra.mxu0 %v279_v33  ;;  %v291_v51 = vld [vmem:[%s4169_s28 + $0x98] sm:$0xff]  ;;  %v306_v54 = vld [vmem:[%s4169_s28 + $0x110] sm:$0xff]  ;;  %v273_v57 = vld [vmem:[%s4169_s28 + $0x8] sm:$0xff] }
  0x4e   : > { %1950 = vmatpush.msra.mxu3 %v328_v32  ;;  %1931 = vmatpush.msra.mxu2 %v311_v34  ;;  %v323_v52 = vld [vmem:[%s4169_s28 + $0x198] sm:$0xff]  ;;  %v290_v55 = vld [vmem:[%s4169_s28 + $0x90] sm:$0xff]  ;;  %v305_v58 = vld [vmem:[%s4169_s28 + $0x108] sm:$0xff] }
  0x4f   : > { %1911 = vmatpush.msra.mxu1 %v295_v35  ;;  %1892 = vmatpush.msra.mxu0 %v278_v37  ;;  %v322_v56 = vld [vmem:[%s4169_s28 + $0x190] sm:$0xff]  ;;  %v289_v59 = vld [vmem:[%s4169_s28 + $0x88] sm:$0xff]  ;;  %v272_v61 = vld [vmem:[%s4169_s28] sm:$0xff] }
  0x50   : > { %1951 = vmatpush.msra.mxu3 %v327_v36  ;;  %1932 = vmatpush.msra.mxu2 %v310_v38  ;;  %v321_v60 = vld [vmem:[%s4169_s28 + $0x188] sm:$0xff]  ;;  %v304_v62 = vld [vmem:[%s4169_s28 + $0x100] sm:$0xff]  ;;  %v351_v63 = vld [vmem:[%s4169_s28 + $0x278] sm:$0xff] }
  0x51   : > { %1912 = vmatpush.msra.mxu1 %v294_v39  ;;  %1893 = vmatpush.msra.mxu0 %v277_v41  ;;  %v383_v0 = vld [vmem:[%s4169_s28 + $0x378] sm:$0xff]  ;;  %v288_v1 = vld [vmem:[%s4169_s28 + $0x80] sm:$0xff]  ;;  %v350_v3 = vld [vmem:[%s4169_s28 + $0x270] sm:$0xff] }
  0x52   : > { %1952 = vmatpush.msra.mxu3 %v326_v40  ;;  %1933 = vmatpush.msra.mxu2 %v309_v42  ;;  %v320_v2 = vld [vmem:[%s4169_s28 + $0x180] sm:$0xff]  ;;  %v367_v4 = vld [vmem:[%s4169_s28 + $0x2f8] sm:$0xff]  ;;  %v382_v5 = vld [vmem:[%s4169_s28 + $0x370] sm:$0xff] }
  0x53   : > { %1913 = vmatpush.msra.mxu1 %v293_v43  ;;  %1894 = vmatpush.msra.mxu0 %v276_v45  ;;  %v399_v6 = vld [vmem:[%s4169_s28 + $0x3f8] sm:$0xff]  ;;  %v349_v7 = vld [vmem:[%s4169_s28 + $0x268] sm:$0xff]  ;;  %v366_v8 = vld [vmem:[%s4169_s28 + $0x2f0] sm:$0xff] }
  0x54   : > { %1953 = vmatpush.msra.mxu3 %v325_v44  ;;  %1934 = vmatpush.msra.mxu2 %v308_v46  ;;  %v381_v9 = vld [vmem:[%s4169_s28 + $0x368] sm:$0xff]  ;;  %v398_v10 = vld [vmem:[%s4169_s28 + $0x3f0] sm:$0xff]  ;;  %v348_v11 = vld [vmem:[%s4169_s28 + $0x260] sm:$0xff] }
  0x55   : > { %1914 = vmatpush.msra.mxu1 %v292_v47  ;;  %1895 = vmatpush.msra.mxu0 %v275_v49  ;;  %v365_v12 = vld [vmem:[%s4169_s28 + $0x2e8] sm:$0xff]  ;;  %v380_v13 = vld [vmem:[%s4169_s28 + $0x360] sm:$0xff]  ;;  %v347_v15 = vld [vmem:[%s4169_s28 + $0x258] sm:$0xff] }
  0x56   : > { %1954 = vmatpush.msra.mxu3 %v324_v48  ;;  %1935 = vmatpush.msra.mxu2 %v307_v50  ;;  %v397_v14 = vld [vmem:[%s4169_s28 + $0x3e8] sm:$0xff]  ;;  %v364_v16 = vld [vmem:[%s4169_s28 + $0x2e0] sm:$0xff]  ;;  %v379_v17 = vld [vmem:[%s4169_s28 + $0x358] sm:$0xff] }
  0x57   : > { %1915 = vmatpush.msra.mxu1 %v291_v51  ;;  %1896 = vmatpush.msra.mxu0 %v274_v53  ;;  %v396_v18 = vld [vmem:[%s4169_s28 + $0x3e0] sm:$0xff]  ;;  %v346_v19 = vld [vmem:[%s4169_s28 + $0x250] sm:$0xff]  ;;  %v363_v20 = vld [vmem:[%s4169_s28 + $0x2d8] sm:$0xff] }
  0x58   : > { %1955 = vmatpush.msra.mxu3 %v323_v52  ;;  %1936 = vmatpush.msra.mxu2 %v306_v54  ;;  %v378_v21 = vld [vmem:[%s4169_s28 + $0x350] sm:$0xff]  ;;  %v395_v22 = vld [vmem:[%s4169_s28 + $0x3d8] sm:$0xff]  ;;  %v345_v24 = vld [vmem:[%s4169_s28 + $0x248] sm:$0xff] }
  0x59   : > { %1916 = vmatpush.msra.mxu1 %v290_v55  ;;  %1897 = vmatpush.msra.mxu0 %v273_v57  ;;  %v250_v23 = vld [vmem:[%s4190_s6] sm:$0xff]  ;;  %v362_v25 = vld [vmem:[%s4169_s28 + $0x2d0] sm:$0xff]  ;;  %v377_v26 = vld [vmem:[%s4169_s28 + $0x348] sm:$0xff] }
  0x5a   : > { %1956 = vmatpush.msra.mxu3 %v322_v56  ;;  %1937 = vmatpush.msra.mxu2 %v305_v58  ;;  %1686 = vst [vmem:[#allocation1] ss:$4 sm:$0xff] %v250_v23  ;;  %v394_v27 = vld [vmem:[%s4169_s28 + $0x3d0] sm:$0xff]  ;;  %v344_v28 = vld [vmem:[%s4169_s28 + $0x240] sm:$0xff]  ;;  %v361_v29 = vld [vmem:[%s4169_s28 + $0x2c8] sm:$0xff] }
  0x5b   : > { %1917 = vmatpush.msra.mxu1 %v289_v59  ;;  %1898 = vmatpush.msra.mxu0 %v272_v61  ;;  %v376_v30 = vld [vmem:[%s4169_s28 + $0x340] sm:$0xff]  ;;  %v393_v31 = vld [vmem:[%s4169_s28 + $0x3c8] sm:$0xff]  ;;  %v343_v32 = vld [vmem:[%s4169_s28 + $0x238] sm:$0xff] }
  0x5c   : > { %1957 = vmatpush.msra.mxu3 %v321_v60  ;;  %1938 = vmatpush.msra.mxu2 %v304_v62  ;;  %v360_v33 = vld [vmem:[%s4169_s28 + $0x2c0] sm:$0xff]  ;;  %v375_v34 = vld [vmem:[%s4169_s28 + $0x338] sm:$0xff]  ;;  %v342_v37 = vld [vmem:[%s4169_s28 + $0x230] sm:$0xff] }
  0x5d   : > { %1963 = vmatpush.msrb.mxu0 %v351_v63  ;;  %1918 = vmatpush.msra.mxu1 %v288_v1  ;;  %v392_v35 = vld [vmem:[%s4169_s28 + $0x3c0] sm:$0xff]  ;;  %v359_v38 = vld [vmem:[%s4169_s28 + $0x2b8] sm:$0xff]  ;;  %v374_v39 = vld [vmem:[%s4169_s28 + $0x330] sm:$0xff] }
  0x5e   : > { %2003 = vmatpush.msrb.mxu2 %v383_v0  ;;  %1958 = vmatpush.msra.mxu3 %v320_v2  ;;  %v251_v36 = vld [vmem:[%s4190_s6 + $0x8] sm:$0xff]  ;;  %v391_v40 = vld [vmem:[%s4169_s28 + $0x3b8] sm:$0xff]  ;;  %v341_v41 = vld [vmem:[%s4169_s28 + $0x228] sm:$0xff] }
  0x5f   : > { %1964 = vmatpush.msrb.mxu0 %v350_v3  ;;  %1983 = vmatpush.msrb.mxu1 %v367_v4  ;;  %1688 = vst [vmem:[#allocation1 + $0x20] ss:$4 sm:$0xff] %v251_v36  ;;  %v358_v42 = vld [vmem:[%s4169_s28 + $0x2b0] sm:$0xff]  ;;  %v373_v43 = vld [vmem:[%s4169_s28 + $0x328] sm:$0xff]  ;;  %v340_v45 = vld [vmem:[%s4169_s28 + $0x220] sm:$0xff] }
  0x60   : > { %2004 = vmatpush.msrb.mxu2 %v382_v5  ;;  %2023 = vmatpush.msrb.mxu3 %v399_v6  ;;  %v390_v44 = vld [vmem:[%s4169_s28 + $0x3b0] sm:$0xff]  ;;  %v357_v46 = vld [vmem:[%s4169_s28 + $0x2a8] sm:$0xff]  ;;  %v372_v47 = vld [vmem:[%s4169_s28 + $0x320] sm:$0xff] }
  0x61   : > { %1965 = vmatpush.msrb.mxu0 %v349_v7  ;;  %1984 = vmatpush.msrb.mxu1 %v366_v8  ;;  %v389_v48 = vld [vmem:[%s4169_s28 + $0x3a8] sm:$0xff]  ;;  %v339_v49 = vld [vmem:[%s4169_s28 + $0x218] sm:$0xff]  ;;  %v356_v50 = vld [vmem:[%s4169_s28 + $0x2a0] sm:$0xff] }
  0x62   : > { %2005 = vmatpush.msrb.mxu2 %v381_v9  ;;  %2024 = vmatpush.msrb.mxu3 %v398_v10  ;;  %v371_v51 = vld [vmem:[%s4169_s28 + $0x318] sm:$0xff]  ;;  %v388_v52 = vld [vmem:[%s4169_s28 + $0x3a0] sm:$0xff]  ;;  %v338_v53 = vld [vmem:[%s4169_s28 + $0x210] sm:$0xff] }
  0x63   : > { %1966 = vmatpush.msrb.mxu0 %v348_v11  ;;  %1985 = vmatpush.msrb.mxu1 %v365_v12  ;;  %v355_v54 = vld [vmem:[%s4169_s28 + $0x298] sm:$0xff]  ;;  %v370_v55 = vld [vmem:[%s4169_s28 + $0x310] sm:$0xff]  ;;  %v337_v57 = vld [vmem:[%s4169_s28 + $0x208] sm:$0xff] }
  0x64   : > { %2006 = vmatpush.msrb.mxu2 %v380_v13  ;;  %2025 = vmatpush.msrb.mxu3 %v397_v14  ;;  %v387_v56 = vld [vmem:[%s4169_s28 + $0x398] sm:$0xff]  ;;  %v354_v58 = vld [vmem:[%s4169_s28 + $0x290] sm:$0xff]  ;;  %v369_v59 = vld [vmem:[%s4169_s28 + $0x308] sm:$0xff] }
  0x65   : > { %1967 = vmatpush.msrb.mxu0 %v347_v15  ;;  %1986 = vmatpush.msrb.mxu1 %v364_v16  ;;  %v386_v60 = vld [vmem:[%s4169_s28 + $0x390] sm:$0xff]  ;;  %v1691_v61 = vld.sshfl [vmem:[#allocation1 + $0x10] sm:$0xff pattern:$0x73625140]  ;;  %v336_v62 = vld [vmem:[%s4169_s28 + $0x200] sm:$0xff] }
  0x66   : > { %2007 = vmatpush.msrb.mxu2 %v379_v17  ;;  %2026 = vmatpush.msrb.mxu3 %v396_v18  ;;  %v353_v63 = vld [vmem:[%s4169_s28 + $0x288] sm:$0xff]  ;;  %v368_v0 = vld [vmem:[%s4169_s28 + $0x300] sm:$0xff]  ;;  %v1689_v2 = vld.sshfl [vmem:[#allocation1] sm:$0xff pattern:$0x73625140] }
  0x67   : > { %1968 = vmatpush.msrb.mxu0 %v346_v19  ;;  %1987 = vmatpush.msrb.mxu1 %v363_v20  ;;  %v385_v1 = vld [vmem:[%s4169_s28 + $0x388] sm:$0xff]  ;;  %v1692_v3 = vld.sshfl [vmem:[#allocation1 + $0x18] sm:$0xff pattern:$0x73625140]  ;;  %v415_v4 = vld [vmem:[%s4169_s28 + $0x478] sm:$0xff] }
  0x68   : > { %2008 = vmatpush.msrb.mxu2 %v378_v21  ;;  %2027 = vmatpush.msrb.mxu3 %v395_v22  ;;  %v447_v5 = vld [vmem:[%s4169_s28 + $0x578] sm:$0xff]  ;;  %v352_v6 = vld [vmem:[%s4169_s28 + $0x280] sm:$0xff]  ;;  %v414_v9 = vld [vmem:[%s4169_s28 + $0x470] sm:$0xff] }
  0x69   : > { %1969 = vmatpush.msrb.mxu0 %v345_v24  ;;  %1988 = vmatpush.msrb.mxu1 %v362_v25  ;;  %v384_v7 = vld [vmem:[%s4169_s28 + $0x380] sm:$0xff]  ;;  %v431_v10 = vld [vmem:[%s4169_s28 + $0x4f8] sm:$0xff]  ;;  %v446_v11 = vld [vmem:[%s4169_s28 + $0x570] sm:$0xff] }
  0x6a   : > { %2009 = vmatpush.msrb.mxu2 %v377_v26  ;;  %2028 = vmatpush.msrb.mxu3 %v394_v27  ;;  %v1690_v8 = vld.sshfl [vmem:[#allocation1 + $0x8] sm:$0xff pattern:$0x73625140]  ;;  %v463_v12 = vld [vmem:[%s4169_s28 + $0x5f8] sm:$0xff]  ;;  %v413_v13 = vld [vmem:[%s4169_s28 + $0x468] sm:$0xff] }
  0x6b   : > { %1970 = vmatpush.msrb.mxu0 %v344_v28  ;;  %1989 = vmatpush.msrb.mxu1 %v361_v29  ;;  %v430_v14 = vld [vmem:[%s4169_s28 + $0x4f0] sm:$0xff]  ;;  %v445_v15 = vld [vmem:[%s4169_s28 + $0x568] sm:$0xff]  ;;  %v412_v19 = vld [vmem:[%s4169_s28 + $0x460] sm:$0xff] }
  0x6c   : > { %2010 = vmatpush.msrb.mxu2 %v376_v30  ;;  %2029 = vmatpush.msrb.mxu3 %v393_v31  ;;  %v462_v16 = vld [vmem:[%s4169_s28 + $0x5f0] sm:$0xff]  ;;  %v252_v17 = vld [vmem:[%s4190_s6 + $0x10] sm:$0xff]  ;;  %v444_v21 = vld [vmem:[%s4169_s28 + $0x560] sm:$0xff] }
  0x6d   : > { %1971 = vmatpush.msrb.mxu0 %v343_v32  ;;  %1990 = vmatpush.msrb.mxu1 %v360_v33  ;;  %v1695_v18 = vld.sshfl [vmem:[#allocation1 + $0x30] sm:$0xff pattern:$0x73625140]  ;;  %1697 = vst [vmem:[#allocation1] ss:$4 sm:$0xff] %v252_v17  ;;  %v411_v24 = vld [vmem:[%s4169_s28 + $0x458] sm:$0xff] }
  0x6e   : > { %2011 = vmatpush.msrb.mxu2 %v375_v34  ;;  %2030 = vmatpush.msrb.mxu3 %v392_v35  ;;  %v429_v20 = vld [vmem:[%s4169_s28 + $0x4e8] sm:$0xff]  ;;  %v1693_v23 = vld.sshfl [vmem:[#allocation1 + $0x20] sm:$0xff pattern:$0x73625140]  ;;  %v428_v26 = vld [vmem:[%s4169_s28 + $0x4e0] sm:$0xff] }
  0x6f   : > { %1972 = vmatpush.msrb.mxu0 %v342_v37  ;;  %1991 = vmatpush.msrb.mxu1 %v359_v38  ;;  %v461_v22 = vld [vmem:[%s4169_s28 + $0x5e8] sm:$0xff]  ;;  %v1696_v25 = vld.sshfl [vmem:[#allocation1 + $0x38] sm:$0xff pattern:$0x73625140]  ;;  %v443_v27 = vld [vmem:[%s4169_s28 + $0x558] sm:$0xff] }
  0x70   : > { %2012 = vmatpush.msrb.mxu2 %v374_v39  ;;  %2031 = vmatpush.msrb.mxu3 %v391_v40  ;;  %v460_v28 = vld [vmem:[%s4169_s28 + $0x5e0] sm:$0xff]  ;;  %v410_v29 = vld [vmem:[%s4169_s28 + $0x450] sm:$0xff]  ;;  %v427_v30 = vld [vmem:[%s4169_s28 + $0x4d8] sm:$0xff] }
  0x71   : > { %1973 = vmatpush.msrb.mxu0 %v341_v41  ;;  %1992 = vmatpush.msrb.mxu1 %v358_v42  ;;  %v1694_v31 = vld.sshfl [vmem:[#allocation1 + $0x28] sm:$0xff pattern:$0x73625140]  ;;  %v442_v32 = vld [vmem:[%s4169_s28 + $0x550] sm:$0xff]  ;;  %v459_v33 = vld [vmem:[%s4169_s28 + $0x5d8] sm:$0xff] }
  0x72   : > { %2013 = vmatpush.msrb.mxu2 %v373_v43  ;;  %2032 = vmatpush.msrb.mxu3 %v390_v44  ;;  %v409_v34 = vld [vmem:[%s4169_s28 + $0x448] sm:$0xff]  ;;  %v426_v35 = vld [vmem:[%s4169_s28 + $0x4d0] sm:$0xff]  ;;  %v254_v36 = vld [vmem:[%s4190_s6 + $0x20] sm:$0xff] }
  0x73   : > { %1974 = vmatpush.msrb.mxu0 %v340_v45  ;;  %1993 = vmatpush.msrb.mxu1 %v357_v46  ;;  %v441_v41 = vld [vmem:[%s4169_s28 + $0x548] sm:$0xff]  ;;  %v458_v42 = vld [vmem:[%s4169_s28 + $0x5d0] sm:$0xff]  ;;  %v408_v43 = vld [vmem:[%s4169_s28 + $0x440] sm:$0xff] }
  0x74   : > { %2014 = vmatpush.msrb.mxu2 %v372_v47  ;;  %2033 = vmatpush.msrb.mxu3 %v389_v48  ;;  %v4352_v37 = vld.sshfl [vmem:[#allocation1] sm:$0xff pattern:$0x73625140]  ;;  %v4354_v38 = vld.sshfl [vmem:[#allocation1 + $0x10] sm:$0xff pattern:$0x73625140] }
  0x75   : > { %1975 = vmatpush.msrb.mxu0 %v339_v49  ;;  %1994 = vmatpush.msrb.mxu1 %v356_v50  ;;  %v4356_v39 = vld.sshfl [vmem:[#allocation1 + $0x8] sm:$0xff pattern:$0x73625140]  ;;  %v4358_v40 = vld.sshfl [vmem:[#allocation1 + $0x18] sm:$0xff pattern:$0x73625140] }
  0x76   : > { %2015 = vmatpush.msrb.mxu2 %v371_v51  ;;  %2034 = vmatpush.msrb.mxu3 %v388_v52  ;;  %1707 = vst [vmem:[#allocation1] ss:$4 sm:$0xff] %v254_v36  ;;  %v425_v44 = vld [vmem:[%s4169_s28 + $0x4c8] sm:$0xff]  ;;  %v440_v45 = vld [vmem:[%s4169_s28 + $0x540] sm:$0xff]  ;;  %v407_v47 = vld [vmem:[%s4169_s28 + $0x438] sm:$0xff] }
  0x77   : > { %1976 = vmatpush.msrb.mxu0 %v338_v53  ;;  %1995 = vmatpush.msrb.mxu1 %v355_v54  ;;  %v457_v46 = vld [vmem:[%s4169_s28 + $0x5c8] sm:$0xff]  ;;  %v424_v48 = vld [vmem:[%s4169_s28 + $0x4c0] sm:$0xff]  ;;  %v439_v49 = vld [vmem:[%s4169_s28 + $0x538] sm:$0xff] }
  0x78   : > { %2016 = vmatpush.msrb.mxu2 %v370_v55  ;;  %2035 = vmatpush.msrb.mxu3 %v387_v56  ;;  %v456_v50 = vld [vmem:[%s4169_s28 + $0x5c0] sm:$0xff]  ;;  %v406_v51 = vld [vmem:[%s4169_s28 + $0x430] sm:$0xff]  ;;  %v423_v52 = vld [vmem:[%s4169_s28 + $0x4b8] sm:$0xff] }
  0x79   : > { %1977 = vmatpush.msrb.mxu0 %v337_v57  ;;  %1996 = vmatpush.msrb.mxu1 %v354_v58  ;;  %v438_v53 = vld [vmem:[%s4169_s28 + $0x530] sm:$0xff]  ;;  %v455_v54 = vld [vmem:[%s4169_s28 + $0x5b8] sm:$0xff]  ;;  %v405_v55 = vld [vmem:[%s4169_s28 + $0x428] sm:$0xff] }
  0x7a   : > { %2017 = vmatpush.msrb.mxu2 %v369_v59  ;;  %2036 = vmatpush.msrb.mxu3 %v386_v60  ;;  %v422_v56 = vld [vmem:[%s4169_s28 + $0x4b0] sm:$0xff]  ;;  %v437_v57 = vld [vmem:[%s4169_s28 + $0x528] sm:$0xff]  ;;  %v404_v59 = vld [vmem:[%s4169_s28 + $0x420] sm:$0xff] }
  0x7b   : > { %1939 = vmatmul.f32.vlgmr.msra.gmra.mxu2 %v1691_v61  ;;  %1978 = vmatpush.msrb.mxu0 %v336_v62  ;;  %v454_v58 = vld [vmem:[%s4169_s28 + $0x5b0] sm:$0xff]  ;;  %v421_v60 = vld [vmem:[%s4169_s28 + $0x4a8] sm:$0xff]  ;;  %v436_v61 = vld [vmem:[%s4169_s28 + $0x520] sm:$0xff] }
  0x7c   : > { %1997 = vmatpush.msrb.mxu1 %v353_v63  ;;  %2018 = vmatpush.msrb.mxu2 %v368_v0  ;;  %v453_v62 = vld [vmem:[%s4169_s28 + $0x5a8] sm:$0xff]  ;;  %v403_v63 = vld [vmem:[%s4169_s28 + $0x418] sm:$0xff]  ;;  %v420_v0 = vld [vmem:[%s4169_s28 + $0x4a0] sm:$0xff] }
  0x7d   : > { %2037 = vmatpush.msrb.mxu3 %v385_v1  ;;  %1899 = vmatmul.f32.vlgmr.msra.gmra.mxu0 %v1689_v2  ;;  %v435_v1 = vld [vmem:[%s4169_s28 + $0x518] sm:$0xff]  ;;  %v452_v2 = vld [vmem:[%s4169_s28 + $0x5a0] sm:$0xff]  ;;  %v525_v36 = vld [vmem:[%s4169_s28 + $0x7e8] sm:$0xff] }
  0x7e   : > { %1959 = vmatmul.f32.vlgmr.msra.gmra.mxu3 %v1692_v3  ;;  %2043 = vmatpush.msra.mxu0 %v415_v4  ;;  %v402_v3 = vld [vmem:[%s4169_s28 + $0x410] sm:$0xff]  ;;  %v419_v4 = vld [vmem:[%s4169_s28 + $0x498] sm:$0xff] }
  0x7f   : > { %2083 = vmatpush.msra.mxu2 %v447_v5  ;;  %1998 = vmatpush.msrb.mxu1 %v352_v6  ;;  %v434_v5 = vld [vmem:[%s4169_s28 + $0x510] sm:$0xff]  ;;  %v451_v6 = vld [vmem:[%s4169_s28 + $0x598] sm:$0xff] }
  0x80   : > { %2038 = vmatpush.msrb.mxu3 %v384_v7  ;;  %1919 = vmatmul.f32.vlgmr.msra.gmra.mxu1 %v1690_v8  ;;  %v401_v7 = vld [vmem:[%s4169_s28 + $0x408] sm:$0xff]  ;;  %v418_v8 = vld [vmem:[%s4169_s28 + $0x490] sm:$0xff]  ;;  %v511_v17 = vld [vmem:[%s4169_s28 + $0x778] sm:$0xff] }
  0x81   : > { %2044 = vmatpush.msra.mxu0 %v414_v9  ;;  %2063 = vmatpush.msra.mxu1 %v431_v10  ;;  %v253_v9 = vld [vmem:[%s4190_s6 + $0x18] sm:$0xff]  ;;  %v433_v10 = vld [vmem:[%s4169_s28 + $0x508] sm:$0xff] }
  0x82   : > { %2084 = vmatpush.msra.mxu2 %v446_v11  ;;  %2103 = vmatpush.msra.mxu3 %v463_v12  ;;  %v450_v11 = vld [vmem:[%s4169_s28 + $0x590] sm:$0xff]  ;;  %1698 = vst [vmem:[#allocation1 + $0x20] ss:$4 sm:$0xff] %v253_v9  ;;  %v400_v12 = vld [vmem:[%s4169_s28 + $0x400] sm:$0xff] }
  0x83   : > { %2045 = vmatpush.msra.mxu0 %v413_v13  ;;  %2064 = vmatpush.msra.mxu1 %v430_v14  ;;  %v417_v13 = vld [vmem:[%s4169_s28 + $0x488] sm:$0xff]  ;;  %v432_v14 = vld [vmem:[%s4169_s28 + $0x500] sm:$0xff]  ;;  %v466_v9 = vld [vmem:[%s4169_s28 + $0x610] sm:$0xff] }
  0x84   : > { %2085 = vmatpush.msra.mxu2 %v445_v15  ;;  %2104 = vmatpush.msra.mxu3 %v462_v16  ;;  %v449_v15 = vld [vmem:[%s4169_s28 + $0x588] sm:$0xff]  ;;  %v479_v16 = vld [vmem:[%s4169_s28 + $0x678] sm:$0xff] }
  0x85   : > { %2019 = vmatmul.f32.vlgmr.msrb.gmra.mxu2 %v1695_v18  ;;  %2046 = vmatpush.msra.mxu0 %v412_v19  ;;  %v416_v18 = vld [vmem:[%s4169_s28 + $0x480] sm:$0xff] }
  0x86   : > { %2065 = vmatpush.msra.mxu1 %v429_v20  ;;  %2086 = vmatpush.msra.mxu2 %v444_v21  ;;  %v448_v19 = vld [vmem:[%s4169_s28 + $0x580] sm:$0xff]  ;;  %v478_v20 = vld [vmem:[%s4169_s28 + $0x670] sm:$0xff]  ;;  %v495_v21 = vld [vmem:[%s4169_s28 + $0x6f8] sm:$0xff] }
  0x87   : > { %2105 = vmatpush.msra.mxu3 %v461_v22  ;;  %1979 = vmatmul.f32.vlgmr.msrb.gmra.mxu0 %v1693_v23  ;;  %v510_v22 = vld [vmem:[%s4169_s28 + $0x770] sm:$0xff]  ;;  %v527_v23 = vld [vmem:[%s4169_s28 + $0x7f8] sm:$0xff] }
  0x88   : > { %2039 = vmatmul.f32.vlgmr.msrb.gmra.mxu3 %v1696_v25  ;;  %2047 = vmatpush.msra.mxu0 %v411_v24  ;;  %v477_v24 = vld [vmem:[%s4169_s28 + $0x668] sm:$0xff]  ;;  %v494_v25 = vld [vmem:[%s4169_s28 + $0x6f0] sm:$0xff] }
  0x89   : > { %2066 = vmatpush.msra.mxu1 %v428_v26  ;;  %2087 = vmatpush.msra.mxu2 %v443_v27  ;;  %v509_v26 = vld [vmem:[%s4169_s28 + $0x768] sm:$0xff]  ;;  %v526_v27 = vld [vmem:[%s4169_s28 + $0x7f0] sm:$0xff] }
  0x8a   : > { %2106 = vmatpush.msra.mxu3 %v460_v28  ;;  %1999 = vmatmul.f32.vlgmr.msrb.gmra.mxu1 %v1694_v31  ;;  %v476_v28 = vld [vmem:[%s4169_s28 + $0x660] sm:$0xff] }
  0x8b   : > { %2048 = vmatpush.msra.mxu0 %v410_v29  ;;  %2067 = vmatpush.msra.mxu1 %v427_v30  ;;  %v4416_v29 = vld.sshfl [vmem:[#allocation1 + $0x20] sm:$0xff pattern:$0x73625140]  ;;  %v4418_v30 = vld.sshfl [vmem:[#allocation1 + $0x30] sm:$0xff pattern:$0x73625140] }
  0x8c   : > { %2088 = vmatpush.msra.mxu2 %v442_v32  ;;  %2107 = vmatpush.msra.mxu3 %v459_v33  ;;  %v4420_v31 = vld.sshfl [vmem:[#allocation1 + $0x28] sm:$0xff pattern:$0x73625140]  ;;  %v493_v32 = vld [vmem:[%s4169_s28 + $0x6e8] sm:$0xff] }
  0x8d   : > { %2049 = vmatpush.msra.mxu0 %v409_v34  ;;  %2068 = vmatpush.msra.mxu1 %v426_v35  ;;  %v255_v33 = vld [vmem:[%s4190_s6 + $0x28] sm:$0xff]  ;;  %v4424_v34 = vld.sshfl [vmem:[#allocation1 + $0x38] sm:$0xff pattern:$0x73625140] }
  0x8e   : > { %2089 = vmatpush.msra.mxu2 %v441_v41  ;;  %2108 = vmatpush.msra.mxu3 %v458_v42  ;;  %v508_v35 = vld [vmem:[%s4169_s28 + $0x760] sm:$0xff]  ;;  %1708 = vst [vmem:[#allocation1 + $0x20] ss:$4 sm:$0xff] %v255_v33  ;;  %v474_v41 = vld [vmem:[%s4169_s28 + $0x650] sm:$0xff]  ;;  %v491_v42 = vld [vmem:[%s4169_s28 + $0x6d8] sm:$0xff] }
  0x8f   : > { %2050 = vmatpush.msra.mxu0 %v408_v43  ;;  %2069 = vmatpush.msra.mxu1 %v425_v44  ;;  %v506_v43 = vld [vmem:[%s4169_s28 + $0x750] sm:$0xff]  ;;  %v523_v44 = vld [vmem:[%s4169_s28 + $0x7d8] sm:$0xff] }
  0x90   : > { %2090 = vmatpush.msra.mxu2 %v440_v45  ;;  %2109 = vmatpush.msra.mxu3 %v457_v46  ;;  %v473_v45 = vld [vmem:[%s4169_s28 + $0x648] sm:$0xff]  ;;  %v490_v46 = vld [vmem:[%s4169_s28 + $0x6d0] sm:$0xff] }
  0x91   : > { %2051 = vmatpush.msra.mxu0 %v407_v47  ;;  %2070 = vmatpush.msra.mxu1 %v424_v48  ;;  %v505_v47 = vld [vmem:[%s4169_s28 + $0x748] sm:$0xff]  ;;  %v522_v48 = vld [vmem:[%s4169_s28 + $0x7d0] sm:$0xff] }
  0x92   : > { %2091 = vmatpush.msra.mxu2 %v439_v49  ;;  %2110 = vmatpush.msra.mxu3 %v456_v50  ;;  %v472_v49 = vld [vmem:[%s4169_s28 + $0x640] sm:$0xff]  ;;  %v489_v50 = vld [vmem:[%s4169_s28 + $0x6c8] sm:$0xff]  ;;  %v590_v33 = vld [vmem:[%s4169_s28 + $0x9f0] sm:$0xff] }
  0x93   : > { %2052 = vmatpush.msra.mxu0 %v406_v51  ;;  %2071 = vmatpush.msra.mxu1 %v423_v52  ;;  %v504_v51 = vld [vmem:[%s4169_s28 + $0x740] sm:$0xff]  ;;  %v521_v52 = vld [vmem:[%s4169_s28 + $0x7c8] sm:$0xff] }
  0x94   : > { %2092 = vmatpush.msra.mxu2 %v438_v53  ;;  %2111 = vmatpush.msra.mxu3 %v455_v54  ;;  %v471_v53 = vld [vmem:[%s4169_s28 + $0x638] sm:$0xff]  ;;  %v488_v54 = vld [vmem:[%s4169_s28 + $0x6c0] sm:$0xff] }
  0x95   : > { %2053 = vmatpush.msra.mxu0 %v405_v55  ;;  %2072 = vmatpush.msra.mxu1 %v422_v56  ;;  %v503_v55 = vld [vmem:[%s4169_s28 + $0x738] sm:$0xff]  ;;  %v520_v56 = vld [vmem:[%s4169_s28 + $0x7c0] sm:$0xff] }
  0x96   : > { %2093 = vmatpush.msra.mxu2 %v437_v57  ;;  %2112 = vmatpush.msra.mxu3 %v454_v58  ;;  %v470_v57 = vld [vmem:[%s4169_s28 + $0x630] sm:$0xff]  ;;  %v487_v58 = vld [vmem:[%s4169_s28 + $0x6b8] sm:$0xff] }
  0x97   : > { %2054 = vmatpush.msra.mxu0 %v404_v59  ;;  %2073 = vmatpush.msra.mxu1 %v421_v60  ;;  %v502_v59 = vld [vmem:[%s4169_s28 + $0x730] sm:$0xff]  ;;  %v519_v60 = vld [vmem:[%s4169_s28 + $0x7b8] sm:$0xff] }
  0x98   : > { %2094 = vmatpush.msra.mxu2 %v436_v61  ;;  %2113 = vmatpush.msra.mxu3 %v453_v62  ;;  %v469_v61 = vld [vmem:[%s4169_s28 + $0x628] sm:$0xff]  ;;  %v486_v62 = vld [vmem:[%s4169_s28 + $0x6b0] sm:$0xff] }
  0x99   : > { %2055 = vmatpush.msra.mxu0 %v403_v63  ;;  %2074 = vmatpush.msra.mxu1 %v420_v0  ;;  %v501_v63 = vld [vmem:[%s4169_s28 + $0x728] sm:$0xff]  ;;  %v518_v0 = vld [vmem:[%s4169_s28 + $0x7b0] sm:$0xff] }
  0x9a   : > { %2095 = vmatpush.msra.mxu2 %v435_v1  ;;  %2114 = vmatpush.msra.mxu3 %v452_v2  ;;  %v468_v1 = vld [vmem:[%s4169_s28 + $0x620] sm:$0xff]  ;;  %v485_v2 = vld [vmem:[%s4169_s28 + $0x6a8] sm:$0xff] }
  0x9b   : > { %2056 = vmatpush.msra.mxu0 %v402_v3  ;;  %2075 = vmatpush.msra.mxu1 %v419_v4  ;;  %v500_v3 = vld [vmem:[%s4169_s28 + $0x720] sm:$0xff]  ;;  %v517_v4 = vld [vmem:[%s4169_s28 + $0x7a8] sm:$0xff] }
  0x9c   : > { %2096 = vmatpush.msra.mxu2 %v434_v5  ;;  %2115 = vmatpush.msra.mxu3 %v451_v6  ;;  %v467_v5 = vld [vmem:[%s4169_s28 + $0x618] sm:$0xff]  ;;  %v484_v6 = vld [vmem:[%s4169_s28 + $0x6a0] sm:$0xff] }
  0x9d   : > { %2057 = vmatpush.msra.mxu0 %v401_v7  ;;  %2076 = vmatpush.msra.mxu1 %v418_v8  ;;  %v499_v7 = vld [vmem:[%s4169_s28 + $0x718] sm:$0xff]  ;;  %v516_v8 = vld [vmem:[%s4169_s28 + $0x7a0] sm:$0xff] }
  0x9e   : > { %2097 = vmatpush.msra.mxu2 %v433_v10  ;;  %2116 = vmatpush.msra.mxu3 %v450_v11  ;;  %v483_v10 = vld [vmem:[%s4169_s28 + $0x698] sm:$0xff]  ;;  %v498_v11 = vld [vmem:[%s4169_s28 + $0x710] sm:$0xff] }
  0x9f   : > { %2058 = vmatpush.msra.mxu0 %v400_v12  ;;  %2077 = vmatpush.msra.mxu1 %v417_v13  ;;  %v515_v12 = vld [vmem:[%s4169_s28 + $0x798] sm:$0xff]  ;;  %v465_v13 = vld [vmem:[%s4169_s28 + $0x608] sm:$0xff] }
  0xa0   : > { %2098 = vmatpush.msra.mxu2 %v432_v14  ;;  %2117 = vmatpush.msra.mxu3 %v449_v15  ;;  %v482_v14 = vld [vmem:[%s4169_s28 + $0x690] sm:$0xff]  ;;  %v497_v15 = vld [vmem:[%s4169_s28 + $0x708] sm:$0xff] }
  0xa1   : > { %2059 = vmatmul.f32.vlgmr.msra.gmra.mxu0 %v4352_v37  ;;  %2099 = vmatmul.f32.vlgmr.msra.gmra.mxu2 %v4354_v38  ;;  %v475_v37 = vld [vmem:[%s4169_s28 + $0x658] sm:$0xff]  ;;  %v492_v38 = vld [vmem:[%s4169_s28 + $0x6e0] sm:$0xff] }
  0xa2   : > { %2123 = vmatpush.msrb.mxu0 %v479_v16  ;;  %2163 = vmatpush.msrb.mxu2 %v511_v17  ;;  %v514_v16 = vld [vmem:[%s4169_s28 + $0x790] sm:$0xff]  ;;  %v464_v17 = vld [vmem:[%s4169_s28 + $0x600] sm:$0xff] }
  0xa3   : > { %2078 = vmatpush.msra.mxu1 %v416_v18  ;;  %2118 = vmatpush.msra.mxu3 %v448_v19  ;;  %v481_v18 = vld [vmem:[%s4169_s28 + $0x688] sm:$0xff]  ;;  %v496_v19 = vld [vmem:[%s4169_s28 + $0x700] sm:$0xff] }
  0xa4   : > { %2079 = vmatmul.f32.vlgmr.msra.gmra.mxu1 %v4356_v39  ;;  %2119 = vmatmul.f32.vlgmr.msra.gmra.mxu3 %v4358_v40  ;;  %v507_v39 = vld [vmem:[%s4169_s28 + $0x758] sm:$0xff]  ;;  %v524_v40 = vld [vmem:[%s4169_s28 + $0x7e0] sm:$0xff] }
  0xa5   : > { %2124 = vmatpush.msrb.mxu0 %v478_v20  ;;  %2143 = vmatpush.msrb.mxu1 %v495_v21  ;;  %v513_v20 = vld [vmem:[%s4169_s28 + $0x788] sm:$0xff]  ;;  %v543_v21 = vld [vmem:[%s4169_s28 + $0x878] sm:$0xff] }
  0xa6   : > { %2164 = vmatpush.msrb.mxu2 %v510_v22  ;;  %2183 = vmatpush.msrb.mxu3 %v527_v23  ;;  %v575_v22 = vld [vmem:[%s4169_s28 + $0x978] sm:$0xff]  ;;  %v480_v23 = vld [vmem:[%s4169_s28 + $0x680] sm:$0xff] }
  0xa7   : > { %2125 = vmatpush.msrb.mxu0 %v477_v24  ;;  %2144 = vmatpush.msrb.mxu1 %v494_v25  ;;  %v512_v24 = vld [vmem:[%s4169_s28 + $0x780] sm:$0xff]  ;;  %v542_v25 = vld [vmem:[%s4169_s28 + $0x870] sm:$0xff] }
  0xa8   : > { %2165 = vmatpush.msrb.mxu2 %v509_v26  ;;  %2184 = vmatpush.msrb.mxu3 %v526_v27  ;;  %v559_v26 = vld [vmem:[%s4169_s28 + $0x8f8] sm:$0xff]  ;;  %v574_v27 = vld [vmem:[%s4169_s28 + $0x970] sm:$0xff] }
  0xa9   : > { %2126 = vmatpush.msrb.mxu0 %v476_v28  ;;  %2145 = vmatpush.msrb.mxu1 %v493_v32  ;;  %v591_v28 = vld [vmem:[%s4169_s28 + $0x9f8] sm:$0xff]  ;;  %v573_v32 = vld [vmem:[%s4169_s28 + $0x968] sm:$0xff] }
  0xaa   : > { %2166 = vmatpush.msrb.mxu2 %v508_v35  ;;  %2185 = vmatpush.msrb.mxu3 %v525_v36  ;;  %v540_v35 = vld [vmem:[%s4169_s28 + $0x860] sm:$0xff]  ;;  %v557_v36 = vld [vmem:[%s4169_s28 + $0x8e8] sm:$0xff] }
  0xab   : > { %2127 = vmatpush.msrb.mxu0 %v475_v37  ;;  %2146 = vmatpush.msrb.mxu1 %v492_v38  ;;  %v539_v37 = vld [vmem:[%s4169_s28 + $0x858] sm:$0xff]  ;;  %v556_v38 = vld [vmem:[%s4169_s28 + $0x8e0] sm:$0xff] }
  0xac   : > { %2167 = vmatpush.msrb.mxu2 %v507_v39  ;;  %2186 = vmatpush.msrb.mxu3 %v524_v40  ;;  %v571_v39 = vld [vmem:[%s4169_s28 + $0x958] sm:$0xff]  ;;  %v588_v40 = vld [vmem:[%s4169_s28 + $0x9e0] sm:$0xff] }
  0xad   : > { %2128 = vmatpush.msrb.mxu0 %v474_v41  ;;  %2147 = vmatpush.msrb.mxu1 %v491_v42  ;;  %v538_v41 = vld [vmem:[%s4169_s28 + $0x850] sm:$0xff]  ;;  %v555_v42 = vld [vmem:[%s4169_s28 + $0x8d8] sm:$0xff] }
  0xae   : > { %2168 = vmatpush.msrb.mxu2 %v506_v43  ;;  %2187 = vmatpush.msrb.mxu3 %v523_v44  ;;  %v570_v43 = vld [vmem:[%s4169_s28 + $0x950] sm:$0xff]  ;;  %v587_v44 = vld [vmem:[%s4169_s28 + $0x9d8] sm:$0xff] }
  0xaf   : > { %2129 = vmatpush.msrb.mxu0 %v473_v45  ;;  %2148 = vmatpush.msrb.mxu1 %v490_v46  ;;  %v537_v45 = vld [vmem:[%s4169_s28 + $0x848] sm:$0xff]  ;;  %v554_v46 = vld [vmem:[%s4169_s28 + $0x8d0] sm:$0xff] }
  0xb0   : > { %2169 = vmatpush.msrb.mxu2 %v505_v47  ;;  %2188 = vmatpush.msrb.mxu3 %v522_v48  ;;  %v569_v47 = vld [vmem:[%s4169_s28 + $0x948] sm:$0xff]  ;;  %v586_v48 = vld [vmem:[%s4169_s28 + $0x9d0] sm:$0xff] }
  0xb1   : > { %2130 = vmatpush.msrb.mxu0 %v472_v49  ;;  %2149 = vmatpush.msrb.mxu1 %v489_v50  ;;  %v536_v49 = vld [vmem:[%s4169_s28 + $0x840] sm:$0xff]  ;;  %v553_v50 = vld [vmem:[%s4169_s28 + $0x8c8] sm:$0xff] }
  0xb2   : > { %2170 = vmatpush.msrb.mxu2 %v504_v51  ;;  %2189 = vmatpush.msrb.mxu3 %v521_v52  ;;  %v568_v51 = vld [vmem:[%s4169_s28 + $0x940] sm:$0xff]  ;;  %v585_v52 = vld [vmem:[%s4169_s28 + $0x9c8] sm:$0xff] }
  0xb3   : > { %2131 = vmatpush.msrb.mxu0 %v471_v53  ;;  %2150 = vmatpush.msrb.mxu1 %v488_v54  ;;  %v535_v53 = vld [vmem:[%s4169_s28 + $0x838] sm:$0xff]  ;;  %v552_v54 = vld [vmem:[%s4169_s28 + $0x8c0] sm:$0xff] }
  0xb4   : > { %2171 = vmatpush.msrb.mxu2 %v503_v55  ;;  %2190 = vmatpush.msrb.mxu3 %v520_v56  ;;  %v567_v55 = vld [vmem:[%s4169_s28 + $0x938] sm:$0xff]  ;;  %v584_v56 = vld [vmem:[%s4169_s28 + $0x9c0] sm:$0xff] }
  0xb5   : > { %2132 = vmatpush.msrb.mxu0 %v470_v57  ;;  %2151 = vmatpush.msrb.mxu1 %v487_v58  ;;  %v534_v57 = vld [vmem:[%s4169_s28 + $0x830] sm:$0xff]  ;;  %v551_v58 = vld [vmem:[%s4169_s28 + $0x8b8] sm:$0xff] }
  0xb6   : > { %2172 = vmatpush.msrb.mxu2 %v502_v59  ;;  %2191 = vmatpush.msrb.mxu3 %v519_v60  ;;  %v566_v59 = vld [vmem:[%s4169_s28 + $0x930] sm:$0xff]  ;;  %v583_v60 = vld [vmem:[%s4169_s28 + $0x9b8] sm:$0xff] }
  0xb7   : > { %2133 = vmatpush.msrb.mxu0 %v469_v61  ;;  %2152 = vmatpush.msrb.mxu1 %v486_v62  ;;  %v533_v61 = vld [vmem:[%s4169_s28 + $0x828] sm:$0xff]  ;;  %v550_v62 = vld [vmem:[%s4169_s28 + $0x8b0] sm:$0xff] }
  0xb8   : > { %2173 = vmatpush.msrb.mxu2 %v501_v63  ;;  %2192 = vmatpush.msrb.mxu3 %v518_v0  ;;  %v565_v63 = vld [vmem:[%s4169_s28 + $0x928] sm:$0xff]  ;;  %v582_v0 = vld [vmem:[%s4169_s28 + $0x9b0] sm:$0xff] }
  0xb9   : > { %2134 = vmatpush.msrb.mxu0 %v468_v1  ;;  %2153 = vmatpush.msrb.mxu1 %v485_v2  ;;  %v532_v1 = vld [vmem:[%s4169_s28 + $0x820] sm:$0xff]  ;;  %v549_v2 = vld [vmem:[%s4169_s28 + $0x8a8] sm:$0xff] }
  0xba   : > { %2174 = vmatpush.msrb.mxu2 %v500_v3  ;;  %2193 = vmatpush.msrb.mxu3 %v517_v4  ;;  %v564_v3 = vld [vmem:[%s4169_s28 + $0x920] sm:$0xff]  ;;  %v581_v4 = vld [vmem:[%s4169_s28 + $0x9a8] sm:$0xff] }
  0xbb   : > { %2135 = vmatpush.msrb.mxu0 %v467_v5  ;;  %2154 = vmatpush.msrb.mxu1 %v484_v6  ;;  %v531_v5 = vld [vmem:[%s4169_s28 + $0x818] sm:$0xff]  ;;  %v548_v6 = vld [vmem:[%s4169_s28 + $0x8a0] sm:$0xff] }
  0xbc   : > { %2175 = vmatpush.msrb.mxu2 %v499_v7  ;;  %2194 = vmatpush.msrb.mxu3 %v516_v8  ;;  %v563_v7 = vld [vmem:[%s4169_s28 + $0x918] sm:$0xff]  ;;  %v580_v8 = vld [vmem:[%s4169_s28 + $0x9a0] sm:$0xff] }
  0xbd   : > { %2136 = vmatpush.msrb.mxu0 %v466_v9  ;;  %2155 = vmatpush.msrb.mxu1 %v483_v10  ;;  %v530_v9 = vld [vmem:[%s4169_s28 + $0x810] sm:$0xff]  ;;  %v547_v10 = vld [vmem:[%s4169_s28 + $0x898] sm:$0xff] }
  0xbe   : > { %2176 = vmatpush.msrb.mxu2 %v498_v11  ;;  %2195 = vmatpush.msrb.mxu3 %v515_v12  ;;  %v562_v11 = vld [vmem:[%s4169_s28 + $0x910] sm:$0xff]  ;;  %v579_v12 = vld [vmem:[%s4169_s28 + $0x998] sm:$0xff] }
  0xbf   : > { %2137 = vmatpush.msrb.mxu0 %v465_v13  ;;  %2156 = vmatpush.msrb.mxu1 %v482_v14  ;;  %v529_v13 = vld [vmem:[%s4169_s28 + $0x808] sm:$0xff]  ;;  %v546_v14 = vld [vmem:[%s4169_s28 + $0x890] sm:$0xff] }
  0xc0   : > { %2177 = vmatpush.msrb.mxu2 %v497_v15  ;;  %2196 = vmatpush.msrb.mxu3 %v514_v16  ;;  %v561_v15 = vld [vmem:[%s4169_s28 + $0x908] sm:$0xff]  ;;  %v578_v16 = vld [vmem:[%s4169_s28 + $0x990] sm:$0xff] }
  0xc1   : > { %2138 = vmatpush.msrb.mxu0 %v464_v17  ;;  %2157 = vmatpush.msrb.mxu1 %v481_v18  ;;  %v528_v17 = vld [vmem:[%s4169_s28 + $0x800] sm:$0xff]  ;;  %v545_v18 = vld [vmem:[%s4169_s28 + $0x888] sm:$0xff] }
  0xc2   : > { %2178 = vmatpush.msrb.mxu2 %v496_v19  ;;  %2197 = vmatpush.msrb.mxu3 %v513_v20  ;;  %v560_v19 = vld [vmem:[%s4169_s28 + $0x900] sm:$0xff]  ;;  %v577_v20 = vld [vmem:[%s4169_s28 + $0x988] sm:$0xff] }
  0xc3   : > { %2139 = vmatmul.f32.vlgmr.msrb.gmra.mxu0 %v4416_v29  ;;  %2179 = vmatmul.f32.vlgmr.msrb.gmra.mxu2 %v4418_v30  ;;  %v541_v29 = vld [vmem:[%s4169_s28 + $0x868] sm:$0xff]  ;;  %v558_v30 = vld [vmem:[%s4169_s28 + $0x8f0] sm:$0xff] }
  0xc4   : > { %2203 = vmatpush.msra.mxu0 %v543_v21  ;;  %2243 = vmatpush.msra.mxu2 %v575_v22  ;;  %v1709_v21 = vld.sshfl [vmem:[#allocation1] sm:$0xff pattern:$0x73625140]  ;;  %v1711_v22 = vld.sshfl [vmem:[#allocation1 + $0x10] sm:$0xff pattern:$0x73625140] }
  0xc5   : > { %2158 = vmatpush.msrb.mxu1 %v480_v23  ;;  %2198 = vmatpush.msrb.mxu3 %v512_v24  ;;  %v607_v23 = vld [vmem:[%s4169_s28 + $0xa78] sm:$0xff] }
  0xc6   : > { %2159 = vmatmul.f32.vlgmr.msrb.gmra.mxu1 %v4420_v31  ;;  %2199 = vmatmul.f32.vlgmr.msrb.gmra.mxu3 %v4424_v34  ;;  %v572_v31 = vld [vmem:[%s4169_s28 + $0x960] sm:$0xff]  ;;  %v589_v34 = vld [vmem:[%s4169_s28 + $0x9e8] sm:$0xff]  ;;  %v639_v24 = vld [vmem:[%s4169_s28 + $0xb78] sm:$0xff] }
  0xc7   : > { %2204 = vmatpush.msra.mxu0 %v542_v25  ;;  %2223 = vmatpush.msra.mxu1 %v559_v26  ;;  %v544_v25 = vld [vmem:[%s4169_s28 + $0x880] sm:$0xff] }
  0xc8   : > { %2244 = vmatpush.msra.mxu2 %v574_v27  ;;  %2263 = vmatpush.msra.mxu3 %v591_v28  ;;  %v576_v26 = vld [vmem:[%s4169_s28 + $0x980] sm:$0xff]  ;;  %v1712_v28 = vld.sshfl [vmem:[#allocation1 + $0x18] sm:$0xff pattern:$0x73625140] }
  0xc9   : > { %2205 = vmatpush.msra.mxu0 %v541_v29  ;;  %2224 = vmatpush.msra.mxu1 %v558_v30  ;;  %v1710_v27 = vld.sshfl [vmem:[#allocation1 + $0x8] sm:$0xff pattern:$0x73625140]  ;;  %v606_v29 = vld [vmem:[%s4169_s28 + $0xa70] sm:$0xff]  ;;  %v623_v30 = vld [vmem:[%s4169_s28 + $0xaf8] sm:$0xff] }
  0xca   : > { %2245 = vmatpush.msra.mxu2 %v573_v32  ;;  %2264 = vmatpush.msra.mxu3 %v590_v33  ;;  %v638_v32 = vld [vmem:[%s4169_s28 + $0xb70] sm:$0xff]  ;;  %v655_v33 = vld [vmem:[%s4169_s28 + $0xbf8] sm:$0xff] }
  0xcb   : > { %2206 = vmatpush.msra.mxu0 %v540_v35  ;;  %2225 = vmatpush.msra.mxu1 %v557_v36  ;;  %v605_v35 = vld [vmem:[%s4169_s28 + $0xa68] sm:$0xff]  ;;  %v622_v36 = vld [vmem:[%s4169_s28 + $0xaf0] sm:$0xff] }
  0xcc   : > { %2246 = vmatpush.msra.mxu2 %v572_v31  ;;  %2265 = vmatpush.msra.mxu3 %v589_v34  ;;  %v637_v31 = vld [vmem:[%s4169_s28 + $0xb68] sm:$0xff]  ;;  %v654_v34 = vld [vmem:[%s4169_s28 + $0xbf0] sm:$0xff] }
  0xcd   : > { %2207 = vmatpush.msra.mxu0 %v539_v37  ;;  %2226 = vmatpush.msra.mxu1 %v556_v38  ;;  %v604_v37 = vld [vmem:[%s4169_s28 + $0xa60] sm:$0xff]  ;;  %v621_v38 = vld [vmem:[%s4169_s28 + $0xae8] sm:$0xff] }
  0xce   : > { %2247 = vmatpush.msra.mxu2 %v571_v39  ;;  %2266 = vmatpush.msra.mxu3 %v588_v40  ;;  %v636_v39 = vld [vmem:[%s4169_s28 + $0xb60] sm:$0xff]  ;;  %v653_v40 = vld [vmem:[%s4169_s28 + $0xbe8] sm:$0xff] }
  0xcf   : > { %2208 = vmatpush.msra.mxu0 %v538_v41  ;;  %2227 = vmatpush.msra.mxu1 %v555_v42  ;;  %v603_v41 = vld [vmem:[%s4169_s28 + $0xa58] sm:$0xff]  ;;  %v620_v42 = vld [vmem:[%s4169_s28 + $0xae0] sm:$0xff] }
  0xd0   : > { %2248 = vmatpush.msra.mxu2 %v570_v43  ;;  %2267 = vmatpush.msra.mxu3 %v587_v44  ;;  %v635_v43 = vld [vmem:[%s4169_s28 + $0xb58] sm:$0xff]  ;;  %v652_v44 = vld [vmem:[%s4169_s28 + $0xbe0] sm:$0xff] }
  0xd1   : > { %2209 = vmatpush.msra.mxu0 %v537_v45  ;;  %2228 = vmatpush.msra.mxu1 %v554_v46  ;;  %v602_v45 = vld [vmem:[%s4169_s28 + $0xa50] sm:$0xff]  ;;  %v619_v46 = vld [vmem:[%s4169_s28 + $0xad8] sm:$0xff] }
  0xd2   : > { %2249 = vmatpush.msra.mxu2 %v569_v47  ;;  %2268 = vmatpush.msra.mxu3 %v586_v48  ;;  %v634_v47 = vld [vmem:[%s4169_s28 + $0xb50] sm:$0xff]  ;;  %v651_v48 = vld [vmem:[%s4169_s28 + $0xbd8] sm:$0xff] }
  0xd3   : > { %2210 = vmatpush.msra.mxu0 %v536_v49  ;;  %2229 = vmatpush.msra.mxu1 %v553_v50  ;;  %v601_v49 = vld [vmem:[%s4169_s28 + $0xa48] sm:$0xff]  ;;  %v618_v50 = vld [vmem:[%s4169_s28 + $0xad0] sm:$0xff] }
  0xd4   : > { %2250 = vmatpush.msra.mxu2 %v568_v51  ;;  %2269 = vmatpush.msra.mxu3 %v585_v52  ;;  %v633_v51 = vld [vmem:[%s4169_s28 + $0xb48] sm:$0xff]  ;;  %v650_v52 = vld [vmem:[%s4169_s28 + $0xbd0] sm:$0xff] }
  0xd5   : > { %2211 = vmatpush.msra.mxu0 %v535_v53  ;;  %2230 = vmatpush.msra.mxu1 %v552_v54  ;;  %v600_v53 = vld [vmem:[%s4169_s28 + $0xa40] sm:$0xff]  ;;  %v617_v54 = vld [vmem:[%s4169_s28 + $0xac8] sm:$0xff] }
  0xd6   : > { %2251 = vmatpush.msra.mxu2 %v567_v55  ;;  %2270 = vmatpush.msra.mxu3 %v584_v56  ;;  %v632_v55 = vld [vmem:[%s4169_s28 + $0xb40] sm:$0xff]  ;;  %v649_v56 = vld [vmem:[%s4169_s28 + $0xbc8] sm:$0xff] }
  0xd7   : > { %2212 = vmatpush.msra.mxu0 %v534_v57  ;;  %2231 = vmatpush.msra.mxu1 %v551_v58  ;;  %v599_v57 = vld [vmem:[%s4169_s28 + $0xa38] sm:$0xff]  ;;  %v616_v58 = vld [vmem:[%s4169_s28 + $0xac0] sm:$0xff] }
  0xd8   : > { %2252 = vmatpush.msra.mxu2 %v566_v59  ;;  %2271 = vmatpush.msra.mxu3 %v583_v60  ;;  %v631_v59 = vld [vmem:[%s4169_s28 + $0xb38] sm:$0xff]  ;;  %v648_v60 = vld [vmem:[%s4169_s28 + $0xbc0] sm:$0xff] }
  0xd9   : > { %2213 = vmatpush.msra.mxu0 %v533_v61  ;;  %2232 = vmatpush.msra.mxu1 %v550_v62  ;;  %v598_v61 = vld [vmem:[%s4169_s28 + $0xa30] sm:$0xff]  ;;  %v615_v62 = vld [vmem:[%s4169_s28 + $0xab8] sm:$0xff] }
  0xda   : > { %2253 = vmatpush.msra.mxu2 %v565_v63  ;;  %2272 = vmatpush.msra.mxu3 %v582_v0  ;;  %v630_v63 = vld [vmem:[%s4169_s28 + $0xb30] sm:$0xff]  ;;  %v647_v0 = vld [vmem:[%s4169_s28 + $0xbb8] sm:$0xff] }
  0xdb   : > { %2214 = vmatpush.msra.mxu0 %v532_v1  ;;  %2233 = vmatpush.msra.mxu1 %v549_v2  ;;  %v597_v1 = vld [vmem:[%s4169_s28 + $0xa28] sm:$0xff]  ;;  %v614_v2 = vld [vmem:[%s4169_s28 + $0xab0] sm:$0xff] }
  0xdc   : > { %2254 = vmatpush.msra.mxu2 %v564_v3  ;;  %2273 = vmatpush.msra.mxu3 %v581_v4  ;;  %v629_v3 = vld [vmem:[%s4169_s28 + $0xb28] sm:$0xff]  ;;  %v646_v4 = vld [vmem:[%s4169_s28 + $0xbb0] sm:$0xff] }
  0xdd   : > { %2215 = vmatpush.msra.mxu0 %v531_v5  ;;  %2234 = vmatpush.msra.mxu1 %v548_v6  ;;  %v596_v5 = vld [vmem:[%s4169_s28 + $0xa20] sm:$0xff]  ;;  %v613_v6 = vld [vmem:[%s4169_s28 + $0xaa8] sm:$0xff] }
  0xde   : > { %2255 = vmatpush.msra.mxu2 %v563_v7  ;;  %2274 = vmatpush.msra.mxu3 %v580_v8  ;;  %v628_v7 = vld [vmem:[%s4169_s28 + $0xb20] sm:$0xff]  ;;  %v645_v8 = vld [vmem:[%s4169_s28 + $0xba8] sm:$0xff] }
  0xdf   : > { %2216 = vmatpush.msra.mxu0 %v530_v9  ;;  %2235 = vmatpush.msra.mxu1 %v547_v10  ;;  %v595_v9 = vld [vmem:[%s4169_s28 + $0xa18] sm:$0xff]  ;;  %v612_v10 = vld [vmem:[%s4169_s28 + $0xaa0] sm:$0xff] }
  0xe0   : > { %2256 = vmatpush.msra.mxu2 %v562_v11  ;;  %2275 = vmatpush.msra.mxu3 %v579_v12  ;;  %v627_v11 = vld [vmem:[%s4169_s28 + $0xb18] sm:$0xff]  ;;  %v644_v12 = vld [vmem:[%s4169_s28 + $0xba0] sm:$0xff] }
  0xe1   : > { %2217 = vmatpush.msra.mxu0 %v529_v13  ;;  %2236 = vmatpush.msra.mxu1 %v546_v14  ;;  %v594_v13 = vld [vmem:[%s4169_s28 + $0xa10] sm:$0xff]  ;;  %v611_v14 = vld [vmem:[%s4169_s28 + $0xa98] sm:$0xff] }
  0xe2   : > { %2257 = vmatpush.msra.mxu2 %v561_v15  ;;  %2276 = vmatpush.msra.mxu3 %v578_v16  ;;  %v626_v15 = vld [vmem:[%s4169_s28 + $0xb10] sm:$0xff]  ;;  %v643_v16 = vld [vmem:[%s4169_s28 + $0xb98] sm:$0xff] }
  0xe3   : > { %2218 = vmatpush.msra.mxu0 %v528_v17  ;;  %2237 = vmatpush.msra.mxu1 %v545_v18  ;;  %v593_v17 = vld [vmem:[%s4169_s28 + $0xa08] sm:$0xff]  ;;  %v610_v18 = vld [vmem:[%s4169_s28 + $0xa90] sm:$0xff] }
  0xe4   : > { %2258 = vmatpush.msra.mxu2 %v560_v19  ;;  %2277 = vmatpush.msra.mxu3 %v577_v20  ;;  %v256_v19 = vld [vmem:[%s4190_s6 + $0x30] sm:$0xff] }
  0xe5   : > { %2219 = vmatmul.f32.vlgmr.msra.gmra.mxu0 %v1709_v21  ;;  %2259 = vmatmul.f32.vlgmr.msra.gmra.mxu2 %v1711_v22  ;;  %v625_v20 = vld [vmem:[%s4169_s28 + $0xb08] sm:$0xff]  ;;  %v642_v21 = vld [vmem:[%s4169_s28 + $0xb90] sm:$0xff]  ;;  %1717 = vst [vmem:[#allocation1] ss:$4 sm:$0xff] %v256_v19  ;;  %v592_v22 = vld [vmem:[%s4169_s28 + $0xa00] sm:$0xff] }
  0xe6   : > { %2283 = vmatpush.msrb.mxu0 %v607_v23  ;;  %2323 = vmatpush.msrb.mxu2 %v639_v24  ;;  %v609_v23 = vld [vmem:[%s4169_s28 + $0xa88] sm:$0xff]  ;;  %v624_v24 = vld [vmem:[%s4169_s28 + $0xb00] sm:$0xff]  ;;  %v675_v19 = vld [vmem:[%s4169_s28 + $0xc98] sm:$0xff] }
  0xe7   : > { %2238 = vmatpush.msra.mxu1 %v544_v25  ;;  %2278 = vmatpush.msra.mxu3 %v576_v26  ;;  %v641_v25 = vld [vmem:[%s4169_s28 + $0xb88] sm:$0xff]  ;;  %v1713_v26 = vld.sshfl [vmem:[#allocation1 + $0x20] sm:$0xff pattern:$0x73625140] }
  0xe8   : > { %2239 = vmatmul.f32.vlgmr.msra.gmra.mxu1 %v1710_v27  ;;  %2279 = vmatmul.f32.vlgmr.msra.gmra.mxu3 %v1712_v28  ;;  %v1715_v27 = vld.sshfl [vmem:[#allocation1 + $0x30] sm:$0xff pattern:$0x73625140]  ;;  %v671_v28 = vld [vmem:[%s4169_s28 + $0xc78] sm:$0xff] }
  0xe9   : > { %2284 = vmatpush.msrb.mxu0 %v606_v29  ;;  %2303 = vmatpush.msrb.mxu1 %v623_v30  ;;  %v703_v29 = vld [vmem:[%s4169_s28 + $0xd78] sm:$0xff]  ;;  %v608_v30 = vld [vmem:[%s4169_s28 + $0xa80] sm:$0xff] }
  0xea   : > { %2324 = vmatpush.msrb.mxu2 %v638_v32  ;;  %2343 = vmatpush.msrb.mxu3 %v655_v33  ;;  %v640_v32 = vld [vmem:[%s4169_s28 + $0xb80] sm:$0xff] }
  0xeb   : > { %2285 = vmatpush.msrb.mxu0 %v605_v35  ;;  %2304 = vmatpush.msrb.mxu1 %v622_v36  ;;  %v1714_v33 = vld.sshfl [vmem:[#allocation1 + $0x28] sm:$0xff pattern:$0x73625140]  ;;  %v1716_v35 = vld.sshfl [vmem:[#allocation1 + $0x38] sm:$0xff pattern:$0x73625140] }
  0xec   : > { %2325 = vmatpush.msrb.mxu2 %v637_v31  ;;  %2344 = vmatpush.msrb.mxu3 %v654_v34  ;;  %v670_v36 = vld [vmem:[%s4169_s28 + $0xc70] sm:$0xff]  ;;  %v687_v31 = vld [vmem:[%s4169_s28 + $0xcf8] sm:$0xff] }
  0xed   : > { %2286 = vmatpush.msrb.mxu0 %v604_v37  ;;  %2305 = vmatpush.msrb.mxu1 %v621_v38  ;;  %v702_v34 = vld [vmem:[%s4169_s28 + $0xd70] sm:$0xff]  ;;  %v719_v37 = vld [vmem:[%s4169_s28 + $0xdf8] sm:$0xff]  ;;  %v669_v38 = vld [vmem:[%s4169_s28 + $0xc68] sm:$0xff] }
  0xee   : > { %2326 = vmatpush.msrb.mxu2 %v636_v39  ;;  %2345 = vmatpush.msrb.mxu3 %v653_v40  ;;  %v686_v39 = vld [vmem:[%s4169_s28 + $0xcf0] sm:$0xff]  ;;  %v701_v40 = vld [vmem:[%s4169_s28 + $0xd68] sm:$0xff] }
  0xef   : > { %2287 = vmatpush.msrb.mxu0 %v603_v41  ;;  %2306 = vmatpush.msrb.mxu1 %v620_v42  ;;  %v718_v41 = vld [vmem:[%s4169_s28 + $0xdf0] sm:$0xff]  ;;  %v668_v42 = vld [vmem:[%s4169_s28 + $0xc60] sm:$0xff] }
  0xf0   : > { %2327 = vmatpush.msrb.mxu2 %v635_v43  ;;  %2346 = vmatpush.msrb.mxu3 %v652_v44  ;;  %v685_v43 = vld [vmem:[%s4169_s28 + $0xce8] sm:$0xff]  ;;  %v700_v44 = vld [vmem:[%s4169_s28 + $0xd60] sm:$0xff] }
  0xf1   : > { %2288 = vmatpush.msrb.mxu0 %v602_v45  ;;  %2307 = vmatpush.msrb.mxu1 %v619_v46  ;;  %v717_v45 = vld [vmem:[%s4169_s28 + $0xde8] sm:$0xff]  ;;  %v667_v46 = vld [vmem:[%s4169_s28 + $0xc58] sm:$0xff] }
  0xf2   : > { %2328 = vmatpush.msrb.mxu2 %v634_v47  ;;  %2347 = vmatpush.msrb.mxu3 %v651_v48  ;;  %v684_v47 = vld [vmem:[%s4169_s28 + $0xce0] sm:$0xff]  ;;  %v699_v48 = vld [vmem:[%s4169_s28 + $0xd58] sm:$0xff] }
  0xf3   : > { %2289 = vmatpush.msrb.mxu0 %v601_v49  ;;  %2308 = vmatpush.msrb.mxu1 %v618_v50  ;;  %v716_v49 = vld [vmem:[%s4169_s28 + $0xde0] sm:$0xff]  ;;  %v666_v50 = vld [vmem:[%s4169_s28 + $0xc50] sm:$0xff] }
  0xf4   : > { %2329 = vmatpush.msrb.mxu2 %v633_v51  ;;  %2348 = vmatpush.msrb.mxu3 %v650_v52  ;;  %v683_v51 = vld [vmem:[%s4169_s28 + $0xcd8] sm:$0xff]  ;;  %v698_v52 = vld [vmem:[%s4169_s28 + $0xd50] sm:$0xff] }
  0xf5   : > { %2290 = vmatpush.msrb.mxu0 %v600_v53  ;;  %2309 = vmatpush.msrb.mxu1 %v617_v54  ;;  %v715_v53 = vld [vmem:[%s4169_s28 + $0xdd8] sm:$0xff]  ;;  %v665_v54 = vld [vmem:[%s4169_s28 + $0xc48] sm:$0xff] }
  0xf6   : > { %2330 = vmatpush.msrb.mxu2 %v632_v55  ;;  %2349 = vmatpush.msrb.mxu3 %v649_v56  ;;  %v682_v55 = vld [vmem:[%s4169_s28 + $0xcd0] sm:$0xff]  ;;  %v697_v56 = vld [vmem:[%s4169_s28 + $0xd48] sm:$0xff] }
  0xf7   : > { %2291 = vmatpush.msrb.mxu0 %v599_v57  ;;  %2310 = vmatpush.msrb.mxu1 %v616_v58  ;;  %v714_v57 = vld [vmem:[%s4169_s28 + $0xdd0] sm:$0xff]  ;;  %v664_v58 = vld [vmem:[%s4169_s28 + $0xc40] sm:$0xff] }
  0xf8   : > { %2331 = vmatpush.msrb.mxu2 %v631_v59  ;;  %2350 = vmatpush.msrb.mxu3 %v648_v60  ;;  %v681_v59 = vld [vmem:[%s4169_s28 + $0xcc8] sm:$0xff]  ;;  %v696_v60 = vld [vmem:[%s4169_s28 + $0xd40] sm:$0xff] }
  0xf9   : > { %2292 = vmatpush.msrb.mxu0 %v598_v61  ;;  %2311 = vmatpush.msrb.mxu1 %v615_v62  ;;  %v713_v61 = vld [vmem:[%s4169_s28 + $0xdc8] sm:$0xff]  ;;  %v663_v62 = vld [vmem:[%s4169_s28 + $0xc38] sm:$0xff] }
  0xfa   : > { %2332 = vmatpush.msrb.mxu2 %v630_v63  ;;  %2351 = vmatpush.msrb.mxu3 %v647_v0  ;;  %v680_v63 = vld [vmem:[%s4169_s28 + $0xcc0] sm:$0xff]  ;;  %v695_v0 = vld [vmem:[%s4169_s28 + $0xd38] sm:$0xff] }
  0xfb   : > { %2293 = vmatpush.msrb.mxu0 %v597_v1  ;;  %2312 = vmatpush.msrb.mxu1 %v614_v2  ;;  %v712_v1 = vld [vmem:[%s4169_s28 + $0xdc0] sm:$0xff]  ;;  %v662_v2 = vld [vmem:[%s4169_s28 + $0xc30] sm:$0xff] }
  0xfc   : > { %2333 = vmatpush.msrb.mxu2 %v629_v3  ;;  %2352 = vmatpush.msrb.mxu3 %v646_v4  ;;  %v679_v3 = vld [vmem:[%s4169_s28 + $0xcb8] sm:$0xff]  ;;  %v694_v4 = vld [vmem:[%s4169_s28 + $0xd30] sm:$0xff] }
  0xfd   : > { %2294 = vmatpush.msrb.mxu0 %v596_v5  ;;  %2313 = vmatpush.msrb.mxu1 %v613_v6  ;;  %v711_v5 = vld [vmem:[%s4169_s28 + $0xdb8] sm:$0xff]  ;;  %v661_v6 = vld [vmem:[%s4169_s28 + $0xc28] sm:$0xff] }
  0xfe   : > { %2334 = vmatpush.msrb.mxu2 %v628_v7  ;;  %2353 = vmatpush.msrb.mxu3 %v645_v8  ;;  %v678_v7 = vld [vmem:[%s4169_s28 + $0xcb0] sm:$0xff]  ;;  %v693_v8 = vld [vmem:[%s4169_s28 + $0xd28] sm:$0xff] }
  0xff   : > { %2295 = vmatpush.msrb.mxu0 %v595_v9  ;;  %2314 = vmatpush.msrb.mxu1 %v612_v10  ;;  %v710_v9 = vld [vmem:[%s4169_s28 + $0xdb0] sm:$0xff]  ;;  %v660_v10 = vld [vmem:[%s4169_s28 + $0xc20] sm:$0xff] }
 0x100   : > { %2335 = vmatpush.msrb.mxu2 %v627_v11  ;;  %2354 = vmatpush.msrb.mxu3 %v644_v12  ;;  %v677_v11 = vld [vmem:[%s4169_s28 + $0xca8] sm:$0xff]  ;;  %v692_v12 = vld [vmem:[%s4169_s28 + $0xd20] sm:$0xff] }
 0x101   : > { %2296 = vmatpush.msrb.mxu0 %v594_v13  ;;  %2315 = vmatpush.msrb.mxu1 %v611_v14  ;;  %v709_v13 = vld [vmem:[%s4169_s28 + $0xda8] sm:$0xff]  ;;  %v659_v14 = vld [vmem:[%s4169_s28 + $0xc18] sm:$0xff] }
 0x102   : > { %2336 = vmatpush.msrb.mxu2 %v626_v15  ;;  %2355 = vmatpush.msrb.mxu3 %v643_v16  ;;  %v676_v15 = vld [vmem:[%s4169_s28 + $0xca0] sm:$0xff]  ;;  %v691_v16 = vld [vmem:[%s4169_s28 + $0xd18] sm:$0xff] }
 0x103   : > { %2297 = vmatpush.msrb.mxu0 %v593_v17  ;;  %2316 = vmatpush.msrb.mxu1 %v610_v18  ;;  %v708_v17 = vld [vmem:[%s4169_s28 + $0xda0] sm:$0xff]  ;;  %v658_v18 = vld [vmem:[%s4169_s28 + $0xc10] sm:$0xff] }
 0x104   : > { %2337 = vmatpush.msrb.mxu2 %v625_v20  ;;  %2356 = vmatpush.msrb.mxu3 %v642_v21  ;;  %v690_v20 = vld [vmem:[%s4169_s28 + $0xd10] sm:$0xff]  ;;  %v707_v21 = vld [vmem:[%s4169_s28 + $0xd98] sm:$0xff] }
 0x105   : > { %2298 = vmatpush.msrb.mxu0 %v592_v22  ;;  %2317 = vmatpush.msrb.mxu1 %v609_v23  ;;  %v657_v22 = vld [vmem:[%s4169_s28 + $0xc08] sm:$0xff]  ;;  %v674_v23 = vld [vmem:[%s4169_s28 + $0xc90] sm:$0xff] }
 0x106   : > { %2338 = vmatpush.msrb.mxu2 %v624_v24  ;;  %2357 = vmatpush.msrb.mxu3 %v641_v25  ;;  %v257_v24 = vld [vmem:[%s4190_s6 + $0x38] sm:$0xff]  ;;  %v689_v25 = vld [vmem:[%s4169_s28 + $0xd08] sm:$0xff] }
 0x107   : > { %2299 = vmatmul.f32.vlgmr.msrb.gmra.mxu0 %v1713_v26  ;;  %2339 = vmatmul.f32.vlgmr.msrb.gmra.mxu2 %v1715_v27  ;;  %v706_v26 = vld [vmem:[%s4169_s28 + $0xd90] sm:$0xff]  ;;  %1718 = vst [vmem:[#allocation1 + $0x20] ss:$4 sm:$0xff] %v257_v24  ;;  %v656_v27 = vld [vmem:[%s4169_s28 + $0xc00] sm:$0xff]  ;;  %v739_v24 = vld [vmem:[%s4169_s28 + $0xe98] sm:$0xff] }
 0x108   : > { %2363 = vmatpush.msra.mxu0 %v671_v28  ;;  %2403 = vmatpush.msra.mxu2 %v703_v29  ;;  %v673_v28 = vld [vmem:[%s4169_s28 + $0xc88] sm:$0xff]  ;;  %v688_v29 = vld [vmem:[%s4169_s28 + $0xd00] sm:$0xff] }
 0x109   : > { %2318 = vmatpush.msrb.mxu1 %v608_v30  ;;  %2358 = vmatpush.msrb.mxu3 %v640_v32  ;;  %v705_v30 = vld [vmem:[%s4169_s28 + $0xd88] sm:$0xff]  ;;  %v1719_v32 = vld.sshfl [vmem:[#allocation1] sm:$0xff pattern:$0x73625140] }
 0x10a   : > { %2319 = vmatmul.f32.vlgmr.msrb.gmra.mxu1 %v1714_v33  ;;  %2359 = vmatmul.f32.vlgmr.msrb.gmra.mxu3 %v1716_v35  ;;  %v1721_v33 = vld.sshfl [vmem:[#allocation1 + $0x10] sm:$0xff pattern:$0x73625140]  ;;  %v735_v35 = vld [vmem:[%s4169_s28 + $0xe78] sm:$0xff] }
 0x10b   : > { %2364 = vmatpush.msra.mxu0 %v670_v36  ;;  %2383 = vmatpush.msra.mxu1 %v687_v31  ;;  %v767_v36 = vld [vmem:[%s4169_s28 + $0xf78] sm:$0xff]  ;;  %v672_v31 = vld [vmem:[%s4169_s28 + $0xc80] sm:$0xff] }
 0x10c   : > { %2404 = vmatpush.msra.mxu2 %v702_v34  ;;  %2423 = vmatpush.msra.mxu3 %v719_v37  ;;  %v704_v34 = vld [vmem:[%s4169_s28 + $0xd80] sm:$0xff] }
 0x10d   : > { %2365 = vmatpush.msra.mxu0 %v669_v38  ;;  %2384 = vmatpush.msra.mxu1 %v686_v39  ;;  %v1720_v37 = vld.sshfl [vmem:[#allocation1 + $0x8] sm:$0xff pattern:$0x73625140]  ;;  %v1722_v38 = vld.sshfl [vmem:[#allocation1 + $0x18] sm:$0xff pattern:$0x73625140] }
 0x10e   : > { %2405 = vmatpush.msra.mxu2 %v701_v40  ;;  %2424 = vmatpush.msra.mxu3 %v718_v41  ;;  %v734_v39 = vld [vmem:[%s4169_s28 + $0xe70] sm:$0xff]  ;;  %v751_v40 = vld [vmem:[%s4169_s28 + $0xef8] sm:$0xff] }
 0x10f   : > { %2366 = vmatpush.msra.mxu0 %v668_v42  ;;  %2385 = vmatpush.msra.mxu1 %v685_v43  ;;  %v766_v41 = vld [vmem:[%s4169_s28 + $0xf70] sm:$0xff]  ;;  %v783_v42 = vld [vmem:[%s4169_s28 + $0xff8] sm:$0xff]  ;;  %v733_v43 = vld [vmem:[%s4169_s28 + $0xe68] sm:$0xff] }
 0x110   : > { %2406 = vmatpush.msra.mxu2 %v700_v44  ;;  %2425 = vmatpush.msra.mxu3 %v717_v45  ;;  %v750_v44 = vld [vmem:[%s4169_s28 + $0xef0] sm:$0xff]  ;;  %v765_v45 = vld [vmem:[%s4169_s28 + $0xf68] sm:$0xff] }
 0x111   : > { %2367 = vmatpush.msra.mxu0 %v667_v46  ;;  %2386 = vmatpush.msra.mxu1 %v684_v47  ;;  %v782_v46 = vld [vmem:[%s4169_s28 + $0xff0] sm:$0xff]  ;;  %v732_v47 = vld [vmem:[%s4169_s28 + $0xe60] sm:$0xff] }
 0x112   : > { %2407 = vmatpush.msra.mxu2 %v699_v48  ;;  %2426 = vmatpush.msra.mxu3 %v716_v49  ;;  %v749_v48 = vld [vmem:[%s4169_s28 + $0xee8] sm:$0xff]  ;;  %v764_v49 = vld [vmem:[%s4169_s28 + $0xf60] sm:$0xff] }
 0x113   : > { %2368 = vmatpush.msra.mxu0 %v666_v50  ;;  %2387 = vmatpush.msra.mxu1 %v683_v51  ;;  %v781_v50 = vld [vmem:[%s4169_s28 + $0xfe8] sm:$0xff]  ;;  %v731_v51 = vld [vmem:[%s4169_s28 + $0xe58] sm:$0xff] }
 0x114   : > { %2408 = vmatpush.msra.mxu2 %v698_v52  ;;  %2427 = vmatpush.msra.mxu3 %v715_v53  ;;  %v748_v52 = vld [vmem:[%s4169_s28 + $0xee0] sm:$0xff]  ;;  %v763_v53 = vld [vmem:[%s4169_s28 + $0xf58] sm:$0xff] }
 0x115   : > { %2369 = vmatpush.msra.mxu0 %v665_v54  ;;  %2388 = vmatpush.msra.mxu1 %v682_v55  ;;  %v780_v54 = vld [vmem:[%s4169_s28 + $0xfe0] sm:$0xff]  ;;  %v730_v55 = vld [vmem:[%s4169_s28 + $0xe50] sm:$0xff] }
 0x116   : > { %2409 = vmatpush.msra.mxu2 %v697_v56  ;;  %2428 = vmatpush.msra.mxu3 %v714_v57  ;;  %v747_v56 = vld [vmem:[%s4169_s28 + $0xed8] sm:$0xff]  ;;  %v762_v57 = vld [vmem:[%s4169_s28 + $0xf50] sm:$0xff] }
 0x117   : > { %2370 = vmatpush.msra.mxu0 %v664_v58  ;;  %2389 = vmatpush.msra.mxu1 %v681_v59  ;;  %v779_v58 = vld [vmem:[%s4169_s28 + $0xfd8] sm:$0xff]  ;;  %v729_v59 = vld [vmem:[%s4169_s28 + $0xe48] sm:$0xff] }
 0x118   : > { %2410 = vmatpush.msra.mxu2 %v696_v60  ;;  %2429 = vmatpush.msra.mxu3 %v713_v61  ;;  %v746_v60 = vld [vmem:[%s4169_s28 + $0xed0] sm:$0xff]  ;;  %v761_v61 = vld [vmem:[%s4169_s28 + $0xf48] sm:$0xff] }
 0x119   : > { %2371 = vmatpush.msra.mxu0 %v663_v62  ;;  %2390 = vmatpush.msra.mxu1 %v680_v63  ;;  %v778_v62 = vld [vmem:[%s4169_s28 + $0xfd0] sm:$0xff]  ;;  %v728_v63 = vld [vmem:[%s4169_s28 + $0xe40] sm:$0xff] }
 0x11a   : > { %2411 = vmatpush.msra.mxu2 %v695_v0  ;;  %2430 = vmatpush.msra.mxu3 %v712_v1  ;;  %v745_v0 = vld [vmem:[%s4169_s28 + $0xec8] sm:$0xff]  ;;  %v760_v1 = vld [vmem:[%s4169_s28 + $0xf40] sm:$0xff] }
 0x11b   : > { %2372 = vmatpush.msra.mxu0 %v662_v2  ;;  %2391 = vmatpush.msra.mxu1 %v679_v3  ;;  %v777_v2 = vld [vmem:[%s4169_s28 + $0xfc8] sm:$0xff]  ;;  %v727_v3 = vld [vmem:[%s4169_s28 + $0xe38] sm:$0xff] }
 0x11c   : > { %2412 = vmatpush.msra.mxu2 %v694_v4  ;;  %2431 = vmatpush.msra.mxu3 %v711_v5  ;;  %v744_v4 = vld [vmem:[%s4169_s28 + $0xec0] sm:$0xff]  ;;  %v759_v5 = vld [vmem:[%s4169_s28 + $0xf38] sm:$0xff] }
 0x11d   : > { %2373 = vmatpush.msra.mxu0 %v661_v6  ;;  %2392 = vmatpush.msra.mxu1 %v678_v7  ;;  %v776_v6 = vld [vmem:[%s4169_s28 + $0xfc0] sm:$0xff]  ;;  %v726_v7 = vld [vmem:[%s4169_s28 + $0xe30] sm:$0xff] }
 0x11e   : > { %2413 = vmatpush.msra.mxu2 %v693_v8  ;;  %2432 = vmatpush.msra.mxu3 %v710_v9  ;;  %v743_v8 = vld [vmem:[%s4169_s28 + $0xeb8] sm:$0xff]  ;;  %v758_v9 = vld [vmem:[%s4169_s28 + $0xf30] sm:$0xff] }
 0x11f   : > { %2374 = vmatpush.msra.mxu0 %v660_v10  ;;  %2393 = vmatpush.msra.mxu1 %v677_v11  ;;  %v775_v10 = vld [vmem:[%s4169_s28 + $0xfb8] sm:$0xff]  ;;  %v725_v11 = vld [vmem:[%s4169_s28 + $0xe28] sm:$0xff] }
 0x120   : > { %2414 = vmatpush.msra.mxu2 %v692_v12  ;;  %2433 = vmatpush.msra.mxu3 %v709_v13  ;;  %v742_v12 = vld [vmem:[%s4169_s28 + $0xeb0] sm:$0xff]  ;;  %v757_v13 = vld [vmem:[%s4169_s28 + $0xf28] sm:$0xff] }
 0x121   : > { %2375 = vmatpush.msra.mxu0 %v659_v14  ;;  %2394 = vmatpush.msra.mxu1 %v676_v15  ;;  %v774_v14 = vld [vmem:[%s4169_s28 + $0xfb0] sm:$0xff]  ;;  %v724_v15 = vld [vmem:[%s4169_s28 + $0xe20] sm:$0xff] }
 0x122   : > { %2415 = vmatpush.msra.mxu2 %v691_v16  ;;  %2434 = vmatpush.msra.mxu3 %v708_v17  ;;  %v741_v16 = vld [vmem:[%s4169_s28 + $0xea8] sm:$0xff]  ;;  %v756_v17 = vld [vmem:[%s4169_s28 + $0xf20] sm:$0xff] }
 0x123   : > { %2376 = vmatpush.msra.mxu0 %v658_v18  ;;  %2395 = vmatpush.msra.mxu1 %v675_v19  ;;  %v773_v18 = vld [vmem:[%s4169_s28 + $0xfa8] sm:$0xff]  ;;  %v723_v19 = vld [vmem:[%s4169_s28 + $0xe18] sm:$0xff] }
 0x124   : > { %2416 = vmatpush.msra.mxu2 %v690_v20  ;;  %2435 = vmatpush.msra.mxu3 %v707_v21  ;;  %v740_v20 = vld [vmem:[%s4169_s28 + $0xea0] sm:$0xff]  ;;  %v755_v21 = vld [vmem:[%s4169_s28 + $0xf18] sm:$0xff] }
 0x125   : > { %2377 = vmatpush.msra.mxu0 %v657_v22  ;;  %2396 = vmatpush.msra.mxu1 %v674_v23  ;;  %v772_v22 = vld [vmem:[%s4169_s28 + $0xfa0] sm:$0xff]  ;;  %v722_v23 = vld [vmem:[%s4169_s28 + $0xe10] sm:$0xff] }
 0x126   : > { %2417 = vmatpush.msra.mxu2 %v689_v25  ;;  %2436 = vmatpush.msra.mxu3 %v706_v26  ;;  %v754_v25 = vld [vmem:[%s4169_s28 + $0xf10] sm:$0xff]  ;;  %v771_v26 = vld [vmem:[%s4169_s28 + $0xf98] sm:$0xff] }
 0x127   : > { %2378 = vmatpush.msra.mxu0 %v656_v27  ;;  %2397 = vmatpush.msra.mxu1 %v673_v28  ;;  %v721_v27 = vld [vmem:[%s4169_s28 + $0xe08] sm:$0xff]  ;;  %v738_v28 = vld [vmem:[%s4169_s28 + $0xe90] sm:$0xff] }
 0x128   : > { %2418 = vmatpush.msra.mxu2 %v688_v29  ;;  %2437 = vmatpush.msra.mxu3 %v705_v30  ;;  %v258_v29 = vld [vmem:[%s4190_s6 + $0x40] sm:$0xff]  ;;  %v753_v30 = vld [vmem:[%s4169_s28 + $0xf08] sm:$0xff] }
 0x129   : > { %2379 = vmatmul.f32.vlgmr.msra.gmra.mxu0 %v1719_v32  ;;  %2419 = vmatmul.f32.vlgmr.msra.gmra.mxu2 %v1721_v33  ;;  %v770_v32 = vld [vmem:[%s4169_s28 + $0xf90] sm:$0xff]  ;;  %1727 = vst [vmem:[#allocation1] ss:$4 sm:$0xff] %v258_v29  ;;  %v720_v33 = vld [vmem:[%s4169_s28 + $0xe00] sm:$0xff]  ;;  %v803_v29 = vld [vmem:[%s4169_s28 + $0x1098] sm:$0xff] }
 0x12a   : > { %2443 = vmatpush.msrb.mxu0 %v735_v35  ;;  %2483 = vmatpush.msrb.mxu2 %v767_v36  ;;  %v737_v35 = vld [vmem:[%s4169_s28 + $0xe88] sm:$0xff]  ;;  %v752_v36 = vld [vmem:[%s4169_s28 + $0xf00] sm:$0xff] }
 0x12b   : > { %2398 = vmatpush.msra.mxu1 %v672_v31  ;;  %2438 = vmatpush.msra.mxu3 %v704_v34  ;;  %v769_v31 = vld [vmem:[%s4169_s28 + $0xf88] sm:$0xff]  ;;  %v1723_v34 = vld.sshfl [vmem:[#allocation1 + $0x20] sm:$0xff pattern:$0x73625140] }
 0x12c   : > { %2399 = vmatmul.f32.vlgmr.msra.gmra.mxu1 %v1720_v37  ;;  %2439 = vmatmul.f32.vlgmr.msra.gmra.mxu3 %v1722_v38  ;;  %v1725_v37 = vld.sshfl [vmem:[#allocation1 + $0x30] sm:$0xff pattern:$0x73625140]  ;;  %v799_v38 = vld [vmem:[%s4169_s28 + $0x1078] sm:$0xff] }
 0x12d   : > { %2444 = vmatpush.msrb.mxu0 %v734_v39  ;;  %2463 = vmatpush.msrb.mxu1 %v751_v40  ;;  %v831_v39 = vld [vmem:[%s4169_s28 + $0x1178] sm:$0xff]  ;;  %v736_v40 = vld [vmem:[%s4169_s28 + $0xe80] sm:$0xff] }
 0x12e   : > { %2484 = vmatpush.msrb.mxu2 %v766_v41  ;;  %2503 = vmatpush.msrb.mxu3 %v783_v42  ;;  %v768_v41 = vld [vmem:[%s4169_s28 + $0xf80] sm:$0xff] }
 0x12f   : > { %2445 = vmatpush.msrb.mxu0 %v733_v43  ;;  %2464 = vmatpush.msrb.mxu1 %v750_v44  ;;  %v1724_v42 = vld.sshfl [vmem:[#allocation1 + $0x28] sm:$0xff pattern:$0x73625140]  ;;  %v1726_v43 = vld.sshfl [vmem:[#allocation1 + $0x38] sm:$0xff pattern:$0x73625140] }
 0x130   : > { %2485 = vmatpush.msrb.mxu2 %v765_v45  ;;  %2504 = vmatpush.msrb.mxu3 %v782_v46  ;;  %v798_v44 = vld [vmem:[%s4169_s28 + $0x1070] sm:$0xff]  ;;  %v815_v45 = vld [vmem:[%s4169_s28 + $0x10f8] sm:$0xff] }
 0x131   : > { %2446 = vmatpush.msrb.mxu0 %v732_v47  ;;  %2465 = vmatpush.msrb.mxu1 %v749_v48  ;;  %v830_v46 = vld [vmem:[%s4169_s28 + $0x1170] sm:$0xff]  ;;  %v847_v47 = vld [vmem:[%s4169_s28 + $0x11f8] sm:$0xff]  ;;  %v797_v48 = vld [vmem:[%s4169_s28 + $0x1068] sm:$0xff] }
 0x132   : > { %2486 = vmatpush.msrb.mxu2 %v764_v49  ;;  %2505 = vmatpush.msrb.mxu3 %v781_v50  ;;  %v814_v49 = vld [vmem:[%s4169_s28 + $0x10f0] sm:$0xff]  ;;  %v829_v50 = vld [vmem:[%s4169_s28 + $0x1168] sm:$0xff] }
 0x133   : > { %2447 = vmatpush.msrb.mxu0 %v731_v51  ;;  %2466 = vmatpush.msrb.mxu1 %v748_v52  ;;  %v846_v51 = vld [vmem:[%s4169_s28 + $0x11f0] sm:$0xff]  ;;  %v796_v52 = vld [vmem:[%s4169_s28 + $0x1060] sm:$0xff] }
 0x134   : > { %2487 = vmatpush.msrb.mxu2 %v763_v53  ;;  %2506 = vmatpush.msrb.mxu3 %v780_v54  ;;  %v813_v53 = vld [vmem:[%s4169_s28 + $0x10e8] sm:$0xff]  ;;  %v828_v54 = vld [vmem:[%s4169_s28 + $0x1160] sm:$0xff] }
 0x135   : > { %2448 = vmatpush.msrb.mxu0 %v730_v55  ;;  %2467 = vmatpush.msrb.mxu1 %v747_v56  ;;  %v845_v55 = vld [vmem:[%s4169_s28 + $0x11e8] sm:$0xff]  ;;  %v795_v56 = vld [vmem:[%s4169_s28 + $0x1058] sm:$0xff] }
 0x136   : > { %2488 = vmatpush.msrb.mxu2 %v762_v57  ;;  %2507 = vmatpush.msrb.mxu3 %v779_v58  ;;  %v812_v57 = vld [vmem:[%s4169_s28 + $0x10e0] sm:$0xff]  ;;  %v827_v58 = vld [vmem:[%s4169_s28 + $0x1158] sm:$0xff] }
 0x137   : > { %2449 = vmatpush.msrb.mxu0 %v729_v59  ;;  %2468 = vmatpush.msrb.mxu1 %v746_v60  ;;  %v844_v59 = vld [vmem:[%s4169_s28 + $0x11e0] sm:$0xff]  ;;  %v794_v60 = vld [vmem:[%s4169_s28 + $0x1050] sm:$0xff] }
 0x138   : > { %2489 = vmatpush.msrb.mxu2 %v761_v61  ;;  %2508 = vmatpush.msrb.mxu3 %v778_v62  ;;  %v811_v61 = vld [vmem:[%s4169_s28 + $0x10d8] sm:$0xff]  ;;  %v826_v62 = vld [vmem:[%s4169_s28 + $0x1150] sm:$0xff] }
 0x139   : > { %2450 = vmatpush.msrb.mxu0 %v728_v63  ;;  %2469 = vmatpush.msrb.mxu1 %v745_v0  ;;  %v843_v63 = vld [vmem:[%s4169_s28 + $0x11d8] sm:$0xff]  ;;  %v793_v0 = vld [vmem:[%s4169_s28 + $0x1048] sm:$0xff] }
 0x13a   : > { %2490 = vmatpush.msrb.mxu2 %v760_v1  ;;  %2509 = vmatpush.msrb.mxu3 %v777_v2  ;;  %v810_v1 = vld [vmem:[%s4169_s28 + $0x10d0] sm:$0xff]  ;;  %v825_v2 = vld [vmem:[%s4169_s28 + $0x1148] sm:$0xff] }
 0x13b   : > { %2451 = vmatpush.msrb.mxu0 %v727_v3  ;;  %2470 = vmatpush.msrb.mxu1 %v744_v4  ;;  %v842_v3 = vld [vmem:[%s4169_s28 + $0x11d0] sm:$0xff]  ;;  %v792_v4 = vld [vmem:[%s4169_s28 + $0x1040] sm:$0xff] }
 0x13c   : > { %2491 = vmatpush.msrb.mxu2 %v759_v5  ;;  %2510 = vmatpush.msrb.mxu3 %v776_v6  ;;  %v809_v5 = vld [vmem:[%s4169_s28 + $0x10c8] sm:$0xff]  ;;  %v824_v6 = vld [vmem:[%s4169_s28 + $0x1140] sm:$0xff] }
 0x13d   : > { %2452 = vmatpush.msrb.mxu0 %v726_v7  ;;  %2471 = vmatpush.msrb.mxu1 %v743_v8  ;;  %v841_v7 = vld [vmem:[%s4169_s28 + $0x11c8] sm:$0xff]  ;;  %v791_v8 = vld [vmem:[%s4169_s28 + $0x1038] sm:$0xff] }
 0x13e   : > { %2492 = vmatpush.msrb.mxu2 %v758_v9  ;;  %2511 = vmatpush.msrb.mxu3 %v775_v10  ;;  %v808_v9 = vld [vmem:[%s4169_s28 + $0x10c0] sm:$0xff]  ;;  %v823_v10 = vld [vmem:[%s4169_s28 + $0x1138] sm:$0xff] }
 0x13f   : > { %2453 = vmatpush.msrb.mxu0 %v725_v11  ;;  %2472 = vmatpush.msrb.mxu1 %v742_v12  ;;  %v840_v11 = vld [vmem:[%s4169_s28 + $0x11c0] sm:$0xff]  ;;  %v790_v12 = vld [vmem:[%s4169_s28 + $0x1030] sm:$0xff] }
 0x140   : > { %2493 = vmatpush.msrb.mxu2 %v757_v13  ;;  %2512 = vmatpush.msrb.mxu3 %v774_v14  ;;  %v807_v13 = vld [vmem:[%s4169_s28 + $0x10b8] sm:$0xff]  ;;  %v822_v14 = vld [vmem:[%s4169_s28 + $0x1130] sm:$0xff] }
 0x141   : > { %2454 = vmatpush.msrb.mxu0 %v724_v15  ;;  %2473 = vmatpush.msrb.mxu1 %v741_v16  ;;  %v839_v15 = vld [vmem:[%s4169_s28 + $0x11b8] sm:$0xff]  ;;  %v789_v16 = vld [vmem:[%s4169_s28 + $0x1028] sm:$0xff] }
 0x142   : > { %2494 = vmatpush.msrb.mxu2 %v756_v17  ;;  %2513 = vmatpush.msrb.mxu3 %v773_v18  ;;  %v806_v17 = vld [vmem:[%s4169_s28 + $0x10b0] sm:$0xff]  ;;  %v821_v18 = vld [vmem:[%s4169_s28 + $0x1128] sm:$0xff] }
 0x143   : > { %2455 = vmatpush.msrb.mxu0 %v723_v19  ;;  %2474 = vmatpush.msrb.mxu1 %v740_v20  ;;  %v838_v19 = vld [vmem:[%s4169_s28 + $0x11b0] sm:$0xff]  ;;  %v788_v20 = vld [vmem:[%s4169_s28 + $0x1020] sm:$0xff] }
 0x144   : > { %2495 = vmatpush.msrb.mxu2 %v755_v21  ;;  %2514 = vmatpush.msrb.mxu3 %v772_v22  ;;  %v805_v21 = vld [vmem:[%s4169_s28 + $0x10a8] sm:$0xff]  ;;  %v820_v22 = vld [vmem:[%s4169_s28 + $0x1120] sm:$0xff] }
 0x145   : > { %2456 = vmatpush.msrb.mxu0 %v722_v23  ;;  %2475 = vmatpush.msrb.mxu1 %v739_v24  ;;  %v837_v23 = vld [vmem:[%s4169_s28 + $0x11a8] sm:$0xff]  ;;  %v787_v24 = vld [vmem:[%s4169_s28 + $0x1018] sm:$0xff] }
 0x146   : > { %2496 = vmatpush.msrb.mxu2 %v754_v25  ;;  %2515 = vmatpush.msrb.mxu3 %v771_v26  ;;  %v804_v25 = vld [vmem:[%s4169_s28 + $0x10a0] sm:$0xff]  ;;  %v819_v26 = vld [vmem:[%s4169_s28 + $0x1118] sm:$0xff] }
 0x147   : > { %2457 = vmatpush.msrb.mxu0 %v721_v27  ;;  %2476 = vmatpush.msrb.mxu1 %v738_v28  ;;  %v836_v27 = vld [vmem:[%s4169_s28 + $0x11a0] sm:$0xff]  ;;  %v786_v28 = vld [vmem:[%s4169_s28 + $0x1010] sm:$0xff] }
 0x148   : > { %2497 = vmatpush.msrb.mxu2 %v753_v30  ;;  %2516 = vmatpush.msrb.mxu3 %v770_v32  ;;  %v818_v30 = vld [vmem:[%s4169_s28 + $0x1110] sm:$0xff]  ;;  %v835_v32 = vld [vmem:[%s4169_s28 + $0x1198] sm:$0xff] }
 0x149   : > { %2458 = vmatpush.msrb.mxu0 %v720_v33  ;;  %2477 = vmatpush.msrb.mxu1 %v737_v35  ;;  %v785_v33 = vld [vmem:[%s4169_s28 + $0x1008] sm:$0xff]  ;;  %v802_v35 = vld [vmem:[%s4169_s28 + $0x1090] sm:$0xff] }
 0x14a   : > { %2498 = vmatpush.msrb.mxu2 %v752_v36  ;;  %2517 = vmatpush.msrb.mxu3 %v769_v31  ;;  %v259_v36 = vld [vmem:[%s4190_s6 + $0x48] sm:$0xff]  ;;  %v817_v31 = vld [vmem:[%s4169_s28 + $0x1108] sm:$0xff] }
 0x14b   : > { %2459 = vmatmul.f32.vlgmr.msrb.gmra.mxu0 %v1723_v34  ;;  %2499 = vmatmul.f32.vlgmr.msrb.gmra.mxu2 %v1725_v37  ;;  %v834_v34 = vld [vmem:[%s4169_s28 + $0x1190] sm:$0xff]  ;;  %1728 = vst [vmem:[#allocation1 + $0x20] ss:$4 sm:$0xff] %v259_v36  ;;  %v784_v37 = vld [vmem:[%s4169_s28 + $0x1000] sm:$0xff]  ;;  %v867_v36 = vld [vmem:[%s4169_s28 + $0x1298] sm:$0xff] }
 0x14c   : > { %2523 = vmatpush.msra.mxu0 %v799_v38  ;;  %2563 = vmatpush.msra.mxu2 %v831_v39  ;;  %v801_v38 = vld [vmem:[%s4169_s28 + $0x1088] sm:$0xff]  ;;  %v816_v39 = vld [vmem:[%s4169_s28 + $0x1100] sm:$0xff] }
 0x14d   : > { %2478 = vmatpush.msrb.mxu1 %v736_v40  ;;  %2518 = vmatpush.msrb.mxu3 %v768_v41  ;;  %v833_v40 = vld [vmem:[%s4169_s28 + $0x1188] sm:$0xff]  ;;  %v1729_v41 = vld.sshfl [vmem:[#allocation1] sm:$0xff pattern:$0x73625140] }
 0x14e   : > { %2479 = vmatmul.f32.vlgmr.msrb.gmra.mxu1 %v1724_v42  ;;  %2519 = vmatmul.f32.vlgmr.msrb.gmra.mxu3 %v1726_v43  ;;  %v1731_v42 = vld.sshfl [vmem:[#allocation1 + $0x10] sm:$0xff pattern:$0x73625140]  ;;  %v863_v43 = vld [vmem:[%s4169_s28 + $0x1278] sm:$0xff] }
 0x14f   : > { %2524 = vmatpush.msra.mxu0 %v798_v44  ;;  %2543 = vmatpush.msra.mxu1 %v815_v45  ;;  %v895_v44 = vld [vmem:[%s4169_s28 + $0x1378] sm:$0xff]  ;;  %v800_v45 = vld [vmem:[%s4169_s28 + $0x1080] sm:$0xff] }
 0x150   : > { %2564 = vmatpush.msra.mxu2 %v830_v46  ;;  %2583 = vmatpush.msra.mxu3 %v847_v47  ;;  %v832_v46 = vld [vmem:[%s4169_s28 + $0x1180] sm:$0xff] }
 0x151   : > { %2525 = vmatpush.msra.mxu0 %v797_v48  ;;  %2544 = vmatpush.msra.mxu1 %v814_v49  ;;  %v1730_v47 = vld.sshfl [vmem:[#allocation1 + $0x8] sm:$0xff pattern:$0x73625140]  ;;  %v1732_v48 = vld.sshfl [vmem:[#allocation1 + $0x18] sm:$0xff pattern:$0x73625140] }
 0x152   : > { %2565 = vmatpush.msra.mxu2 %v829_v50  ;;  %2584 = vmatpush.msra.mxu3 %v846_v51  ;;  %v862_v49 = vld [vmem:[%s4169_s28 + $0x1270] sm:$0xff]  ;;  %v879_v50 = vld [vmem:[%s4169_s28 + $0x12f8] sm:$0xff] }
 0x153   : > { %2526 = vmatpush.msra.mxu0 %v796_v52  ;;  %2545 = vmatpush.msra.mxu1 %v813_v53  ;;  %v894_v51 = vld [vmem:[%s4169_s28 + $0x1370] sm:$0xff]  ;;  %v911_v52 = vld [vmem:[%s4169_s28 + $0x13f8] sm:$0xff]  ;;  %v861_v53 = vld [vmem:[%s4169_s28 + $0x1268] sm:$0xff] }
 0x154   : > { %2566 = vmatpush.msra.mxu2 %v828_v54  ;;  %2585 = vmatpush.msra.mxu3 %v845_v55  ;;  %v878_v54 = vld [vmem:[%s4169_s28 + $0x12f0] sm:$0xff]  ;;  %v893_v55 = vld [vmem:[%s4169_s28 + $0x1368] sm:$0xff] }
 0x155   : > { %2527 = vmatpush.msra.mxu0 %v795_v56  ;;  %2546 = vmatpush.msra.mxu1 %v812_v57  ;;  %v910_v56 = vld [vmem:[%s4169_s28 + $0x13f0] sm:$0xff]  ;;  %v860_v57 = vld [vmem:[%s4169_s28 + $0x1260] sm:$0xff] }
 0x156   : > { %2567 = vmatpush.msra.mxu2 %v827_v58  ;;  %2586 = vmatpush.msra.mxu3 %v844_v59  ;;  %v877_v58 = vld [vmem:[%s4169_s28 + $0x12e8] sm:$0xff]  ;;  %v892_v59 = vld [vmem:[%s4169_s28 + $0x1360] sm:$0xff] }
 0x157   : > { %2528 = vmatpush.msra.mxu0 %v794_v60  ;;  %2547 = vmatpush.msra.mxu1 %v811_v61  ;;  %v909_v60 = vld [vmem:[%s4169_s28 + $0x13e8] sm:$0xff]  ;;  %v859_v61 = vld [vmem:[%s4169_s28 + $0x1258] sm:$0xff] }
 0x158   : > { %2568 = vmatpush.msra.mxu2 %v826_v62  ;;  %2587 = vmatpush.msra.mxu3 %v843_v63  ;;  %v876_v62 = vld [vmem:[%s4169_s28 + $0x12e0] sm:$0xff]  ;;  %v891_v63 = vld [vmem:[%s4169_s28 + $0x1358] sm:$0xff] }
 0x159   : > { %2529 = vmatpush.msra.mxu0 %v793_v0  ;;  %2548 = vmatpush.msra.mxu1 %v810_v1  ;;  %v908_v0 = vld [vmem:[%s4169_s28 + $0x13e0] sm:$0xff]  ;;  %v858_v1 = vld [vmem:[%s4169_s28 + $0x1250] sm:$0xff] }
 0x15a   : > { %2569 = vmatpush.msra.mxu2 %v825_v2  ;;  %2588 = vmatpush.msra.mxu3 %v842_v3  ;;  %v875_v2 = vld [vmem:[%s4169_s28 + $0x12d8] sm:$0xff]  ;;  %v890_v3 = vld [vmem:[%s4169_s28 + $0x1350] sm:$0xff] }
 0x15b   : > { %2530 = vmatpush.msra.mxu0 %v792_v4  ;;  %2549 = vmatpush.msra.mxu1 %v809_v5  ;;  %v907_v4 = vld [vmem:[%s4169_s28 + $0x13d8] sm:$0xff]  ;;  %v857_v5 = vld [vmem:[%s4169_s28 + $0x1248] sm:$0xff] }
 0x15c   : > { %2570 = vmatpush.msra.mxu2 %v824_v6  ;;  %2589 = vmatpush.msra.mxu3 %v841_v7  ;;  %v874_v6 = vld [vmem:[%s4169_s28 + $0x12d0] sm:$0xff]  ;;  %v889_v7 = vld [vmem:[%s4169_s28 + $0x1348] sm:$0xff] }
 0x15d   : > { %2531 = vmatpush.msra.mxu0 %v791_v8  ;;  %2550 = vmatpush.msra.mxu1 %v808_v9  ;;  %v906_v8 = vld [vmem:[%s4169_s28 + $0x13d0] sm:$0xff]  ;;  %v856_v9 = vld [vmem:[%s4169_s28 + $0x1240] sm:$0xff] }
 0x15e   : > { %2571 = vmatpush.msra.mxu2 %v823_v10  ;;  %2590 = vmatpush.msra.mxu3 %v840_v11  ;;  %v873_v10 = vld [vmem:[%s4169_s28 + $0x12c8] sm:$0xff]  ;;  %v888_v11 = vld [vmem:[%s4169_s28 + $0x1340] sm:$0xff] }
 0x15f   : > { %2532 = vmatpush.msra.mxu0 %v790_v12  ;;  %2551 = vmatpush.msra.mxu1 %v807_v13  ;;  %v905_v12 = vld [vmem:[%s4169_s28 + $0x13c8] sm:$0xff]  ;;  %v855_v13 = vld [vmem:[%s4169_s28 + $0x1238] sm:$0xff] }
 0x160   : > { %2572 = vmatpush.msra.mxu2 %v822_v14  ;;  %2591 = vmatpush.msra.mxu3 %v839_v15  ;;  %v872_v14 = vld [vmem:[%s4169_s28 + $0x12c0] sm:$0xff]  ;;  %v887_v15 = vld [vmem:[%s4169_s28 + $0x1338] sm:$0xff] }
 0x161   : > { %2533 = vmatpush.msra.mxu0 %v789_v16  ;;  %2552 = vmatpush.msra.mxu1 %v806_v17  ;;  %v904_v16 = vld [vmem:[%s4169_s28 + $0x13c0] sm:$0xff]  ;;  %v854_v17 = vld [vmem:[%s4169_s28 + $0x1230] sm:$0xff] }
 0x162   : > { %2573 = vmatpush.msra.mxu2 %v821_v18  ;;  %2592 = vmatpush.msra.mxu3 %v838_v19  ;;  %v871_v18 = vld [vmem:[%s4169_s28 + $0x12b8] sm:$0xff]  ;;  %v886_v19 = vld [vmem:[%s4169_s28 + $0x1330] sm:$0xff] }
 0x163   : > { %2534 = vmatpush.msra.mxu0 %v788_v20  ;;  %2553 = vmatpush.msra.mxu1 %v805_v21  ;;  %v903_v20 = vld [vmem:[%s4169_s28 + $0x13b8] sm:$0xff]  ;;  %v853_v21 = vld [vmem:[%s4169_s28 + $0x1228] sm:$0xff] }
 0x164   : > { %2574 = vmatpush.msra.mxu2 %v820_v22  ;;  %2593 = vmatpush.msra.mxu3 %v837_v23  ;;  %v870_v22 = vld [vmem:[%s4169_s28 + $0x12b0] sm:$0xff]  ;;  %v885_v23 = vld [vmem:[%s4169_s28 + $0x1328] sm:$0xff] }
 0x165   : > { %2535 = vmatpush.msra.mxu0 %v787_v24  ;;  %2554 = vmatpush.msra.mxu1 %v804_v25  ;;  %v902_v24 = vld [vmem:[%s4169_s28 + $0x13b0] sm:$0xff]  ;;  %v852_v25 = vld [vmem:[%s4169_s28 + $0x1220] sm:$0xff] }
 0x166   : > { %2575 = vmatpush.msra.mxu2 %v819_v26  ;;  %2594 = vmatpush.msra.mxu3 %v836_v27  ;;  %v869_v26 = vld [vmem:[%s4169_s28 + $0x12a8] sm:$0xff]  ;;  %v884_v27 = vld [vmem:[%s4169_s28 + $0x1320] sm:$0xff] }
 0x167   : > { %2536 = vmatpush.msra.mxu0 %v786_v28  ;;  %2555 = vmatpush.msra.mxu1 %v803_v29  ;;  %v901_v28 = vld [vmem:[%s4169_s28 + $0x13a8] sm:$0xff]  ;;  %v851_v29 = vld [vmem:[%s4169_s28 + $0x1218] sm:$0xff] }
 0x168   : > { %2576 = vmatpush.msra.mxu2 %v818_v30  ;;  %2595 = vmatpush.msra.mxu3 %v835_v32  ;;  %v868_v30 = vld [vmem:[%s4169_s28 + $0x12a0] sm:$0xff]  ;;  %v883_v32 = vld [vmem:[%s4169_s28 + $0x1318] sm:$0xff] }
 0x169   : > { %2537 = vmatpush.msra.mxu0 %v785_v33  ;;  %2556 = vmatpush.msra.mxu1 %v802_v35  ;;  %v900_v33 = vld [vmem:[%s4169_s28 + $0x13a0] sm:$0xff]  ;;  %v850_v35 = vld [vmem:[%s4169_s28 + $0x1210] sm:$0xff] }
 0x16a   : > { %2577 = vmatpush.msra.mxu2 %v817_v31  ;;  %2596 = vmatpush.msra.mxu3 %v834_v34  ;;  %v882_v31 = vld [vmem:[%s4169_s28 + $0x1310] sm:$0xff]  ;;  %v899_v34 = vld [vmem:[%s4169_s28 + $0x1398] sm:$0xff] }
 0x16b   : > { %2538 = vmatpush.msra.mxu0 %v784_v37  ;;  %2557 = vmatpush.msra.mxu1 %v801_v38  ;;  %v849_v37 = vld [vmem:[%s4169_s28 + $0x1208] sm:$0xff]  ;;  %v866_v38 = vld [vmem:[%s4169_s28 + $0x1290] sm:$0xff] }
 0x16c   : > { %2578 = vmatpush.msra.mxu2 %v816_v39  ;;  %2597 = vmatpush.msra.mxu3 %v833_v40  ;;  %v260_v39 = vld [vmem:[%s4190_s6 + $0x50] sm:$0xff] }
 0x16d   : > { %2539 = vmatmul.f32.vlgmr.msra.gmra.mxu0 %v1729_v41  ;;  %2579 = vmatmul.f32.vlgmr.msra.gmra.mxu2 %v1731_v42  ;;  %v881_v40 = vld [vmem:[%s4169_s28 + $0x1308] sm:$0xff]  ;;  %v898_v41 = vld [vmem:[%s4169_s28 + $0x1390] sm:$0xff]  ;;  %1737 = vst [vmem:[#allocation1] ss:$4 sm:$0xff] %v260_v39  ;;  %v848_v42 = vld [vmem:[%s4169_s28 + $0x1200] sm:$0xff] }
 0x16e   : > { %2603 = vmatpush.msrb.mxu0 %v863_v43  ;;  %2643 = vmatpush.msrb.mxu2 %v895_v44  ;;  %v865_v43 = vld [vmem:[%s4169_s28 + $0x1288] sm:$0xff]  ;;  %v880_v44 = vld [vmem:[%s4169_s28 + $0x1300] sm:$0xff]  ;;  %v931_v39 = vld [vmem:[%s4169_s28 + $0x1498] sm:$0xff] }
 0x16f   : > { %2558 = vmatpush.msra.mxu1 %v800_v45  ;;  %2598 = vmatpush.msra.mxu3 %v832_v46  ;;  %v897_v45 = vld [vmem:[%s4169_s28 + $0x1388] sm:$0xff]  ;;  %v1733_v46 = vld.sshfl [vmem:[#allocation1 + $0x20] sm:$0xff pattern:$0x73625140] }
 0x170   : > { %2559 = vmatmul.f32.vlgmr.msra.gmra.mxu1 %v1730_v47  ;;  %2599 = vmatmul.f32.vlgmr.msra.gmra.mxu3 %v1732_v48  ;;  %v1735_v47 = vld.sshfl [vmem:[#allocation1 + $0x30] sm:$0xff pattern:$0x73625140]  ;;  %v927_v48 = vld [vmem:[%s4169_s28 + $0x1478] sm:$0xff] }
 0x171   : > { %2604 = vmatpush.msrb.mxu0 %v862_v49  ;;  %2623 = vmatpush.msrb.mxu1 %v879_v50  ;;  %v959_v49 = vld [vmem:[%s4169_s28 + $0x1578] sm:$0xff]  ;;  %v864_v50 = vld [vmem:[%s4169_s28 + $0x1280] sm:$0xff] }
 0x172   : > { %2644 = vmatpush.msrb.mxu2 %v894_v51  ;;  %2663 = vmatpush.msrb.mxu3 %v911_v52  ;;  %v896_v51 = vld [vmem:[%s4169_s28 + $0x1380] sm:$0xff] }
 0x173   : > { %2605 = vmatpush.msrb.mxu0 %v861_v53  ;;  %2624 = vmatpush.msrb.mxu1 %v878_v54  ;;  %v1734_v52 = vld.sshfl [vmem:[#allocation1 + $0x28] sm:$0xff pattern:$0x73625140]  ;;  %v1736_v53 = vld.sshfl [vmem:[#allocation1 + $0x38] sm:$0xff pattern:$0x73625140] }
 0x174   : > { %2645 = vmatpush.msrb.mxu2 %v893_v55  ;;  %2664 = vmatpush.msrb.mxu3 %v910_v56  ;;  %v926_v54 = vld [vmem:[%s4169_s28 + $0x1470] sm:$0xff]  ;;  %v943_v55 = vld [vmem:[%s4169_s28 + $0x14f8] sm:$0xff] }
 0x175   : > { %2606 = vmatpush.msrb.mxu0 %v860_v57  ;;  %2625 = vmatpush.msrb.mxu1 %v877_v58  ;;  %v958_v56 = vld [vmem:[%s4169_s28 + $0x1570] sm:$0xff]  ;;  %v975_v57 = vld [vmem:[%s4169_s28 + $0x15f8] sm:$0xff]  ;;  %v925_v58 = vld [vmem:[%s4169_s28 + $0x1468] sm:$0xff] }
 0x176   : > { %2646 = vmatpush.msrb.mxu2 %v892_v59  ;;  %2665 = vmatpush.msrb.mxu3 %v909_v60  ;;  %v942_v59 = vld [vmem:[%s4169_s28 + $0x14f0] sm:$0xff]  ;;  %v957_v60 = vld [vmem:[%s4169_s28 + $0x1568] sm:$0xff] }
 0x177   : > { %2607 = vmatpush.msrb.mxu0 %v859_v61  ;;  %2626 = vmatpush.msrb.mxu1 %v876_v62  ;;  %v974_v61 = vld [vmem:[%s4169_s28 + $0x15f0] sm:$0xff]  ;;  %v924_v62 = vld [vmem:[%s4169_s28 + $0x1460] sm:$0xff] }
 0x178   : > { %2647 = vmatpush.msrb.mxu2 %v891_v63  ;;  %2666 = vmatpush.msrb.mxu3 %v908_v0  ;;  %v941_v63 = vld [vmem:[%s4169_s28 + $0x14e8] sm:$0xff]  ;;  %v956_v0 = vld [vmem:[%s4169_s28 + $0x1560] sm:$0xff] }
 0x179   : > { %2608 = vmatpush.msrb.mxu0 %v858_v1  ;;  %2627 = vmatpush.msrb.mxu1 %v875_v2  ;;  %v973_v1 = vld [vmem:[%s4169_s28 + $0x15e8] sm:$0xff]  ;;  %v923_v2 = vld [vmem:[%s4169_s28 + $0x1458] sm:$0xff] }
 0x17a   : > { %2648 = vmatpush.msrb.mxu2 %v890_v3  ;;  %2667 = vmatpush.msrb.mxu3 %v907_v4  ;;  %v940_v3 = vld [vmem:[%s4169_s28 + $0x14e0] sm:$0xff]  ;;  %v955_v4 = vld [vmem:[%s4169_s28 + $0x1558] sm:$0xff] }
 0x17b   : > { %2609 = vmatpush.msrb.mxu0 %v857_v5  ;;  %2628 = vmatpush.msrb.mxu1 %v874_v6  ;;  %v972_v5 = vld [vmem:[%s4169_s28 + $0x15e0] sm:$0xff]  ;;  %v922_v6 = vld [vmem:[%s4169_s28 + $0x1450] sm:$0xff] }
 0x17c   : > { %2649 = vmatpush.msrb.mxu2 %v889_v7  ;;  %2668 = vmatpush.msrb.mxu3 %v906_v8  ;;  %v939_v7 = vld [vmem:[%s4169_s28 + $0x14d8] sm:$0xff]  ;;  %v954_v8 = vld [vmem:[%s4169_s28 + $0x1550] sm:$0xff] }
 0x17d   : > { %2610 = vmatpush.msrb.mxu0 %v856_v9  ;;  %2629 = vmatpush.msrb.mxu1 %v873_v10  ;;  %v971_v9 = vld [vmem:[%s4169_s28 + $0x15d8] sm:$0xff]  ;;  %v921_v10 = vld [vmem:[%s4169_s28 + $0x1448] sm:$0xff] }
 0x17e   : > { %2650 = vmatpush.msrb.mxu2 %v888_v11  ;;  %2669 = vmatpush.msrb.mxu3 %v905_v12  ;;  %v938_v11 = vld [vmem:[%s4169_s28 + $0x14d0] sm:$0xff]  ;;  %v953_v12 = vld [vmem:[%s4169_s28 + $0x1548] sm:$0xff] }
 0x17f   : > { %2611 = vmatpush.msrb.mxu0 %v855_v13  ;;  %2630 = vmatpush.msrb.mxu1 %v872_v14  ;;  %v970_v13 = vld [vmem:[%s4169_s28 + $0x15d0] sm:$0xff]  ;;  %v920_v14 = vld [vmem:[%s4169_s28 + $0x1440] sm:$0xff] }
 0x180   : > { %2651 = vmatpush.msrb.mxu2 %v887_v15  ;;  %2670 = vmatpush.msrb.mxu3 %v904_v16  ;;  %v937_v15 = vld [vmem:[%s4169_s28 + $0x14c8] sm:$0xff]  ;;  %v952_v16 = vld [vmem:[%s4169_s28 + $0x1540] sm:$0xff] }
 0x181   : > { %2612 = vmatpush.msrb.mxu0 %v854_v17  ;;  %2631 = vmatpush.msrb.mxu1 %v871_v18  ;;  %v969_v17 = vld [vmem:[%s4169_s28 + $0x15c8] sm:$0xff]  ;;  %v919_v18 = vld [vmem:[%s4169_s28 + $0x1438] sm:$0xff] }
 0x182   : > { %2652 = vmatpush.msrb.mxu2 %v886_v19  ;;  %2671 = vmatpush.msrb.mxu3 %v903_v20  ;;  %v936_v19 = vld [vmem:[%s4169_s28 + $0x14c0] sm:$0xff]  ;;  %v951_v20 = vld [vmem:[%s4169_s28 + $0x1538] sm:$0xff] }
 0x183   : > { %2613 = vmatpush.msrb.mxu0 %v853_v21  ;;  %2632 = vmatpush.msrb.mxu1 %v870_v22  ;;  %v968_v21 = vld [vmem:[%s4169_s28 + $0x15c0] sm:$0xff]  ;;  %v918_v22 = vld [vmem:[%s4169_s28 + $0x1430] sm:$0xff] }
 0x184   : > { %2653 = vmatpush.msrb.mxu2 %v885_v23  ;;  %2672 = vmatpush.msrb.mxu3 %v902_v24  ;;  %v935_v23 = vld [vmem:[%s4169_s28 + $0x14b8] sm:$0xff]  ;;  %v950_v24 = vld [vmem:[%s4169_s28 + $0x1530] sm:$0xff] }
 0x185   : > { %2614 = vmatpush.msrb.mxu0 %v852_v25  ;;  %2633 = vmatpush.msrb.mxu1 %v869_v26  ;;  %v967_v25 = vld [vmem:[%s4169_s28 + $0x15b8] sm:$0xff]  ;;  %v917_v26 = vld [vmem:[%s4169_s28 + $0x1428] sm:$0xff] }
 0x186   : > { %2654 = vmatpush.msrb.mxu2 %v884_v27  ;;  %2673 = vmatpush.msrb.mxu3 %v901_v28  ;;  %v934_v27 = vld [vmem:[%s4169_s28 + $0x14b0] sm:$0xff]  ;;  %v949_v28 = vld [vmem:[%s4169_s28 + $0x1528] sm:$0xff] }
 0x187   : > { %2615 = vmatpush.msrb.mxu0 %v851_v29  ;;  %2634 = vmatpush.msrb.mxu1 %v868_v30  ;;  %v966_v29 = vld [vmem:[%s4169_s28 + $0x15b0] sm:$0xff]  ;;  %v916_v30 = vld [vmem:[%s4169_s28 + $0x1420] sm:$0xff] }
 0x188   : > { %2655 = vmatpush.msrb.mxu2 %v883_v32  ;;  %2674 = vmatpush.msrb.mxu3 %v900_v33  ;;  %v933_v32 = vld [vmem:[%s4169_s28 + $0x14a8] sm:$0xff]  ;;  %v948_v33 = vld [vmem:[%s4169_s28 + $0x1520] sm:$0xff] }
 0x189   : > { %2616 = vmatpush.msrb.mxu0 %v850_v35  ;;  %2635 = vmatpush.msrb.mxu1 %v867_v36  ;;  %v965_v35 = vld [vmem:[%s4169_s28 + $0x15a8] sm:$0xff]  ;;  %v915_v36 = vld [vmem:[%s4169_s28 + $0x1418] sm:$0xff] }
 0x18a   : > { %2656 = vmatpush.msrb.mxu2 %v882_v31  ;;  %2675 = vmatpush.msrb.mxu3 %v899_v34  ;;  %v932_v31 = vld [vmem:[%s4169_s28 + $0x14a0] sm:$0xff]  ;;  %v947_v34 = vld [vmem:[%s4169_s28 + $0x1518] sm:$0xff] }
 0x18b   : > { %2617 = vmatpush.msrb.mxu0 %v849_v37  ;;  %2636 = vmatpush.msrb.mxu1 %v866_v38  ;;  %v964_v37 = vld [vmem:[%s4169_s28 + $0x15a0] sm:$0xff]  ;;  %v914_v38 = vld [vmem:[%s4169_s28 + $0x1410] sm:$0xff] }
 0x18c   : > { %2657 = vmatpush.msrb.mxu2 %v881_v40  ;;  %2676 = vmatpush.msrb.mxu3 %v898_v41  ;;  %v946_v40 = vld [vmem:[%s4169_s28 + $0x1510] sm:$0xff]  ;;  %v963_v41 = vld [vmem:[%s4169_s28 + $0x1598] sm:$0xff] }
 0x18d   : > { %2618 = vmatpush.msrb.mxu0 %v848_v42  ;;  %2637 = vmatpush.msrb.mxu1 %v865_v43  ;;  %v913_v42 = vld [vmem:[%s4169_s28 + $0x1408] sm:$0xff]  ;;  %v930_v43 = vld [vmem:[%s4169_s28 + $0x1490] sm:$0xff] }
 0x18e   : > { %2658 = vmatpush.msrb.mxu2 %v880_v44  ;;  %2677 = vmatpush.msrb.mxu3 %v897_v45  ;;  %v261_v44 = vld [vmem:[%s4190_s6 + $0x58] sm:$0xff]  ;;  %v945_v45 = vld [vmem:[%s4169_s28 + $0x1508] sm:$0xff] }
 0x18f   : > { %2619 = vmatmul.f32.vlgmr.msrb.gmra.mxu0 %v1733_v46  ;;  %2659 = vmatmul.f32.vlgmr.msrb.gmra.mxu2 %v1735_v47  ;;  %v962_v46 = vld [vmem:[%s4169_s28 + $0x1590] sm:$0xff]  ;;  %1738 = vst [vmem:[#allocation1 + $0x20] ss:$4 sm:$0xff] %v261_v44  ;;  %v912_v47 = vld [vmem:[%s4169_s28 + $0x1400] sm:$0xff]  ;;  %v995_v44 = vld [vmem:[%s4169_s28 + $0x1698] sm:$0xff] }
 0x190   : > { %2683 = vmatpush.msra.mxu0 %v927_v48  ;;  %2723 = vmatpush.msra.mxu2 %v959_v49  ;;  %v929_v48 = vld [vmem:[%s4169_s28 + $0x1488] sm:$0xff]  ;;  %v944_v49 = vld [vmem:[%s4169_s28 + $0x1500] sm:$0xff] }
 0x191   : > { %2638 = vmatpush.msrb.mxu1 %v864_v50  ;;  %2678 = vmatpush.msrb.mxu3 %v896_v51  ;;  %v961_v50 = vld [vmem:[%s4169_s28 + $0x1588] sm:$0xff]  ;;  %v1739_v51 = vld.sshfl [vmem:[#allocation1] sm:$0xff pattern:$0x73625140] }
 0x192   : > { %2639 = vmatmul.f32.vlgmr.msrb.gmra.mxu1 %v1734_v52  ;;  %2679 = vmatmul.f32.vlgmr.msrb.gmra.mxu3 %v1736_v53  ;;  %v1741_v52 = vld.sshfl [vmem:[#allocation1 + $0x10] sm:$0xff pattern:$0x73625140]  ;;  %v991_v53 = vld [vmem:[%s4169_s28 + $0x1678] sm:$0xff] }
 0x193   : > { %2684 = vmatpush.msra.mxu0 %v926_v54  ;;  %2703 = vmatpush.msra.mxu1 %v943_v55  ;;  %v1023_v54 = vld [vmem:[%s4169_s28 + $0x1778] sm:$0xff]  ;;  %v928_v55 = vld [vmem:[%s4169_s28 + $0x1480] sm:$0xff] }
 0x194   : > { %2724 = vmatpush.msra.mxu2 %v958_v56  ;;  %2743 = vmatpush.msra.mxu3 %v975_v57  ;;  %v960_v56 = vld [vmem:[%s4169_s28 + $0x1580] sm:$0xff] }
 0x195   : > { %2685 = vmatpush.msra.mxu0 %v925_v58  ;;  %2704 = vmatpush.msra.mxu1 %v942_v59  ;;  %v1740_v57 = vld.sshfl [vmem:[#allocation1 + $0x8] sm:$0xff pattern:$0x73625140]  ;;  %v1742_v58 = vld.sshfl [vmem:[#allocation1 + $0x18] sm:$0xff pattern:$0x73625140] }
 0x196   : > { %2725 = vmatpush.msra.mxu2 %v957_v60  ;;  %2744 = vmatpush.msra.mxu3 %v974_v61  ;;  %v990_v59 = vld [vmem:[%s4169_s28 + $0x1670] sm:$0xff]  ;;  %v1007_v60 = vld [vmem:[%s4169_s28 + $0x16f8] sm:$0xff] }
 0x197   : > { %2686 = vmatpush.msra.mxu0 %v924_v62  ;;  %2705 = vmatpush.msra.mxu1 %v941_v63  ;;  %v1022_v61 = vld [vmem:[%s4169_s28 + $0x1770] sm:$0xff]  ;;  %v1039_v62 = vld [vmem:[%s4169_s28 + $0x17f8] sm:$0xff]  ;;  %v989_v63 = vld [vmem:[%s4169_s28 + $0x1668] sm:$0xff] }
 0x198   : > { %2726 = vmatpush.msra.mxu2 %v956_v0  ;;  %2745 = vmatpush.msra.mxu3 %v973_v1  ;;  %v1006_v0 = vld [vmem:[%s4169_s28 + $0x16f0] sm:$0xff]  ;;  %v1021_v1 = vld [vmem:[%s4169_s28 + $0x1768] sm:$0xff] }
 0x199   : > { %2687 = vmatpush.msra.mxu0 %v923_v2  ;;  %2706 = vmatpush.msra.mxu1 %v940_v3  ;;  %v1038_v2 = vld [vmem:[%s4169_s28 + $0x17f0] sm:$0xff]  ;;  %v988_v3 = vld [vmem:[%s4169_s28 + $0x1660] sm:$0xff] }
 0x19a   : > { %2727 = vmatpush.msra.mxu2 %v955_v4  ;;  %2746 = vmatpush.msra.mxu3 %v972_v5  ;;  %v1005_v4 = vld [vmem:[%s4169_s28 + $0x16e8] sm:$0xff]  ;;  %v1020_v5 = vld [vmem:[%s4169_s28 + $0x1760] sm:$0xff] }
 0x19b   : > { %2688 = vmatpush.msra.mxu0 %v922_v6  ;;  %2707 = vmatpush.msra.mxu1 %v939_v7  ;;  %v1037_v6 = vld [vmem:[%s4169_s28 + $0x17e8] sm:$0xff]  ;;  %v987_v7 = vld [vmem:[%s4169_s28 + $0x1658] sm:$0xff] }
 0x19c   : > { %2728 = vmatpush.msra.mxu2 %v954_v8  ;;  %2747 = vmatpush.msra.mxu3 %v971_v9  ;;  %v1004_v8 = vld [vmem:[%s4169_s28 + $0x16e0] sm:$0xff]  ;;  %v1019_v9 = vld [vmem:[%s4169_s28 + $0x1758] sm:$0xff] }
 0x19d   : > { %2689 = vmatpush.msra.mxu0 %v921_v10  ;;  %2708 = vmatpush.msra.mxu1 %v938_v11  ;;  %v1036_v10 = vld [vmem:[%s4169_s28 + $0x17e0] sm:$0xff]  ;;  %v986_v11 = vld [vmem:[%s4169_s28 + $0x1650] sm:$0xff] }
 0x19e   : > { %2729 = vmatpush.msra.mxu2 %v953_v12  ;;  %2748 = vmatpush.msra.mxu3 %v970_v13  ;;  %v1003_v12 = vld [vmem:[%s4169_s28 + $0x16d8] sm:$0xff]  ;;  %v1018_v13 = vld [vmem:[%s4169_s28 + $0x1750] sm:$0xff] }
 0x19f   : > { %2690 = vmatpush.msra.mxu0 %v920_v14  ;;  %2709 = vmatpush.msra.mxu1 %v937_v15  ;;  %v1035_v14 = vld [vmem:[%s4169_s28 + $0x17d8] sm:$0xff]  ;;  %v985_v15 = vld [vmem:[%s4169_s28 + $0x1648] sm:$0xff] }
 0x1a0   : > { %2730 = vmatpush.msra.mxu2 %v952_v16  ;;  %2749 = vmatpush.msra.mxu3 %v969_v17  ;;  %v1002_v16 = vld [vmem:[%s4169_s28 + $0x16d0] sm:$0xff]  ;;  %v1017_v17 = vld [vmem:[%s4169_s28 + $0x1748] sm:$0xff] }
 0x1a1   : > { %2691 = vmatpush.msra.mxu0 %v919_v18  ;;  %2710 = vmatpush.msra.mxu1 %v936_v19  ;;  %v1034_v18 = vld [vmem:[%s4169_s28 + $0x17d0] sm:$0xff]  ;;  %v984_v19 = vld [vmem:[%s4169_s28 + $0x1640] sm:$0xff] }
 0x1a2   : > { %2731 = vmatpush.msra.mxu2 %v951_v20  ;;  %2750 = vmatpush.msra.mxu3 %v968_v21  ;;  %v1001_v20 = vld [vmem:[%s4169_s28 + $0x16c8] sm:$0xff]  ;;  %v1016_v21 = vld [vmem:[%s4169_s28 + $0x1740] sm:$0xff] }
 0x1a3   : > { %2692 = vmatpush.msra.mxu0 %v918_v22  ;;  %2711 = vmatpush.msra.mxu1 %v935_v23  ;;  %v1033_v22 = vld [vmem:[%s4169_s28 + $0x17c8] sm:$0xff]  ;;  %v983_v23 = vld [vmem:[%s4169_s28 + $0x1638] sm:$0xff] }
 0x1a4   : > { %2732 = vmatpush.msra.mxu2 %v950_v24  ;;  %2751 = vmatpush.msra.mxu3 %v967_v25  ;;  %v1000_v24 = vld [vmem:[%s4169_s28 + $0x16c0] sm:$0xff]  ;;  %v1015_v25 = vld [vmem:[%s4169_s28 + $0x1738] sm:$0xff] }
 0x1a5   : > { %2693 = vmatpush.msra.mxu0 %v917_v26  ;;  %2712 = vmatpush.msra.mxu1 %v934_v27  ;;  %v1032_v26 = vld [vmem:[%s4169_s28 + $0x17c0] sm:$0xff]  ;;  %v982_v27 = vld [vmem:[%s4169_s28 + $0x1630] sm:$0xff] }
 0x1a6   : > { %2733 = vmatpush.msra.mxu2 %v949_v28  ;;  %2752 = vmatpush.msra.mxu3 %v966_v29  ;;  %v999_v28 = vld [vmem:[%s4169_s28 + $0x16b8] sm:$0xff]  ;;  %v1014_v29 = vld [vmem:[%s4169_s28 + $0x1730] sm:$0xff] }
 0x1a7   : > { %2694 = vmatpush.msra.mxu0 %v916_v30  ;;  %2713 = vmatpush.msra.mxu1 %v933_v32  ;;  %v1031_v30 = vld [vmem:[%s4169_s28 + $0x17b8] sm:$0xff]  ;;  %v981_v32 = vld [vmem:[%s4169_s28 + $0x1628] sm:$0xff] }
 0x1a8   : > { %2734 = vmatpush.msra.mxu2 %v948_v33  ;;  %2753 = vmatpush.msra.mxu3 %v965_v35  ;;  %v998_v33 = vld [vmem:[%s4169_s28 + $0x16b0] sm:$0xff]  ;;  %v1013_v35 = vld [vmem:[%s4169_s28 + $0x1728] sm:$0xff] }
 0x1a9   : > { %2695 = vmatpush.msra.mxu0 %v915_v36  ;;  %2714 = vmatpush.msra.mxu1 %v932_v31  ;;  %v1030_v36 = vld [vmem:[%s4169_s28 + $0x17b0] sm:$0xff]  ;;  %v980_v31 = vld [vmem:[%s4169_s28 + $0x1620] sm:$0xff] }
 0x1aa   : > { %2735 = vmatpush.msra.mxu2 %v947_v34  ;;  %2754 = vmatpush.msra.mxu3 %v964_v37  ;;  %v997_v34 = vld [vmem:[%s4169_s28 + $0x16a8] sm:$0xff]  ;;  %v1012_v37 = vld [vmem:[%s4169_s28 + $0x1720] sm:$0xff] }
 0x1ab   : > { %2696 = vmatpush.msra.mxu0 %v914_v38  ;;  %2715 = vmatpush.msra.mxu1 %v931_v39  ;;  %v1029_v38 = vld [vmem:[%s4169_s28 + $0x17a8] sm:$0xff]  ;;  %v979_v39 = vld [vmem:[%s4169_s28 + $0x1618] sm:$0xff] }
 0x1ac   : > { %2736 = vmatpush.msra.mxu2 %v946_v40  ;;  %2755 = vmatpush.msra.mxu3 %v963_v41  ;;  %v996_v40 = vld [vmem:[%s4169_s28 + $0x16a0] sm:$0xff]  ;;  %v1011_v41 = vld [vmem:[%s4169_s28 + $0x1718] sm:$0xff] }
 0x1ad   : > { %2697 = vmatpush.msra.mxu0 %v913_v42  ;;  %2716 = vmatpush.msra.mxu1 %v930_v43  ;;  %v1028_v42 = vld [vmem:[%s4169_s28 + $0x17a0] sm:$0xff]  ;;  %v978_v43 = vld [vmem:[%s4169_s28 + $0x1610] sm:$0xff] }
 0x1ae   : > { %2737 = vmatpush.msra.mxu2 %v945_v45  ;;  %2756 = vmatpush.msra.mxu3 %v962_v46  ;;  %v1010_v45 = vld [vmem:[%s4169_s28 + $0x1710] sm:$0xff]  ;;  %v1027_v46 = vld [vmem:[%s4169_s28 + $0x1798] sm:$0xff] }
 0x1af   : > { %2698 = vmatpush.msra.mxu0 %v912_v47  ;;  %2717 = vmatpush.msra.mxu1 %v929_v48  ;;  %v977_v47 = vld [vmem:[%s4169_s28 + $0x1608] sm:$0xff]  ;;  %v994_v48 = vld [vmem:[%s4169_s28 + $0x1690] sm:$0xff] }
 0x1b0   : > { %2738 = vmatpush.msra.mxu2 %v944_v49  ;;  %2757 = vmatpush.msra.mxu3 %v961_v50  ;;  %v262_v49 = vld [vmem:[%s4190_s6 + $0x60] sm:$0xff]  ;;  %v1009_v50 = vld [vmem:[%s4169_s28 + $0x1708] sm:$0xff] }
 0x1b1   : > { %2699 = vmatmul.f32.vlgmr.msra.gmra.mxu0 %v1739_v51  ;;  %2739 = vmatmul.f32.vlgmr.msra.gmra.mxu2 %v1741_v52  ;;  %v1026_v51 = vld [vmem:[%s4169_s28 + $0x1790] sm:$0xff]  ;;  %1747 = vst [vmem:[#allocation1] ss:$4 sm:$0xff] %v262_v49  ;;  %v976_v52 = vld [vmem:[%s4169_s28 + $0x1600] sm:$0xff]  ;;  %v1059_v49 = vld [vmem:[%s4169_s28 + $0x1898] sm:$0xff] }
 0x1b2   : > { %2763 = vmatpush.msrb.mxu0 %v991_v53  ;;  %2803 = vmatpush.msrb.mxu2 %v1023_v54  ;;  %v993_v53 = vld [vmem:[%s4169_s28 + $0x1688] sm:$0xff]  ;;  %v1008_v54 = vld [vmem:[%s4169_s28 + $0x1700] sm:$0xff] }
 0x1b3   : > { %2718 = vmatpush.msra.mxu1 %v928_v55  ;;  %2758 = vmatpush.msra.mxu3 %v960_v56  ;;  %v1025_v55 = vld [vmem:[%s4169_s28 + $0x1788] sm:$0xff]  ;;  %v1743_v56 = vld.sshfl [vmem:[#allocation1 + $0x20] sm:$0xff pattern:$0x73625140] }
 0x1b4   : > { %2719 = vmatmul.f32.vlgmr.msra.gmra.mxu1 %v1740_v57  ;;  %2759 = vmatmul.f32.vlgmr.msra.gmra.mxu3 %v1742_v58  ;;  %v1745_v57 = vld.sshfl [vmem:[#allocation1 + $0x30] sm:$0xff pattern:$0x73625140]  ;;  %v1055_v58 = vld [vmem:[%s4169_s28 + $0x1878] sm:$0xff] }
 0x1b5   : > { %2764 = vmatpush.msrb.mxu0 %v990_v59  ;;  %2783 = vmatpush.msrb.mxu1 %v1007_v60  ;;  %v1087_v59 = vld [vmem:[%s4169_s28 + $0x1978] sm:$0xff]  ;;  %v992_v60 = vld [vmem:[%s4169_s28 + $0x1680] sm:$0xff] }
 0x1b6   : > { %2804 = vmatpush.msrb.mxu2 %v1022_v61  ;;  %2823 = vmatpush.msrb.mxu3 %v1039_v62  ;;  %v1024_v61 = vld [vmem:[%s4169_s28 + $0x1780] sm:$0xff] }
 0x1b7   : > { %2765 = vmatpush.msrb.mxu0 %v989_v63  ;;  %2784 = vmatpush.msrb.mxu1 %v1006_v0  ;;  %v1744_v62 = vld.sshfl [vmem:[#allocation1 + $0x28] sm:$0xff pattern:$0x73625140]  ;;  %v1746_v63 = vld.sshfl [vmem:[#allocation1 + $0x38] sm:$0xff pattern:$0x73625140] }
 0x1b8   : > { %2805 = vmatpush.msrb.mxu2 %v1021_v1  ;;  %2824 = vmatpush.msrb.mxu3 %v1038_v2  ;;  %v1054_v0 = vld [vmem:[%s4169_s28 + $0x1870] sm:$0xff]  ;;  %v1071_v1 = vld [vmem:[%s4169_s28 + $0x18f8] sm:$0xff] }
 0x1b9   : > { %2766 = vmatpush.msrb.mxu0 %v988_v3  ;;  %2785 = vmatpush.msrb.mxu1 %v1005_v4  ;;  %v1086_v2 = vld [vmem:[%s4169_s28 + $0x1970] sm:$0xff]  ;;  %v1103_v3 = vld [vmem:[%s4169_s28 + $0x19f8] sm:$0xff]  ;;  %v1053_v4 = vld [vmem:[%s4169_s28 + $0x1868] sm:$0xff] }
 0x1ba   : > { %2806 = vmatpush.msrb.mxu2 %v1020_v5  ;;  %2825 = vmatpush.msrb.mxu3 %v1037_v6  ;;  %v1070_v5 = vld [vmem:[%s4169_s28 + $0x18f0] sm:$0xff]  ;;  %v1085_v6 = vld [vmem:[%s4169_s28 + $0x1968] sm:$0xff] }
 0x1bb   : > { %2767 = vmatpush.msrb.mxu0 %v987_v7  ;;  %2786 = vmatpush.msrb.mxu1 %v1004_v8  ;;  %v1102_v7 = vld [vmem:[%s4169_s28 + $0x19f0] sm:$0xff]  ;;  %v1052_v8 = vld [vmem:[%s4169_s28 + $0x1860] sm:$0xff] }
 0x1bc   : > { %2807 = vmatpush.msrb.mxu2 %v1019_v9  ;;  %2826 = vmatpush.msrb.mxu3 %v1036_v10  ;;  %v1069_v9 = vld [vmem:[%s4169_s28 + $0x18e8] sm:$0xff]  ;;  %v1084_v10 = vld [vmem:[%s4169_s28 + $0x1960] sm:$0xff] }
 0x1bd   : > { %2768 = vmatpush.msrb.mxu0 %v986_v11  ;;  %2787 = vmatpush.msrb.mxu1 %v1003_v12  ;;  %v1101_v11 = vld [vmem:[%s4169_s28 + $0x19e8] sm:$0xff]  ;;  %v1051_v12 = vld [vmem:[%s4169_s28 + $0x1858] sm:$0xff] }
 0x1be   : > { %2808 = vmatpush.msrb.mxu2 %v1018_v13  ;;  %2827 = vmatpush.msrb.mxu3 %v1035_v14  ;;  %v1068_v13 = vld [vmem:[%s4169_s28 + $0x18e0] sm:$0xff]  ;;  %v1083_v14 = vld [vmem:[%s4169_s28 + $0x1958] sm:$0xff] }
 0x1bf   : > { %2769 = vmatpush.msrb.mxu0 %v985_v15  ;;  %2788 = vmatpush.msrb.mxu1 %v1002_v16  ;;  %v1100_v15 = vld [vmem:[%s4169_s28 + $0x19e0] sm:$0xff]  ;;  %v1050_v16 = vld [vmem:[%s4169_s28 + $0x1850] sm:$0xff] }
 0x1c0   : > { %2809 = vmatpush.msrb.mxu2 %v1017_v17  ;;  %2828 = vmatpush.msrb.mxu3 %v1034_v18  ;;  %v1067_v17 = vld [vmem:[%s4169_s28 + $0x18d8] sm:$0xff]  ;;  %v1082_v18 = vld [vmem:[%s4169_s28 + $0x1950] sm:$0xff] }
 0x1c1   : > { %2770 = vmatpush.msrb.mxu0 %v984_v19  ;;  %2789 = vmatpush.msrb.mxu1 %v1001_v20  ;;  %v1099_v19 = vld [vmem:[%s4169_s28 + $0x19d8] sm:$0xff]  ;;  %v1049_v20 = vld [vmem:[%s4169_s28 + $0x1848] sm:$0xff] }
 0x1c2   : > { %2810 = vmatpush.msrb.mxu2 %v1016_v21  ;;  %2829 = vmatpush.msrb.mxu3 %v1033_v22  ;;  %v1066_v21 = vld [vmem:[%s4169_s28 + $0x18d0] sm:$0xff]  ;;  %v1081_v22 = vld [vmem:[%s4169_s28 + $0x1948] sm:$0xff] }
 0x1c3   : > { %2771 = vmatpush.msrb.mxu0 %v983_v23  ;;  %2790 = vmatpush.msrb.mxu1 %v1000_v24  ;;  %v1098_v23 = vld [vmem:[%s4169_s28 + $0x19d0] sm:$0xff]  ;;  %v1048_v24 = vld [vmem:[%s4169_s28 + $0x1840] sm:$0xff] }
 0x1c4   : > { %2811 = vmatpush.msrb.mxu2 %v1015_v25  ;;  %2830 = vmatpush.msrb.mxu3 %v1032_v26  ;;  %v1065_v25 = vld [vmem:[%s4169_s28 + $0x18c8] sm:$0xff]  ;;  %v1080_v26 = vld [vmem:[%s4169_s28 + $0x1940] sm:$0xff] }
 0x1c5   : > { %2772 = vmatpush.msrb.mxu0 %v982_v27  ;;  %2791 = vmatpush.msrb.mxu1 %v999_v28  ;;  %v1097_v27 = vld [vmem:[%s4169_s28 + $0x19c8] sm:$0xff]  ;;  %v1047_v28 = vld [vmem:[%s4169_s28 + $0x1838] sm:$0xff] }
 0x1c6   : > { %2812 = vmatpush.msrb.mxu2 %v1014_v29  ;;  %2831 = vmatpush.msrb.mxu3 %v1031_v30  ;;  %v1064_v29 = vld [vmem:[%s4169_s28 + $0x18c0] sm:$0xff]  ;;  %v1079_v30 = vld [vmem:[%s4169_s28 + $0x1938] sm:$0xff] }
 0x1c7   : > { %2773 = vmatpush.msrb.mxu0 %v981_v32  ;;  %2792 = vmatpush.msrb.mxu1 %v998_v33  ;;  %v1096_v32 = vld [vmem:[%s4169_s28 + $0x19c0] sm:$0xff]  ;;  %v1046_v33 = vld [vmem:[%s4169_s28 + $0x1830] sm:$0xff] }
 0x1c8   : > { %2813 = vmatpush.msrb.mxu2 %v1013_v35  ;;  %2832 = vmatpush.msrb.mxu3 %v1030_v36  ;;  %v1063_v35 = vld [vmem:[%s4169_s28 + $0x18b8] sm:$0xff]  ;;  %v1078_v36 = vld [vmem:[%s4169_s28 + $0x1930] sm:$0xff] }
 0x1c9   : > { %2774 = vmatpush.msrb.mxu0 %v980_v31  ;;  %2793 = vmatpush.msrb.mxu1 %v997_v34  ;;  %v1095_v31 = vld [vmem:[%s4169_s28 + $0x19b8] sm:$0xff]  ;;  %v1045_v34 = vld [vmem:[%s4169_s28 + $0x1828] sm:$0xff] }
 0x1ca   : > { %2814 = vmatpush.msrb.mxu2 %v1012_v37  ;;  %2833 = vmatpush.msrb.mxu3 %v1029_v38  ;;  %v1062_v37 = vld [vmem:[%s4169_s28 + $0x18b0] sm:$0xff]  ;;  %v1077_v38 = vld [vmem:[%s4169_s28 + $0x1928] sm:$0xff] }
 0x1cb   : > { %2775 = vmatpush.msrb.mxu0 %v979_v39  ;;  %2794 = vmatpush.msrb.mxu1 %v996_v40  ;;  %v1094_v39 = vld [vmem:[%s4169_s28 + $0x19b0] sm:$0xff]  ;;  %v1044_v40 = vld [vmem:[%s4169_s28 + $0x1820] sm:$0xff] }
 0x1cc   : > { %2815 = vmatpush.msrb.mxu2 %v1011_v41  ;;  %2834 = vmatpush.msrb.mxu3 %v1028_v42  ;;  %v1061_v41 = vld [vmem:[%s4169_s28 + $0x18a8] sm:$0xff]  ;;  %v1076_v42 = vld [vmem:[%s4169_s28 + $0x1920] sm:$0xff] }
 0x1cd   : > { %2776 = vmatpush.msrb.mxu0 %v978_v43  ;;  %2795 = vmatpush.msrb.mxu1 %v995_v44  ;;  %v1093_v43 = vld [vmem:[%s4169_s28 + $0x19a8] sm:$0xff]  ;;  %v1043_v44 = vld [vmem:[%s4169_s28 + $0x1818] sm:$0xff] }
 0x1ce   : > { %2816 = vmatpush.msrb.mxu2 %v1010_v45  ;;  %2835 = vmatpush.msrb.mxu3 %v1027_v46  ;;  %v1060_v45 = vld [vmem:[%s4169_s28 + $0x18a0] sm:$0xff]  ;;  %v1075_v46 = vld [vmem:[%s4169_s28 + $0x1918] sm:$0xff] }
 0x1cf   : > { %2777 = vmatpush.msrb.mxu0 %v977_v47  ;;  %2796 = vmatpush.msrb.mxu1 %v994_v48  ;;  %v1092_v47 = vld [vmem:[%s4169_s28 + $0x19a0] sm:$0xff]  ;;  %v1042_v48 = vld [vmem:[%s4169_s28 + $0x1810] sm:$0xff] }
 0x1d0   : > { %2817 = vmatpush.msrb.mxu2 %v1009_v50  ;;  %2836 = vmatpush.msrb.mxu3 %v1026_v51  ;;  %v1074_v50 = vld [vmem:[%s4169_s28 + $0x1910] sm:$0xff]  ;;  %v1091_v51 = vld [vmem:[%s4169_s28 + $0x1998] sm:$0xff] }
 0x1d1   : > { %2778 = vmatpush.msrb.mxu0 %v976_v52  ;;  %2797 = vmatpush.msrb.mxu1 %v993_v53  ;;  %v1041_v52 = vld [vmem:[%s4169_s28 + $0x1808] sm:$0xff]  ;;  %v1058_v53 = vld [vmem:[%s4169_s28 + $0x1890] sm:$0xff] }
 0x1d2   : > { %2818 = vmatpush.msrb.mxu2 %v1008_v54  ;;  %2837 = vmatpush.msrb.mxu3 %v1025_v55  ;;  %v263_v54 = vld [vmem:[%s4190_s6 + $0x68] sm:$0xff]  ;;  %v1073_v55 = vld [vmem:[%s4169_s28 + $0x1908] sm:$0xff] }
 0x1d3   : > { %2779 = vmatmul.f32.vlgmr.msrb.gmra.mxu0 %v1743_v56  ;;  %2819 = vmatmul.f32.vlgmr.msrb.gmra.mxu2 %v1745_v57  ;;  %v1090_v56 = vld [vmem:[%s4169_s28 + $0x1990] sm:$0xff]  ;;  %1748 = vst [vmem:[#allocation1 + $0x20] ss:$4 sm:$0xff] %v263_v54  ;;  %v1040_v57 = vld [vmem:[%s4169_s28 + $0x1800] sm:$0xff]  ;;  %v1123_v54 = vld [vmem:[%s4169_s28 + $0x1a98] sm:$0xff] }
 0x1d4   : > { %2843 = vmatpush.msra.mxu0 %v1055_v58  ;;  %2883 = vmatpush.msra.mxu2 %v1087_v59  ;;  %v1057_v58 = vld [vmem:[%s4169_s28 + $0x1888] sm:$0xff]  ;;  %v1072_v59 = vld [vmem:[%s4169_s28 + $0x1900] sm:$0xff] }
 0x1d5   : > { %2798 = vmatpush.msrb.mxu1 %v992_v60  ;;  %2838 = vmatpush.msrb.mxu3 %v1024_v61  ;;  %v1089_v60 = vld [vmem:[%s4169_s28 + $0x1988] sm:$0xff]  ;;  %v1749_v61 = vld.sshfl [vmem:[#allocation1] sm:$0xff pattern:$0x73625140] }
 0x1d6   : > { %2799 = vmatmul.f32.vlgmr.msrb.gmra.mxu1 %v1744_v62  ;;  %2839 = vmatmul.f32.vlgmr.msrb.gmra.mxu3 %v1746_v63  ;;  %v1751_v62 = vld.sshfl [vmem:[#allocation1 + $0x10] sm:$0xff pattern:$0x73625140]  ;;  %v1119_v63 = vld [vmem:[%s4169_s28 + $0x1a78] sm:$0xff] }
 0x1d7   : > { %2844 = vmatpush.msra.mxu0 %v1054_v0  ;;  %2863 = vmatpush.msra.mxu1 %v1071_v1  ;;  %v1151_v0 = vld [vmem:[%s4169_s28 + $0x1b78] sm:$0xff]  ;;  %v1056_v1 = vld [vmem:[%s4169_s28 + $0x1880] sm:$0xff] }
 0x1d8   : > { %2884 = vmatpush.msra.mxu2 %v1086_v2  ;;  %2903 = vmatpush.msra.mxu3 %v1103_v3  ;;  %v1088_v2 = vld [vmem:[%s4169_s28 + $0x1980] sm:$0xff] }
 0x1d9   : > { %2845 = vmatpush.msra.mxu0 %v1053_v4  ;;  %2864 = vmatpush.msra.mxu1 %v1070_v5  ;;  %v1750_v3 = vld.sshfl [vmem:[#allocation1 + $0x8] sm:$0xff pattern:$0x73625140]  ;;  %v1752_v4 = vld.sshfl [vmem:[#allocation1 + $0x18] sm:$0xff pattern:$0x73625140] }
 0x1da   : > { %2885 = vmatpush.msra.mxu2 %v1085_v6  ;;  %2904 = vmatpush.msra.mxu3 %v1102_v7  ;;  %v1118_v5 = vld [vmem:[%s4169_s28 + $0x1a70] sm:$0xff]  ;;  %v1135_v6 = vld [vmem:[%s4169_s28 + $0x1af8] sm:$0xff] }
 0x1db   : > { %2846 = vmatpush.msra.mxu0 %v1052_v8  ;;  %2865 = vmatpush.msra.mxu1 %v1069_v9  ;;  %v1150_v7 = vld [vmem:[%s4169_s28 + $0x1b70] sm:$0xff]  ;;  %v1167_v8 = vld [vmem:[%s4169_s28 + $0x1bf8] sm:$0xff]  ;;  %v1117_v9 = vld [vmem:[%s4169_s28 + $0x1a68] sm:$0xff] }
 0x1dc   : > { %2886 = vmatpush.msra.mxu2 %v1084_v10  ;;  %2905 = vmatpush.msra.mxu3 %v1101_v11  ;;  %v1134_v10 = vld [vmem:[%s4169_s28 + $0x1af0] sm:$0xff]  ;;  %v1149_v11 = vld [vmem:[%s4169_s28 + $0x1b68] sm:$0xff] }
 0x1dd   : > { %2847 = vmatpush.msra.mxu0 %v1051_v12  ;;  %2866 = vmatpush.msra.mxu1 %v1068_v13  ;;  %v1166_v12 = vld [vmem:[%s4169_s28 + $0x1bf0] sm:$0xff]  ;;  %v1116_v13 = vld [vmem:[%s4169_s28 + $0x1a60] sm:$0xff] }
 0x1de   : > { %2887 = vmatpush.msra.mxu2 %v1083_v14  ;;  %2906 = vmatpush.msra.mxu3 %v1100_v15  ;;  %v1133_v14 = vld [vmem:[%s4169_s28 + $0x1ae8] sm:$0xff]  ;;  %v1148_v15 = vld [vmem:[%s4169_s28 + $0x1b60] sm:$0xff] }
 0x1df   : > { %2848 = vmatpush.msra.mxu0 %v1050_v16  ;;  %2867 = vmatpush.msra.mxu1 %v1067_v17  ;;  %v1165_v16 = vld [vmem:[%s4169_s28 + $0x1be8] sm:$0xff]  ;;  %v1115_v17 = vld [vmem:[%s4169_s28 + $0x1a58] sm:$0xff] }
 0x1e0   : > { %2888 = vmatpush.msra.mxu2 %v1082_v18  ;;  %2907 = vmatpush.msra.mxu3 %v1099_v19  ;;  %v1132_v18 = vld [vmem:[%s4169_s28 + $0x1ae0] sm:$0xff]  ;;  %v1147_v19 = vld [vmem:[%s4169_s28 + $0x1b58] sm:$0xff] }
 0x1e1   : > { %2849 = vmatpush.msra.mxu0 %v1049_v20  ;;  %2868 = vmatpush.msra.mxu1 %v1066_v21  ;;  %v1164_v20 = vld [vmem:[%s4169_s28 + $0x1be0] sm:$0xff]  ;;  %v1114_v21 = vld [vmem:[%s4169_s28 + $0x1a50] sm:$0xff] }
 0x1e2   : > { %2889 = vmatpush.msra.mxu2 %v1081_v22  ;;  %2908 = vmatpush.msra.mxu3 %v1098_v23  ;;  %v1131_v22 = vld [vmem:[%s4169_s28 + $0x1ad8] sm:$0xff]  ;;  %v1146_v23 = vld [vmem:[%s4169_s28 + $0x1b50] sm:$0xff] }
 0x1e3   : > { %2850 = vmatpush.msra.mxu0 %v1048_v24  ;;  %2869 = vmatpush.msra.mxu1 %v1065_v25  ;;  %v1163_v24 = vld [vmem:[%s4169_s28 + $0x1bd8] sm:$0xff]  ;;  %v1113_v25 = vld [vmem:[%s4169_s28 + $0x1a48] sm:$0xff] }
 0x1e4   : > { %2890 = vmatpush.msra.mxu2 %v1080_v26  ;;  %2909 = vmatpush.msra.mxu3 %v1097_v27  ;;  %v1130_v26 = vld [vmem:[%s4169_s28 + $0x1ad0] sm:$0xff]  ;;  %v1145_v27 = vld [vmem:[%s4169_s28 + $0x1b48] sm:$0xff] }
 0x1e5   : > { %2851 = vmatpush.msra.mxu0 %v1047_v28  ;;  %2870 = vmatpush.msra.mxu1 %v1064_v29  ;;  %v1162_v28 = vld [vmem:[%s4169_s28 + $0x1bd0] sm:$0xff]  ;;  %v1112_v29 = vld [vmem:[%s4169_s28 + $0x1a40] sm:$0xff] }
 0x1e6   : > { %2891 = vmatpush.msra.mxu2 %v1079_v30  ;;  %2910 = vmatpush.msra.mxu3 %v1096_v32  ;;  %v1129_v30 = vld [vmem:[%s4169_s28 + $0x1ac8] sm:$0xff]  ;;  %v1144_v32 = vld [vmem:[%s4169_s28 + $0x1b40] sm:$0xff] }
 0x1e7   : > { %2852 = vmatpush.msra.mxu0 %v1046_v33  ;;  %2871 = vmatpush.msra.mxu1 %v1063_v35  ;;  %v1161_v33 = vld [vmem:[%s4169_s28 + $0x1bc8] sm:$0xff]  ;;  %v1111_v35 = vld [vmem:[%s4169_s28 + $0x1a38] sm:$0xff] }
 0x1e8   : > { %2892 = vmatpush.msra.mxu2 %v1078_v36  ;;  %2911 = vmatpush.msra.mxu3 %v1095_v31  ;;  %v1128_v36 = vld [vmem:[%s4169_s28 + $0x1ac0] sm:$0xff]  ;;  %v1143_v31 = vld [vmem:[%s4169_s28 + $0x1b38] sm:$0xff] }
 0x1e9   : > { %2853 = vmatpush.msra.mxu0 %v1045_v34  ;;  %2872 = vmatpush.msra.mxu1 %v1062_v37  ;;  %v1160_v34 = vld [vmem:[%s4169_s28 + $0x1bc0] sm:$0xff]  ;;  %v1110_v37 = vld [vmem:[%s4169_s28 + $0x1a30] sm:$0xff] }
 0x1ea   : > { %2893 = vmatpush.msra.mxu2 %v1077_v38  ;;  %2912 = vmatpush.msra.mxu3 %v1094_v39  ;;  %v1127_v38 = vld [vmem:[%s4169_s28 + $0x1ab8] sm:$0xff]  ;;  %v1142_v39 = vld [vmem:[%s4169_s28 + $0x1b30] sm:$0xff] }
 0x1eb   : > { %2854 = vmatpush.msra.mxu0 %v1044_v40  ;;  %2873 = vmatpush.msra.mxu1 %v1061_v41  ;;  %v1159_v40 = vld [vmem:[%s4169_s28 + $0x1bb8] sm:$0xff]  ;;  %v1109_v41 = vld [vmem:[%s4169_s28 + $0x1a28] sm:$0xff] }
 0x1ec   : > { %2894 = vmatpush.msra.mxu2 %v1076_v42  ;;  %2913 = vmatpush.msra.mxu3 %v1093_v43  ;;  %v1126_v42 = vld [vmem:[%s4169_s28 + $0x1ab0] sm:$0xff]  ;;  %v1141_v43 = vld [vmem:[%s4169_s28 + $0x1b28] sm:$0xff] }
 0x1ed   : > { %2855 = vmatpush.msra.mxu0 %v1043_v44  ;;  %2874 = vmatpush.msra.mxu1 %v1060_v45  ;;  %v1158_v44 = vld [vmem:[%s4169_s28 + $0x1bb0] sm:$0xff]  ;;  %v1108_v45 = vld [vmem:[%s4169_s28 + $0x1a20] sm:$0xff] }
 0x1ee   : > { %2895 = vmatpush.msra.mxu2 %v1075_v46  ;;  %2914 = vmatpush.msra.mxu3 %v1092_v47  ;;  %v1125_v46 = vld [vmem:[%s4169_s28 + $0x1aa8] sm:$0xff]  ;;  %v1140_v47 = vld [vmem:[%s4169_s28 + $0x1b20] sm:$0xff] }
 0x1ef   : > { %2856 = vmatpush.msra.mxu0 %v1042_v48  ;;  %2875 = vmatpush.msra.mxu1 %v1059_v49  ;;  %v1157_v48 = vld [vmem:[%s4169_s28 + $0x1ba8] sm:$0xff]  ;;  %v1107_v49 = vld [vmem:[%s4169_s28 + $0x1a18] sm:$0xff] }
 0x1f0   : > { %2896 = vmatpush.msra.mxu2 %v1074_v50  ;;  %2915 = vmatpush.msra.mxu3 %v1091_v51  ;;  %v1124_v50 = vld [vmem:[%s4169_s28 + $0x1aa0] sm:$0xff]  ;;  %v1139_v51 = vld [vmem:[%s4169_s28 + $0x1b18] sm:$0xff] }
 0x1f1   : > { %2857 = vmatpush.msra.mxu0 %v1041_v52  ;;  %2876 = vmatpush.msra.mxu1 %v1058_v53  ;;  %v1156_v52 = vld [vmem:[%s4169_s28 + $0x1ba0] sm:$0xff]  ;;  %v1106_v53 = vld [vmem:[%s4169_s28 + $0x1a10] sm:$0xff] }
 0x1f2   : > { %2897 = vmatpush.msra.mxu2 %v1073_v55  ;;  %2916 = vmatpush.msra.mxu3 %v1090_v56  ;;  %v1138_v55 = vld [vmem:[%s4169_s28 + $0x1b10] sm:$0xff]  ;;  %v1155_v56 = vld [vmem:[%s4169_s28 + $0x1b98] sm:$0xff] }
 0x1f3   : > { %2858 = vmatpush.msra.mxu0 %v1040_v57  ;;  %2877 = vmatpush.msra.mxu1 %v1057_v58  ;;  %v1105_v57 = vld [vmem:[%s4169_s28 + $0x1a08] sm:$0xff]  ;;  %v1122_v58 = vld [vmem:[%s4169_s28 + $0x1a90] sm:$0xff] }
 0x1f4   : > { %2898 = vmatpush.msra.mxu2 %v1072_v59  ;;  %2917 = vmatpush.msra.mxu3 %v1089_v60  ;;  %v264_v59 = vld [vmem:[%s4190_s6 + $0x70] sm:$0xff] }
 0x1f5   : > { %2859 = vmatmul.f32.vlgmr.msra.gmra.mxu0 %v1749_v61  ;;  %2899 = vmatmul.f32.vlgmr.msra.gmra.mxu2 %v1751_v62  ;;  %v1137_v60 = vld [vmem:[%s4169_s28 + $0x1b08] sm:$0xff]  ;;  %v1154_v61 = vld [vmem:[%s4169_s28 + $0x1b90] sm:$0xff]  ;;  %1757 = vst [vmem:[#allocation1] ss:$4 sm:$0xff] %v264_v59  ;;  %v1104_v62 = vld [vmem:[%s4169_s28 + $0x1a00] sm:$0xff] }
 0x1f6   : > { %2923 = vmatpush.msrb.mxu0 %v1119_v63  ;;  %2963 = vmatpush.msrb.mxu2 %v1151_v0  ;;  %v1121_v63 = vld [vmem:[%s4169_s28 + $0x1a88] sm:$0xff]  ;;  %v1136_v0 = vld [vmem:[%s4169_s28 + $0x1b00] sm:$0xff]  ;;  %v1187_v59 = vld [vmem:[%s4169_s28 + $0x1c98] sm:$0xff] }
 0x1f7   : > { %2878 = vmatpush.msra.mxu1 %v1056_v1  ;;  %2918 = vmatpush.msra.mxu3 %v1088_v2  ;;  %v1153_v1 = vld [vmem:[%s4169_s28 + $0x1b88] sm:$0xff]  ;;  %v1753_v2 = vld.sshfl [vmem:[#allocation1 + $0x20] sm:$0xff pattern:$0x73625140] }
 0x1f8   : > { %2879 = vmatmul.f32.vlgmr.msra.gmra.mxu1 %v1750_v3  ;;  %2919 = vmatmul.f32.vlgmr.msra.gmra.mxu3 %v1752_v4  ;;  %v1755_v3 = vld.sshfl [vmem:[#allocation1 + $0x30] sm:$0xff pattern:$0x73625140]  ;;  %v1183_v4 = vld [vmem:[%s4169_s28 + $0x1c78] sm:$0xff] }
 0x1f9   : > { %2924 = vmatpush.msrb.mxu0 %v1118_v5  ;;  %2943 = vmatpush.msrb.mxu1 %v1135_v6  ;;  %v1215_v5 = vld [vmem:[%s4169_s28 + $0x1d78] sm:$0xff]  ;;  %v1120_v6 = vld [vmem:[%s4169_s28 + $0x1a80] sm:$0xff] }
 0x1fa   : > { %2964 = vmatpush.msrb.mxu2 %v1150_v7  ;;  %2983 = vmatpush.msrb.mxu3 %v1167_v8  ;;  %v1152_v7 = vld [vmem:[%s4169_s28 + $0x1b80] sm:$0xff] }
 0x1fb   : > { %2925 = vmatpush.msrb.mxu0 %v1117_v9  ;;  %2944 = vmatpush.msrb.mxu1 %v1134_v10  ;;  %v1754_v8 = vld.sshfl [vmem:[#allocation1 + $0x28] sm:$0xff pattern:$0x73625140]  ;;  %v1756_v9 = vld.sshfl [vmem:[#allocation1 + $0x38] sm:$0xff pattern:$0x73625140] }
 0x1fc   : > { %2965 = vmatpush.msrb.mxu2 %v1149_v11  ;;  %2984 = vmatpush.msrb.mxu3 %v1166_v12  ;;  %v1182_v10 = vld [vmem:[%s4169_s28 + $0x1c70] sm:$0xff]  ;;  %v1199_v11 = vld [vmem:[%s4169_s28 + $0x1cf8] sm:$0xff] }
 0x1fd   : > { %2926 = vmatpush.msrb.mxu0 %v1116_v13  ;;  %2945 = vmatpush.msrb.mxu1 %v1133_v14  ;;  %v1214_v12 = vld [vmem:[%s4169_s28 + $0x1d70] sm:$0xff]  ;;  %v1231_v13 = vld [vmem:[%s4169_s28 + $0x1df8] sm:$0xff]  ;;  %v1181_v14 = vld [vmem:[%s4169_s28 + $0x1c68] sm:$0xff] }
 0x1fe   : > { %2966 = vmatpush.msrb.mxu2 %v1148_v15  ;;  %2985 = vmatpush.msrb.mxu3 %v1165_v16  ;;  %v1198_v15 = vld [vmem:[%s4169_s28 + $0x1cf0] sm:$0xff]  ;;  %v1213_v16 = vld [vmem:[%s4169_s28 + $0x1d68] sm:$0xff] }
 0x1ff   : > { %2927 = vmatpush.msrb.mxu0 %v1115_v17  ;;  %2946 = vmatpush.msrb.mxu1 %v1132_v18  ;;  %v1230_v17 = vld [vmem:[%s4169_s28 + $0x1df0] sm:$0xff]  ;;  %v1180_v18 = vld [vmem:[%s4169_s28 + $0x1c60] sm:$0xff] }
 0x200   : > { %2967 = vmatpush.msrb.mxu2 %v1147_v19  ;;  %2986 = vmatpush.msrb.mxu3 %v1164_v20  ;;  %v1197_v19 = vld [vmem:[%s4169_s28 + $0x1ce8] sm:$0xff]  ;;  %v1212_v20 = vld [vmem:[%s4169_s28 + $0x1d60] sm:$0xff] }
 0x201   : > { %2928 = vmatpush.msrb.mxu0 %v1114_v21  ;;  %2947 = vmatpush.msrb.mxu1 %v1131_v22  ;;  %v1229_v21 = vld [vmem:[%s4169_s28 + $0x1de8] sm:$0xff]  ;;  %v1179_v22 = vld [vmem:[%s4169_s28 + $0x1c58] sm:$0xff] }
 0x202   : > { %2968 = vmatpush.msrb.mxu2 %v1146_v23  ;;  %2987 = vmatpush.msrb.mxu3 %v1163_v24  ;;  %v1196_v23 = vld [vmem:[%s4169_s28 + $0x1ce0] sm:$0xff]  ;;  %v1211_v24 = vld [vmem:[%s4169_s28 + $0x1d58] sm:$0xff] }
 0x203   : > { %2929 = vmatpush.msrb.mxu0 %v1113_v25  ;;  %2948 = vmatpush.msrb.mxu1 %v1130_v26  ;;  %v1228_v25 = vld [vmem:[%s4169_s28 + $0x1de0] sm:$0xff]  ;;  %v1178_v26 = vld [vmem:[%s4169_s28 + $0x1c50] sm:$0xff] }
 0x204   : > { %2969 = vmatpush.msrb.mxu2 %v1145_v27  ;;  %2988 = vmatpush.msrb.mxu3 %v1162_v28  ;;  %v1195_v27 = vld [vmem:[%s4169_s28 + $0x1cd8] sm:$0xff]  ;;  %v1210_v28 = vld [vmem:[%s4169_s28 + $0x1d50] sm:$0xff] }
 0x205   : > { %2930 = vmatpush.msrb.mxu0 %v1112_v29  ;;  %2949 = vmatpush.msrb.mxu1 %v1129_v30  ;;  %v1227_v29 = vld [vmem:[%s4169_s28 + $0x1dd8] sm:$0xff]  ;;  %v1177_v30 = vld [vmem:[%s4169_s28 + $0x1c48] sm:$0xff] }
 0x206   : > { %2970 = vmatpush.msrb.mxu2 %v1144_v32  ;;  %2989 = vmatpush.msrb.mxu3 %v1161_v33  ;;  %v1194_v32 = vld [vmem:[%s4169_s28 + $0x1cd0] sm:$0xff]  ;;  %v1209_v33 = vld [vmem:[%s4169_s28 + $0x1d48] sm:$0xff] }
 0x207   : > { %2931 = vmatpush.msrb.mxu0 %v1111_v35  ;;  %2950 = vmatpush.msrb.mxu1 %v1128_v36  ;;  %v1226_v35 = vld [vmem:[%s4169_s28 + $0x1dd0] sm:$0xff]  ;;  %v1176_v36 = vld [vmem:[%s4169_s28 + $0x1c40] sm:$0xff] }
 0x208   : > { %2971 = vmatpush.msrb.mxu2 %v1143_v31  ;;  %2990 = vmatpush.msrb.mxu3 %v1160_v34  ;;  %v1193_v31 = vld [vmem:[%s4169_s28 + $0x1cc8] sm:$0xff]  ;;  %v1208_v34 = vld [vmem:[%s4169_s28 + $0x1d40] sm:$0xff] }
 0x209   : > { %2932 = vmatpush.msrb.mxu0 %v1110_v37  ;;  %2951 = vmatpush.msrb.mxu1 %v1127_v38  ;;  %v1225_v37 = vld [vmem:[%s4169_s28 + $0x1dc8] sm:$0xff]  ;;  %v1175_v38 = vld [vmem:[%s4169_s28 + $0x1c38] sm:$0xff] }
 0x20a   : > { %2972 = vmatpush.msrb.mxu2 %v1142_v39  ;;  %2991 = vmatpush.msrb.mxu3 %v1159_v40  ;;  %v1192_v39 = vld [vmem:[%s4169_s28 + $0x1cc0] sm:$0xff]  ;;  %v1207_v40 = vld [vmem:[%s4169_s28 + $0x1d38] sm:$0xff] }
 0x20b   : > { %2933 = vmatpush.msrb.mxu0 %v1109_v41  ;;  %2952 = vmatpush.msrb.mxu1 %v1126_v42  ;;  %v1224_v41 = vld [vmem:[%s4169_s28 + $0x1dc0] sm:$0xff]  ;;  %v1174_v42 = vld [vmem:[%s4169_s28 + $0x1c30] sm:$0xff] }
 0x20c   : > { %2973 = vmatpush.msrb.mxu2 %v1141_v43  ;;  %2992 = vmatpush.msrb.mxu3 %v1158_v44  ;;  %v1191_v43 = vld [vmem:[%s4169_s28 + $0x1cb8] sm:$0xff]  ;;  %v1206_v44 = vld [vmem:[%s4169_s28 + $0x1d30] sm:$0xff] }
 0x20d   : > { %2934 = vmatpush.msrb.mxu0 %v1108_v45  ;;  %2953 = vmatpush.msrb.mxu1 %v1125_v46  ;;  %v1223_v45 = vld [vmem:[%s4169_s28 + $0x1db8] sm:$0xff]  ;;  %v1173_v46 = vld [vmem:[%s4169_s28 + $0x1c28] sm:$0xff] }
 0x20e   : > { %2974 = vmatpush.msrb.mxu2 %v1140_v47  ;;  %2993 = vmatpush.msrb.mxu3 %v1157_v48  ;;  %v1190_v47 = vld [vmem:[%s4169_s28 + $0x1cb0] sm:$0xff]  ;;  %v1205_v48 = vld [vmem:[%s4169_s28 + $0x1d28] sm:$0xff] }
 0x20f   : > { %2935 = vmatpush.msrb.mxu0 %v1107_v49  ;;  %2954 = vmatpush.msrb.mxu1 %v1124_v50  ;;  %v1222_v49 = vld [vmem:[%s4169_s28 + $0x1db0] sm:$0xff]  ;;  %v1172_v50 = vld [vmem:[%s4169_s28 + $0x1c20] sm:$0xff] }
 0x210   : > { %2975 = vmatpush.msrb.mxu2 %v1139_v51  ;;  %2994 = vmatpush.msrb.mxu3 %v1156_v52  ;;  %v1189_v51 = vld [vmem:[%s4169_s28 + $0x1ca8] sm:$0xff]  ;;  %v1204_v52 = vld [vmem:[%s4169_s28 + $0x1d20] sm:$0xff] }
 0x211   : > { %2936 = vmatpush.msrb.mxu0 %v1106_v53  ;;  %2955 = vmatpush.msrb.mxu1 %v1123_v54  ;;  %v1221_v53 = vld [vmem:[%s4169_s28 + $0x1da8] sm:$0xff]  ;;  %v1171_v54 = vld [vmem:[%s4169_s28 + $0x1c18] sm:$0xff] }
 0x212   : > { %2976 = vmatpush.msrb.mxu2 %v1138_v55  ;;  %2995 = vmatpush.msrb.mxu3 %v1155_v56  ;;  %v1188_v55 = vld [vmem:[%s4169_s28 + $0x1ca0] sm:$0xff]  ;;  %v1203_v56 = vld [vmem:[%s4169_s28 + $0x1d18] sm:$0xff] }
 0x213   : > { %2937 = vmatpush.msrb.mxu0 %v1105_v57  ;;  %2956 = vmatpush.msrb.mxu1 %v1122_v58  ;;  %v1220_v57 = vld [vmem:[%s4169_s28 + $0x1da0] sm:$0xff]  ;;  %v1170_v58 = vld [vmem:[%s4169_s28 + $0x1c10] sm:$0xff] }
 0x214   : > { %2977 = vmatpush.msrb.mxu2 %v1137_v60  ;;  %2996 = vmatpush.msrb.mxu3 %v1154_v61  ;;  %v1202_v60 = vld [vmem:[%s4169_s28 + $0x1d10] sm:$0xff]  ;;  %v1219_v61 = vld [vmem:[%s4169_s28 + $0x1d98] sm:$0xff] }
 0x215   : > { %2938 = vmatpush.msrb.mxu0 %v1104_v62  ;;  %2957 = vmatpush.msrb.mxu1 %v1121_v63  ;;  %v1169_v62 = vld [vmem:[%s4169_s28 + $0x1c08] sm:$0xff]  ;;  %v1186_v63 = vld [vmem:[%s4169_s28 + $0x1c90] sm:$0xff] }
 0x216   : > { %2978 = vmatpush.msrb.mxu2 %v1136_v0  ;;  %2997 = vmatpush.msrb.mxu3 %v1153_v1  ;;  %v265_v0 = vld [vmem:[%s4190_s6 + $0x78] sm:$0xff]  ;;  %v1201_v1 = vld [vmem:[%s4169_s28 + $0x1d08] sm:$0xff] }
 0x217   : > { %2939 = vmatmul.f32.vlgmr.msrb.gmra.mxu0 %v1753_v2  ;;  %2979 = vmatmul.f32.vlgmr.msrb.gmra.mxu2 %v1755_v3  ;;  %v1218_v2 = vld [vmem:[%s4169_s28 + $0x1d90] sm:$0xff]  ;;  %1758 = vst [vmem:[#allocation1 + $0x20] ss:$4 sm:$0xff] %v265_v0  ;;  %v1168_v3 = vld [vmem:[%s4169_s28 + $0x1c00] sm:$0xff]  ;;  %v1251_v0 = vld [vmem:[%s4169_s28 + $0x1e98] sm:$0xff] }
 0x218   : > { %3003 = vmatpush.msra.mxu0 %v1183_v4  ;;  %3043 = vmatpush.msra.mxu2 %v1215_v5  ;;  %v1185_v4 = vld [vmem:[%s4169_s28 + $0x1c88] sm:$0xff]  ;;  %v1200_v5 = vld [vmem:[%s4169_s28 + $0x1d00] sm:$0xff] }
 0x219   : > { %2958 = vmatpush.msrb.mxu1 %v1120_v6  ;;  %2998 = vmatpush.msrb.mxu3 %v1152_v7  ;;  %v1217_v6 = vld [vmem:[%s4169_s28 + $0x1d88] sm:$0xff]  ;;  %v1759_v7 = vld.sshfl [vmem:[#allocation1] sm:$0xff pattern:$0x73625140] }
 0x21a   : > { %2959 = vmatmul.f32.vlgmr.msrb.gmra.mxu1 %v1754_v8  ;;  %2999 = vmatmul.f32.vlgmr.msrb.gmra.mxu3 %v1756_v9  ;;  %v1761_v8 = vld.sshfl [vmem:[#allocation1 + $0x10] sm:$0xff pattern:$0x73625140]  ;;  %v1247_v9 = vld [vmem:[%s4169_s28 + $0x1e78] sm:$0xff] }
 0x21b   : > { %3004 = vmatpush.msra.mxu0 %v1182_v10  ;;  %3023 = vmatpush.msra.mxu1 %v1199_v11  ;;  %v1279_v10 = vld [vmem:[%s4169_s28 + $0x1f78] sm:$0xff]  ;;  %v1184_v11 = vld [vmem:[%s4169_s28 + $0x1c80] sm:$0xff] }
 0x21c   : > { %3044 = vmatpush.msra.mxu2 %v1214_v12  ;;  %3063 = vmatpush.msra.mxu3 %v1231_v13  ;;  %v1216_v12 = vld [vmem:[%s4169_s28 + $0x1d80] sm:$0xff] }
 0x21d   : > { %3005 = vmatpush.msra.mxu0 %v1181_v14  ;;  %3024 = vmatpush.msra.mxu1 %v1198_v15  ;;  %v1760_v13 = vld.sshfl [vmem:[#allocation1 + $0x8] sm:$0xff pattern:$0x73625140]  ;;  %v1762_v14 = vld.sshfl [vmem:[#allocation1 + $0x18] sm:$0xff pattern:$0x73625140] }
 0x21e   : > { %3045 = vmatpush.msra.mxu2 %v1213_v16  ;;  %3064 = vmatpush.msra.mxu3 %v1230_v17  ;;  %v1246_v15 = vld [vmem:[%s4169_s28 + $0x1e70] sm:$0xff]  ;;  %v1263_v16 = vld [vmem:[%s4169_s28 + $0x1ef8] sm:$0xff] }
 0x21f   : > { %3006 = vmatpush.msra.mxu0 %v1180_v18  ;;  %3025 = vmatpush.msra.mxu1 %v1197_v19  ;;  %v1278_v17 = vld [vmem:[%s4169_s28 + $0x1f70] sm:$0xff]  ;;  %v1295_v18 = vld [vmem:[%s4169_s28 + $0x1ff8] sm:$0xff]  ;;  %v1245_v19 = vld [vmem:[%s4169_s28 + $0x1e68] sm:$0xff] }
 0x220   : > { %3046 = vmatpush.msra.mxu2 %v1212_v20  ;;  %3065 = vmatpush.msra.mxu3 %v1229_v21  ;;  %v1262_v20 = vld [vmem:[%s4169_s28 + $0x1ef0] sm:$0xff]  ;;  %v1277_v21 = vld [vmem:[%s4169_s28 + $0x1f68] sm:$0xff] }
 0x221   : > { %3007 = vmatpush.msra.mxu0 %v1179_v22  ;;  %3026 = vmatpush.msra.mxu1 %v1196_v23  ;;  %v1294_v22 = vld [vmem:[%s4169_s28 + $0x1ff0] sm:$0xff]  ;;  %v1244_v23 = vld [vmem:[%s4169_s28 + $0x1e60] sm:$0xff] }
 0x222   : > { %3047 = vmatpush.msra.mxu2 %v1211_v24  ;;  %3066 = vmatpush.msra.mxu3 %v1228_v25  ;;  %v1261_v24 = vld [vmem:[%s4169_s28 + $0x1ee8] sm:$0xff]  ;;  %v1276_v25 = vld [vmem:[%s4169_s28 + $0x1f60] sm:$0xff] }
 0x223   : > { %3008 = vmatpush.msra.mxu0 %v1178_v26  ;;  %3027 = vmatpush.msra.mxu1 %v1195_v27  ;;  %v1293_v26 = vld [vmem:[%s4169_s28 + $0x1fe8] sm:$0xff]  ;;  %v1243_v27 = vld [vmem:[%s4169_s28 + $0x1e58] sm:$0xff] }
 0x224   : > { %3048 = vmatpush.msra.mxu2 %v1210_v28  ;;  %3067 = vmatpush.msra.mxu3 %v1227_v29  ;;  %v1260_v28 = vld [vmem:[%s4169_s28 + $0x1ee0] sm:$0xff]  ;;  %v1275_v29 = vld [vmem:[%s4169_s28 + $0x1f58] sm:$0xff] }
 0x225   : > { %3009 = vmatpush.msra.mxu0 %v1177_v30  ;;  %3028 = vmatpush.msra.mxu1 %v1194_v32  ;;  %v1292_v30 = vld [vmem:[%s4169_s28 + $0x1fe0] sm:$0xff]  ;;  %v1242_v32 = vld [vmem:[%s4169_s28 + $0x1e50] sm:$0xff] }
 0x226   : > { %3049 = vmatpush.msra.mxu2 %v1209_v33  ;;  %3068 = vmatpush.msra.mxu3 %v1226_v35  ;;  %v1259_v33 = vld [vmem:[%s4169_s28 + $0x1ed8] sm:$0xff]  ;;  %v1274_v35 = vld [vmem:[%s4169_s28 + $0x1f50] sm:$0xff] }
 0x227   : > { %3010 = vmatpush.msra.mxu0 %v1176_v36  ;;  %3029 = vmatpush.msra.mxu1 %v1193_v31  ;;  %v1291_v36 = vld [vmem:[%s4169_s28 + $0x1fd8] sm:$0xff]  ;;  %v1241_v31 = vld [vmem:[%s4169_s28 + $0x1e48] sm:$0xff] }
 0x228   : > { %3050 = vmatpush.msra.mxu2 %v1208_v34  ;;  %3069 = vmatpush.msra.mxu3 %v1225_v37  ;;  %v1258_v34 = vld [vmem:[%s4169_s28 + $0x1ed0] sm:$0xff]  ;;  %v1273_v37 = vld [vmem:[%s4169_s28 + $0x1f48] sm:$0xff] }
 0x229   : > { %3011 = vmatpush.msra.mxu0 %v1175_v38  ;;  %3030 = vmatpush.msra.mxu1 %v1192_v39  ;;  %v1290_v38 = vld [vmem:[%s4169_s28 + $0x1fd0] sm:$0xff]  ;;  %v1240_v39 = vld [vmem:[%s4169_s28 + $0x1e40] sm:$0xff] }
 0x22a   : > { %3051 = vmatpush.msra.mxu2 %v1207_v40  ;;  %3070 = vmatpush.msra.mxu3 %v1224_v41  ;;  %v1257_v40 = vld [vmem:[%s4169_s28 + $0x1ec8] sm:$0xff]  ;;  %v1272_v41 = vld [vmem:[%s4169_s28 + $0x1f40] sm:$0xff] }
 0x22b   : > { %3012 = vmatpush.msra.mxu0 %v1174_v42  ;;  %3031 = vmatpush.msra.mxu1 %v1191_v43  ;;  %v1289_v42 = vld [vmem:[%s4169_s28 + $0x1fc8] sm:$0xff]  ;;  %v1239_v43 = vld [vmem:[%s4169_s28 + $0x1e38] sm:$0xff] }
 0x22c   : > { %3052 = vmatpush.msra.mxu2 %v1206_v44  ;;  %3071 = vmatpush.msra.mxu3 %v1223_v45  ;;  %v1256_v44 = vld [vmem:[%s4169_s28 + $0x1ec0] sm:$0xff]  ;;  %v1271_v45 = vld [vmem:[%s4169_s28 + $0x1f38] sm:$0xff] }
 0x22d   : > { %3013 = vmatpush.msra.mxu0 %v1173_v46  ;;  %3032 = vmatpush.msra.mxu1 %v1190_v47  ;;  %v1288_v46 = vld [vmem:[%s4169_s28 + $0x1fc0] sm:$0xff]  ;;  %v1238_v47 = vld [vmem:[%s4169_s28 + $0x1e30] sm:$0xff] }
 0x22e   : > { %3053 = vmatpush.msra.mxu2 %v1205_v48  ;;  %3072 = vmatpush.msra.mxu3 %v1222_v49  ;;  %v1255_v48 = vld [vmem:[%s4169_s28 + $0x1eb8] sm:$0xff]  ;;  %v1270_v49 = vld [vmem:[%s4169_s28 + $0x1f30] sm:$0xff] }
 0x22f   : > { %3014 = vmatpush.msra.mxu0 %v1172_v50  ;;  %3033 = vmatpush.msra.mxu1 %v1189_v51  ;;  %v1287_v50 = vld [vmem:[%s4169_s28 + $0x1fb8] sm:$0xff]  ;;  %v1237_v51 = vld [vmem:[%s4169_s28 + $0x1e28] sm:$0xff] }
 0x230   : > { %3054 = vmatpush.msra.mxu2 %v1204_v52  ;;  %3073 = vmatpush.msra.mxu3 %v1221_v53  ;;  %v1254_v52 = vld [vmem:[%s4169_s28 + $0x1eb0] sm:$0xff]  ;;  %v1269_v53 = vld [vmem:[%s4169_s28 + $0x1f28] sm:$0xff] }
 0x231   : > { %3015 = vmatpush.msra.mxu0 %v1171_v54  ;;  %3034 = vmatpush.msra.mxu1 %v1188_v55  ;;  %v1286_v54 = vld [vmem:[%s4169_s28 + $0x1fb0] sm:$0xff]  ;;  %v1236_v55 = vld [vmem:[%s4169_s28 + $0x1e20] sm:$0xff] }
 0x232   : > { %3055 = vmatpush.msra.mxu2 %v1203_v56  ;;  %3074 = vmatpush.msra.mxu3 %v1220_v57  ;;  %v1253_v56 = vld [vmem:[%s4169_s28 + $0x1ea8] sm:$0xff]  ;;  %v1268_v57 = vld [vmem:[%s4169_s28 + $0x1f20] sm:$0xff] }
 0x233   : > { %3016 = vmatpush.msra.mxu0 %v1170_v58  ;;  %3035 = vmatpush.msra.mxu1 %v1187_v59  ;;  %v1285_v58 = vld [vmem:[%s4169_s28 + $0x1fa8] sm:$0xff]  ;;  %v1235_v59 = vld [vmem:[%s4169_s28 + $0x1e18] sm:$0xff] }
 0x234   : > { %3056 = vmatpush.msra.mxu2 %v1202_v60  ;;  %3075 = vmatpush.msra.mxu3 %v1219_v61  ;;  %v1252_v60 = vld [vmem:[%s4169_s28 + $0x1ea0] sm:$0xff]  ;;  %v1267_v61 = vld [vmem:[%s4169_s28 + $0x1f18] sm:$0xff] }
 0x235   : > { %3017 = vmatpush.msra.mxu0 %v1169_v62  ;;  %3036 = vmatpush.msra.mxu1 %v1186_v63  ;;  %v1284_v62 = vld [vmem:[%s4169_s28 + $0x1fa0] sm:$0xff]  ;;  %v1234_v63 = vld [vmem:[%s4169_s28 + $0x1e10] sm:$0xff] }
 0x236   : > { %3057 = vmatpush.msra.mxu2 %v1201_v1  ;;  %3076 = vmatpush.msra.mxu3 %v1218_v2  ;;  %v1266_v1 = vld [vmem:[%s4169_s28 + $0x1f10] sm:$0xff]  ;;  %v1283_v2 = vld [vmem:[%s4169_s28 + $0x1f98] sm:$0xff] }
 0x237   : > { %3018 = vmatpush.msra.mxu0 %v1168_v3  ;;  %3037 = vmatpush.msra.mxu1 %v1185_v4  ;;  %v1233_v3 = vld [vmem:[%s4169_s28 + $0x1e08] sm:$0xff]  ;;  %v1250_v4 = vld [vmem:[%s4169_s28 + $0x1e90] sm:$0xff] }
 0x238   : > { %3058 = vmatpush.msra.mxu2 %v1200_v5  ;;  %3077 = vmatpush.msra.mxu3 %v1217_v6  ;;  %v266_v5 = vld [vmem:[%s4190_s6 + $0x80] sm:$0xff]  ;;  %v1265_v6 = vld [vmem:[%s4169_s28 + $0x1f08] sm:$0xff] }
 0x239   : > { %3019 = vmatmul.f32.vlgmr.msra.gmra.mxu0 %v1759_v7  ;;  %3059 = vmatmul.f32.vlgmr.msra.gmra.mxu2 %v1761_v8  ;;  %v1282_v7 = vld [vmem:[%s4169_s28 + $0x1f90] sm:$0xff]  ;;  %1767 = vst [vmem:[#allocation1] ss:$4 sm:$0xff] %v266_v5  ;;  %v1232_v8 = vld [vmem:[%s4169_s28 + $0x1e00] sm:$0xff]  ;;  %v1315_v5 = vld [vmem:[%s4169_s28 + $0x2098] sm:$0xff] }
 0x23a   : > { %3083 = vmatpush.msrb.mxu0 %v1247_v9  ;;  %3123 = vmatpush.msrb.mxu2 %v1279_v10  ;;  %v1249_v9 = vld [vmem:[%s4169_s28 + $0x1e88] sm:$0xff]  ;;  %v1264_v10 = vld [vmem:[%s4169_s28 + $0x1f00] sm:$0xff] }
 0x23b   : > { %3038 = vmatpush.msra.mxu1 %v1184_v11  ;;  %3078 = vmatpush.msra.mxu3 %v1216_v12  ;;  %v1281_v11 = vld [vmem:[%s4169_s28 + $0x1f88] sm:$0xff]  ;;  %v1763_v12 = vld.sshfl [vmem:[#allocation1 + $0x20] sm:$0xff pattern:$0x73625140] }
 0x23c   : > { %3039 = vmatmul.f32.vlgmr.msra.gmra.mxu1 %v1760_v13  ;;  %3079 = vmatmul.f32.vlgmr.msra.gmra.mxu3 %v1762_v14  ;;  %v1765_v13 = vld.sshfl [vmem:[#allocation1 + $0x30] sm:$0xff pattern:$0x73625140]  ;;  %v1311_v14 = vld [vmem:[%s4169_s28 + $0x2078] sm:$0xff] }
 0x23d   : > { %3084 = vmatpush.msrb.mxu0 %v1246_v15  ;;  %3103 = vmatpush.msrb.mxu1 %v1263_v16  ;;  %v1343_v15 = vld [vmem:[%s4169_s28 + $0x2178] sm:$0xff]  ;;  %v1248_v16 = vld [vmem:[%s4169_s28 + $0x1e80] sm:$0xff] }
 0x23e   : > { %3124 = vmatpush.msrb.mxu2 %v1278_v17  ;;  %3143 = vmatpush.msrb.mxu3 %v1295_v18  ;;  %v1280_v17 = vld [vmem:[%s4169_s28 + $0x1f80] sm:$0xff] }
 0x23f   : > { %3085 = vmatpush.msrb.mxu0 %v1245_v19  ;;  %3104 = vmatpush.msrb.mxu1 %v1262_v20  ;;  %v1764_v18 = vld.sshfl [vmem:[#allocation1 + $0x28] sm:$0xff pattern:$0x73625140]  ;;  %v1766_v19 = vld.sshfl [vmem:[#allocation1 + $0x38] sm:$0xff pattern:$0x73625140] }
 0x240   : > { %3125 = vmatpush.msrb.mxu2 %v1277_v21  ;;  %3144 = vmatpush.msrb.mxu3 %v1294_v22  ;;  %v1310_v20 = vld [vmem:[%s4169_s28 + $0x2070] sm:$0xff]  ;;  %v1327_v21 = vld [vmem:[%s4169_s28 + $0x20f8] sm:$0xff] }
 0x241   : > { %3086 = vmatpush.msrb.mxu0 %v1244_v23  ;;  %3105 = vmatpush.msrb.mxu1 %v1261_v24  ;;  %v1342_v22 = vld [vmem:[%s4169_s28 + $0x2170] sm:$0xff]  ;;  %v1359_v23 = vld [vmem:[%s4169_s28 + $0x21f8] sm:$0xff]  ;;  %v1309_v24 = vld [vmem:[%s4169_s28 + $0x2068] sm:$0xff] }
 0x242   : > { %3126 = vmatpush.msrb.mxu2 %v1276_v25  ;;  %3145 = vmatpush.msrb.mxu3 %v1293_v26  ;;  %v1326_v25 = vld [vmem:[%s4169_s28 + $0x20f0] sm:$0xff]  ;;  %v1341_v26 = vld [vmem:[%s4169_s28 + $0x2168] sm:$0xff] }
 0x243   : > { %3087 = vmatpush.msrb.mxu0 %v1243_v27  ;;  %3106 = vmatpush.msrb.mxu1 %v1260_v28  ;;  %v1358_v27 = vld [vmem:[%s4169_s28 + $0x21f0] sm:$0xff]  ;;  %v1308_v28 = vld [vmem:[%s4169_s28 + $0x2060] sm:$0xff] }
 0x244   : > { %3127 = vmatpush.msrb.mxu2 %v1275_v29  ;;  %3146 = vmatpush.msrb.mxu3 %v1292_v30  ;;  %v1325_v29 = vld [vmem:[%s4169_s28 + $0x20e8] sm:$0xff]  ;;  %v1340_v30 = vld [vmem:[%s4169_s28 + $0x2160] sm:$0xff] }
 0x245   : > { %3088 = vmatpush.msrb.mxu0 %v1242_v32  ;;  %3107 = vmatpush.msrb.mxu1 %v1259_v33  ;;  %v1357_v32 = vld [vmem:[%s4169_s28 + $0x21e8] sm:$0xff]  ;;  %v1307_v33 = vld [vmem:[%s4169_s28 + $0x2058] sm:$0xff] }
 0x246   : > { %3128 = vmatpush.msrb.mxu2 %v1274_v35  ;;  %3147 = vmatpush.msrb.mxu3 %v1291_v36  ;;  %v1324_v35 = vld [vmem:[%s4169_s28 + $0x20e0] sm:$0xff]  ;;  %v1339_v36 = vld [vmem:[%s4169_s28 + $0x2158] sm:$0xff] }
 0x247   : > { %3089 = vmatpush.msrb.mxu0 %v1241_v31  ;;  %3108 = vmatpush.msrb.mxu1 %v1258_v34  ;;  %v1356_v31 = vld [vmem:[%s4169_s28 + $0x21e0] sm:$0xff]  ;;  %v1306_v34 = vld [vmem:[%s4169_s28 + $0x2050] sm:$0xff] }
 0x248   : > { %3129 = vmatpush.msrb.mxu2 %v1273_v37  ;;  %3148 = vmatpush.msrb.mxu3 %v1290_v38  ;;  %v1323_v37 = vld [vmem:[%s4169_s28 + $0x20d8] sm:$0xff]  ;;  %v1338_v38 = vld [vmem:[%s4169_s28 + $0x2150] sm:$0xff] }
 0x249   : > { %3090 = vmatpush.msrb.mxu0 %v1240_v39  ;;  %3109 = vmatpush.msrb.mxu1 %v1257_v40  ;;  %v1355_v39 = vld [vmem:[%s4169_s28 + $0x21d8] sm:$0xff]  ;;  %v1305_v40 = vld [vmem:[%s4169_s28 + $0x2048] sm:$0xff] }
 0x24a   : > { %3130 = vmatpush.msrb.mxu2 %v1272_v41  ;;  %3149 = vmatpush.msrb.mxu3 %v1289_v42  ;;  %v1322_v41 = vld [vmem:[%s4169_s28 + $0x20d0] sm:$0xff]  ;;  %v1337_v42 = vld [vmem:[%s4169_s28 + $0x2148] sm:$0xff] }
 0x24b   : > { %3091 = vmatpush.msrb.mxu0 %v1239_v43  ;;  %3110 = vmatpush.msrb.mxu1 %v1256_v44  ;;  %v1354_v43 = vld [vmem:[%s4169_s28 + $0x21d0] sm:$0xff]  ;;  %v1304_v44 = vld [vmem:[%s4169_s28 + $0x2040] sm:$0xff] }
 0x24c   : > { %3131 = vmatpush.msrb.mxu2 %v1271_v45  ;;  %3150 = vmatpush.msrb.mxu3 %v1288_v46  ;;  %v1321_v45 = vld [vmem:[%s4169_s28 + $0x20c8] sm:$0xff]  ;;  %v1336_v46 = vld [vmem:[%s4169_s28 + $0x2140] sm:$0xff] }
 0x24d   : > { %3092 = vmatpush.msrb.mxu0 %v1238_v47  ;;  %3111 = vmatpush.msrb.mxu1 %v1255_v48  ;;  %v1353_v47 = vld [vmem:[%s4169_s28 + $0x21c8] sm:$0xff]  ;;  %v1303_v48 = vld [vmem:[%s4169_s28 + $0x2038] sm:$0xff] }
 0x24e   : > { %3132 = vmatpush.msrb.mxu2 %v1270_v49  ;;  %3151 = vmatpush.msrb.mxu3 %v1287_v50  ;;  %v1320_v49 = vld [vmem:[%s4169_s28 + $0x20c0] sm:$0xff]  ;;  %v1335_v50 = vld [vmem:[%s4169_s28 + $0x2138] sm:$0xff] }
 0x24f   : > { %3093 = vmatpush.msrb.mxu0 %v1237_v51  ;;  %3112 = vmatpush.msrb.mxu1 %v1254_v52  ;;  %v1352_v51 = vld [vmem:[%s4169_s28 + $0x21c0] sm:$0xff]  ;;  %v1302_v52 = vld [vmem:[%s4169_s28 + $0x2030] sm:$0xff] }
 0x250   : > { %3133 = vmatpush.msrb.mxu2 %v1269_v53  ;;  %3152 = vmatpush.msrb.mxu3 %v1286_v54  ;;  %v1319_v53 = vld [vmem:[%s4169_s28 + $0x20b8] sm:$0xff]  ;;  %v1334_v54 = vld [vmem:[%s4169_s28 + $0x2130] sm:$0xff] }
 0x251   : > { %3094 = vmatpush.msrb.mxu0 %v1236_v55  ;;  %3113 = vmatpush.msrb.mxu1 %v1253_v56  ;;  %v1351_v55 = vld [vmem:[%s4169_s28 + $0x21b8] sm:$0xff]  ;;  %v1301_v56 = vld [vmem:[%s4169_s28 + $0x2028] sm:$0xff] }
 0x252   : > { %3134 = vmatpush.msrb.mxu2 %v1268_v57  ;;  %3153 = vmatpush.msrb.mxu3 %v1285_v58  ;;  %v1318_v57 = vld [vmem:[%s4169_s28 + $0x20b0] sm:$0xff]  ;;  %v1333_v58 = vld [vmem:[%s4169_s28 + $0x2128] sm:$0xff] }
 0x253   : > { %3095 = vmatpush.msrb.mxu0 %v1235_v59  ;;  %3114 = vmatpush.msrb.mxu1 %v1252_v60  ;;  %v1350_v59 = vld [vmem:[%s4169_s28 + $0x21b0] sm:$0xff]  ;;  %v1300_v60 = vld [vmem:[%s4169_s28 + $0x2020] sm:$0xff] }
 0x254   : > { %3135 = vmatpush.msrb.mxu2 %v1267_v61  ;;  %3154 = vmatpush.msrb.mxu3 %v1284_v62  ;;  %v1317_v61 = vld [vmem:[%s4169_s28 + $0x20a8] sm:$0xff]  ;;  %v1332_v62 = vld [vmem:[%s4169_s28 + $0x2120] sm:$0xff] }
 0x255   : > { %3096 = vmatpush.msrb.mxu0 %v1234_v63  ;;  %3115 = vmatpush.msrb.mxu1 %v1251_v0  ;;  %v1349_v63 = vld [vmem:[%s4169_s28 + $0x21a8] sm:$0xff]  ;;  %v1299_v0 = vld [vmem:[%s4169_s28 + $0x2018] sm:$0xff] }
 0x256   : > { %3136 = vmatpush.msrb.mxu2 %v1266_v1  ;;  %3155 = vmatpush.msrb.mxu3 %v1283_v2  ;;  %v1316_v1 = vld [vmem:[%s4169_s28 + $0x20a0] sm:$0xff]  ;;  %v1331_v2 = vld [vmem:[%s4169_s28 + $0x2118] sm:$0xff] }
 0x257   : > { %3097 = vmatpush.msrb.mxu0 %v1233_v3  ;;  %3116 = vmatpush.msrb.mxu1 %v1250_v4  ;;  %v1348_v3 = vld [vmem:[%s4169_s28 + $0x21a0] sm:$0xff]  ;;  %v1298_v4 = vld [vmem:[%s4169_s28 + $0x2010] sm:$0xff] }
 0x258   : > { %3137 = vmatpush.msrb.mxu2 %v1265_v6  ;;  %3156 = vmatpush.msrb.mxu3 %v1282_v7  ;;  %v1330_v6 = vld [vmem:[%s4169_s28 + $0x2110] sm:$0xff]  ;;  %v1347_v7 = vld [vmem:[%s4169_s28 + $0x2198] sm:$0xff] }
 0x259   : > { %3098 = vmatpush.msrb.mxu0 %v1232_v8  ;;  %3117 = vmatpush.msrb.mxu1 %v1249_v9  ;;  %v1297_v8 = vld [vmem:[%s4169_s28 + $0x2008] sm:$0xff]  ;;  %v1314_v9 = vld [vmem:[%s4169_s28 + $0x2090] sm:$0xff] }
 0x25a   : > { %3138 = vmatpush.msrb.mxu2 %v1264_v10  ;;  %3157 = vmatpush.msrb.mxu3 %v1281_v11  ;;  %v267_v10 = vld [vmem:[%s4190_s6 + $0x88] sm:$0xff]  ;;  %v1329_v11 = vld [vmem:[%s4169_s28 + $0x2108] sm:$0xff] }
 0x25b   : > { %3099 = vmatmul.f32.vlgmr.msrb.gmra.mxu0 %v1763_v12  ;;  %3139 = vmatmul.f32.vlgmr.msrb.gmra.mxu2 %v1765_v13  ;;  %v1346_v12 = vld [vmem:[%s4169_s28 + $0x2190] sm:$0xff]  ;;  %1768 = vst [vmem:[#allocation1 + $0x20] ss:$4 sm:$0xff] %v267_v10  ;;  %v1296_v13 = vld [vmem:[%s4169_s28 + $0x2000] sm:$0xff]  ;;  %v1379_v10 = vld [vmem:[%s4169_s28 + $0x2298] sm:$0xff] }
 0x25c   : > { %3163 = vmatpush.msra.mxu0 %v1311_v14  ;;  %3203 = vmatpush.msra.mxu2 %v1343_v15  ;;  %v1313_v14 = vld [vmem:[%s4169_s28 + $0x2088] sm:$0xff]  ;;  %v1328_v15 = vld [vmem:[%s4169_s28 + $0x2100] sm:$0xff] }
 0x25d   : > { %3118 = vmatpush.msrb.mxu1 %v1248_v16  ;;  %3158 = vmatpush.msrb.mxu3 %v1280_v17  ;;  %v1345_v16 = vld [vmem:[%s4169_s28 + $0x2188] sm:$0xff]  ;;  %v1769_v17 = vld.sshfl [vmem:[#allocation1] sm:$0xff pattern:$0x73625140] }
 0x25e   : > { %3119 = vmatmul.f32.vlgmr.msrb.gmra.mxu1 %v1764_v18  ;;  %3159 = vmatmul.f32.vlgmr.msrb.gmra.mxu3 %v1766_v19  ;;  %v1771_v18 = vld.sshfl [vmem:[#allocation1 + $0x10] sm:$0xff pattern:$0x73625140]  ;;  %v1375_v19 = vld [vmem:[%s4169_s28 + $0x2278] sm:$0xff] }
 0x25f   : > { %3164 = vmatpush.msra.mxu0 %v1310_v20  ;;  %3183 = vmatpush.msra.mxu1 %v1327_v21  ;;  %v1407_v20 = vld [vmem:[%s4169_s28 + $0x2378] sm:$0xff]  ;;  %v1312_v21 = vld [vmem:[%s4169_s28 + $0x2080] sm:$0xff] }
 0x260   : > { %3204 = vmatpush.msra.mxu2 %v1342_v22  ;;  %3223 = vmatpush.msra.mxu3 %v1359_v23  ;;  %v1344_v22 = vld [vmem:[%s4169_s28 + $0x2180] sm:$0xff] }
 0x261   : > { %3165 = vmatpush.msra.mxu0 %v1309_v24  ;;  %3184 = vmatpush.msra.mxu1 %v1326_v25  ;;  %v1770_v23 = vld.sshfl [vmem:[#allocation1 + $0x8] sm:$0xff pattern:$0x73625140]  ;;  %v1772_v24 = vld.sshfl [vmem:[#allocation1 + $0x18] sm:$0xff pattern:$0x73625140] }
 0x262   : > { %3205 = vmatpush.msra.mxu2 %v1341_v26  ;;  %3224 = vmatpush.msra.mxu3 %v1358_v27  ;;  %v1374_v25 = vld [vmem:[%s4169_s28 + $0x2270] sm:$0xff]  ;;  %v1391_v26 = vld [vmem:[%s4169_s28 + $0x22f8] sm:$0xff] }
 0x263   : > { %3166 = vmatpush.msra.mxu0 %v1308_v28  ;;  %3185 = vmatpush.msra.mxu1 %v1325_v29  ;;  %v1406_v27 = vld [vmem:[%s4169_s28 + $0x2370] sm:$0xff]  ;;  %v1423_v28 = vld [vmem:[%s4169_s28 + $0x23f8] sm:$0xff]  ;;  %v1373_v29 = vld [vmem:[%s4169_s28 + $0x2268] sm:$0xff] }
 0x264   : > { %3206 = vmatpush.msra.mxu2 %v1340_v30  ;;  %3225 = vmatpush.msra.mxu3 %v1357_v32  ;;  %v1390_v30 = vld [vmem:[%s4169_s28 + $0x22f0] sm:$0xff]  ;;  %v1405_v32 = vld [vmem:[%s4169_s28 + $0x2368] sm:$0xff] }
 0x265   : > { %3167 = vmatpush.msra.mxu0 %v1307_v33  ;;  %3186 = vmatpush.msra.mxu1 %v1324_v35  ;;  %v1422_v33 = vld [vmem:[%s4169_s28 + $0x23f0] sm:$0xff]  ;;  %v1372_v35 = vld [vmem:[%s4169_s28 + $0x2260] sm:$0xff] }
 0x266   : > { %3207 = vmatpush.msra.mxu2 %v1339_v36  ;;  %3226 = vmatpush.msra.mxu3 %v1356_v31  ;;  %v1389_v36 = vld [vmem:[%s4169_s28 + $0x22e8] sm:$0xff]  ;;  %v1404_v31 = vld [vmem:[%s4169_s28 + $0x2360] sm:$0xff] }
 0x267   : > { %3168 = vmatpush.msra.mxu0 %v1306_v34  ;;  %3187 = vmatpush.msra.mxu1 %v1323_v37  ;;  %v1421_v34 = vld [vmem:[%s4169_s28 + $0x23e8] sm:$0xff]  ;;  %v1371_v37 = vld [vmem:[%s4169_s28 + $0x2258] sm:$0xff] }
 0x268   : > { %3208 = vmatpush.msra.mxu2 %v1338_v38  ;;  %3227 = vmatpush.msra.mxu3 %v1355_v39  ;;  %v1388_v38 = vld [vmem:[%s4169_s28 + $0x22e0] sm:$0xff]  ;;  %v1403_v39 = vld [vmem:[%s4169_s28 + $0x2358] sm:$0xff] }
 0x269   : > { %3169 = vmatpush.msra.mxu0 %v1305_v40  ;;  %3188 = vmatpush.msra.mxu1 %v1322_v41  ;;  %v1420_v40 = vld [vmem:[%s4169_s28 + $0x23e0] sm:$0xff]  ;;  %v1370_v41 = vld [vmem:[%s4169_s28 + $0x2250] sm:$0xff] }
 0x26a   : > { %3209 = vmatpush.msra.mxu2 %v1337_v42  ;;  %3228 = vmatpush.msra.mxu3 %v1354_v43  ;;  %v1387_v42 = vld [vmem:[%s4169_s28 + $0x22d8] sm:$0xff]  ;;  %v1402_v43 = vld [vmem:[%s4169_s28 + $0x2350] sm:$0xff] }
 0x26b   : > { %3170 = vmatpush.msra.mxu0 %v1304_v44  ;;  %3189 = vmatpush.msra.mxu1 %v1321_v45  ;;  %v1419_v44 = vld [vmem:[%s4169_s28 + $0x23d8] sm:$0xff]  ;;  %v1369_v45 = vld [vmem:[%s4169_s28 + $0x2248] sm:$0xff] }
 0x26c   : > { %3210 = vmatpush.msra.mxu2 %v1336_v46  ;;  %3229 = vmatpush.msra.mxu3 %v1353_v47  ;;  %v1386_v46 = vld [vmem:[%s4169_s28 + $0x22d0] sm:$0xff]  ;;  %v1401_v47 = vld [vmem:[%s4169_s28 + $0x2348] sm:$0xff] }
 0x26d   : > { %3171 = vmatpush.msra.mxu0 %v1303_v48  ;;  %3190 = vmatpush.msra.mxu1 %v1320_v49  ;;  %v1418_v48 = vld [vmem:[%s4169_s28 + $0x23d0] sm:$0xff]  ;;  %v1368_v49 = vld [vmem:[%s4169_s28 + $0x2240] sm:$0xff] }
 0x26e   : > { %3211 = vmatpush.msra.mxu2 %v1335_v50  ;;  %3230 = vmatpush.msra.mxu3 %v1352_v51  ;;  %v1385_v50 = vld [vmem:[%s4169_s28 + $0x22c8] sm:$0xff]  ;;  %v1400_v51 = vld [vmem:[%s4169_s28 + $0x2340] sm:$0xff] }
 0x26f   : > { %3172 = vmatpush.msra.mxu0 %v1302_v52  ;;  %3191 = vmatpush.msra.mxu1 %v1319_v53  ;;  %v1417_v52 = vld [vmem:[%s4169_s28 + $0x23c8] sm:$0xff]  ;;  %v1367_v53 = vld [vmem:[%s4169_s28 + $0x2238] sm:$0xff] }
 0x270   : > { %3212 = vmatpush.msra.mxu2 %v1334_v54  ;;  %3231 = vmatpush.msra.mxu3 %v1351_v55  ;;  %v1384_v54 = vld [vmem:[%s4169_s28 + $0x22c0] sm:$0xff]  ;;  %v1399_v55 = vld [vmem:[%s4169_s28 + $0x2338] sm:$0xff] }
 0x271   : > { %3173 = vmatpush.msra.mxu0 %v1301_v56  ;;  %3192 = vmatpush.msra.mxu1 %v1318_v57  ;;  %v1416_v56 = vld [vmem:[%s4169_s28 + $0x23c0] sm:$0xff]  ;;  %v1366_v57 = vld [vmem:[%s4169_s28 + $0x2230] sm:$0xff] }
 0x272   : > { %3213 = vmatpush.msra.mxu2 %v1333_v58  ;;  %3232 = vmatpush.msra.mxu3 %v1350_v59  ;;  %v1383_v58 = vld [vmem:[%s4169_s28 + $0x22b8] sm:$0xff]  ;;  %v1398_v59 = vld [vmem:[%s4169_s28 + $0x2330] sm:$0xff] }
 0x273   : > { %3174 = vmatpush.msra.mxu0 %v1300_v60  ;;  %3193 = vmatpush.msra.mxu1 %v1317_v61  ;;  %v1415_v60 = vld [vmem:[%s4169_s28 + $0x23b8] sm:$0xff]  ;;  %v1365_v61 = vld [vmem:[%s4169_s28 + $0x2228] sm:$0xff] }
 0x274   : > { %3214 = vmatpush.msra.mxu2 %v1332_v62  ;;  %3233 = vmatpush.msra.mxu3 %v1349_v63  ;;  %v1382_v62 = vld [vmem:[%s4169_s28 + $0x22b0] sm:$0xff]  ;;  %v1397_v63 = vld [vmem:[%s4169_s28 + $0x2328] sm:$0xff] }
 0x275   : > { %3175 = vmatpush.msra.mxu0 %v1299_v0  ;;  %3194 = vmatpush.msra.mxu1 %v1316_v1  ;;  %v1414_v0 = vld [vmem:[%s4169_s28 + $0x23b0] sm:$0xff]  ;;  %v1364_v1 = vld [vmem:[%s4169_s28 + $0x2220] sm:$0xff] }
 0x276   : > { %3215 = vmatpush.msra.mxu2 %v1331_v2  ;;  %3234 = vmatpush.msra.mxu3 %v1348_v3  ;;  %v1381_v2 = vld [vmem:[%s4169_s28 + $0x22a8] sm:$0xff]  ;;  %v1396_v3 = vld [vmem:[%s4169_s28 + $0x2320] sm:$0xff] }
 0x277   : > { %3176 = vmatpush.msra.mxu0 %v1298_v4  ;;  %3195 = vmatpush.msra.mxu1 %v1315_v5  ;;  %v1413_v4 = vld [vmem:[%s4169_s28 + $0x23a8] sm:$0xff]  ;;  %v1363_v5 = vld [vmem:[%s4169_s28 + $0x2218] sm:$0xff] }
 0x278   : > { %3216 = vmatpush.msra.mxu2 %v1330_v6  ;;  %3235 = vmatpush.msra.mxu3 %v1347_v7  ;;  %v1380_v6 = vld [vmem:[%s4169_s28 + $0x22a0] sm:$0xff]  ;;  %v1395_v7 = vld [vmem:[%s4169_s28 + $0x2318] sm:$0xff] }
 0x279   : > { %3177 = vmatpush.msra.mxu0 %v1297_v8  ;;  %3196 = vmatpush.msra.mxu1 %v1314_v9  ;;  %v1412_v8 = vld [vmem:[%s4169_s28 + $0x23a0] sm:$0xff]  ;;  %v1362_v9 = vld [vmem:[%s4169_s28 + $0x2210] sm:$0xff] }
 0x27a   : > { %3217 = vmatpush.msra.mxu2 %v1329_v11  ;;  %3236 = vmatpush.msra.mxu3 %v1346_v12  ;;  %v1394_v11 = vld [vmem:[%s4169_s28 + $0x2310] sm:$0xff]  ;;  %v1411_v12 = vld [vmem:[%s4169_s28 + $0x2398] sm:$0xff] }
 0x27b   : > { %3178 = vmatpush.msra.mxu0 %v1296_v13  ;;  %3197 = vmatpush.msra.mxu1 %v1313_v14  ;;  %v1361_v13 = vld [vmem:[%s4169_s28 + $0x2208] sm:$0xff]  ;;  %v1378_v14 = vld [vmem:[%s4169_s28 + $0x2290] sm:$0xff] }
 0x27c   : > { %3218 = vmatpush.msra.mxu2 %v1328_v15  ;;  %3237 = vmatpush.msra.mxu3 %v1345_v16  ;;  %v268_v15 = vld [vmem:[%s4190_s6 + $0x90] sm:$0xff] }
 0x27d   : > { %3179 = vmatmul.f32.vlgmr.msra.gmra.mxu0 %v1769_v17  ;;  %3219 = vmatmul.f32.vlgmr.msra.gmra.mxu2 %v1771_v18  ;;  %v1393_v16 = vld [vmem:[%s4169_s28 + $0x2308] sm:$0xff]  ;;  %v1410_v17 = vld [vmem:[%s4169_s28 + $0x2390] sm:$0xff]  ;;  %1777 = vst [vmem:[#allocation1] ss:$4 sm:$0xff] %v268_v15  ;;  %v1360_v18 = vld [vmem:[%s4169_s28 + $0x2200] sm:$0xff] }
 0x27e   : > { %3243 = vmatpush.msrb.mxu0 %v1375_v19  ;;  %3283 = vmatpush.msrb.mxu2 %v1407_v20  ;;  %v1377_v19 = vld [vmem:[%s4169_s28 + $0x2288] sm:$0xff]  ;;  %v1392_v20 = vld [vmem:[%s4169_s28 + $0x2300] sm:$0xff] }
 0x27f   : > { %3198 = vmatpush.msra.mxu1 %v1312_v21  ;;  %3238 = vmatpush.msra.mxu3 %v1344_v22  ;;  %v1409_v21 = vld [vmem:[%s4169_s28 + $0x2388] sm:$0xff]  ;;  %v1773_v22 = vld.sshfl [vmem:[#allocation1 + $0x20] sm:$0xff pattern:$0x73625140] }
 0x280   : > { %3199 = vmatmul.f32.vlgmr.msra.gmra.mxu1 %v1770_v23  ;;  %3239 = vmatmul.f32.vlgmr.msra.gmra.mxu3 %v1772_v24  ;;  %v1775_v23 = vld.sshfl [vmem:[#allocation1 + $0x30] sm:$0xff pattern:$0x73625140]  ;;  %v1439_v24 = vld [vmem:[%s4169_s28 + $0x2478] sm:$0xff] }
 0x281   : > { %3244 = vmatpush.msrb.mxu0 %v1374_v25  ;;  %3263 = vmatpush.msrb.mxu1 %v1391_v26  ;;  %v1471_v25 = vld [vmem:[%s4169_s28 + $0x2578] sm:$0xff]  ;;  %v1376_v26 = vld [vmem:[%s4169_s28 + $0x2280] sm:$0xff] }
 0x282   : > { %3284 = vmatpush.msrb.mxu2 %v1406_v27  ;;  %3303 = vmatpush.msrb.mxu3 %v1423_v28  ;;  %v1408_v27 = vld [vmem:[%s4169_s28 + $0x2380] sm:$0xff] }
 0x283   : > { %3245 = vmatpush.msrb.mxu0 %v1373_v29  ;;  %3264 = vmatpush.msrb.mxu1 %v1390_v30  ;;  %v1774_v28 = vld.sshfl [vmem:[#allocation1 + $0x28] sm:$0xff pattern:$0x73625140]  ;;  %v1776_v29 = vld.sshfl [vmem:[#allocation1 + $0x38] sm:$0xff pattern:$0x73625140] }
 0x284   : > { %3285 = vmatpush.msrb.mxu2 %v1405_v32  ;;  %3304 = vmatpush.msrb.mxu3 %v1422_v33  ;;  %v1438_v30 = vld [vmem:[%s4169_s28 + $0x2470] sm:$0xff]  ;;  %v1455_v32 = vld [vmem:[%s4169_s28 + $0x24f8] sm:$0xff] }
 0x285   : > { %3246 = vmatpush.msrb.mxu0 %v1372_v35  ;;  %3265 = vmatpush.msrb.mxu1 %v1389_v36  ;;  %v1470_v33 = vld [vmem:[%s4169_s28 + $0x2570] sm:$0xff]  ;;  %v1487_v35 = vld [vmem:[%s4169_s28 + $0x25f8] sm:$0xff]  ;;  %v1437_v36 = vld [vmem:[%s4169_s28 + $0x2468] sm:$0xff] }
 0x286   : > { %3286 = vmatpush.msrb.mxu2 %v1404_v31  ;;  %3305 = vmatpush.msrb.mxu3 %v1421_v34  ;;  %v1454_v31 = vld [vmem:[%s4169_s28 + $0x24f0] sm:$0xff]  ;;  %v1469_v34 = vld [vmem:[%s4169_s28 + $0x2568] sm:$0xff] }
 0x287   : > { %3247 = vmatpush.msrb.mxu0 %v1371_v37  ;;  %3266 = vmatpush.msrb.mxu1 %v1388_v38  ;;  %v1486_v37 = vld [vmem:[%s4169_s28 + $0x25f0] sm:$0xff]  ;;  %v1920_v38 = vpop.f32.mrf.mxu1 }
 0x288   : > { %3287 = vmatpush.msrb.mxu2 %v1403_v39  ;;  %3306 = vmatpush.msrb.mxu3 %v1420_v40  ;;  %v1436_v39 = vld [vmem:[%s4169_s28 + $0x2460] sm:$0xff]  ;;  %v1453_v40 = vld [vmem:[%s4169_s28 + $0x24e8] sm:$0xff] }
 0x289   : > { %3248 = vmatpush.msrb.mxu0 %v1370_v41  ;;  %3267 = vmatpush.msrb.mxu1 %v1387_v42  ;;  %v1468_v41 = vld [vmem:[%s4169_s28 + $0x2560] sm:$0xff]  ;;  %v1485_v42 = vld [vmem:[%s4169_s28 + $0x25e8] sm:$0xff] }
 0x28a   : > { %3288 = vmatpush.msrb.mxu2 %v1402_v43  ;;  %3307 = vmatpush.msrb.mxu3 %v1419_v44  ;;  %v1900_v43 = vpop.f32.mrf.mxu0  ;;  %v1435_v44 = vld [vmem:[%s4169_s28 + $0x2458] sm:$0xff] }
 0x28b   : > { %3249 = vmatpush.msrb.mxu0 %v1369_v45  ;;  %3268 = vmatpush.msrb.mxu1 %v1386_v46  ;;  %v1452_v45 = vld [vmem:[%s4169_s28 + $0x24e0] sm:$0xff]  ;;  %v1921_v46 = vadd.f32 %v1920_v38, %v1900_v43  ;;  %v1441_v38 = vld [vmem:[%s4169_s28 + $0x2488] sm:$0xff] }
 0x28c   : > { %3289 = vmatpush.msrb.mxu2 %v1401_v47  ;;  %3308 = vmatpush.msrb.mxu3 %v1418_v48  ;;  %v1467_v47 = vld [vmem:[%s4169_s28 + $0x2558] sm:$0xff]  ;;  %v1484_v48 = vld [vmem:[%s4169_s28 + $0x25e0] sm:$0xff]  ;;  %v1781_v43 = vld.sshfl [vmem:[#allocation1 + $0x10] sm:$0xff pattern:$0x73625140] }
 0x28d   : > { %3250 = vmatpush.msrb.mxu0 %v1368_v49  ;;  %3269 = vmatpush.msrb.mxu1 %v1385_v50  ;;  %v1940_v49 = vpop.f32.mrf.mxu2  ;;  %v1434_v50 = vld [vmem:[%s4169_s28 + $0x2450] sm:$0xff] }
 0x28e   : > { %3290 = vmatpush.msrb.mxu2 %v1400_v51  ;;  %3309 = vmatpush.msrb.mxu3 %v1417_v52  ;;  %v1451_v51 = vld [vmem:[%s4169_s28 + $0x24d8] sm:$0xff]  ;;  %v1466_v52 = vld [vmem:[%s4169_s28 + $0x2550] sm:$0xff] }
 0x28f   : > { %3251 = vmatpush.msrb.mxu0 %v1367_v53  ;;  %3270 = vmatpush.msrb.mxu1 %v1384_v54  ;;  %v1483_v53 = vld [vmem:[%s4169_s28 + $0x25d8] sm:$0xff]  ;;  %v1433_v54 = vld [vmem:[%s4169_s28 + $0x2448] sm:$0xff]  ;;  %v2000_v15 = vpop.f32.mrf.mxu1 }
 0x290   : > { %3291 = vmatpush.msrb.mxu2 %v1399_v55  ;;  %3310 = vmatpush.msrb.mxu3 %v1416_v56  ;;  %v1450_v55 = vld [vmem:[%s4169_s28 + $0x24d0] sm:$0xff]  ;;  %v1941_v56 = vadd.f32 %v1940_v49, %v1921_v46  ;;  %v1535_v46 = vld [vmem:[%s4169_s28 + $0x2778] sm:$0xff] }
 0x291   : > { %3252 = vmatpush.msrb.mxu0 %v1366_v57  ;;  %3271 = vmatpush.msrb.mxu1 %v1383_v58  ;;  %v1465_v57 = vld [vmem:[%s4169_s28 + $0x2548] sm:$0xff]  ;;  %v1482_v58 = vld [vmem:[%s4169_s28 + $0x25d0] sm:$0xff] }
 0x292   : > { %3292 = vmatpush.msrb.mxu2 %v1398_v59  ;;  %3311 = vmatpush.msrb.mxu3 %v1415_v60  ;;  %v1960_v59 = vpop.f32.mrf.mxu3  ;;  %v1432_v60 = vld [vmem:[%s4169_s28 + $0x2440] sm:$0xff] }
 0x293   : > { %3253 = vmatpush.msrb.mxu0 %v1365_v61  ;;  %3272 = vmatpush.msrb.mxu1 %v1382_v62  ;;  %v1449_v61 = vld [vmem:[%s4169_s28 + $0x24c8] sm:$0xff]  ;;  %v1464_v62 = vld [vmem:[%s4169_s28 + $0x2540] sm:$0xff] }
 0x294   : > { %3293 = vmatpush.msrb.mxu2 %v1397_v63  ;;  %3312 = vmatpush.msrb.mxu3 %v1414_v0  ;;  %v1481_v63 = vld [vmem:[%s4169_s28 + $0x25c8] sm:$0xff]  ;;  %v1431_v0 = vld [vmem:[%s4169_s28 + $0x2438] sm:$0xff] }
 0x295   : > { %3254 = vmatpush.msrb.mxu0 %v1364_v1  ;;  %3273 = vmatpush.msrb.mxu1 %v1381_v2  ;;  %v1448_v1 = vld [vmem:[%s4169_s28 + $0x24c0] sm:$0xff]  ;;  %v1961_v2 = vadd.f32 %v1960_v59, %v1941_v56  ;;  %v1551_v56 = vld [vmem:[%s4169_s28 + $0x27f8] sm:$0xff]  ;;  %v1518_v59 = vld [vmem:[%s4169_s28 + $0x26f0] sm:$0xff] }
 0x296   : > { %3294 = vmatpush.msrb.mxu2 %v1396_v3  ;;  %3313 = vmatpush.msrb.mxu3 %v1413_v4  ;;  %v1463_v3 = vld [vmem:[%s4169_s28 + $0x2538] sm:$0xff]  ;;  %v1480_v4 = vld [vmem:[%s4169_s28 + $0x25c0] sm:$0xff] }
 0x297   : > { %3255 = vmatpush.msrb.mxu0 %v1363_v5  ;;  %3274 = vmatpush.msrb.mxu1 %v1380_v6  ;;  %v1980_v5 = vpop.f32.mrf.mxu0  ;;  %v1430_v6 = vld [vmem:[%s4169_s28 + $0x2430] sm:$0xff] }
 0x298   : > { %3295 = vmatpush.msrb.mxu2 %v1395_v7  ;;  %3314 = vmatpush.msrb.mxu3 %v1412_v8  ;;  %v1447_v7 = vld [vmem:[%s4169_s28 + $0x24b8] sm:$0xff]  ;;  %v1462_v8 = vld [vmem:[%s4169_s28 + $0x2530] sm:$0xff] }
 0x299   : > { %3256 = vmatpush.msrb.mxu0 %v1362_v9  ;;  %3275 = vmatpush.msrb.mxu1 %v1379_v10  ;;  %v1479_v9 = vld [vmem:[%s4169_s28 + $0x25b8] sm:$0xff]  ;;  %v1429_v10 = vld [vmem:[%s4169_s28 + $0x2428] sm:$0xff] }
 0x29a   : > { %3296 = vmatpush.msrb.mxu2 %v1394_v11  ;;  %3315 = vmatpush.msrb.mxu3 %v1411_v12  ;;  %v1446_v11 = vld [vmem:[%s4169_s28 + $0x24b0] sm:$0xff]  ;;  %v1981_v12 = vadd.f32 %v1980_v5, %v1961_v2  ;;  %v1532_v2 = vld [vmem:[%s4169_s28 + $0x2760] sm:$0xff]  ;;  %v1499_v5 = vld [vmem:[%s4169_s28 + $0x2658] sm:$0xff] }
 0x29b   : > { %3257 = vmatpush.msrb.mxu0 %v1361_v13  ;;  %3276 = vmatpush.msrb.mxu1 %v1378_v14  ;;  %v1461_v13 = vld [vmem:[%s4169_s28 + $0x2528] sm:$0xff]  ;;  %v1478_v14 = vld [vmem:[%s4169_s28 + $0x25b0] sm:$0xff] }
 0x29c   : > { %3297 = vmatpush.msrb.mxu2 %v1393_v16  ;;  %3316 = vmatpush.msrb.mxu3 %v1410_v17  ;;  %v1428_v16 = vld [vmem:[%s4169_s28 + $0x2420] sm:$0xff]  ;;  %v1445_v17 = vld [vmem:[%s4169_s28 + $0x24a8] sm:$0xff] }
 0x29d   : > { %3258 = vmatpush.msrb.mxu0 %v1360_v18  ;;  %3277 = vmatpush.msrb.mxu1 %v1377_v19  ;;  %v1460_v18 = vld [vmem:[%s4169_s28 + $0x2520] sm:$0xff]  ;;  %v1477_v19 = vld [vmem:[%s4169_s28 + $0x25a8] sm:$0xff] }
 0x29e   : > { %3298 = vmatpush.msrb.mxu2 %v1392_v20  ;;  %3317 = vmatpush.msrb.mxu3 %v1409_v21  ;;  %v1427_v20 = vld [vmem:[%s4169_s28 + $0x2418] sm:$0xff]  ;;  %v1444_v21 = vld [vmem:[%s4169_s28 + $0x24a0] sm:$0xff] }
 0x29f   : > { %3259 = vmatmul.f32.vlgmr.msrb.gmra.mxu0 %v1773_v22  ;;  %3299 = vmatmul.f32.vlgmr.msrb.gmra.mxu2 %v1775_v23  ;;  %v2001_v22 = vadd.f32 %v2000_v15, %v1981_v12  ;;  %v1459_v23 = vld [vmem:[%s4169_s28 + $0x2518] sm:$0xff]  ;;  %v1497_v15 = vld [vmem:[%s4169_s28 + $0x2648] sm:$0xff] }
 0x2a0   : > { %3323 = vmatpush.msra.mxu0 %v1439_v24  ;;  %3363 = vmatpush.msra.mxu2 %v1471_v25  ;;  %v1476_v24 = vld [vmem:[%s4169_s28 + $0x25a0] sm:$0xff]  ;;  %v2020_v25 = vpop.f32.mrf.mxu2 }
 0x2a1   : > { %3278 = vmatpush.msrb.mxu1 %v1376_v26  ;;  %3318 = vmatpush.msrb.mxu3 %v1408_v27  ;;  %v1426_v26 = vld [vmem:[%s4169_s28 + $0x2410] sm:$0xff]  ;;  %v1443_v27 = vld [vmem:[%s4169_s28 + $0x2498] sm:$0xff] }
 0x2a2   : > { %3279 = vmatmul.f32.vlgmr.msrb.gmra.mxu1 %v1774_v28  ;;  %3319 = vmatmul.f32.vlgmr.msrb.gmra.mxu3 %v1776_v29  ;;  %v1458_v28 = vld [vmem:[%s4169_s28 + $0x2510] sm:$0xff]  ;;  %v1475_v29 = vld [vmem:[%s4169_s28 + $0x2598] sm:$0xff] }
 0x2a3   : > { %3324 = vmatpush.msra.mxu0 %v1438_v30  ;;  %3343 = vmatpush.msra.mxu1 %v1455_v32  ;;  %v1425_v30 = vld [vmem:[%s4169_s28 + $0x2408] sm:$0xff]  ;;  %v1442_v32 = vld [vmem:[%s4169_s28 + $0x2490] sm:$0xff] }
 0x2a4   : > { %3364 = vmatpush.msra.mxu2 %v1470_v33  ;;  %3383 = vmatpush.msra.mxu3 %v1487_v35  ;;  %v269_v33 = vld [vmem:[%s4190_s6 + $0x98] sm:$0xff]  ;;  %v2021_v35 = vadd.f32 %v2020_v25, %v2001_v22  ;;  %v1513_v22 = vld [vmem:[%s4169_s28 + $0x26c8] sm:$0xff] }
 0x2a5   : > { %3325 = vmatpush.msra.mxu0 %v1437_v36  ;;  %3344 = vmatpush.msra.mxu1 %v1454_v31  ;;  %v1457_v36 = vld [vmem:[%s4169_s28 + $0x2508] sm:$0xff]  ;;  %v1474_v31 = vld [vmem:[%s4169_s28 + $0x2590] sm:$0xff]  ;;  %1778 = vst [vmem:[#allocation1 + $0x20] ss:$4 sm:$0xff] %v269_v33  ;;  %v1511_v33 = vld [vmem:[%s4169_s28 + $0x26b8] sm:$0xff] }
 0x2a6   : > { %3365 = vmatpush.msra.mxu2 %v1469_v34  ;;  %3384 = vmatpush.msra.mxu3 %v1486_v37  ;;  %v2040_v34 = vpop.f32.mrf.mxu3  ;;  %v1424_v37 = vld [vmem:[%s4169_s28 + $0x2400] sm:$0xff] }
 0x2a7   : > { %3326 = vmatpush.msra.mxu0 %v1436_v39  ;;  %3345 = vmatpush.msra.mxu1 %v1453_v40  ;;  %v1456_v39 = vld [vmem:[%s4169_s28 + $0x2500] sm:$0xff]  ;;  %v1473_v40 = vld [vmem:[%s4169_s28 + $0x2588] sm:$0xff] }
 0x2a8   : > { %3366 = vmatpush.msra.mxu2 %v1468_v41  ;;  %3385 = vmatpush.msra.mxu3 %v1485_v42  ;;  %v2060_v41 = vpop.f32.mrf.mxu0  ;;  %v1779_v42 = vld.sshfl [vmem:[#allocation1] sm:$0xff pattern:$0x73625140] }
 0x2a9   : > { %3327 = vmatpush.msra.mxu0 %v1435_v44  ;;  %3346 = vmatpush.msra.mxu1 %v1452_v45  ;;  %v2041_v44 = vadd.f32 %v2040_v34, %v2021_v35  ;;  %v1503_v45 = vld [vmem:[%s4169_s28 + $0x2678] sm:$0xff] }
 0x2aa   : > { %3367 = vmatpush.msra.mxu2 %v1467_v47  ;;  %3386 = vmatpush.msra.mxu3 %v1484_v48  ;;  %v1440_v47 = vld [vmem:[%s4169_s28 + $0x2480] sm:$0xff] }
 0x2ab   : > { %3328 = vmatpush.msra.mxu0 %v1434_v50  ;;  %3347 = vmatpush.msra.mxu1 %v1451_v51  ;;  %v1472_v48 = vld [vmem:[%s4169_s28 + $0x2580] sm:$0xff]  ;;  %v2061_v49 = vadd.f32 %v2060_v41, %v2041_v44  ;;  %v1782_v51 = vld.sshfl [vmem:[#allocation1 + $0x18] sm:$0xff pattern:$0x73625140] }
 0x2ac   : > { %3368 = vmatpush.msra.mxu2 %v1466_v52  ;;  %3387 = vmatpush.msra.mxu3 %v1483_v53  ;;  %v1780_v50 = vld.sshfl [vmem:[#allocation1 + $0x8] sm:$0xff pattern:$0x73625140]  ;;  %v2080_v52 = vpop.f32.mrf.mxu1  ;;  %v1502_v53 = vld [vmem:[%s4169_s28 + $0x2670] sm:$0xff] }
 0x2ad   : > { %3329 = vmatpush.msra.mxu0 %v1433_v54  ;;  %3348 = vmatpush.msra.mxu1 %v1450_v55  ;;  %v1519_v54 = vld [vmem:[%s4169_s28 + $0x26f8] sm:$0xff]  ;;  %v1534_v55 = vld [vmem:[%s4169_s28 + $0x2770] sm:$0xff] }
 0x2ae   : > { %3369 = vmatpush.msra.mxu2 %v1465_v57  ;;  %3388 = vmatpush.msra.mxu3 %v1482_v58  ;;  %v2100_v57 = vpop.f32.mrf.mxu2  ;;  %v1501_v58 = vld [vmem:[%s4169_s28 + $0x2668] sm:$0xff] }
 0x2af   : > { %3330 = vmatpush.msra.mxu0 %v1432_v60  ;;  %3349 = vmatpush.msra.mxu1 %v1449_v61  ;;  %v2081_v60 = vadd.f32 %v2080_v52, %v2061_v49  ;;  %v1533_v61 = vld [vmem:[%s4169_s28 + $0x2768] sm:$0xff] }
 0x2b0   : > { %3370 = vmatpush.msra.mxu2 %v1464_v62  ;;  %3389 = vmatpush.msra.mxu3 %v1481_v63  ;;  %v1550_v62 = vld [vmem:[%s4169_s28 + $0x27f0] sm:$0xff]  ;;  %v1500_v63 = vld [vmem:[%s4169_s28 + $0x2660] sm:$0xff] }
 0x2b1   : > { %3331 = vmatpush.msra.mxu0 %v1431_v0  ;;  %3350 = vmatpush.msra.mxu1 %v1448_v1  ;;  %v1517_v0 = vld [vmem:[%s4169_s28 + $0x26e8] sm:$0xff]  ;;  %v2101_v1 = vadd.f32 %v2100_v57, %v2081_v60  ;;  %v270_v60 = vld [vmem:[%s4190_s6 + $0xa0] sm:$0xff] }
 0x2b2   : > { %3371 = vmatpush.msra.mxu2 %v1463_v3  ;;  %3390 = vmatpush.msra.mxu3 %v1480_v4  ;;  %v1549_v3 = vld [vmem:[%s4169_s28 + $0x27e8] sm:$0xff]  ;;  %v2120_v4 = vpop.f32.mrf.mxu3  ;;  %1787 = vst [vmem:[#allocation1] ss:$4 sm:$0xff] %v270_v60  ;;  %v1575_v60 = vld [vmem:[%s4169_s28 + $0x28b8] sm:$0xff] }
 0x2b3   : > { %3332 = vmatpush.msra.mxu0 %v1430_v6  ;;  %3351 = vmatpush.msra.mxu1 %v1447_v7  ;;  %v1516_v6 = vld [vmem:[%s4169_s28 + $0x26e0] sm:$0xff]  ;;  %v1531_v7 = vld [vmem:[%s4169_s28 + $0x2758] sm:$0xff]  ;;  %v2121_v12 = vadd.f32 %v2120_v4, %v2101_v1  ;;  %v1505_v1 = vld [vmem:[%s4169_s28 + $0x2688] sm:$0xff] }
 0x2b4   : > { %3372 = vmatpush.msra.mxu2 %v1462_v8  ;;  %3391 = vmatpush.msra.mxu3 %v1479_v9  ;;  %v1548_v8 = vld [vmem:[%s4169_s28 + $0x27e0] sm:$0xff]  ;;  %v2140_v9 = vpop.f32.mrf.mxu0  ;;  %v1537_v4 = vld [vmem:[%s4169_s28 + $0x2788] sm:$0xff] }
 0x2b5   : > { %3333 = vmatpush.msra.mxu0 %v1429_v10  ;;  %3352 = vmatpush.msra.mxu1 %v1446_v11  ;;  %v1498_v10 = vld [vmem:[%s4169_s28 + $0x2650] sm:$0xff]  ;;  %v1515_v11 = vld [vmem:[%s4169_s28 + $0x26d8] sm:$0xff] }
 0x2b6   : > { %3373 = vmatpush.msra.mxu2 %v1461_v13  ;;  %3392 = vmatpush.msra.mxu3 %v1478_v14  ;;  %v1530_v13 = vld [vmem:[%s4169_s28 + $0x2750] sm:$0xff]  ;;  %v1547_v14 = vld [vmem:[%s4169_s28 + $0x27d8] sm:$0xff]  ;;  %v2180_v25 = vpop.f32.mrf.mxu2 }
 0x2b7   : > { %3334 = vmatpush.msra.mxu0 %v1428_v16  ;;  %3353 = vmatpush.msra.mxu1 %v1445_v17  ;;  %v1514_v16 = vld [vmem:[%s4169_s28 + $0x26d0] sm:$0xff]  ;;  %v2141_v17 = vadd.f32 %v2140_v9, %v2121_v12  ;;  %v1599_v9 = vld [vmem:[%s4169_s28 + $0x2978] sm:$0xff]  ;;  %v1536_v12 = vld [vmem:[%s4169_s28 + $0x2780] sm:$0xff] }
 0x2b8   : > { %3374 = vmatpush.msra.mxu2 %v1460_v18  ;;  %3393 = vmatpush.msra.mxu3 %v1477_v19  ;;  %v1529_v18 = vld [vmem:[%s4169_s28 + $0x2748] sm:$0xff]  ;;  %v1546_v19 = vld [vmem:[%s4169_s28 + $0x27d0] sm:$0xff] }
 0x2b9   : > { %3335 = vmatpush.msra.mxu0 %v1427_v20  ;;  %3354 = vmatpush.msra.mxu1 %v1444_v21  ;;  %v2160_v20 = vpop.f32.mrf.mxu1  ;;  %v1496_v21 = vld [vmem:[%s4169_s28 + $0x2640] sm:$0xff] }
 0x2ba   : > { %3375 = vmatpush.msra.mxu2 %v1459_v23  ;;  %3394 = vmatpush.msra.mxu3 %v1476_v24  ;;  %v1528_v23 = vld [vmem:[%s4169_s28 + $0x2740] sm:$0xff]  ;;  %v1545_v24 = vld [vmem:[%s4169_s28 + $0x27c8] sm:$0xff]  ;;  %v2200_v34 = vpop.f32.mrf.mxu3 }
 0x2bb   : > { %3336 = vmatpush.msra.mxu0 %v1426_v26  ;;  %3355 = vmatpush.msra.mxu1 %v1443_v27  ;;  %v1495_v26 = vld [vmem:[%s4169_s28 + $0x2638] sm:$0xff]  ;;  %v1512_v27 = vld [vmem:[%s4169_s28 + $0x26c0] sm:$0xff] }
 0x2bc   : > { %3376 = vmatpush.msra.mxu2 %v1458_v28  ;;  %3395 = vmatpush.msra.mxu3 %v1475_v29  ;;  %v2161_v28 = vadd.f32 %v2160_v20, %v2141_v17  ;;  %v1527_v29 = vld [vmem:[%s4169_s28 + $0x2738] sm:$0xff]  ;;  %v2220_v41 = vpop.f32.mrf.mxu0 }
 0x2bd   : > { %3337 = vmatpush.msra.mxu0 %v1425_v30  ;;  %3356 = vmatpush.msra.mxu1 %v1442_v32  ;;  %v1544_v30 = vld [vmem:[%s4169_s28 + $0x27c0] sm:$0xff]  ;;  %v1494_v32 = vld [vmem:[%s4169_s28 + $0x2630] sm:$0xff]  ;;  %v1583_v17 = vld [vmem:[%s4169_s28 + $0x28f8] sm:$0xff] }
 0x2be   : > { %3377 = vmatpush.msra.mxu2 %v1457_v36  ;;  %3396 = vmatpush.msra.mxu3 %v1474_v31  ;;  %v2181_v35 = vadd.f32 %v2180_v25, %v2161_v28  ;;  %v1526_v36 = vld [vmem:[%s4169_s28 + $0x2730] sm:$0xff]  ;;  %v1543_v31 = vld [vmem:[%s4169_s28 + $0x27b8] sm:$0xff]  ;;  %v2260_v57 = vpop.f32.mrf.mxu2  ;;  %v1581_v28 = vld [vmem:[%s4169_s28 + $0x28e8] sm:$0xff] }
 0x2bf   : > { %3338 = vmatpush.msra.mxu0 %v1424_v37  ;;  %3357 = vmatpush.msra.mxu1 %v1441_v38  ;;  %v1493_v37 = vld [vmem:[%s4169_s28 + $0x2628] sm:$0xff]  ;;  %v1510_v38 = vld [vmem:[%s4169_s28 + $0x26b0] sm:$0xff]  ;;  %v1615_v20 = vld [vmem:[%s4169_s28 + $0x29f8] sm:$0xff] }
 0x2c0   : > { %3378 = vmatpush.msra.mxu2 %v1456_v39  ;;  %3397 = vmatpush.msra.mxu3 %v1473_v40  ;;  %v1525_v39 = vld [vmem:[%s4169_s28 + $0x2728] sm:$0xff]  ;;  %v1542_v40 = vld [vmem:[%s4169_s28 + $0x27b0] sm:$0xff]  ;;  %v2201_v44 = vadd.f32 %v2200_v34, %v2181_v35  ;;  %v1580_v35 = vld [vmem:[%s4169_s28 + $0x28e0] sm:$0xff] }
 0x2c1   : > { %3339 = vmatmul.f32.vlgmr.msra.gmra.mxu0 %v1779_v42  ;;  %3379 = vmatmul.f32.vlgmr.msra.gmra.mxu2 %v1781_v43  ;;  %v1492_v42 = vld [vmem:[%s4169_s28 + $0x2620] sm:$0xff]  ;;  %v1509_v43 = vld [vmem:[%s4169_s28 + $0x26a8] sm:$0xff]  ;;  %v2240_v52 = vpop.f32.mrf.mxu1  ;;  %v1614_v25 = vld [vmem:[%s4169_s28 + $0x29f0] sm:$0xff] }
 0x2c2   : > { %3403 = vmatpush.msrb.mxu0 %v1503_v45  ;;  %3443 = vmatpush.msrb.mxu2 %v1535_v46  ;;  %v1524_v45 = vld [vmem:[%s4169_s28 + $0x2720] sm:$0xff]  ;;  %v1541_v46 = vld [vmem:[%s4169_s28 + $0x27a8] sm:$0xff]  ;;  %v2221_v49 = vadd.f32 %v2220_v41, %v2201_v44  ;;  %v1611_v41 = vld [vmem:[%s4169_s28 + $0x29d8] sm:$0xff] }
 0x2c3   : > { %3358 = vmatpush.msra.mxu1 %v1440_v47  ;;  %3398 = vmatpush.msra.mxu3 %v1472_v48  ;;  %v1491_v47 = vld [vmem:[%s4169_s28 + $0x2618] sm:$0xff]  ;;  %v1508_v48 = vld [vmem:[%s4169_s28 + $0x26a0] sm:$0xff]  ;;  %v1578_v44 = vld [vmem:[%s4169_s28 + $0x28d0] sm:$0xff] }
 0x2c4   : > { %3359 = vmatmul.f32.vlgmr.msra.gmra.mxu1 %v1780_v50  ;;  %3399 = vmatmul.f32.vlgmr.msra.gmra.mxu3 %v1782_v51  ;;  %v1523_v50 = vld [vmem:[%s4169_s28 + $0x2718] sm:$0xff]  ;;  %v1540_v51 = vld [vmem:[%s4169_s28 + $0x27a0] sm:$0xff] }
 0x2c5   : > { %3404 = vmatpush.msrb.mxu0 %v1502_v53  ;;  %3423 = vmatpush.msrb.mxu1 %v1519_v54  ;;  %v1490_v53 = vld [vmem:[%s4169_s28 + $0x2610] sm:$0xff]  ;;  %v1507_v54 = vld [vmem:[%s4169_s28 + $0x2698] sm:$0xff]  ;;  %v1612_v34 = vld [vmem:[%s4169_s28 + $0x29e0] sm:$0xff] }
 0x2c6   : > { %3444 = vmatpush.msrb.mxu2 %v1534_v55  ;;  %3463 = vmatpush.msrb.mxu3 %v1551_v56  ;;  %v1522_v55 = vld [vmem:[%s4169_s28 + $0x2710] sm:$0xff]  ;;  %v1539_v56 = vld [vmem:[%s4169_s28 + $0x2798] sm:$0xff] }
 0x2c7   : > { %3405 = vmatpush.msrb.mxu0 %v1501_v58  ;;  %3424 = vmatpush.msrb.mxu1 %v1518_v59  ;;  %v1489_v58 = vld [vmem:[%s4169_s28 + $0x2608] sm:$0xff]  ;;  %v1506_v59 = vld [vmem:[%s4169_s28 + $0x2690] sm:$0xff] }
 0x2c8   : > { %3445 = vmatpush.msrb.mxu2 %v1533_v61  ;;  %3464 = vmatpush.msrb.mxu3 %v1550_v62  ;;  %v2241_v61 = vadd.f32 %v2240_v52, %v2221_v49  ;;  %v1521_v62 = vld [vmem:[%s4169_s28 + $0x2708] sm:$0xff] }
 0x2c9   : > { %3406 = vmatpush.msrb.mxu0 %v1500_v63  ;;  %3425 = vmatpush.msrb.mxu1 %v1517_v0  ;;  %v1538_v63 = vld [vmem:[%s4169_s28 + $0x2790] sm:$0xff]  ;;  %v1488_v0 = vld [vmem:[%s4169_s28 + $0x2600] sm:$0xff]  ;;  %v1577_v49 = vld [vmem:[%s4169_s28 + $0x28c8] sm:$0xff] }
 0x2ca   : > { %3446 = vmatpush.msrb.mxu2 %v1532_v2  ;;  %3465 = vmatpush.msrb.mxu3 %v1549_v3  ;;  %v2261_v2 = vadd.f32 %v2260_v57, %v2241_v61  ;;  %v1520_v3 = vld [vmem:[%s4169_s28 + $0x2700] sm:$0xff]  ;;  %v1609_v52 = vld [vmem:[%s4169_s28 + $0x29c8] sm:$0xff] }
 0x2cb   : > { %3407 = vmatpush.msrb.mxu0 %v1499_v5  ;;  %3426 = vmatpush.msrb.mxu1 %v1516_v6  ;;  %v2280_v5 = vpop.f32.mrf.mxu3  ;;  %v1783_v6 = vld.sshfl [vmem:[#allocation1 + $0x20] sm:$0xff pattern:$0x73625140]  ;;  %v1608_v57 = vld [vmem:[%s4169_s28 + $0x29c0] sm:$0xff] }
 0x2cc   : > { %3447 = vmatpush.msrb.mxu2 %v1531_v7  ;;  %3466 = vmatpush.msrb.mxu3 %v1548_v8  ;;  %v1785_v7 = vld.sshfl [vmem:[#allocation1 + $0x30] sm:$0xff pattern:$0x73625140]  ;;  %v1567_v8 = vld [vmem:[%s4169_s28 + $0x2878] sm:$0xff] }
 0x2cd   : > { %3408 = vmatpush.msrb.mxu0 %v1498_v10  ;;  %3427 = vmatpush.msrb.mxu1 %v1515_v11  ;;  %v2300_v10 = vpop.f32.mrf.mxu0  ;;  %v1504_v11 = vld [vmem:[%s4169_s28 + $0x2680] sm:$0xff] }
 0x2ce   : > { %3448 = vmatpush.msrb.mxu2 %v1530_v13  ;;  %3467 = vmatpush.msrb.mxu3 %v1547_v14  ;;  %v2281_v13 = vadd.f32 %v2280_v5, %v2261_v2  ;;  %v1784_v14 = vld.sshfl [vmem:[#allocation1 + $0x28] sm:$0xff pattern:$0x73625140] }
 0x2cf   : > { %3409 = vmatpush.msrb.mxu0 %v1497_v15  ;;  %3428 = vmatpush.msrb.mxu1 %v1514_v16  ;;  %v1786_v15 = vld.sshfl [vmem:[#allocation1 + $0x38] sm:$0xff pattern:$0x73625140] }
 0x2d0   : > { %3449 = vmatpush.msrb.mxu2 %v1529_v18  ;;  %3468 = vmatpush.msrb.mxu3 %v1546_v19  ;;  %v1566_v16 = vld [vmem:[%s4169_s28 + $0x2870] sm:$0xff]  ;;  %v2301_v18 = vadd.f32 %v2300_v10, %v2281_v13 }
 0x2d1   : > { %3410 = vmatpush.msrb.mxu0 %v1496_v21  ;;  %3429 = vmatpush.msrb.mxu1 %v1513_v22  ;;  %v1598_v19 = vld [vmem:[%s4169_s28 + $0x2970] sm:$0xff]  ;;  %v2320_v21 = vpop.f32.mrf.mxu1  ;;  %v1565_v22 = vld [vmem:[%s4169_s28 + $0x2868] sm:$0xff] }
 0x2d2   : > { %3450 = vmatpush.msrb.mxu2 %v1528_v23  ;;  %3469 = vmatpush.msrb.mxu3 %v1545_v24  ;;  %v1582_v23 = vld [vmem:[%s4169_s28 + $0x28f0] sm:$0xff]  ;;  %v1597_v24 = vld [vmem:[%s4169_s28 + $0x2968] sm:$0xff] }
 0x2d3   : > { %3411 = vmatpush.msrb.mxu0 %v1495_v26  ;;  %3430 = vmatpush.msrb.mxu1 %v1512_v27  ;;  %v2340_v26 = vpop.f32.mrf.mxu2  ;;  %v1564_v27 = vld [vmem:[%s4169_s28 + $0x2860] sm:$0xff] }
 0x2d4   : > { %3451 = vmatpush.msrb.mxu2 %v1527_v29  ;;  %3470 = vmatpush.msrb.mxu3 %v1544_v30  ;;  %v2321_v29 = vadd.f32 %v2320_v21, %v2301_v18  ;;  %v1596_v30 = vld [vmem:[%s4169_s28 + $0x2960] sm:$0xff] }
 0x2d5   : > { %3412 = vmatpush.msrb.mxu0 %v1494_v32  ;;  %3431 = vmatpush.msrb.mxu1 %v1511_v33  ;;  %v1613_v32 = vld [vmem:[%s4169_s28 + $0x29e8] sm:$0xff]  ;;  %v1563_v33 = vld [vmem:[%s4169_s28 + $0x2858] sm:$0xff] }
 0x2d6   : > { %3452 = vmatpush.msrb.mxu2 %v1526_v36  ;;  %3471 = vmatpush.msrb.mxu3 %v1543_v31  ;;  %v2341_v36 = vadd.f32 %v2340_v26, %v2321_v29  ;;  %v1595_v31 = vld [vmem:[%s4169_s28 + $0x2958] sm:$0xff]  ;;  %v1602_v26 = vld [vmem:[%s4169_s28 + $0x2990] sm:$0xff]  ;;  %v1569_v29 = vld [vmem:[%s4169_s28 + $0x2888] sm:$0xff] }
 0x2d7   : > { %3413 = vmatpush.msrb.mxu0 %v1493_v37  ;;  %3432 = vmatpush.msrb.mxu1 %v1510_v38  ;;  %v2360_v37 = vpop.f32.mrf.mxu3  ;;  %v1562_v38 = vld [vmem:[%s4169_s28 + $0x2850] sm:$0xff] }
 0x2d8   : > { %3453 = vmatpush.msrb.mxu2 %v1525_v39  ;;  %3472 = vmatpush.msrb.mxu3 %v1542_v40  ;;  %v1579_v39 = vld [vmem:[%s4169_s28 + $0x28d8] sm:$0xff]  ;;  %v1594_v40 = vld [vmem:[%s4169_s28 + $0x2950] sm:$0xff] }
 0x2d9   : > { %3414 = vmatpush.msrb.mxu0 %v1492_v42  ;;  %3433 = vmatpush.msrb.mxu1 %v1509_v43  ;;  %v2380_v42 = vpop.f32.mrf.mxu0  ;;  %v1561_v43 = vld [vmem:[%s4169_s28 + $0x2848] sm:$0xff] }
 0x2da   : > { %3454 = vmatpush.msrb.mxu2 %v1524_v45  ;;  %3473 = vmatpush.msrb.mxu3 %v1541_v46  ;;  %v2361_v45 = vadd.f32 %v2360_v37, %v2341_v36  ;;  %v1593_v46 = vld [vmem:[%s4169_s28 + $0x2948] sm:$0xff]  ;;  %v1663_v37 = vld [vmem:[%s4169_s28 + $0x2b78] sm:$0xff] }
 0x2db   : > { %3415 = vmatpush.msrb.mxu0 %v1491_v47  ;;  %3434 = vmatpush.msrb.mxu1 %v1508_v48  ;;  %v1610_v47 = vld [vmem:[%s4169_s28 + $0x29d0] sm:$0xff]  ;;  %v1560_v48 = vld [vmem:[%s4169_s28 + $0x2840] sm:$0xff]  ;;  %v1791_v36 = vld.sshfl [vmem:[#allocation1 + $0x10] sm:$0xff pattern:$0x73625140] }
 0x2dc   : > { %3455 = vmatpush.msrb.mxu2 %v1523_v50  ;;  %3474 = vmatpush.msrb.mxu3 %v1540_v51  ;;  %v2381_v50 = vadd.f32 %v2380_v42, %v2361_v45  ;;  %v1592_v51 = vld [vmem:[%s4169_s28 + $0x2940] sm:$0xff]  ;;  %v1792_v42 = vld.sshfl [vmem:[#allocation1 + $0x18] sm:$0xff pattern:$0x73625140]  ;;  %v1647_v45 = vld [vmem:[%s4169_s28 + $0x2af8] sm:$0xff] }
 0x2dd   : > { %3416 = vmatpush.msrb.mxu0 %v1490_v53  ;;  %3435 = vmatpush.msrb.mxu1 %v1507_v54  ;;  %v2400_v53 = vpop.f32.mrf.mxu1  ;;  %v1559_v54 = vld [vmem:[%s4169_s28 + $0x2838] sm:$0xff] }
 0x2de   : > { %3456 = vmatpush.msrb.mxu2 %v1522_v55  ;;  %3475 = vmatpush.msrb.mxu3 %v1539_v56  ;;  %v1576_v55 = vld [vmem:[%s4169_s28 + $0x28c0] sm:$0xff]  ;;  %v1591_v56 = vld [vmem:[%s4169_s28 + $0x2938] sm:$0xff]  ;;  %v2401_v61 = vadd.f32 %v2400_v53, %v2381_v50 }
 0x2df   : > { %3417 = vmatpush.msrb.mxu0 %v1489_v58  ;;  %3436 = vmatpush.msrb.mxu1 %v1506_v59  ;;  %v2420_v58 = vpop.f32.mrf.mxu2  ;;  %v1558_v59 = vld [vmem:[%s4169_s28 + $0x2830] sm:$0xff]  ;;  %v2440_v5 = vpop.f32.mrf.mxu3  ;;  %v1628_v53 = vld [vmem:[%s4169_s28 + $0x2a60] sm:$0xff] }
 0x2e0   : > { %3457 = vmatpush.msrb.mxu2 %v1521_v62  ;;  %3476 = vmatpush.msrb.mxu3 %v1538_v63  ;;  %v1590_v62 = vld [vmem:[%s4169_s28 + $0x2930] sm:$0xff]  ;;  %v1607_v63 = vld [vmem:[%s4169_s28 + $0x29b8] sm:$0xff]  ;;  %v2421_v2 = vadd.f32 %v2420_v58, %v2401_v61  ;;  %v1644_v58 = vld [vmem:[%s4169_s28 + $0x2ae0] sm:$0xff] }
 0x2e1   : > { %3418 = vmatpush.msrb.mxu0 %v1488_v0  ;;  %3437 = vmatpush.msrb.mxu1 %v1505_v1  ;;  %v1557_v0 = vld [vmem:[%s4169_s28 + $0x2828] sm:$0xff]  ;;  %v1574_v1 = vld [vmem:[%s4169_s28 + $0x28b0] sm:$0xff]  ;;  %v2460_v10 = vpop.f32.mrf.mxu0 }
 0x2e2   : > { %3458 = vmatpush.msrb.mxu2 %v1520_v3  ;;  %3477 = vmatpush.msrb.mxu3 %v1537_v4  ;;  %v1589_v3 = vld [vmem:[%s4169_s28 + $0x2928] sm:$0xff]  ;;  %v1606_v4 = vld [vmem:[%s4169_s28 + $0x29b0] sm:$0xff]  ;;  %v2441_v13 = vadd.f32 %v2440_v5, %v2421_v2 }
 0x2e3   : > { %3419 = vmatmul.f32.vlgmr.msrb.gmra.mxu0 %v1783_v6  ;;  %3459 = vmatmul.f32.vlgmr.msrb.gmra.mxu2 %v1785_v7  ;;  %v1556_v6 = vld [vmem:[%s4169_s28 + $0x2820] sm:$0xff]  ;;  %v1573_v7 = vld [vmem:[%s4169_s28 + $0x28a8] sm:$0xff]  ;;  %v1626_v61 = vld [vmem:[%s4169_s28 + $0x2a50] sm:$0xff] }
 0x2e4   : > { %3483 = vmatpush.msra.mxu0 %v1567_v8  ;;  %3523 = vmatpush.msra.mxu2 %v1599_v9  ;;  %v1588_v8 = vld [vmem:[%s4169_s28 + $0x2920] sm:$0xff]  ;;  %v1605_v9 = vld [vmem:[%s4169_s28 + $0x29a8] sm:$0xff]  ;;  %v2461_v18 = vadd.f32 %v2460_v10, %v2441_v13  ;;  %v1623_v10 = vld [vmem:[%s4169_s28 + $0x2a38] sm:$0xff] }
 0x2e5   : > { %3438 = vmatpush.msrb.mxu1 %v1504_v11  ;;  %3478 = vmatpush.msrb.mxu3 %v1536_v12  ;;  %v1555_v11 = vld [vmem:[%s4169_s28 + $0x2818] sm:$0xff]  ;;  %v1572_v12 = vld [vmem:[%s4169_s28 + $0x28a0] sm:$0xff]  ;;  %v2480_v21 = vpop.f32.mrf.mxu1  ;;  %v1625_v2 = vld [vmem:[%s4169_s28 + $0x2a48] sm:$0xff] }
 0x2e6   : > { %3439 = vmatmul.f32.vlgmr.msrb.gmra.mxu1 %v1784_v14  ;;  %3479 = vmatmul.f32.vlgmr.msrb.gmra.mxu3 %v1786_v15  ;;  %v1587_v14 = vld [vmem:[%s4169_s28 + $0x2918] sm:$0xff]  ;;  %v1604_v15 = vld [vmem:[%s4169_s28 + $0x29a0] sm:$0xff] }
 0x2e7   : > { %3484 = vmatpush.msra.mxu0 %v1566_v16  ;;  %3503 = vmatpush.msra.mxu1 %v1583_v17  ;;  %v1554_v16 = vld [vmem:[%s4169_s28 + $0x2810] sm:$0xff]  ;;  %v1571_v17 = vld [vmem:[%s4169_s28 + $0x2898] sm:$0xff] }
 0x2e8   : > { %3524 = vmatpush.msra.mxu2 %v1598_v19  ;;  %3543 = vmatpush.msra.mxu3 %v1615_v20  ;;  %v1586_v19 = vld [vmem:[%s4169_s28 + $0x2910] sm:$0xff]  ;;  %v1603_v20 = vld [vmem:[%s4169_s28 + $0x2998] sm:$0xff] }
 0x2e9   : > { %3485 = vmatpush.msra.mxu0 %v1565_v22  ;;  %3504 = vmatpush.msra.mxu1 %v1582_v23  ;;  %v1553_v22 = vld [vmem:[%s4169_s28 + $0x2808] sm:$0xff]  ;;  %v1570_v23 = vld [vmem:[%s4169_s28 + $0x2890] sm:$0xff]  ;;  %v1655_v13 = vld [vmem:[%s4169_s28 + $0x2b38] sm:$0xff] }
 0x2ea   : > { %3525 = vmatpush.msra.mxu2 %v1597_v24  ;;  %3544 = vmatpush.msra.mxu3 %v1614_v25  ;;  %v271_v24 = vld [vmem:[%s4190_s6 + $0xa8] sm:$0x3f]  ;;  %v1585_v25 = vld [vmem:[%s4169_s28 + $0x2908] sm:$0xff] }
 0x2eb   : > { %3486 = vmatpush.msra.mxu0 %v1564_v27  ;;  %3505 = vmatpush.msra.mxu1 %v1581_v28  ;;  %1788 = vst [vmem:[#allocation1 + $0x20] ss:$4 sm:$0xff] %v271_v24  ;;  %v2500_v27 = vpop.f32.mrf.mxu2  ;;  %v1552_v28 = vld [vmem:[%s4169_s28 + $0x2800] sm:$0xff]  ;;  %v1637_v24 = vld [vmem:[%s4169_s28 + $0x2aa8] sm:$0xff] }
 0x2ec   : > { %3526 = vmatpush.msra.mxu2 %v1596_v30  ;;  %3545 = vmatpush.msra.mxu3 %v1613_v32  ;;  %v2481_v30 = vadd.f32 %v2480_v21, %v2461_v18  ;;  %v1584_v32 = vld [vmem:[%s4169_s28 + $0x2900] sm:$0xff] }
 0x2ed   : > { %3487 = vmatpush.msra.mxu0 %v1563_v33  ;;  %3506 = vmatpush.msra.mxu1 %v1580_v35  ;;  %v1601_v33 = vld [vmem:[%s4169_s28 + $0x2988] sm:$0xff]  ;;  %v1789_v35 = vld.sshfl [vmem:[#allocation1] sm:$0xff pattern:$0x73625140] }
 0x2ee   : > { %3527 = vmatpush.msra.mxu2 %v1595_v31  ;;  %3546 = vmatpush.msra.mxu3 %v1612_v34  ;;  %v2501_v31 = vadd.f32 %v2500_v27, %v2481_v30  ;;  %v1631_v34 = vld [vmem:[%s4169_s28 + $0x2a78] sm:$0xff] }
 0x2ef   : > { %3488 = vmatpush.msra.mxu0 %v1562_v38  ;;  %3507 = vmatpush.msra.mxu1 %v1579_v39  ;;  %v2520_v38 = vpop.f32.mrf.mxu3  ;;  %v1568_v39 = vld [vmem:[%s4169_s28 + $0x2880] sm:$0xff]  ;;  %v1651_v30 = vld [vmem:[%s4169_s28 + $0x2b18] sm:$0xff] }
 0x2f0   : > { %3528 = vmatpush.msra.mxu2 %v1594_v40  ;;  %3547 = vmatpush.msra.mxu3 %v1611_v41  ;;  %v1600_v40 = vld [vmem:[%s4169_s28 + $0x2980] sm:$0xff] }
 0x2f1   : > { %3489 = vmatpush.msra.mxu0 %v1561_v43  ;;  %3508 = vmatpush.msra.mxu1 %v1578_v44  ;;  %v1790_v41 = vld.sshfl [vmem:[#allocation1 + $0x8] sm:$0xff pattern:$0x73625140]  ;;  %v2540_v43 = vpop.f32.mrf.mxu0  ;;  %v1630_v44 = vld [vmem:[%s4169_s28 + $0x2a70] sm:$0xff] }
 0x2f2   : > { %3529 = vmatpush.msra.mxu2 %v1593_v46  ;;  %3548 = vmatpush.msra.mxu3 %v1610_v47  ;;  %v2521_v46 = vadd.f32 %v2520_v38, %v2501_v31  ;;  %v1662_v47 = vld [vmem:[%s4169_s28 + $0x2b70] sm:$0xff] }
 0x2f3   : > { %3490 = vmatpush.msra.mxu0 %v1560_v48  ;;  %3509 = vmatpush.msra.mxu1 %v1577_v49  ;;  %v1629_v48 = vld [vmem:[%s4169_s28 + $0x2a68] sm:$0xff]  ;;  %v1646_v49 = vld [vmem:[%s4169_s28 + $0x2af0] sm:$0xff] }
 0x2f4   : > { %3530 = vmatpush.msra.mxu2 %v1592_v51  ;;  %3549 = vmatpush.msra.mxu3 %v1609_v52  ;;  %v2541_v50 = vadd.f32 %v2540_v43, %v2521_v46  ;;  %v1661_v51 = vld [vmem:[%s4169_s28 + $0x2b68] sm:$0xff]  ;;  %v2560_v52 = vpop.f32.mrf.mxu1  ;;  %v1650_v31 = vld [vmem:[%s4169_s28 + $0x2b10] sm:$0xff]  ;;  %v1648_v43 = vld [vmem:[%s4169_s28 + $0x2b00] sm:$0xff] }
 0x2f5   : > { %3491 = vmatpush.msra.mxu0 %v1559_v54  ;;  %3510 = vmatpush.msra.mxu1 %v1576_v55  ;;  %v1645_v54 = vld [vmem:[%s4169_s28 + $0x2ae8] sm:$0xff]  ;;  %v1660_v55 = vld [vmem:[%s4169_s28 + $0x2b60] sm:$0xff] }
 0x2f6   : > { %3531 = vmatpush.msra.mxu2 %v1591_v56  ;;  %3550 = vmatpush.msra.mxu3 %v1608_v57  ;;  %v2580_v56 = vpop.f32.mrf.mxu2  ;;  %v1627_v57 = vld [vmem:[%s4169_s28 + $0x2a58] sm:$0xff]  ;;  %v1795_v46 = vld.sshfl [vmem:[#allocation1 + $0x30] sm:$0xff pattern:$0x73625140] }
 0x2f7   : > { %3492 = vmatpush.msra.mxu0 %v1558_v59  ;;  %3511 = vmatpush.msra.mxu1 %v1575_v60  ;;  %v2561_v59 = vadd.f32 %v2560_v52, %v2541_v50  ;;  %v1659_v60 = vld [vmem:[%s4169_s28 + $0x2b58] sm:$0xff] }
 0x2f8   : > { %3532 = vmatpush.msra.mxu2 %v1590_v62  ;;  %3551 = vmatpush.msra.mxu3 %v1607_v63  ;;  %v1643_v62 = vld [vmem:[%s4169_s28 + $0x2ad8] sm:$0xff] }
 0x2f9   : > { %3493 = vmatpush.msra.mxu0 %v1557_v0  ;;  %3512 = vmatpush.msra.mxu1 %v1574_v1  ;;  %v2581_v63 = vadd.f32 %v2580_v56, %v2561_v59  ;;  %v1658_v0 = vld [vmem:[%s4169_s28 + $0x2b50] sm:$0xff]  ;;  %v2600_v1 = vpop.f32.mrf.mxu3  ;;  %v2620_v5 = vpop.f32.mrf.mxu0 }
 0x2fa   : > { %3533 = vmatpush.msra.mxu2 %v1589_v3  ;;  %3552 = vmatpush.msra.mxu3 %v1606_v4  ;;  %v1642_v3 = vld [vmem:[%s4169_s28 + $0x2ad0] sm:$0xff]  ;;  %v1657_v4 = vld [vmem:[%s4169_s28 + $0x2b48] sm:$0xff] }
 0x2fb   : > { %3494 = vmatpush.msra.mxu0 %v1556_v6  ;;  %3513 = vmatpush.msra.mxu1 %v1573_v7  ;;  %v1624_v6 = vld [vmem:[%s4169_s28 + $0x2a40] sm:$0xff]  ;;  %v1641_v7 = vld [vmem:[%s4169_s28 + $0x2ac8] sm:$0xff] }
 0x2fc   : > { %3534 = vmatpush.msra.mxu2 %v1588_v8  ;;  %3553 = vmatpush.msra.mxu3 %v1605_v9  ;;  %v2601_v8 = vadd.f32 %v2600_v1, %v2581_v63  ;;  %v1656_v9 = vld [vmem:[%s4169_s28 + $0x2b40] sm:$0xff] }
 0x2fd   : > { %3495 = vmatpush.msra.mxu0 %v1555_v11  ;;  %3514 = vmatpush.msra.mxu1 %v1572_v12  ;;  %v1640_v11 = vld [vmem:[%s4169_s28 + $0x2ac0] sm:$0xff] }
 0x2fe   : > { %3535 = vmatpush.msra.mxu2 %v1587_v14  ;;  %3554 = vmatpush.msra.mxu3 %v1604_v15  ;;  %v2621_v12 = vadd.f32 %v2620_v5, %v2601_v8  ;;  %v2640_v14 = vpop.f32.mrf.mxu1  ;;  %v1622_v15 = vld [vmem:[%s4169_s28 + $0x2a30] sm:$0xff]  ;;  %v2660_v18 = vpop.f32.mrf.mxu2 }
 0x2ff   : > { %3496 = vmatpush.msra.mxu0 %v1554_v16  ;;  %3515 = vmatpush.msra.mxu1 %v1571_v17  ;;  %v1639_v16 = vld [vmem:[%s4169_s28 + $0x2ab8] sm:$0xff]  ;;  %v1654_v17 = vld [vmem:[%s4169_s28 + $0x2b30] sm:$0xff] }
 0x300   : > { %3536 = vmatpush.msra.mxu2 %v1586_v19  ;;  %3555 = vmatpush.msra.mxu3 %v1603_v20  ;;  %v1621_v19 = vld [vmem:[%s4169_s28 + $0x2a28] sm:$0xff]  ;;  %v1638_v20 = vld [vmem:[%s4169_s28 + $0x2ab0] sm:$0xff]  ;;  %v2641_v21 = vadd.f32 %v2640_v14, %v2621_v12 }
 0x301   : > { %3497 = vmatpush.msra.mxu0 %v1553_v22  ;;  %3516 = vmatpush.msra.mxu1 %v1570_v23  ;;  %v1653_v22 = vld [vmem:[%s4169_s28 + $0x2b28] sm:$0xff]  ;;  %v1620_v23 = vld [vmem:[%s4169_s28 + $0x2a20] sm:$0xff]  ;;  %v2680_v27 = vpop.f32.mrf.mxu3 }
 0x302   : > { %3537 = vmatpush.msra.mxu2 %v1585_v25  ;;  %3556 = vmatpush.msra.mxu3 %v1602_v26  ;;  %v2661_v25 = vadd.f32 %v2660_v18, %v2641_v21  ;;  %v1652_v26 = vld [vmem:[%s4169_s28 + $0x2b20] sm:$0xff] }
 0x303   : > { %3498 = vmatpush.msra.mxu0 %v1552_v28  ;;  %3517 = vmatpush.msra.mxu1 %v1569_v29  ;;  %v1619_v28 = vld [vmem:[%s4169_s28 + $0x2a18] sm:$0xff]  ;;  %v1636_v29 = vld [vmem:[%s4169_s28 + $0x2aa0] sm:$0xff] }
 0x304   : > { %3538 = vmatpush.msra.mxu2 %v1584_v32  ;;  %3557 = vmatpush.msra.mxu3 %v1601_v33  ;;  %v2700_v32 = vpop.f32.mrf.mxu0  ;;  %v1618_v33 = vld [vmem:[%s4169_s28 + $0x2a10] sm:$0xff] }
 0x305   : > { %3499 = vmatmul.f32.vlgmr.msra.gmra.mxu0 %v1789_v35  ;;  %3539 = vmatmul.f32.vlgmr.msra.gmra.mxu2 %v1791_v36  ;;  %v1635_v35 = vld [vmem:[%s4169_s28 + $0x2a98] sm:$0xff]  ;;  %v2681_v36 = vadd.f32 %v2680_v27, %v2661_v25 }
 0x306   : > { %3563 = vmatpush.msrb.mxu0 %v1631_v34  ;;  %3603 = vmatpush.msrb.mxu2 %v1663_v37  ;;  %v1617_v34 = vld [vmem:[%s4169_s28 + $0x2a08] sm:$0xff]  ;;  %v1634_v37 = vld [vmem:[%s4169_s28 + $0x2a90] sm:$0xff] }
 0x307   : > { %3518 = vmatpush.msra.mxu1 %v1568_v39  ;;  %3558 = vmatpush.msra.mxu3 %v1600_v40  ;;  %v2701_v38 = vadd.f32 %v2700_v32, %v2681_v36  ;;  %v1649_v39 = vld [vmem:[%s4169_s28 + $0x2b08] sm:$0xff]  ;;  %v2720_v40 = vpop.f32.mrf.mxu1 }
 0x308   : > { %3519 = vmatmul.f32.vlgmr.msra.gmra.mxu1 %v1790_v41  ;;  %3559 = vmatmul.f32.vlgmr.msra.gmra.mxu3 %v1792_v42  ;;  %v1616_v41 = vld [vmem:[%s4169_s28 + $0x2a00] sm:$0xff]  ;;  %v1633_v42 = vld [vmem:[%s4169_s28 + $0x2a88] sm:$0xff] }
 0x309   : > { %3564 = vmatpush.msrb.mxu0 %v1630_v44  ;;  %3583 = vmatpush.msrb.mxu1 %v1647_v45  ;;  %v1793_v44 = vld.sshfl [vmem:[#allocation1 + $0x20] sm:$0xff pattern:$0x73625140]  ;;  %v2740_v45 = vpop.f32.mrf.mxu2 }
 0x30a   : > { %3604 = vmatpush.msrb.mxu2 %v1662_v47  ;;  %v1632_v47 = vld [vmem:[%s4169_s28 + $0x2a80] sm:$0xff] }
 0x30b   : > { %3565 = vmatpush.msrb.mxu0 %v1629_v48  ;;  %3584 = vmatpush.msrb.mxu1 %v1646_v49  ;;  %v2721_v48 = vadd.f32 %v2720_v40, %v2701_v38  ;;  %v1794_v49 = vld.sshfl [vmem:[#allocation1 + $0x28] sm:$0xff pattern:$0x73625140] }
 0x30c   : > { %3605 = vmatpush.msrb.mxu2 %v1661_v51  ;;  %v2760_v51 = vpop.f32.mrf.mxu3  ;;  %v2780_v52 = vpop.f32.mrf.mxu0 }
 0x30d   : > { %3566 = vmatpush.msrb.mxu0 %v1628_v53  ;;  %3585 = vmatpush.msrb.mxu1 %v1645_v54  ;;  %v2741_v50 = vadd.f32 %v2740_v45, %v2721_v48 }
 0x30e   : > { %3606 = vmatpush.msrb.mxu2 %v1660_v55 }
 0x30f   : > { %3567 = vmatpush.msrb.mxu0 %v1627_v57  ;;  %3586 = vmatpush.msrb.mxu1 %v1644_v58  ;;  %v2761_v53 = vadd.f32 %v2760_v51, %v2741_v50  ;;  %v2800_v55 = vpop.f32.mrf.mxu1 }
 0x310   : > { %3607 = vmatpush.msrb.mxu2 %v1659_v60 }
 0x311   : > { %3568 = vmatpush.msrb.mxu0 %v1626_v61  ;;  %3587 = vmatpush.msrb.mxu1 %v1643_v62  ;;  %v2781_v54 = vadd.f32 %v2780_v52, %v2761_v53  ;;  %v2820_v56 = vpop.f32.mrf.mxu2 }
 0x312   : > { %3608 = vmatpush.msrb.mxu2 %v1658_v0 }
 0x313   : > { %3569 = vmatpush.msrb.mxu0 %v1625_v2  ;;  %3588 = vmatpush.msrb.mxu1 %v1642_v3  ;;  %v2801_v57 = vadd.f32 %v2800_v55, %v2781_v54 }
 0x314   : > { %3609 = vmatpush.msrb.mxu2 %v1657_v4  ;;  %v2840_v59 = vpop.f32.mrf.mxu3  ;;  %v2860_v60 = vpop.f32.mrf.mxu0 }
 0x315   : > { %3570 = vmatpush.msrb.mxu0 %v1624_v6  ;;  %3589 = vmatpush.msrb.mxu1 %v1641_v7  ;;  %v2821_v58 = vadd.f32 %v2820_v56, %v2801_v57 }
 0x316   : > { %3610 = vmatpush.msrb.mxu2 %v1656_v9 }
 0x317   : > { %3571 = vmatpush.msrb.mxu0 %v1623_v10  ;;  %3590 = vmatpush.msrb.mxu1 %v1640_v11  ;;  %v2841_v61 = vadd.f32 %v2840_v59, %v2821_v58  ;;  %v2880_v63 = vpop.f32.mrf.mxu1 }
 0x318   : > { %3611 = vmatpush.msrb.mxu2 %v1655_v13 }
 0x319   : > { %3572 = vmatpush.msrb.mxu0 %v1622_v15  ;;  %3591 = vmatpush.msrb.mxu1 %v1639_v16  ;;  %v2861_v62 = vadd.f32 %v2860_v60, %v2841_v61  ;;  %v2900_v0 = vpop.f32.mrf.mxu2 }
 0x31a   : > { %3612 = vmatpush.msrb.mxu2 %v1654_v17 }
 0x31b   : > { %3573 = vmatpush.msrb.mxu0 %v1621_v19  ;;  %3592 = vmatpush.msrb.mxu1 %v1638_v20  ;;  %v2881_v1 = vadd.f32 %v2880_v63, %v2861_v62 }
 0x31c   : > { %3613 = vmatpush.msrb.mxu2 %v1653_v22  ;;  %v2920_v3 = vpop.f32.mrf.mxu3  ;;  %v2940_v4 = vpop.f32.mrf.mxu0 }
 0x31d   : > { %3574 = vmatpush.msrb.mxu0 %v1620_v23  ;;  %3593 = vmatpush.msrb.mxu1 %v1637_v24  ;;  %v2901_v2 = vadd.f32 %v2900_v0, %v2881_v1 }
 0x31e   : > { %3614 = vmatpush.msrb.mxu2 %v1652_v26 }
 0x31f   : > { %3575 = vmatpush.msrb.mxu0 %v1619_v28  ;;  %3594 = vmatpush.msrb.mxu1 %v1636_v29  ;;  %v2921_v5 = vadd.f32 %v2920_v3, %v2901_v2  ;;  %v2960_v7 = vpop.f32.mrf.mxu1 }
 0x320   : > { %3615 = vmatpush.msrb.mxu2 %v1651_v30 }
 0x321   : > { %3576 = vmatpush.msrb.mxu0 %v1618_v33  ;;  %3595 = vmatpush.msrb.mxu1 %v1635_v35  ;;  %v2941_v6 = vadd.f32 %v2940_v4, %v2921_v5  ;;  %v2980_v8 = vpop.f32.mrf.mxu2 }
 0x322   : > { %3616 = vmatpush.msrb.mxu2 %v1650_v31 }
 0x323   : > { %3577 = vmatpush.msrb.mxu0 %v1617_v34  ;;  %3596 = vmatpush.msrb.mxu1 %v1634_v37  ;;  %v2961_v9 = vadd.f32 %v2960_v7, %v2941_v6 }
 0x324   : > { %3617 = vmatpush.msrb.mxu2 %v1649_v39  ;;  %v3000_v11 = vpop.f32.mrf.mxu3  ;;  %v3020_v12 = vpop.f32.mrf.mxu0 }
 0x325   : > { %3578 = vmatpush.msrb.mxu0 %v1616_v41  ;;  %3597 = vmatpush.msrb.mxu1 %v1633_v42  ;;  %v2981_v10 = vadd.f32 %v2980_v8, %v2961_v9  ;;  %v249_v9 = vld [vmem:[%s4192_s27] sm:$0x3] }
 0x326   : > { %3618 = vmatpush.msrb.mxu2 %v1648_v43  ;;  %3579 = vmatmul.f32.vlgmr.msrb.gmra.mxu0 %v1793_v44 }
 0x327   : > { %3619 = vmatmul.f32.vlgmr.msrb.gmra.mxu2 %v1795_v46  ;;  %3598 = vmatpush.msrb.mxu1 %v1632_v47  ;;  %v3001_v13 = vadd.f32 %v3000_v11, %v2981_v10  ;;  %v3040_v15 = vpop.f32.mrf.mxu1 }
 0x328   : > { %3599 = vmatmul.f32.vlgmr.msrb.gmra.mxu1 %v1794_v49 }
 0x329   : > { %v3021_v14 = vadd.f32 %v3020_v12, %v3001_v13  ;;  %v3060_v16 = vpop.f32.mrf.mxu2 }
 0x32b   : > { %v3041_v17 = vadd.f32 %v3040_v15, %v3021_v14 }
 0x32c   : > { %v3080_v19 = vpop.f32.mrf.mxu3  ;;  %v3100_v20 = vpop.f32.mrf.mxu0 }
 0x32d   : > { %v3061_v18 = vadd.f32 %v3060_v16, %v3041_v17 }
 0x32f   : > { %v3081_v21 = vadd.f32 %v3080_v19, %v3061_v18  ;;  %v3120_v23 = vpop.f32.mrf.mxu1 }
 0x331   : > { %v3101_v22 = vadd.f32 %v3100_v20, %v3081_v21  ;;  %v3140_v24 = vpop.f32.mrf.mxu2 }
 0x333   : > { %v3121_v25 = vadd.f32 %v3120_v23, %v3101_v22 }
 0x334   : > { %v3160_v27 = vpop.f32.mrf.mxu3  ;;  %v3180_v28 = vpop.f32.mrf.mxu0 }
 0x335   : > { %v3141_v26 = vadd.f32 %v3140_v24, %v3121_v25 }
 0x337   : > { %v3161_v29 = vadd.f32 %v3160_v27, %v3141_v26  ;;  %v3200_v32 = vpop.f32.mrf.mxu1 }
 0x339   : > { %v3181_v30 = vadd.f32 %v3180_v28, %v3161_v29  ;;  %v3220_v33 = vpop.f32.mrf.mxu2 }
 0x33b   : > { %v3201_v35 = vadd.f32 %v3200_v32, %v3181_v30 }
 0x33c   : > { %v3240_v31 = vpop.f32.mrf.mxu3  ;;  %v3260_v34 = vpop.f32.mrf.mxu0 }
 0x33d   : > { %v3221_v36 = vadd.f32 %v3220_v33, %v3201_v35 }
 0x33f   : > { %v3241_v37 = vadd.f32 %v3240_v31, %v3221_v36  ;;  %v3280_v39 = vpop.f32.mrf.mxu1 }
 0x341   : > { %v3261_v38 = vadd.f32 %v3260_v34, %v3241_v37  ;;  %v3300_v40 = vpop.f32.mrf.mxu2 }
 0x343   : > { %v3281_v41 = vadd.f32 %v3280_v39, %v3261_v38 }
 0x344   : > { %v3320_v43 = vpop.f32.mrf.mxu3  ;;  %v3340_v44 = vpop.f32.mrf.mxu0 }
 0x345   : > { %v3301_v42 = vadd.f32 %v3300_v40, %v3281_v41 }
 0x347   : > { %v3321_v45 = vadd.f32 %v3320_v43, %v3301_v42  ;;  %v3360_v47 = vpop.f32.mrf.mxu1 }
 0x349   : > { %v3341_v46 = vadd.f32 %v3340_v44, %v3321_v45  ;;  %v3380_v48 = vpop.f32.mrf.mxu2 }
 0x34b   : > { %v3361_v49 = vadd.f32 %v3360_v47, %v3341_v46 }
 0x34c   : > { %v3400_v51 = vpop.f32.mrf.mxu3 }
 0x34d   : > { %v3381_v50 = vadd.f32 %v3380_v48, %v3361_v49 }
 0x34f   : > { %v3401_v53 = vadd.f32 %v3400_v51, %v3381_v50 }
 0x360   : > { %v3420_v52 = vpop.f32.mrf.mxu0 }
 0x361   : > { %v3421_v54 = vadd.f32 %v3420_v52, %v3401_v53 }
 0x363   : > { %v3440_v55 = vpop.f32.mrf.mxu1 }
 0x364   : > { %v3441_v57 = vadd.f32 %v3440_v55, %v3421_v54 }
 0x366   : > { %v3460_v56 = vpop.f32.mrf.mxu2 }
 0x367   : > { %v3461_v58 = vadd.f32 %v3460_v56, %v3441_v57 }
 0x369   : > { %v3480_v59 = vpop.f32.mrf.mxu3 }
 0x36a   : > { %v3481_v61 = vadd.f32 %v3480_v59, %v3461_v58 }
 0x382   : > { %v3500_v60 = vpop.f32.mrf.mxu0 }
 0x383   : > { %v3501_v62 = vadd.f32 %v3500_v60, %v3481_v61 }
 0x385   : > { %v3520_v63 = vpop.f32.mrf.mxu1 }
 0x386   : > { %v3521_v1 = vadd.f32 %v3520_v63, %v3501_v62 }
 0x388   : > { %v3540_v0 = vpop.f32.mrf.mxu2 }
 0x389   : > { %v3541_v2 = vadd.f32 %v3540_v0, %v3521_v1 }
 0x38b   : > { %v3560_v3 = vpop.f32.mrf.mxu3 }
 0x38c   : > { %v3561_v4 = vadd.f32 %v3560_v3, %v3541_v2 }
 0x3a3   : > { %v3580_v5 = vpop.f32.mrf.mxu0 }
 0x3a4   : > { %v3581_v6 = vadd.f32 %v3580_v5, %v3561_v4 }
 0x3a5   : > { %v3600_v7 = vpop.f32.mrf.mxu1 }
 0x3a6   : > { %v3601_v8 = vadd.f32 %v3600_v7, %v3581_v6 }
 0x3aa   : > { %v3620_v10 = vpop.f32.mrf.mxu2 }
 0x3ab   : > { %v3621_v11 = vadd.f32 %v3620_v10, %v3601_v8  ;;  %3628 = sbr.rel (%p3766_p10) target bundleno = 954 (0x3ba), region = 44 }
 0x3ad   : > { %v3623_v12 = vadd.f32 %v3621_v11, %v249_v9 }
 0x3af   : > { %3624 = vst [vmem:[%s4192_s27] sm:$0x3] %v3623_v12 }
 0x3b0   : > { %v3880_v14 = vld [vmem:[%s243_s4] ss:$0 sm:$0xff] }
 0x3b6   : > { %v3629_v13 = vld [vmem:[%s4192_s27] sm:$0x3] }
 0x3b7   : > { %v3634_v15 = vadd.f32 %v3880_v14, %v3629_v13 }
 0x3b9   : > { %3635 = vst [vmem:[%s4192_s27] sm:$0x3] %v3634_v15 }
 0x3ba PF: > { %s3768_s15 = sshll.u32 %s4021_s19, 1  ;;  %s3649_s17 = sshll.u32 %s4192_s27, 4  ;;  %s3650_s17 = int_to_ptr.vmem [resolvable:$true] %s3649_s17 }
 0x3bb   : > { %s3647_s28 = scalar_lea.hbm %s5701_s3, %s3768_s15  ;;  %s3637_s8 = scalar_lea.sflag [#allocation4], %s231_s14 }
 0x3bc   : > { %s3651_s25 = sshll.u32 %s3647_s28, 4  ;;  %s3931_s19 = scalar_lea.hbm %s5701_s3, 4  ;;  %s3652_s25 = int_to_ptr.hbm [resolvable:$true] %s3651_s25 }
 0x3bd   : > { %s3925_s26 = sshra.s32 %s3652_s25, 4  ;;  %s3926_s26 = int_to_ptr.hbm [resolvable:$true] %s3925_s26 }
 0x3be   : > { %s3927_s9 = scalar_lea.hbm %s3926_s26, 2  ;;  %p3932_p1 = scmp.lt.s32.totalorder %s3926_s26, %s5701_s3 }
 0x3bf   : > { %p3928_p11 = scmp.ne.s32.totalorder %s3926_s26, %s3927_s9  ;;  %p3933_p4 = scmp.lt.s32.totalorder %s3931_s19, %s3927_s9 }
 0x3c1   : > { %p3929_p13 = pnand %p3928_p11, %p4141_p12  ;;  %p3934_p5 = por %p3933_p4, %p3932_p1 }
 0x3c3   : > { %p3930_p0 = pneg %p3929_p13 }
 0x3c5   : > { %p3935_p6 = pnand %p3934_p5, %p3930_p0 }
 0x3c7   : > { %3938 = shalt.err (!%p3935_p6)
}
 0x3c8   : > { %3776 = dma.vmem_to_hbm [thread:$0]  (%p4141_p12), %s3650_s17, 32, %s3652_s25, %s3637_s8  }
 0x3c9 PF: > { %p3787_p8 = scmp.ge.s32.totalorder %s4033_s22, 2  ;;  %s3663_s14 = sand.u32 1, %s3993_s12  }
 0x3ca   : > { %s3664_s6 = scalar_lea.sflag [#allocation4], %s3663_s14 }
 0x3cb   : > { %p3783_p3 = pnand %p3787_p8, %p4154_p2 }
 0x3cd   : > { %p3784_p9 = pneg %p3783_p3 }
 0x3cf   : > { %3988 = dma.done.wait (%p3784_p9), %s3664_s6, 32  }
 0x3d0   : > { %3990 = vsyncadd (%p3784_p9), %s3664_s6, 4294967264  ;;  %s19_s22 = sadd.s32 1, %s4033_s22   ;;  %s5716_s27 = sld [smem:[#allocation8_spill]] }
 0x3d1   : > { %p16_p7 = scmp.ge.s32.totalorder %s19_s22, 12   ;;  %s5717_s14 = sld [smem:[#allocation12_spill]] }
 0x3d2   : > { %s5718_s7 = sld [smem:[#allocation9_spill]]  ;;  %s5722_s12 = smov %s3997_s13 }
 0x3d3   : > { %s5719_s17 = sld [smem:[#allocation13_spill]]  ;;  %s5724_s15 = smov %s4009_s16 }
 0x3d4   : > { %s5720_s24 = sld [smem:[#allocation10_spill]]  ;;  %s5726_s18 = smov %s4025_s20 }
 0x3d5   : > { %s5721_s29 = sld [smem:[#allocation11_spill]]  ;;  %s5727_s19 = smov %s4029_s21 }
 0x3d6   : > { %s5723_s13 = smov %s5716_s27 }
 0x3d7   :  { %18 = sbr.rel (!%p16_p7) target bundleno = 9 (0x9), region = 92 }
 0x3d8   : > { %s5725_s16 = smov %s5718_s7 }
 0x3da   : > { %s5728_s20 = smov %s5720_s24 }
 0x3db   : > { %s5729_s21 = smov %s5721_s29 }
 0x3dc   :  { %3670 = vsyncpa [#allocation3], 1 }
 0x3dd   :  { %3672 = vsyncpa [#allocation3 + $0x1], 1 }
 0x3de   :  { %3673 = vsyncpa [#allocation4], 1 }
 0x3df   :  { %3675 = vsyncpa [#allocation4 + $0x1], 1 }

</bundles_post_ra>
